<compile_context>
chip_gen: v7x
topology: tpu7x:2x2x1
jax: 0.10.0
libtpu: 0.0.40
codegen_flags: <defaults>
</compile_context>

<pallas_src>
import functools

import jax
import jax.numpy as jnp
from jax.experimental import pallas as pl
from jax.experimental.pallas import tpu as pltpu


# ---------------------------------------------------------------------------
# Small helpers.
# ---------------------------------------------------------------------------
def _round_up(x, m):
    return (x + m - 1) // m * m


def _pick_tile(extent, candidates):
    for c in candidates:
        if extent % c == 0:
            return c
    raise ValueError(f"no tile in {candidates} divides {extent}")


def _mish_in_kernel(y):
    """mish(y) = y * tanh(softplus(y)) = y * q/(q+2),  q = e*(e+2), e = exp(y).

    One EUP exp + one approximate EUP reciprocal (instead of exp+log1p+tanh).
    For y > 20, tanh(softplus(y)) == 1 to f32 precision -> return y.
    """
    e = jnp.exp(jnp.minimum(y, 20.0))
    q = e * (e + 2.0)
    t = q * pl.reciprocal(q + 2.0, approx=True)
    return jnp.where(y > 20.0, y, y * t)


# ---------------------------------------------------------------------------
# Fused GEMM (1 or 2 K-sources) + folded-BN affine + Mish kernel.
# Used for conv1 (via im2col patches), conv2, conv3, conv4 and conv5
# (conv5 uses 2 sources: the concat is fused as two K-halves).
# ---------------------------------------------------------------------------
def _gemm_bn_mish_kernel(*refs, n_src):
    xs = refs[:n_src]
    ws = refs[n_src:2 * n_src]
    s_ref, b_ref, o_ref = refs[2 * n_src:2 * n_src + 3]

    acc = jnp.dot(xs[0][...], ws[0][...], preferred_element_type=jnp.float32)
    for x_ref, w_ref in zip(xs[1:], ws[1:]):
        acc = acc + jnp.dot(x_ref[...], w_ref[...],
                            preferred_element_type=jnp.float32)
    y = acc * s_ref[...] + b_ref[...]                 # folded BatchNorm (f32)
    o_ref[...] = _mish_in_kernel(y).astype(o_ref.dtype)


def _gemm_bn_mish(xs, ws, scale, bias, out_dtype):
    """mish((sum_i xs[i] @ ws[i]) * scale + bias), one fused pallas_call.

    xs[i]: (M, K_i) bf16.   ws[i]: (K_i, N) bf16.   scale/bias: (1, N) f32.
    """
    M = xs[0].shape[0]
    N = ws[0].shape[1]
    for x_, w_ in zip(xs, ws):
        assert x_.shape[0] == M and w_.shape[1] == N
        assert x_.shape[1] == w_.shape[0]
        assert x_.shape[1] % 128 == 0                 # K lane-aligned
    assert N % 128 == 0

    M_pad = _round_up(M, 16)                          # clean bf16 sublane packing
    tm = _pick_tile(M_pad, (512, 256, 128, 64, 32, 16))
    tn = N
    # Keep >= 2 parallel tiles so v7x's second TensorCore has work.
    if M_pad // tm == 1 and N >= 256 and (N // 2) % 128 == 0:
        tn = N // 2
    assert M_pad % tm == 0 and N % tn == 0

    xs_p = [x_ if M_pad == M else jnp.pad(x_, ((0, M_pad - M), (0, 0)))
            for x_ in xs]

    n_src = len(xs)
    in_specs = []
    for x_ in xs_p:
        in_specs.append(pl.BlockSpec((tm, x_.shape[1]), lambda i, j: (i, 0)))
    for w_ in ws:
        in_specs.append(pl.BlockSpec((w_.shape[0], tn), lambda i, j: (0, j)))
    in_specs += [pl.BlockSpec((1, tn), lambda i, j: (0, j)),
                 pl.BlockSpec((1, tn), lambda i, j: (0, j))]

    out = pl.pallas_call(
        functools.partial(_gemm_bn_mish_kernel, n_src=n_src),
        out_shape=jax.ShapeDtypeStruct((M_pad, N), out_dtype),
        grid_spec=pltpu.PrefetchScalarGridSpec(
            num_scalar_prefetch=0,
            grid=(M_pad // tm, N // tn),
            in_specs=in_specs,
            out_specs=pl.BlockSpec((tm, tn), lambda i, j: (i, j)),
        ),
        compiler_params=pltpu.CompilerParams(
            dimension_semantics=("parallel", "parallel")),
    )(*xs_p, *ws, scale, bias)

    return out if M_pad == M else out[:M]


# ---------------------------------------------------------------------------
# Fused ResBlock unit:  h = mish(bn(conv1x1(x)));  y = x + mish(bn(conv3x3(h)))
# One pallas_call per unit, grid over batch.  `h` lives only in VMEM (a
# zero-padded scratch); the 3x3 conv reads its 9 taps as shifted windows of
# that scratch -> no HBM im2col, no HBM round trip of `h`.
# ---------------------------------------------------------------------------
def _resblock_unit_kernel(x_ref, w1_ref, s1_ref, b1_ref, w3_ref, s3_ref, b3_ref,
                          o_ref, hpad_ref):
    _, ho, wo, c = x_ref.shape
    x2d = x_ref[...].reshape(ho * wo, c)                      # bf16

    # --- 1x1 conv + BN + Mish ---------------------------------------------
    h = jnp.dot(x2d, w1_ref[...], preferred_element_type=jnp.float32)
    h = _mish_in_kernel(h * s1_ref[...] + b1_ref[...])        # (ho*wo, c) f32

    # --- zero-padded VMEM scratch (halo for the 3x3) ------------------------
    hpad_ref[...] = jnp.zeros_like(hpad_ref)
    hpad_ref[1:1 + ho, 1:1 + wo, :] = h.reshape(ho, wo, c)

    # --- 3x3 conv as 9 shifted-window GEMMs (bf16 MXU operands) -------------
    acc = None
    for t in range(9):
        dh, dw = divmod(t, 3)
        win = hpad_ref[dh:dh + ho, dw:dw + wo, :]              # (ho, wo, c) f32
        part = jnp.dot(win.reshape(ho * wo, c).astype(jnp.bfloat16),
                       w3_ref[t], preferred_element_type=jnp.float32)
        acc = part if acc is None else acc + part

    y = _mish_in_kernel(acc * s3_ref[...] + b3_ref[...])
    y = y + x2d.astype(jnp.float32)                            # shortcut add
    o_ref[...] = y.reshape(1, ho, wo, c).astype(o_ref.dtype)


def _resblock_unit(r_nhwc, p1, p3):
    n, ho, wo, c = r_nhwc.shape
    return pl.pallas_call(
        _resblock_unit_kernel,
        out_shape=jax.ShapeDtypeStruct((n, ho, wo, c), r_nhwc.dtype),
        grid_spec=pltpu.PrefetchScalarGridSpec(
            num_scalar_prefetch=0,
            grid=(n,),
            in_specs=[
                pl.BlockSpec((1, ho, wo, c), lambda b: (b, 0, 0, 0)),
                pl.BlockSpec((c, c), lambda b: (0, 0)),
                pl.BlockSpec((1, c), lambda b: (0, 0)),
                pl.BlockSpec((1, c), lambda b: (0, 0)),
                pl.BlockSpec((9, c, c), lambda b: (0, 0, 0)),
                pl.BlockSpec((1, c), lambda b: (0, 0)),
                pl.BlockSpec((1, c), lambda b: (0, 0)),
            ],
            out_specs=pl.BlockSpec((1, ho, wo, c), lambda b: (b, 0, 0, 0)),
            scratch_shapes=[pltpu.VMEM((ho + 2, wo + 2, c), jnp.float32)],
        ),
        compiler_params=pltpu.CompilerParams(
            dimension_semantics=("parallel",)),
    )(r_nhwc, p1["w"], p1["scale"], p1["bias"],
      p3["w"], p3["scale"], p3["bias"])


# ---------------------------------------------------------------------------
# Wrapper glue.
# ---------------------------------------------------------------------------
def _im2col_3x3(x_nhwc, stride, pad):
    # TODO(synk): conv1-only wrapper-side patch extraction (single use).
    n, h, w, c = x_nhwc.shape
    ho = (h + 2 * pad - 3) // stride + 1
    wo = (w + 2 * pad - 3) // stride + 1
    xp = jnp.pad(x_nhwc, ((0, 0), (pad, pad), (pad, pad), (0, 0)))
    cols = []
    for dh in range(3):
        for dw in range(3):
            cols.append(
                xp[:, dh:dh + stride * ho:stride, dw:dw + stride * wo:stride, :])
    patches = jnp.concatenate(cols, axis=-1)          # (dh, dw, c) channel order
    return patches.reshape(n * ho * wo, 9 * c), (ho, wo)


@jax.jit
def downsample4_forward(x_nchw, params):
    n = x_nchw.shape[0]
    # NCHW -> NHWC (lane-dense channels), bf16 activations throughout.
    x = jnp.transpose(x_nchw.astype(jnp.bfloat16), (0, 2, 3, 1))

    # conv1: 3x3 stride-2.
    patches, (ho, wo) = _im2col_3x3(x, stride=2, pad=1)
    p = params["conv1"]
    x1 = _gemm_bn_mish([patches], [p["w"].reshape(-1, p["w"].shape[-1])],
                       p["scale"], p["bias"], jnp.bfloat16)          # (m, 512)
    m = n * ho * wo

    p = params["conv2"]
    x2 = _gemm_bn_mish([x1], [p["w"]], p["scale"], p["bias"], jnp.bfloat16)
    p = params["conv3"]
    x3 = _gemm_bn_mish([x1], [p["w"]], p["scale"], p["bias"], jnp.bfloat16)

    r = x3.reshape(n, ho, wo, 256)
    for p1, p3 in params["resblock"]:
        r = _resblock_unit(r, p1, p3)                 # fused 1x1 + 3x3 + shortcut

    p = params["conv4"]
    x4 = _gemm_bn_mish([r.reshape(m, 256)], [p["w"]],
                       p["scale"], p["bias"], jnp.bfloat16)

    # conv5 with the channel concat fused as two K-halves: cat([x4, x2], C).
    p = params["conv5"]
    x5 = _gemm_bn_mish([x4, x2], [p["w_a"], p["w_b"]],
                       p["scale"], p["bias"], jnp.float32)           # (m, 512)

    x5 = x5.reshape(n, ho, wo, 512)
    return jnp.transpose(x5, (0, 3, 1, 2))            # NHWC -> NCHW


# ---------------------------------------------------------------------------
# Parameter construction: Conv weight (GEMM layout, bf16) + eval-mode BN
# folded to per-channel scale/bias (f32).  Weight transposes happen ONCE here.
# ---------------------------------------------------------------------------
def _init_conv_bn(key, cin, cout, ksize):
    kw, kg, kb, km, kv = jax.random.split(key, 5)
    fan_in = cin * ksize * ksize
    w = jax.random.normal(kw, (cout, cin, ksize, ksize), jnp.float32)
    w = w * (2.0 / fan_in) ** 0.5
    gamma = jax.random.uniform(kg, (cout,), jnp.float32, 0.8, 1.2)
    beta = 0.1 * jax.random.normal(kb, (cout,), jnp.float32)
    mean = 0.1 * jax.random.normal(km, (cout,), jnp.float32)
    var = jax.random.uniform(kv, (cout,), jnp.float32, 0.5, 1.5)
    scale = gamma / jnp.sqrt(var + 1e-5)
    bias = beta - mean * scale
    # GEMM layout: 1x1 -> (cin, cout); 3x3 -> (9, cin, cout) with tap index
    # t = 3*dh + dw, matching both the fused kernel loops and _im2col_3x3.
    if ksize == 1:
        w_g = jnp.transpose(w[:, :, 0, 0], (1, 0))
    else:
        w_g = jnp.transpose(w, (2, 3, 1, 0)).reshape(ksize * ksize, cin, cout)
    return {"w": w_g.astype(jnp.bfloat16),
            "scale": scale.reshape(1, cout),
            "bias": bias.reshape(1, cout)}


def init_downsample4_params(key):
    keys = jax.random.split(key, 21)
    c5 = _init_conv_bn(keys[4], 512, 512, 1)
    return {
        "conv1": _init_conv_bn(keys[0], 256, 512, 3),
        "conv2": _init_conv_bn(keys[1], 512, 256, 1),
        "conv3": _init_conv_bn(keys[2], 512, 256, 1),
        "conv4": _init_conv_bn(keys[3], 256, 256, 1),
        # conv5 weight pre-split into the [x4 | x2] K-halves (concat fused in-kernel).
        "conv5": {"w_a": c5["w"][:256], "w_b": c5["w"][256:],
                  "scale": c5["scale"], "bias": c5["bias"]},
        "resblock": [
            (_init_conv_bn(keys[5 + 2 * i], 256, 256, 1),
             _init_conv_bn(keys[6 + 2 * i], 256, 256, 3))
            for i in range(8)
        ],
    }


# ---------------------------------------------------------------------------
# Reference (lax.conv, bf16 operands + f32 accumulation — matches the kernels'
# numerics except for the exact-vs-approx Mish and accumulation order).
# ---------------------------------------------------------------------------
def _mish_exact(y):
    sp = jnp.maximum(y, 0.0) + jnp.log1p(jnp.exp(-jnp.abs(y)))
    return y * jnp.tanh(sp)


def _oihw_from_gemm(w_g, ksize):
    if ksize == 1:
        cin, cout = w_g.shape
        return jnp.transpose(w_g, (1, 0)).reshape(cout, cin, 1, 1)
    _, cin, cout = w_g.shape
    return jnp.transpose(w_g.reshape(ksize, ksize, cin, cout), (3, 2, 0, 1))


def _ref_block(x_bf16, p, ksize, stride, pad):
    w = _oihw_from_gemm(p["w"], ksize)
    y = jax.lax.conv_general_dilated(
        x_bf16, w, (stride, stride), [(pad, pad), (pad, pad)],
        dimension_numbers=("NCHW", "OIHW", "NCHW"),
        preferred_element_type=jnp.float32)
    y = y * p["scale"].reshape(1, -1, 1, 1) + p["bias"].reshape(1, -1, 1, 1)
    return _mish_exact(y)                                        # f32


@jax.jit
def downsample4_ref(x_nchw, params):
    xb = x_nchw.astype(jnp.bfloat16)
    x1 = _ref_block(xb, params["conv1"], 3, 2, 1).astype(jnp.bfloat16)
    x2 = _ref_block(x1, params["conv2"], 1, 1, 0).astype(jnp.bfloat16)
    x3 = _ref_block(x1, params["conv3"], 1, 1, 0).astype(jnp.bfloat16)
    r = x3
    for p1, p3 in params["resblock"]:
        h = _ref_block(r, p1, 1, 1, 0).astype(jnp.bfloat16)
        h = _ref_block(h, p3, 3, 1, 1)                           # f32
        r = (h + r.astype(jnp.float32)).astype(jnp.bfloat16)
    x4 = _ref_block(r, params["conv4"], 1, 1, 0).astype(jnp.bfloat16)
    p5 = {"w": jnp.concatenate([params["conv5"]["w_a"],
                                params["conv5"]["w_b"]], axis=0),
          "scale": params["conv5"]["scale"], "bias": params["conv5"]["bias"]}
    xc = jnp.concatenate([x4, x2], axis=1)
    return _ref_block(xc, p5, 1, 1, 0)


if __name__ == "__main__":
    root = jax.random.PRNGKey(0)
    k_x, k_p = jax.random.split(root)

    # DownSample4 requires 256 input channels; batch=2, 16x16 spatial (-> 8x8
    # after the stride-2 conv1) keeps the test small but architecture-consistent.
    x = jax.random.normal(k_x, (2, 256, 16, 16), dtype=jnp.float32)
    params = init_downsample4_params(k_p)

    out = jax.block_until_ready(downsample4_forward(x, params))
    assert out.shape == (2, 512, 8, 8), out.shape
    assert out.dtype == jnp.float32

    ref = jax.block_until_ready(downsample4_ref(x, params))
    err = float(jnp.max(jnp.abs(out - ref)) /
                jnp.maximum(1.0, jnp.max(jnp.abs(ref))))
    # Tolerance covers bf16 MXU operands + the approximate-reciprocal Mish
    # epilogue compounding across 19 chained conv layers; an indexing/layout
    # bug would produce O(1) error, not a few percent.
    assert err < 4e-2, f"mismatch vs bf16 lax.conv reference: {err}"

    print("KERNEL_OK")
</pallas_src>

<mosaic_0001>
module attributes {stable_mosaic.version = 11 : i64} {
  func.func @_gemm_bn_mish_kernel(%arg0: i32, %arg1: i32, %arg2: memref<128x512xbf16, #tpu.memory_space<vmem>>, %arg3: memref<512x128xbf16, #tpu.memory_space<vmem>>, %arg4: memref<1x128xf32, #tpu.memory_space<vmem>>, %arg5: memref<1x128xf32, #tpu.memory_space<vmem>>, %arg6: memref<128x128xbf16, #tpu.memory_space<vmem>>) attributes {dimension_semantics = [#tpu.dimension_semantics<parallel>, #tpu.dimension_semantics<parallel>], iteration_bounds = array<i64: 1, 2>, scalar_prefetch = 0 : i64, scratch_operands = 0 : i64, tpu.core_type = #tpu.core_type<tc>, window_params = [{transform_indices = @transform_0, window_bounds = array<i64: 128, 512>}, {transform_indices = @transform_1, window_bounds = array<i64: 512, 128>}, {transform_indices = @transform_2, window_bounds = array<i64: 1, 128>}, {transform_indices = @transform_3, window_bounds = array<i64: 1, 128>}, {transform_indices = @transform_4, window_bounds = array<i64: 128, 128>}]} {
    %c0 = arith.constant 0 : index
    %c0_0 = arith.constant 0 : index
    %0 = vector.load %arg2[%c0, %c0_0] : memref<128x512xbf16, #tpu.memory_space<vmem>>, vector<128x512xbf16>
    %c0_1 = arith.constant 0 : index
    %c0_2 = arith.constant 0 : index
    %1 = vector.load %arg3[%c0_1, %c0_2] : memref<512x128xbf16, #tpu.memory_space<vmem>>, vector<512x128xbf16>
    %cst = arith.constant dense<0.000000e+00> : vector<128x128xf32>
    %2 = tpu.matmul %0, %1, %cst {dimension_numbers = #tpu.dot_dimension_numbers<[1], [0], [0], [1], [0, 0, 1, 1], [], []>} : vector<128x512xbf16>, vector<512x128xbf16>, vector<128x128xf32> -> vector<128x128xf32>
    %c0_3 = arith.constant 0 : index
    %c0_4 = arith.constant 0 : index
    %3 = vector.load %arg4[%c0_3, %c0_4] : memref<1x128xf32, #tpu.memory_space<vmem>>, vector<1x128xf32>
    %4 = vector.broadcast %3 : vector<1x128xf32> to vector<128x128xf32>
    %5 = arith.mulf %2, %4 : vector<128x128xf32>
    %c0_5 = arith.constant 0 : index
    %c0_6 = arith.constant 0 : index
    %6 = vector.load %arg5[%c0_5, %c0_6] : memref<1x128xf32, #tpu.memory_space<vmem>>, vector<1x128xf32>
    %7 = vector.broadcast %6 : vector<1x128xf32> to vector<128x128xf32>
    %8 = arith.addf %5, %7 : vector<128x128xf32>
    %cst_7 = arith.constant 2.000000e+01 : f32
    %9 = vector.broadcast %cst_7 : f32 to vector<128x128xf32>
    %10 = arith.minimumf %8, %9 : vector<128x128xf32>
    %11 = math.exp %10 : vector<128x128xf32>
    %cst_8 = arith.constant 2.000000e+00 : f32
    %12 = vector.broadcast %cst_8 : f32 to vector<128x128xf32>
    %13 = arith.addf %11, %12 : vector<128x128xf32>
    %14 = arith.mulf %11, %13 : vector<128x128xf32>
    %cst_9 = arith.constant 2.000000e+00 : f32
    %15 = vector.broadcast %cst_9 : f32 to vector<128x128xf32>
    %16 = arith.addf %14, %15 : vector<128x128xf32>
    %17 = tpu.reciprocal %16 {approx = true} : vector<128x128xf32> -> vector<128x128xf32>
    %18 = arith.mulf %14, %17 : vector<128x128xf32>
    %cst_10 = arith.constant 2.000000e+01 : f32
    %19 = vector.broadcast %cst_10 : f32 to vector<128x128xf32>
    %20 = arith.cmpf ogt, %8, %19 : vector<128x128xf32>
    %21 = arith.mulf %8, %18 : vector<128x128xf32>
    %22 = arith.select %20, %8, %21 : vector<128x128xi1>, vector<128x128xf32>
    %23 = arith.truncf %22 : vector<128x128xf32> to vector<128x128xbf16>
    %c0_11 = arith.constant 0 : index
    %c0_12 = arith.constant 0 : index
    %24 = vector.load %arg6[%c0_11, %c0_12] : memref<128x128xbf16, #tpu.memory_space<vmem>>, vector<128x128xbf16>
    tpu.vector_store %arg6[%c0_11, %c0_12], %23 {strides = array<i32>} : memref<128x128xbf16, #tpu.memory_space<vmem>>, vector<128x128xbf16>,
    return
  }
  func.func @transform_0(%arg0: i32, %arg1: i32) -> (i32, i32) {
    %c0_i32 = arith.constant 0 : i32
    %c0_i32_0 = arith.constant 0 : i32
    return %arg0, %c0_i32 : i32, i32
  }
  func.func @transform_1(%arg0: i32, %arg1: i32) -> (i32, i32) {
    %c0_i32 = arith.constant 0 : i32
    %c0_i32_0 = arith.constant 0 : i32
    return %c0_i32, %arg1 : i32, i32
  }
  func.func @transform_2(%arg0: i32, %arg1: i32) -> (i32, i32) {
    %c0_i32 = arith.constant 0 : i32
    %c0_i32_0 = arith.constant 0 : i32
    return %c0_i32, %arg1 : i32, i32
  }
  func.func @transform_3(%arg0: i32, %arg1: i32) -> (i32, i32) {
    %c0_i32 = arith.constant 0 : i32
    %c0_i32_0 = arith.constant 0 : i32
    return %c0_i32, %arg1 : i32, i32
  }
  func.func @transform_4(%arg0: i32, %arg1: i32) -> (i32, i32) {
    %c0_i32 = arith.constant 0 : i32
    return %arg0, %arg1 : i32, i32
  }
}

module attributes {stable_mosaic.version = 11 : i64} {
  func.func @_gemm_bn_mish_kernel(%arg0: i32, %arg1: i32, %arg2: memref<128x2304xbf16, #tpu.memory_space<vmem>>, %arg3: memref<2304x256xbf16, #tpu.memory_space<vmem>>, %arg4: memref<1x256xf32, #tpu.memory_space<vmem>>, %arg5: memref<1x256xf32, #tpu.memory_space<vmem>>, %arg6: memref<128x256xbf16, #tpu.memory_space<vmem>>) attributes {dimension_semantics = [#tpu.dimension_semantics<parallel>, #tpu.dimension_semantics<parallel>], iteration_bounds = array<i64: 1, 2>, scalar_prefetch = 0 : i64, scratch_operands = 0 : i64, tpu.core_type = #tpu.core_type<tc>, window_params = [{transform_indices = @transform_0, window_bounds = array<i64: 128, 2304>}, {transform_indices = @transform_1, window_bounds = array<i64: 2304, 256>}, {transform_indices = @transform_2, window_bounds = array<i64: 1, 256>}, {transform_indices = @transform_3, window_bounds = array<i64: 1, 256>}, {transform_indices = @transform_4, window_bounds = array<i64: 128, 256>}]} {
    %c0 = arith.constant 0 : index
    %c0_0 = arith.constant 0 : index
    %0 = vector.load %arg2[%c0, %c0_0] : memref<128x2304xbf16, #tpu.memory_space<vmem>>, vector<128x2304xbf16>
    %c0_1 = arith.constant 0 : index
    %c0_2 = arith.constant 0 : index
    %1 = vector.load %arg3[%c0_1, %c0_2] : memref<2304x256xbf16, #tpu.memory_space<vmem>>, vector<2304x256xbf16>
    %cst = arith.constant dense<0.000000e+00> : vector<128x256xf32>
    %2 = tpu.matmul %0, %1, %cst {dimension_numbers = #tpu.dot_dimension_numbers<[1], [0], [0], [1], [0, 0, 1, 1], [], []>} : vector<128x2304xbf16>, vector<2304x256xbf16>, vector<128x256xf32> -> vector<128x256xf32>
    %c0_3 = arith.constant 0 : index
    %c0_4 = arith.constant 0 : index
    %3 = vector.load %arg4[%c0_3, %c0_4] : memref<1x256xf32, #tpu.memory_space<vmem>>, vector<1x256xf32>
    %4 = vector.broadcast %3 : vector<1x256xf32> to vector<128x256xf32>
    %5 = arith.mulf %2, %4 : vector<128x256xf32>
    %c0_5 = arith.constant 0 : index
    %c0_6 = arith.constant 0 : index
    %6 = vector.load %arg5[%c0_5, %c0_6] : memref<1x256xf32, #tpu.memory_space<vmem>>, vector<1x256xf32>
    %7 = vector.broadcast %6 : vector<1x256xf32> to vector<128x256xf32>
    %8 = arith.addf %5, %7 : vector<128x256xf32>
    %cst_7 = arith.constant 2.000000e+01 : f32
    %9 = vector.broadcast %cst_7 : f32 to vector<128x256xf32>
    %10 = arith.minimumf %8, %9 : vector<128x256xf32>
    %11 = math.exp %10 : vector<128x256xf32>
    %cst_8 = arith.constant 2.000000e+00 : f32
    %12 = vector.broadcast %cst_8 : f32 to vector<128x256xf32>
    %13 = arith.addf %11, %12 : vector<128x256xf32>
    %14 = arith.mulf %11, %13 : vector<128x256xf32>
    %cst_9 = arith.constant 2.000000e+00 : f32
    %15 = vector.broadcast %cst_9 : f32 to vector<128x256xf32>
    %16 = arith.addf %14, %15 : vector<128x256xf32>
    %17 = tpu.reciprocal %16 {approx = true} : vector<128x256xf32> -> vector<128x256xf32>
    %18 = arith.mulf %14, %17 : vector<128x256xf32>
    %cst_10 = arith.constant 2.000000e+01 : f32
    %19 = vector.broadcast %cst_10 : f32 to vector<128x256xf32>
    %20 = arith.cmpf ogt, %8, %19 : vector<128x256xf32>
    %21 = arith.mulf %8, %18 : vector<128x256xf32>
    %22 = arith.select %20, %8, %21 : vector<128x256xi1>, vector<128x256xf32>
    %23 = arith.truncf %22 : vector<128x256xf32> to vector<128x256xbf16>
    %c0_11 = arith.constant 0 : index
    %c0_12 = arith.constant 0 : index
    %24 = vector.load %arg6[%c0_11, %c0_12] : memref<128x256xbf16, #tpu.memory_space<vmem>>, vector<128x256xbf16>
    tpu.vector_store %arg6[%c0_11, %c0_12], %23 {strides = array<i32>} : memref<128x256xbf16, #tpu.memory_space<vmem>>, vector<128x256xbf16>,
    return
  }
  func.func @transform_0(%arg0: i32, %arg1: i32) -> (i32, i32) {
    %c0_i32 = arith.constant 0 : i32
    %c0_i32_0 = arith.constant 0 : i32
    return %arg0, %c0_i32 : i32, i32
  }
  func.func @transform_1(%arg0: i32, %arg1: i32) -> (i32, i32) {
    %c0_i32 = arith.constant 0 : i32
    %c0_i32_0 = arith.constant 0 : i32
    return %c0_i32, %arg1 : i32, i32
  }
  func.func @transform_2(%arg0: i32, %arg1: i32) -> (i32, i32) {
    %c0_i32 = arith.constant 0 : i32
    %c0_i32_0 = arith.constant 0 : i32
    return %c0_i32, %arg1 : i32, i32
  }
  func.func @transform_3(%arg0: i32, %arg1: i32) -> (i32, i32) {
    %c0_i32 = arith.constant 0 : i32
    %c0_i32_0 = arith.constant 0 : i32
    return %c0_i32, %arg1 : i32, i32
  }
  func.func @transform_4(%arg0: i32, %arg1: i32) -> (i32, i32) {
    %c0_i32 = arith.constant 0 : i32
    return %arg0, %arg1 : i32, i32
  }
}

module attributes {stable_mosaic.version = 11 : i64} {
  func.func @_gemm_bn_mish_kernel(%arg0: i32, %arg1: i32, %arg2: memref<128x256xbf16, #tpu.memory_space<vmem>>, %arg3: memref<256x128xbf16, #tpu.memory_space<vmem>>, %arg4: memref<1x128xf32, #tpu.memory_space<vmem>>, %arg5: memref<1x128xf32, #tpu.memory_space<vmem>>, %arg6: memref<128x128xbf16, #tpu.memory_space<vmem>>) attributes {dimension_semantics = [#tpu.dimension_semantics<parallel>, #tpu.dimension_semantics<parallel>], iteration_bounds = array<i64: 1, 2>, scalar_prefetch = 0 : i64, scratch_operands = 0 : i64, tpu.core_type = #tpu.core_type<tc>, window_params = [{transform_indices = @transform_0, window_bounds = array<i64: 128, 256>}, {transform_indices = @transform_1, window_bounds = array<i64: 256, 128>}, {transform_indices = @transform_2, window_bounds = array<i64: 1, 128>}, {transform_indices = @transform_3, window_bounds = array<i64: 1, 128>}, {transform_indices = @transform_4, window_bounds = array<i64: 128, 128>}]} {
    %c0 = arith.constant 0 : index
    %c0_0 = arith.constant 0 : index
    %0 = vector.load %arg2[%c0, %c0_0] : memref<128x256xbf16, #tpu.memory_space<vmem>>, vector<128x256xbf16>
    %c0_1 = arith.constant 0 : index
    %c0_2 = arith.constant 0 : index
    %1 = vector.load %arg3[%c0_1, %c0_2] : memref<256x128xbf16, #tpu.memory_space<vmem>>, vector<256x128xbf16>
    %cst = arith.constant dense<0.000000e+00> : vector<128x128xf32>
    %2 = tpu.matmul %0, %1, %cst {dimension_numbers = #tpu.dot_dimension_numbers<[1], [0], [0], [1], [0, 0, 1, 1], [], []>} : vector<128x256xbf16>, vector<256x128xbf16>, vector<128x128xf32> -> vector<128x128xf32>
    %c0_3 = arith.constant 0 : index
    %c0_4 = arith.constant 0 : index
    %3 = vector.load %arg4[%c0_3, %c0_4] : memref<1x128xf32, #tpu.memory_space<vmem>>, vector<1x128xf32>
    %4 = vector.broadcast %3 : vector<1x128xf32> to vector<128x128xf32>
    %5 = arith.mulf %2, %4 : vector<128x128xf32>
    %c0_5 = arith.constant 0 : index
    %c0_6 = arith.constant 0 : index
    %6 = vector.load %arg5[%c0_5, %c0_6] : memref<1x128xf32, #tpu.memory_space<vmem>>, vector<1x128xf32>
    %7 = vector.broadcast %6 : vector<1x128xf32> to vector<128x128xf32>
    %8 = arith.addf %5, %7 : vector<128x128xf32>
    %cst_7 = arith.constant 2.000000e+01 : f32
    %9 = vector.broadcast %cst_7 : f32 to vector<128x128xf32>
    %10 = arith.minimumf %8, %9 : vector<128x128xf32>
    %11 = math.exp %10 : vector<128x128xf32>
    %cst_8 = arith.constant 2.000000e+00 : f32
    %12 = vector.broadcast %cst_8 : f32 to vector<128x128xf32>
    %13 = arith.addf %11, %12 : vector<128x128xf32>
    %14 = arith.mulf %11, %13 : vector<128x128xf32>
    %cst_9 = arith.constant 2.000000e+00 : f32
    %15 = vector.broadcast %cst_9 : f32 to vector<128x128xf32>
    %16 = arith.addf %14, %15 : vector<128x128xf32>
    %17 = tpu.reciprocal %16 {approx = true} : vector<128x128xf32> -> vector<128x128xf32>
    %18 = arith.mulf %14, %17 : vector<128x128xf32>
    %cst_10 = arith.constant 2.000000e+01 : f32
    %19 = vector.broadcast %cst_10 : f32 to vector<128x128xf32>
    %20 = arith.cmpf ogt, %8, %19 : vector<128x128xf32>
    %21 = arith.mulf %8, %18 : vector<128x128xf32>
    %22 = arith.select %20, %8, %21 : vector<128x128xi1>, vector<128x128xf32>
    %23 = arith.truncf %22 : vector<128x128xf32> to vector<128x128xbf16>
    %c0_11 = arith.constant 0 : index
    %c0_12 = arith.constant 0 : index
    %24 = vector.load %arg6[%c0_11, %c0_12] : memref<128x128xbf16, #tpu.memory_space<vmem>>, vector<128x128xbf16>
    tpu.vector_store %arg6[%c0_11, %c0_12], %23 {strides = array<i32>} : memref<128x128xbf16, #tpu.memory_space<vmem>>, vector<128x128xbf16>,
    return
  }
  func.func @transform_0(%arg0: i32, %arg1: i32) -> (i32, i32) {
    %c0_i32 = arith.constant 0 : i32
    %c0_i32_0 = arith.constant 0 : i32
    return %arg0, %c0_i32 : i32, i32
  }
  func.func @transform_1(%arg0: i32, %arg1: i32) -> (i32, i32) {
    %c0_i32 = arith.constant 0 : i32
    %c0_i32_0 = arith.constant 0 : i32
    return %c0_i32, %arg1 : i32, i32
  }
  func.func @transform_2(%arg0: i32, %arg1: i32) -> (i32, i32) {
    %c0_i32 = arith.constant 0 : i32
    %c0_i32_0 = arith.constant 0 : i32
    return %c0_i32, %arg1 : i32, i32
  }
  func.func @transform_3(%arg0: i32, %arg1: i32) -> (i32, i32) {
    %c0_i32 = arith.constant 0 : i32
    %c0_i32_0 = arith.constant 0 : i32
    return %c0_i32, %arg1 : i32, i32
  }
  func.func @transform_4(%arg0: i32, %arg1: i32) -> (i32, i32) {
    %c0_i32 = arith.constant 0 : i32
    return %arg0, %arg1 : i32, i32
  }
}

module attributes {stable_mosaic.version = 11 : i64} {
  func.func @_resblock_unit_kernel(%arg0: i32, %arg1: memref<1x8x8x256xbf16, #tpu.memory_space<vmem>>, %arg2: memref<256x256xbf16, #tpu.memory_space<vmem>>, %arg3: memref<1x256xf32, #tpu.memory_space<vmem>>, %arg4: memref<1x256xf32, #tpu.memory_space<vmem>>, %arg5: memref<9x256x256xbf16, #tpu.memory_space<vmem>>, %arg6: memref<1x256xf32, #tpu.memory_space<vmem>>, %arg7: memref<1x256xf32, #tpu.memory_space<vmem>>, %arg8: memref<1x8x8x256xbf16, #tpu.memory_space<vmem>>, %arg9: memref<10x10x256xf32, #tpu.memory_space<vmem>>) attributes {dimension_semantics = [#tpu.dimension_semantics<parallel>], iteration_bounds = array<i64: 2>, scalar_prefetch = 0 : i64, scratch_operands = 1 : i64, tpu.core_type = #tpu.core_type<tc>, window_params = [{transform_indices = @transform_0, window_bounds = array<i64: 1, 8, 8, 256>}, {pipeline_mode = #tpu.pipeline_mode<synchronous>, transform_indices = @transform_1, window_bounds = array<i64: 256, 256>}, {pipeline_mode = #tpu.pipeline_mode<synchronous>, transform_indices = @transform_2, window_bounds = array<i64: 1, 256>}, {pipeline_mode = #tpu.pipeline_mode<synchronous>, transform_indices = @transform_3, window_bounds = array<i64: 1, 256>}, {pipeline_mode = #tpu.pipeline_mode<synchronous>, transform_indices = @transform_4, window_bounds = array<i64: 9, 256, 256>}, {pipeline_mode = #tpu.pipeline_mode<synchronous>, transform_indices = @transform_5, window_bounds = array<i64: 1, 256>}, {pipeline_mode = #tpu.pipeline_mode<synchronous>, transform_indices = @transform_6, window_bounds = array<i64: 1, 256>}, {transform_indices = @transform_7, window_bounds = array<i64: 1, 8, 8, 256>}]} {
    %c0 = arith.constant 0 : index
    %c0_0 = arith.constant 0 : index
    %c0_1 = arith.constant 0 : index
    %c0_2 = arith.constant 0 : index
    %0 = vector.load %arg1[%c0, %c0_0, %c0_1, %c0_2] : memref<1x8x8x256xbf16, #tpu.memory_space<vmem>>, vector<1x8x8x256xbf16>
    %1 = vector.shape_cast %0 : vector<1x8x8x256xbf16> to vector<64x256xbf16>
    %c0_3 = arith.constant 0 : index
    %c0_4 = arith.constant 0 : index
    %2 = vector.load %arg2[%c0_3, %c0_4] : memref<256x256xbf16, #tpu.memory_space<vmem>>, vector<256x256xbf16>
    %cst = arith.constant dense<0.000000e+00> : vector<64x256xf32>
    %3 = tpu.matmul %1, %2, %cst {dimension_numbers = #tpu.dot_dimension_numbers<[1], [0], [0], [1], [0, 0, 1, 1], [], []>} : vector<64x256xbf16>, vector<256x256xbf16>, vector<64x256xf32> -> vector<64x256xf32>
    %c0_5 = arith.constant 0 : index
    %c0_6 = arith.constant 0 : index
    %4 = vector.load %arg3[%c0_5, %c0_6] : memref<1x256xf32, #tpu.memory_space<vmem>>, vector<1x256xf32>
    %5 = vector.broadcast %4 : vector<1x256xf32> to vector<64x256xf32>
    %6 = arith.mulf %3, %5 : vector<64x256xf32>
    %c0_7 = arith.constant 0 : index
    %c0_8 = arith.constant 0 : index
    %7 = vector.load %arg4[%c0_7, %c0_8] : memref<1x256xf32, #tpu.memory_space<vmem>>, vector<1x256xf32>
    %8 = vector.broadcast %7 : vector<1x256xf32> to vector<64x256xf32>
    %9 = arith.addf %6, %8 : vector<64x256xf32>
    %cst_9 = arith.constant 2.000000e+01 : f32
    %10 = vector.broadcast %cst_9 : f32 to vector<64x256xf32>
    %11 = arith.minimumf %9, %10 : vector<64x256xf32>
    %12 = math.exp %11 : vector<64x256xf32>
    %cst_10 = arith.constant 2.000000e+00 : f32
    %13 = vector.broadcast %cst_10 : f32 to vector<64x256xf32>
    %14 = arith.addf %12, %13 : vector<64x256xf32>
    %15 = arith.mulf %12, %14 : vector<64x256xf32>
    %cst_11 = arith.constant 2.000000e+00 : f32
    %16 = vector.broadcast %cst_11 : f32 to vector<64x256xf32>
    %17 = arith.addf %15, %16 : vector<64x256xf32>
    %18 = tpu.reciprocal %17 {approx = true} : vector<64x256xf32> -> vector<64x256xf32>
    %19 = arith.mulf %15, %18 : vector<64x256xf32>
    %cst_12 = arith.constant 2.000000e+01 : f32
    %20 = vector.broadcast %cst_12 : f32 to vector<64x256xf32>
    %21 = arith.cmpf ogt, %9, %20 : vector<64x256xf32>
    %22 = arith.mulf %9, %19 : vector<64x256xf32>
    %23 = arith.select %21, %9, %22 : vector<64x256xi1>, vector<64x256xf32>
    %cst_13 = arith.constant 0.000000e+00 : f32
    %24 = vector.broadcast %cst_13 : f32 to vector<10x10x256xf32>
    %c0_14 = arith.constant 0 : index
    %c0_15 = arith.constant 0 : index
    %c0_16 = arith.constant 0 : index
    %25 = vector.load %arg9[%c0_14, %c0_15, %c0_16] : memref<10x10x256xf32, #tpu.memory_space<vmem>>, vector<10x10x256xf32>
    tpu.vector_store %arg9[%c0_14, %c0_15, %c0_16], %24 {strides = array<i32>} : memref<10x10x256xf32, #tpu.memory_space<vmem>>, vector<10x10x256xf32>,
    %26 = vector.shape_cast %23 : vector<64x256xf32> to vector<8x8x256xf32>
    %c1 = arith.constant 1 : index
    %c1_17 = arith.constant 1 : index
    %c0_18 = arith.constant 0 : index
    %27 = vector.load %arg9[%c1, %c1_17, %c0_18] : memref<10x10x256xf32, #tpu.memory_space<vmem>>, vector<8x8x256xf32>
    tpu.vector_store %arg9[%c1, %c1_17, %c0_18], %26 {strides = array<i32>} : memref<10x10x256xf32, #tpu.memory_space<vmem>>, vector<8x8x256xf32>,
    %c0_19 = arith.constant 0 : index
    %c0_20 = arith.constant 0 : index
    %c0_21 = arith.constant 0 : index
    %28 = vector.load %arg9[%c0_19, %c0_20, %c0_21] : memref<10x10x256xf32, #tpu.memory_space<vmem>>, vector<8x8x256xf32>
    %29 = vector.shape_cast %28 : vector<8x8x256xf32> to vector<64x256xf32>
    %30 = arith.truncf %29 : vector<64x256xf32> to vector<64x256xbf16>
    %c0_22 = arith.constant 0 : index
    %c0_23 = arith.constant 0 : index
    %c0_24 = arith.constant 0 : index
    %31 = vector.load %arg5[%c0_22, %c0_23, %c0_24] : memref<9x256x256xbf16, #tpu.memory_space<vmem>>, vector<1x256x256xbf16>
    %32 = vector.shape_cast %31 : vector<1x256x256xbf16> to vector<256x256xbf16>
    %cst_25 = arith.constant dense<0.000000e+00> : vector<64x256xf32>
    %33 = tpu.matmul %30, %32, %cst_25 {dimension_numbers = #tpu.dot_dimension_numbers<[1], [0], [0], [1], [0, 0, 1, 1], [], []>} : vector<64x256xbf16>, vector<256x256xbf16>, vector<64x256xf32> -> vector<64x256xf32>
    %c0_26 = arith.constant 0 : index
    %c1_27 = arith.constant 1 : index
    %c0_28 = arith.constant 0 : index
    %34 = vector.load %arg9[%c0_26, %c1_27, %c0_28] : memref<10x10x256xf32, #tpu.memory_space<vmem>>, vector<8x8x256xf32>
    %35 = vector.shape_cast %34 : vector<8x8x256xf32> to vector<64x256xf32>
    %36 = arith.truncf %35 : vector<64x256xf32> to vector<64x256xbf16>
    %c1_29 = arith.constant 1 : index
    %c0_30 = arith.constant 0 : index
    %c0_31 = arith.constant 0 : index
    %37 = vector.load %arg5[%c1_29, %c0_30, %c0_31] : memref<9x256x256xbf16, #tpu.memory_space<vmem>>, vector<1x256x256xbf16>
    %38 = vector.shape_cast %37 : vector<1x256x256xbf16> to vector<256x256xbf16>
    %cst_32 = arith.constant dense<0.000000e+00> : vector<64x256xf32>
    %39 = tpu.matmul %36, %38, %cst_32 {dimension_numbers = #tpu.dot_dimension_numbers<[1], [0], [0], [1], [0, 0, 1, 1], [], []>} : vector<64x256xbf16>, vector<256x256xbf16>, vector<64x256xf32> -> vector<64x256xf32>
    %40 = arith.addf %33, %39 : vector<64x256xf32>
    %c0_33 = arith.constant 0 : index
    %c2 = arith.constant 2 : index
    %c0_34 = arith.constant 0 : index
    %41 = vector.load %arg9[%c0_33, %c2, %c0_34] : memref<10x10x256xf32, #tpu.memory_space<vmem>>, vector<8x8x256xf32>
    %42 = vector.shape_cast %41 : vector<8x8x256xf32> to vector<64x256xf32>
    %43 = arith.truncf %42 : vector<64x256xf32> to vector<64x256xbf16>
    %c2_35 = arith.constant 2 : index
    %c0_36 = arith.constant 0 : index
    %c0_37 = arith.constant 0 : index
    %44 = vector.load %arg5[%c2_35, %c0_36, %c0_37] : memref<9x256x256xbf16, #tpu.memory_space<vmem>>, vector<1x256x256xbf16>
    %45 = vector.shape_cast %44 : vector<1x256x256xbf16> to vector<256x256xbf16>
    %cst_38 = arith.constant dense<0.000000e+00> : vector<64x256xf32>
    %46 = tpu.matmul %43, %45, %cst_38 {dimension_numbers = #tpu.dot_dimension_numbers<[1], [0], [0], [1], [0, 0, 1, 1], [], []>} : vector<64x256xbf16>, vector<256x256xbf16>, vector<64x256xf32> -> vector<64x256xf32>
    %47 = arith.addf %40, %46 : vector<64x256xf32>
    %c1_39 = arith.constant 1 : index
    %c0_40 = arith.constant 0 : index
    %c0_41 = arith.constant 0 : index
    %48 = vector.load %arg9[%c1_39, %c0_40, %c0_41] : memref<10x10x256xf32, #tpu.memory_space<vmem>>, vector<8x8x256xf32>
    %49 = vector.shape_cast %48 : vector<8x8x256xf32> to vector<64x256xf32>
    %50 = arith.truncf %49 : vector<64x256xf32> to vector<64x256xbf16>
    %c3 = arith.constant 3 : index
    %c0_42 = arith.constant 0 : index
    %c0_43 = arith.constant 0 : index
    %51 = vector.load %arg5[%c3, %c0_42, %c0_43] : memref<9x256x256xbf16, #tpu.memory_space<vmem>>, vector<1x256x256xbf16>
    %52 = vector.shape_cast %51 : vector<1x256x256xbf16> to vector<256x256xbf16>
    %cst_44 = arith.constant dense<0.000000e+00> : vector<64x256xf32>
    %53 = tpu.matmul %50, %52, %cst_44 {dimension_numbers = #tpu.dot_dimension_numbers<[1], [0], [0], [1], [0, 0, 1, 1], [], []>} : vector<64x256xbf16>, vector<256x256xbf16>, vector<64x256xf32> -> vector<64x256xf32>
    %54 = arith.addf %47, %53 : vector<64x256xf32>
    %c1_45 = arith.constant 1 : index
    %c1_46 = arith.constant 1 : index
    %c0_47 = arith.constant 0 : index
    %55 = vector.load %arg9[%c1_45, %c1_46, %c0_47] : memref<10x10x256xf32, #tpu.memory_space<vmem>>, vector<8x8x256xf32>
    %56 = vector.shape_cast %55 : vector<8x8x256xf32> to vector<64x256xf32>
    %57 = arith.truncf %56 : vector<64x256xf32> to vector<64x256xbf16>
    %c4 = arith.constant 4 : index
    %c0_48 = arith.constant 0 : index
    %c0_49 = arith.constant 0 : index
    %58 = vector.load %arg5[%c4, %c0_48, %c0_49] : memref<9x256x256xbf16, #tpu.memory_space<vmem>>, vector<1x256x256xbf16>
    %59 = vector.shape_cast %58 : vector<1x256x256xbf16> to vector<256x256xbf16>
    %cst_50 = arith.constant dense<0.000000e+00> : vector<64x256xf32>
    %60 = tpu.matmul %57, %59, %cst_50 {dimension_numbers = #tpu.dot_dimension_numbers<[1], [0], [0], [1], [0, 0, 1, 1], [], []>} : vector<64x256xbf16>, vector<256x256xbf16>, vector<64x256xf32> -> vector<64x256xf32>
    %61 = arith.addf %54, %60 : vector<64x256xf32>
    %c1_51 = arith.constant 1 : index
    %c2_52 = arith.constant 2 : index
    %c0_53 = arith.constant 0 : index
    %62 = vector.load %arg9[%c1_51, %c2_52, %c0_53] : memref<10x10x256xf32, #tpu.memory_space<vmem>>, vector<8x8x256xf32>
    %63 = vector.shape_cast %62 : vector<8x8x256xf32> to vector<64x256xf32>
    %64 = arith.truncf %63 : vector<64x256xf32> to vector<64x256xbf16>
    %c5 = arith.constant 5 : index
    %c0_54 = arith.constant 0 : index
    %c0_55 = arith.constant 0 : index
    %65 = vector.load %arg5[%c5, %c0_54, %c0_55] : memref<9x256x256xbf16, #tpu.memory_space<vmem>>, vector<1x256x256xbf16>
    %66 = vector.shape_cast %65 : vector<1x256x256xbf16> to vector<256x256xbf16>
    %cst_56 = arith.constant dense<0.000000e+00> : vector<64x256xf32>
    %67 = tpu.matmul %64, %66, %cst_56 {dimension_numbers = #tpu.dot_dimension_numbers<[1], [0], [0], [1], [0, 0, 1, 1], [], []>} : vector<64x256xbf16>, vector<256x256xbf16>, vector<64x256xf32> -> vector<64x256xf32>
    %68 = arith.addf %61, %67 : vector<64x256xf32>
    %c2_57 = arith.constant 2 : index
    %c0_58 = arith.constant 0 : index
    %c0_59 = arith.constant 0 : index
    %69 = vector.load %arg9[%c2_57, %c0_58, %c0_59] : memref<10x10x256xf32, #tpu.memory_space<vmem>>, vector<8x8x256xf32>
    %70 = vector.shape_cast %69 : vector<8x8x256xf32> to vector<64x256xf32>
    %71 = arith.truncf %70 : vector<64x256xf32> to vector<64x256xbf16>
    %c6 = arith.constant 6 : index
    %c0_60 = arith.constant 0 : index
    %c0_61 = arith.constant 0 : index
    %72 = vector.load %arg5[%c6, %c0_60, %c0_61] : memref<9x256x256xbf16, #tpu.memory_space<vmem>>, vector<1x256x256xbf16>
    %73 = vector.shape_cast %72 : vector<1x256x256xbf16> to vector<256x256xbf16>
    %cst_62 = arith.constant dense<0.000000e+00> : vector<64x256xf32>
    %74 = tpu.matmul %71, %73, %cst_62 {dimension_numbers = #tpu.dot_dimension_numbers<[1], [0], [0], [1], [0, 0, 1, 1], [], []>} : vector<64x256xbf16>, vector<256x256xbf16>, vector<64x256xf32> -> vector<64x256xf32>
    %75 = arith.addf %68, %74 : vector<64x256xf32>
    %c2_63 = arith.constant 2 : index
    %c1_64 = arith.constant 1 : index
    %c0_65 = arith.constant 0 : index
    %76 = vector.load %arg9[%c2_63, %c1_64, %c0_65] : memref<10x10x256xf32, #tpu.memory_space<vmem>>, vector<8x8x256xf32>
    %77 = vector.shape_cast %76 : vector<8x8x256xf32> to vector<64x256xf32>
    %78 = arith.truncf %77 : vector<64x256xf32> to vector<64x256xbf16>
    %c7 = arith.constant 7 : index
    %c0_66 = arith.constant 0 : index
    %c0_67 = arith.constant 0 : index
    %79 = vector.load %arg5[%c7, %c0_66, %c0_67] : memref<9x256x256xbf16, #tpu.memory_space<vmem>>, vector<1x256x256xbf16>
    %80 = vector.shape_cast %79 : vector<1x256x256xbf16> to vector<256x256xbf16>
    %cst_68 = arith.constant dense<0.000000e+00> : vector<64x256xf32>
    %81 = tpu.matmul %78, %80, %cst_68 {dimension_numbers = #tpu.dot_dimension_numbers<[1], [0], [0], [1], [0, 0, 1, 1], [], []>} : vector<64x256xbf16>, vector<256x256xbf16>, vector<64x256xf32> -> vector<64x256xf32>
    %82 = arith.addf %75, %81 : vector<64x256xf32>
    %c2_69 = arith.constant 2 : index
    %c2_70 = arith.constant 2 : index
    %c0_71 = arith.constant 0 : index
    %83 = vector.load %arg9[%c2_69, %c2_70, %c0_71] : memref<10x10x256xf32, #tpu.memory_space<vmem>>, vector<8x8x256xf32>
    %84 = vector.shape_cast %83 : vector<8x8x256xf32> to vector<64x256xf32>
    %85 = arith.truncf %84 : vector<64x256xf32> to vector<64x256xbf16>
    %c8 = arith.constant 8 : index
    %c0_72 = arith.constant 0 : index
    %c0_73 = arith.constant 0 : index
    %86 = vector.load %arg5[%c8, %c0_72, %c0_73] : memref<9x256x256xbf16, #tpu.memory_space<vmem>>, vector<1x256x256xbf16>
    %87 = vector.shape_cast %86 : vector<1x256x256xbf16> to vector<256x256xbf16>
    %cst_74 = arith.constant dense<0.000000e+00> : vector<64x256xf32>
    %88 = tpu.matmul %85, %87, %cst_74 {dimension_numbers = #tpu.dot_dimension_numbers<[1], [0], [0], [1], [0, 0, 1, 1], [], []>} : vector<64x256xbf16>, vector<256x256xbf16>, vector<64x256xf32> -> vector<64x256xf32>
    %89 = arith.addf %82, %88 : vector<64x256xf32>
    %c0_75 = arith.constant 0 : index
    %c0_76 = arith.constant 0 : index
    %90 = vector.load %arg6[%c0_75, %c0_76] : memref<1x256xf32, #tpu.memory_space<vmem>>, vector<1x256xf32>
    %91 = vector.broadcast %90 : vector<1x256xf32> to vector<64x256xf32>
    %92 = arith.mulf %89, %91 : vector<64x256xf32>
    %c0_77 = arith.constant 0 : index
    %c0_78 = arith.constant 0 : index
    %93 = vector.load %arg7[%c0_77, %c0_78] : memref<1x256xf32, #tpu.memory_space<vmem>>, vector<1x256xf32>
    %94 = vector.broadcast %93 : vector<1x256xf32> to vector<64x256xf32>
    %95 = arith.addf %92, %94 : vector<64x256xf32>
    %cst_79 = arith.constant 2.000000e+01 : f32
    %96 = vector.broadcast %cst_79 : f32 to vector<64x256xf32>
    %97 = arith.minimumf %95, %96 : vector<64x256xf32>
    %98 = math.exp %97 : vector<64x256xf32>
    %cst_80 = arith.constant 2.000000e+00 : f32
    %99 = vector.broadcast %cst_80 : f32 to vector<64x256xf32>
    %100 = arith.addf %98, %99 : vector<64x256xf32>
    %101 = arith.mulf %98, %100 : vector<64x256xf32>
    %cst_81 = arith.constant 2.000000e+00 : f32
    %102 = vector.broadcast %cst_81 : f32 to vector<64x256xf32>
    %103 = arith.addf %101, %102 : vector<64x256xf32>
    %104 = tpu.reciprocal %103 {approx = true} : vector<64x256xf32> -> vector<64x256xf32>
    %105 = arith.mulf %101, %104 : vector<64x256xf32>
    %cst_82 = arith.constant 2.000000e+01 : f32
    %106 = vector.broadcast %cst_82 : f32 to vector<64x256xf32>
    %107 = arith.cmpf ogt, %95, %106 : vector<64x256xf32>
    %108 = arith.mulf %95, %105 : vector<64x256xf32>
    %109 = arith.select %107, %95, %108 : vector<64x256xi1>, vector<64x256xf32>
    %110 = arith.extf %1 : vector<64x256xbf16> to vector<64x256xf32>
    %111 = arith.addf %109, %110 : vector<64x256xf32>
    %112 = vector.shape_cast %111 : vector<64x256xf32> to vector<1x8x8x256xf32>
    %113 = arith.truncf %112 : vector<1x8x8x256xf32> to vector<1x8x8x256xbf16>
    %c0_83 = arith.constant 0 : index
    %c0_84 = arith.constant 0 : index
    %c0_85 = arith.constant 0 : index
    %c0_86 = arith.constant 0 : index
    %114 = vector.load %arg8[%c0_83, %c0_84, %c0_85, %c0_86] : memref<1x8x8x256xbf16, #tpu.memory_space<vmem>>, vector<1x8x8x256xbf16>
    tpu.vector_store %arg8[%c0_83, %c0_84, %c0_85, %c0_86], %113 {strides = array<i32>} : memref<1x8x8x256xbf16, #tpu.memory_space<vmem>>, vector<1x8x8x256xbf16>,
    return
  }
  func.func @transform_0(%arg0: i32) -> (i32, i32, i32, i32) {
    %c0_i32 = arith.constant 0 : i32
    %c0_i32_0 = arith.constant 0 : i32
    %c0_i32_1 = arith.constant 0 : i32
    %c0_i32_2 = arith.constant 0 : i32
    return %arg0, %c0_i32, %c0_i32_0, %c0_i32_1 : i32, i32, i32, i32
  }
  func.func @transform_1(%arg0: i32) -> (i32, i32) {
    %c0_i32 = arith.constant 0 : i32
    %c0_i32_0 = arith.constant 0 : i32
    %c0_i32_1 = arith.constant 0 : i32
    return %c0_i32, %c0_i32_0 : i32, i32
  }
  func.func @transform_2(%arg0: i32) -> (i32, i32) {
    %c0_i32 = arith.constant 0 : i32
    %c0_i32_0 = arith.constant 0 : i32
    %c0_i32_1 = arith.constant 0 : i32
    return %c0_i32, %c0_i32_0 : i32, i32
  }
  func.func @transform_3(%arg0: i32) -> (i32, i32) {
    %c0_i32 = arith.constant 0 : i32
    %c0_i32_0 = arith.constant 0 : i32
    %c0_i32_1 = arith.constant 0 : i32
    return %c0_i32, %c0_i32_0 : i32, i32
  }
  func.func @transform_4(%arg0: i32) -> (i32, i32, i32) {
    %c0_i32 = arith.constant 0 : i32
    %c0_i32_0 = arith.constant 0 : i32
    %c0_i32_1 = arith.constant 0 : i32
    %c0_i32_2 = arith.constant 0 : i32
    return %c0_i32, %c0_i32_0, %c0_i32_1 : i32, i32, i32
  }
  func.func @transform_5(%arg0: i32) -> (i32, i32) {
    %c0_i32 = arith.constant 0 : i32
    %c0_i32_0 = arith.constant 0 : i32
    %c0_i32_1 = arith.constant 0 : i32
    return %c0_i32, %c0_i32_0 : i32, i32
  }
  func.func @transform_6(%arg0: i32) -> (i32, i32) {
    %c0_i32 = arith.constant 0 : i32
    %c0_i32_0 = arith.constant 0 : i32
    %c0_i32_1 = arith.constant 0 : i32
    return %c0_i32, %c0_i32_0 : i32, i32
  }
  func.func @transform_7(%arg0: i32) -> (i32, i32, i32, i32) {
    %c0_i32 = arith.constant 0 : i32
    %c0_i32_0 = arith.constant 0 : i32
    %c0_i32_1 = arith.constant 0 : i32
    %c0_i32_2 = arith.constant 0 : i32
    return %arg0, %c0_i32, %c0_i32_0, %c0_i32_1 : i32, i32, i32, i32
  }
}

module attributes {stable_mosaic.version = 11 : i64} {
  func.func @_gemm_bn_mish_kernel(%arg0: i32, %arg1: i32, %arg2: memref<128x256xbf16, #tpu.memory_space<vmem>>, %arg3: memref<128x256xbf16, #tpu.memory_space<vmem>>, %arg4: memref<256x256xbf16, #tpu.memory_space<vmem>>, %arg5: memref<256x256xbf16, #tpu.memory_space<vmem>>, %arg6: memref<1x256xf32, #tpu.memory_space<vmem>>, %arg7: memref<1x256xf32, #tpu.memory_space<vmem>>, %arg8: memref<128x256xf32, #tpu.memory_space<vmem>>) attributes {dimension_semantics = [#tpu.dimension_semantics<parallel>, #tpu.dimension_semantics<parallel>], iteration_bounds = array<i64: 1, 2>, scalar_prefetch = 0 : i64, scratch_operands = 0 : i64, tpu.core_type = #tpu.core_type<tc>, window_params = [{transform_indices = @transform_0, window_bounds = array<i64: 128, 256>}, {transform_indices = @transform_1, window_bounds = array<i64: 128, 256>}, {transform_indices = @transform_2, window_bounds = array<i64: 256, 256>}, {transform_indices = @transform_3, window_bounds = array<i64: 256, 256>}, {transform_indices = @transform_4, window_bounds = array<i64: 1, 256>}, {transform_indices = @transform_5, window_bounds = array<i64: 1, 256>}, {transform_indices = @transform_6, window_bounds = array<i64: 128, 256>}]} {
    %c0 = arith.constant 0 : index
    %c0_0 = arith.constant 0 : index
    %0 = vector.load %arg2[%c0, %c0_0] : memref<128x256xbf16, #tpu.memory_space<vmem>>, vector<128x256xbf16>
    %c0_1 = arith.constant 0 : index
    %c0_2 = arith.constant 0 : index
    %1 = vector.load %arg4[%c0_1, %c0_2] : memref<256x256xbf16, #tpu.memory_space<vmem>>, vector<256x256xbf16>
    %cst = arith.constant dense<0.000000e+00> : vector<128x256xf32>
    %2 = tpu.matmul %0, %1, %cst {dimension_numbers = #tpu.dot_dimension_numbers<[1], [0], [0], [1], [0, 0, 1, 1], [], []>} : vector<128x256xbf16>, vector<256x256xbf16>, vector<128x256xf32> -> vector<128x256xf32>
    %c0_3 = arith.constant 0 : index
    %c0_4 = arith.constant 0 : index
    %3 = vector.load %arg3[%c0_3, %c0_4] : memref<128x256xbf16, #tpu.memory_space<vmem>>, vector<128x256xbf16>
    %c0_5 = arith.constant 0 : index
    %c0_6 = arith.constant 0 : index
    %4 = vector.load %arg5[%c0_5, %c0_6] : memref<256x256xbf16, #tpu.memory_space<vmem>>, vector<256x256xbf16>
    %cst_7 = arith.constant dense<0.000000e+00> : vector<128x256xf32>
    %5 = tpu.matmul %3, %4, %cst_7 {dimension_numbers = #tpu.dot_dimension_numbers<[1], [0], [0], [1], [0, 0, 1, 1], [], []>} : vector<128x256xbf16>, vector<256x256xbf16>, vector<128x256xf32> -> vector<128x256xf32>
    %6 = arith.addf %2, %5 : vector<128x256xf32>
    %c0_8 = arith.constant 0 : index
    %c0_9 = arith.constant 0 : index
    %7 = vector.load %arg6[%c0_8, %c0_9] : memref<1x256xf32, #tpu.memory_space<vmem>>, vector<1x256xf32>
    %8 = vector.broadcast %7 : vector<1x256xf32> to vector<128x256xf32>
    %9 = arith.mulf %6, %8 : vector<128x256xf32>
    %c0_10 = arith.constant 0 : index
    %c0_11 = arith.constant 0 : index
    %10 = vector.load %arg7[%c0_10, %c0_11] : memref<1x256xf32, #tpu.memory_space<vmem>>, vector<1x256xf32>
    %11 = vector.broadcast %10 : vector<1x256xf32> to vector<128x256xf32>
    %12 = arith.addf %9, %11 : vector<128x256xf32>
    %cst_12 = arith.constant 2.000000e+01 : f32
    %13 = vector.broadcast %cst_12 : f32 to vector<128x256xf32>
    %14 = arith.minimumf %12, %13 : vector<128x256xf32>
    %15 = math.exp %14 : vector<128x256xf32>
    %cst_13 = arith.constant 2.000000e+00 : f32
    %16 = vector.broadcast %cst_13 : f32 to vector<128x256xf32>
    %17 = arith.addf %15, %16 : vector<128x256xf32>
    %18 = arith.mulf %15, %17 : vector<128x256xf32>
    %cst_14 = arith.constant 2.000000e+00 : f32
    %19 = vector.broadcast %cst_14 : f32 to vector<128x256xf32>
    %20 = arith.addf %18, %19 : vector<128x256xf32>
    %21 = tpu.reciprocal %20 {approx = true} : vector<128x256xf32> -> vector<128x256xf32>
    %22 = arith.mulf %18, %21 : vector<128x256xf32>
    %cst_15 = arith.constant 2.000000e+01 : f32
    %23 = vector.broadcast %cst_15 : f32 to vector<128x256xf32>
    %24 = arith.cmpf ogt, %12, %23 : vector<128x256xf32>
    %25 = arith.mulf %12, %22 : vector<128x256xf32>
    %26 = arith.select %24, %12, %25 : vector<128x256xi1>, vector<128x256xf32>
    %c0_16 = arith.constant 0 : index
    %c0_17 = arith.constant 0 : index
    %27 = vector.load %arg8[%c0_16, %c0_17] : memref<128x256xf32, #tpu.memory_space<vmem>>, vector<128x256xf32>
    tpu.vector_store %arg8[%c0_16, %c0_17], %26 {strides = array<i32>} : memref<128x256xf32, #tpu.memory_space<vmem>>, vector<128x256xf32>,
    return
  }
  func.func @transform_0(%arg0: i32, %arg1: i32) -> (i32, i32) {
    %c0_i32 = arith.constant 0 : i32
    %c0_i32_0 = arith.constant 0 : i32
    return %arg0, %c0_i32 : i32, i32
  }
  func.func @transform_1(%arg0: i32, %arg1: i32) -> (i32, i32) {
    %c0_i32 = arith.constant 0 : i32
    %c0_i32_0 = arith.constant 0 : i32
    return %arg0, %c0_i32 : i32, i32
  }
  func.func @transform_2(%arg0: i32, %arg1: i32) -> (i32, i32) {
    %c0_i32 = arith.constant 0 : i32
    %c0_i32_0 = arith.constant 0 : i32
    return %c0_i32, %arg1 : i32, i32
  }
  func.func @transform_3(%arg0: i32, %arg1: i32) -> (i32, i32) {
    %c0_i32 = arith.constant 0 : i32
    %c0_i32_0 = arith.constant 0 : i32
    return %c0_i32, %arg1 : i32, i32
  }
  func.func @transform_4(%arg0: i32, %arg1: i32) -> (i32, i32) {
    %c0_i32 = arith.constant 0 : i32
    %c0_i32_0 = arith.constant 0 : i32
    return %c0_i32, %arg1 : i32, i32
  }
  func.func @transform_5(%arg0: i32, %arg1: i32) -> (i32, i32) {
    %c0_i32 = arith.constant 0 : i32
    %c0_i32_0 = arith.constant 0 : i32
    return %c0_i32, %arg1 : i32, i32
  }
  func.func @transform_6(%arg0: i32, %arg1: i32) -> (i32, i32) {
    %c0_i32 = arith.constant 0 : i32
    return %arg0, %arg1 : i32, i32
  }
}

</mosaic_0001>

<bundles_post_ra>
// kernel: downsample4_forward.24
= control target key start
LH: loop header
LB: loop body
LE: loop exit
PB: predicated region body
PF: predicated region fallthrough
CT: control target
= control target key end

     0   :  { %s1676_s15 = smov 0   ;;  %s1678_s16 = smov 0   ;;  %s2100_s0 = inlined_call_operand.vmem [shape: bf16[128,256], index: 0, kind: input, shape index: {}]   ;;  %s2101_s1 = inlined_call_operand.vmem [shape: bf16[256,256], index: 1, kind: input, shape index: {}]   ;;  %s2102_s2 = inlined_call_operand.vmem [shape: f32[1,256], index: 2, kind: input, shape index: {}]   ;;  %s2103_s3 = inlined_call_operand.vmem [shape: f32[1,256], index: 3, kind: input, shape index: {}]   ;;  %s2104_s4 = inlined_call_operand.vmem [shape: bf16[128,256], index: 4, kind: output, shape index: {}]  }
   0x1   :  { %s1680_s17 = smov 0   ;;  %s1682_s18 = smov 0  }
   0x2   :  { %s1684_s19 = smov 0  }
   0x3 LB: > { %s23_s20 = sadd.s32 1, %s1645_s18  ;;  %s1260_s21 = sadd.s32 4294967295, %s1649_s19   ;;  %s1649_s19 = sphi %s1684_s19, %s14_s19   ;;  %s1645_s18 = sphi %s1682_s18, %s2109_s18   ;;  %s1641_s17 = sphi %s1680_s17, %s2108_s17   ;;  %s1637_s16 = sphi %s1678_s16, %s2107_s16   ;;  %s1633_s15 = sphi %s1676_s15, %s2106_s15  }
   0x4   : > { %p24_p0 = scmp.ge.s32.totalorder %s23_s20, 2  ;;  %p66_p1 = scmp.ne.s32.totalorder %s1637_s16, %s1633_s15 }
   0x5   : > { %p67_p2 = scmp.eq.s32.totalorder %s1649_s19, 0  ;;  %p150_p4 = scmp.eq.s32.totalorder %s1260_s21, 1 }
   0x6   : > { %s2111_s20 = smov (%p24_p0, %s23_s20), 0  ;;  %s59_s23 = sadd.s32 1, %s1637_s16 }
   0x7   : > { %p68_p3 = por %p67_p2, %p66_p1  ;;  %s56_s22 = ssub.s32 %s1645_s18, %s2111_s20 }
   0x8   : > { %p57_p5 = scmp.eq.s32.totalorder %s56_s22, 0  ;;  %p1711_p6 = por %p150_p4, %p66_p1 }
   0x9   : > { %p1264_p7 = scmp.ge.s32.totalorder %s1649_s19, 2 }
   0xa   : > { %s1716_s25 = scalar_select %p57_p5, %s1637_s16, %s59_s23  }
   0xb   : > { %182 = sbr.rel (%p1264_p7) target bundleno = 43 (0x2b), region = 20 }
  0x12   : > { %185 = sbr.rel (!%p68_p3) target bundleno = 43 (0x2b), region = 24  ;;  %s187_s26 = sand.u32 (%p68_p3), 1, %s1637_s16  }
  0x13   : > { %s1266_s27 = sshll.u32 (%p68_p3), %s1645_s18, 2  ;;  %s1265_s28 = sshll.u32 (%p68_p3), %s187_s26, 7 }
  0x14   : > { %s1724_s5 = scalar_lea.vmem (%p68_p3), %s2101_s1, %s1266_s27  ;;  %s1728_s6 = scalar_lea.vmem (%p68_p3), [#allocation2], %s1265_s28 }
  0x15   : > { %v207_v0 = vld [vmem:[%s1724_s5] sm:$0xf] (%p68_p3)  ;;  %v209_v1 = vld [vmem:[%s1724_s5 + $0x8] sm:$0xf] (%p68_p3)  ;;  %v211_v2 = vld [vmem:[%s1724_s5 + $0x10] sm:$0xf] (%p68_p3) }
  0x16   : > { %208 = vst [vmem:[%s1728_s6] sm:$0xf] (%p68_p3), %v207_v0  ;;  %210 = vst [vmem:[%s1728_s6 + $0x4] sm:$0xf] (%p68_p3), %v209_v1  ;;  %v213_v3 = vld [vmem:[%s1724_s5 + $0x18] sm:$0xf] (%p68_p3) }
  0x17   : > { %v215_v4 = vld [vmem:[%s1724_s5 + $0x20] sm:$0xf] (%p68_p3)  ;;  %212 = vst [vmem:[%s1728_s6 + $0x8] sm:$0xf] (%p68_p3), %v211_v2  ;;  %214 = vst [vmem:[%s1728_s6 + $0xc] sm:$0xf] (%p68_p3), %v213_v3 }
  0x18   : > { %216 = vst [vmem:[%s1728_s6 + $0x10] sm:$0xf] (%p68_p3), %v215_v4  ;;  %v217_v5 = vld [vmem:[%s1724_s5 + $0x28] sm:$0xf] (%p68_p3)  ;;  %v219_v6 = vld [vmem:[%s1724_s5 + $0x30] sm:$0xf] (%p68_p3) }
  0x19   : > { %v221_v7 = vld [vmem:[%s1724_s5 + $0x38] sm:$0xf]  ;;  %218 = vst [vmem:[%s1728_s6 + $0x14] sm:$0xf] %v217_v5  ;;  %220 = vst [vmem:[%s1728_s6 + $0x18] sm:$0xf] %v219_v6 }
  0x1a   : > { %222 = vst [vmem:[%s1728_s6 + $0x1c] sm:$0xf] %v221_v7  ;;  %v223_v8 = vld [vmem:[%s1724_s5 + $0x40] sm:$0xf]  ;;  %v225_v9 = vld [vmem:[%s1724_s5 + $0x48] sm:$0xf] }
  0x1b   : > { %v227_v10 = vld [vmem:[%s1724_s5 + $0x50] sm:$0xf]  ;;  %224 = vst [vmem:[%s1728_s6 + $0x20] sm:$0xf] %v223_v8  ;;  %226 = vst [vmem:[%s1728_s6 + $0x24] sm:$0xf] %v225_v9 }
  0x1c   : > { %228 = vst [vmem:[%s1728_s6 + $0x28] sm:$0xf] %v227_v10  ;;  %v229_v11 = vld [vmem:[%s1724_s5 + $0x58] sm:$0xf]  ;;  %v231_v12 = vld [vmem:[%s1724_s5 + $0x60] sm:$0xf] }
  0x1d   : > { %v233_v13 = vld [vmem:[%s1724_s5 + $0x68] sm:$0xf]  ;;  %230 = vst [vmem:[%s1728_s6 + $0x2c] sm:$0xf] %v229_v11  ;;  %232 = vst [vmem:[%s1728_s6 + $0x30] sm:$0xf] %v231_v12 }
  0x1e   : > { %234 = vst [vmem:[%s1728_s6 + $0x34] sm:$0xf] %v233_v13  ;;  %v235_v14 = vld [vmem:[%s1724_s5 + $0x70] sm:$0xf]  ;;  %v237_v15 = vld [vmem:[%s1724_s5 + $0x78] sm:$0xf] }
  0x1f   : > { %v239_v16 = vld [vmem:[%s1724_s5 + $0x80] sm:$0xf]  ;;  %236 = vst [vmem:[%s1728_s6 + $0x38] sm:$0xf] %v235_v14  ;;  %238 = vst [vmem:[%s1728_s6 + $0x3c] sm:$0xf] %v237_v15 }
  0x20   : > { %240 = vst [vmem:[%s1728_s6 + $0x40] sm:$0xf] %v239_v16  ;;  %v241_v17 = vld [vmem:[%s1724_s5 + $0x88] sm:$0xf]  ;;  %v243_v18 = vld [vmem:[%s1724_s5 + $0x90] sm:$0xf] }
  0x21   : > { %v245_v19 = vld [vmem:[%s1724_s5 + $0x98] sm:$0xf]  ;;  %242 = vst [vmem:[%s1728_s6 + $0x44] sm:$0xf] %v241_v17  ;;  %244 = vst [vmem:[%s1728_s6 + $0x48] sm:$0xf] %v243_v18 }
  0x22   : > { %246 = vst [vmem:[%s1728_s6 + $0x4c] sm:$0xf] %v245_v19  ;;  %v247_v20 = vld [vmem:[%s1724_s5 + $0xa0] sm:$0xf]  ;;  %v249_v21 = vld [vmem:[%s1724_s5 + $0xa8] sm:$0xf] }
  0x23   : > { %v251_v22 = vld [vmem:[%s1724_s5 + $0xb0] sm:$0xf]  ;;  %248 = vst [vmem:[%s1728_s6 + $0x50] sm:$0xf] %v247_v20  ;;  %250 = vst [vmem:[%s1728_s6 + $0x54] sm:$0xf] %v249_v21 }
  0x24   : > { %252 = vst [vmem:[%s1728_s6 + $0x58] sm:$0xf] %v251_v22  ;;  %v253_v23 = vld [vmem:[%s1724_s5 + $0xb8] sm:$0xf]  ;;  %v255_v24 = vld [vmem:[%s1724_s5 + $0xc0] sm:$0xf] }
  0x25   : > { %v257_v25 = vld [vmem:[%s1724_s5 + $0xc8] sm:$0xf]  ;;  %254 = vst [vmem:[%s1728_s6 + $0x5c] sm:$0xf] %v253_v23  ;;  %256 = vst [vmem:[%s1728_s6 + $0x60] sm:$0xf] %v255_v24 }
  0x26   : > { %258 = vst [vmem:[%s1728_s6 + $0x64] sm:$0xf] %v257_v25  ;;  %v259_v26 = vld [vmem:[%s1724_s5 + $0xd0] sm:$0xf]  ;;  %v261_v27 = vld [vmem:[%s1724_s5 + $0xd8] sm:$0xf] }
  0x27   : > { %v263_v28 = vld [vmem:[%s1724_s5 + $0xe0] sm:$0xf]  ;;  %260 = vst [vmem:[%s1728_s6 + $0x68] sm:$0xf] %v259_v26  ;;  %262 = vst [vmem:[%s1728_s6 + $0x6c] sm:$0xf] %v261_v27 }
  0x28   : > { %264 = vst [vmem:[%s1728_s6 + $0x70] sm:$0xf] %v263_v28  ;;  %v265_v29 = vld [vmem:[%s1724_s5 + $0xe8] sm:$0xf]  ;;  %v267_v30 = vld [vmem:[%s1724_s5 + $0xf0] sm:$0xf] }
  0x29   : > { %v269_v31 = vld [vmem:[%s1724_s5 + $0xf8] sm:$0xf]  ;;  %266 = vst [vmem:[%s1728_s6 + $0x74] sm:$0xf] %v265_v29  ;;  %268 = vst [vmem:[%s1728_s6 + $0x78] sm:$0xf] %v267_v30 }
  0x2a   : > { %270 = vst [vmem:[%s1728_s6 + $0x7c] sm:$0xf] %v269_v31 }
  0x2b PF: > { %p1267_p8 = scmp.ge.s32.totalorder %s1649_s19, 1  ;;  %p368_p9 = scmp.lt.s32.totalorder %s1649_s19, 3 }
  0x2d   : > { %p369_p10 = pnand %p1267_p8, %p368_p9 }
  0x2e   : > { %s375_s7 = sand.u32 (!%p369_p10), 1, %s1633_s15   ;;  %v1525_v32 = vld [vmem:[%s2100_s0 + $0x4] ss:$8 sps:$4 sm:$0xff] (!%p369_p10)   ;;  %v1523_v50 = vld [vmem:[%s2100_s0] ss:$8 sps:$4 sm:$0xff] (!%p369_p10)   ;;  %p418_p11 = scmp.lt.s32.totalorder (!%p369_p10), %s1641_s17, 1 }
  0x2f   : > { %372 = sbr.rel (%p369_p10) target bundleno = 389 (0x185), region = 73  ;;  %s1268_s8 = sshll.u32 (!%p369_p10), %s375_s7, 7  ;;  %v1528_v33 = vld [vmem:[%s2100_s0 + $0x44] ss:$8 sps:$4 sm:$0xff] (!%p369_p10)   ;;  %682 = vmatprep.mubr.bf16.mxu0 (!%p369_p10), %v1525_v32  ;;  %v1526_v51 = vld [vmem:[%s2100_s0 + $0x40] ss:$8 sps:$4 sm:$0xff] (!%p369_p10)  }
  0x30   : > { %s1803_s13 = scalar_lea.vmem (!%p369_p10), [#allocation2], %s1268_s8  ;;  %714 = vmatprep.mubr.bf16.mxu1 (!%p369_p10), %v1528_v33  ;;  %v1529_v52 = vld [vmem:[%s2100_s0 + $0x14] ss:$8 sps:$4 sm:$0xff] (!%p369_p10)   ;;  %v1533_v54 = vld [vmem:[%s2100_s0 + $0x10] ss:$8 sps:$4 sm:$0xff] (!%p369_p10)   ;;  %s1269_s21 = sshll.u32 (!%p369_p10), %s375_s7, 6 }
  0x31   : > { %v1507_v34 = vld [vmem:[%s1803_s13 + $0x40] sm:$0xff] (!%p369_p10)   ;;  %v1509_v36 = vld [vmem:[%s1803_s13 + $0x48] sm:$0xff] (!%p369_p10)   ;;  %v1511_v38 = vld [vmem:[%s1803_s13 + $0x50] sm:$0xff] (!%p369_p10)   ;;  %s2013_s15 = scalar_lea.vmem (!%p369_p10), [#allocation3], %s1269_s21 }
  0x32   : > { %v1508_v35 = vld [vmem:[%s1803_s13] sm:$0xff] (!%p369_p10)   ;;  %1387 = vmatprep.subr.bf16.mxu0 (!%p369_p10), %v1507_v34  ;;  %1451 = vmatprep.subr.bf16.mxu1 (!%p369_p10), %v1507_v34  ;;  %v1510_v37 = vld [vmem:[%s1803_s13 + $0x8] sm:$0xff] (!%p369_p10)   ;;  %v1512_v39 = vld [vmem:[%s1803_s13 + $0x10] sm:$0xff] (!%p369_p10)  }
  0x33   : > { %1388 = vmatpush3.bf16.msra.mxu0 (!%p369_p10), %v1508_v35  ;;  %1459 = vmatpush3.bf16.msra.mxu1 (!%p369_p10), %v1508_v35  ;;  %v1513_v40 = vld [vmem:[%s1803_s13 + $0x58] sm:$0xff] (!%p369_p10)   ;;  %v1515_v42 = vld [vmem:[%s1803_s13 + $0x60] sm:$0xff] (!%p369_p10)   ;;  %v1517_v44 = vld [vmem:[%s1803_s13 + $0x68] sm:$0xff] (!%p369_p10)  }
  0x34   : > { %1389 = vmatprep.subr.bf16.mxu0 (!%p369_p10), %v1509_v36  ;;  %1452 = vmatprep.subr.bf16.mxu1 (!%p369_p10), %v1509_v36  ;;  %v1514_v41 = vld [vmem:[%s1803_s13 + $0x18] sm:$0xff] (!%p369_p10)   ;;  %v1516_v43 = vld [vmem:[%s1803_s13 + $0x20] sm:$0xff] (!%p369_p10)   ;;  %v1518_v45 = vld [vmem:[%s1803_s13 + $0x28] sm:$0xff] (!%p369_p10)  }
  0x35   : > { %v1519_v46 = vld [vmem:[%s1803_s13 + $0x70] sm:$0xff] (!%p369_p10)   ;;  %v1521_v48 = vld [vmem:[%s1803_s13 + $0x78] sm:$0xff] (!%p369_p10)   ;;  %v1535_v56 = vld [vmem:[%s2100_s0 + $0x24] ss:$8 sps:$4 sm:$0xff] (!%p369_p10)  }
  0x36   : > { %v1520_v47 = vld [vmem:[%s1803_s13 + $0x30] sm:$0xff]   ;;  %v1522_v49 = vld [vmem:[%s1803_s13 + $0x38] sm:$0xff]   ;;  %v1537_v57 = vld [vmem:[%s2100_s0 + $0x64] ss:$8 sps:$4 sm:$0xff]   ;;  %s419_s8 = scalar_select %p418_p11, %s1641_s17, 1 }
  0x37   : > { %1390 = vmatpush3.bf16.msra.mxu0 %v1510_v37  ;;  %1460 = vmatpush3.bf16.msra.mxu1 %v1510_v37  ;;  %v1531_v53 = vld [vmem:[%s2100_s0 + $0x54] ss:$8 sps:$4 sm:$0xff]   ;;  %v1534_v55 = vld [vmem:[%s2100_s0 + $0x50] ss:$8 sps:$4 sm:$0xff]   ;;  %v1539_v58 = vld [vmem:[%s2100_s0 + $0x20] ss:$8 sps:$4 sm:$0xff]  }
  0x38   : > { %1391 = vmatprep.subr.bf16.mxu0 %v1511_v38  ;;  %1453 = vmatprep.subr.bf16.mxu1 %v1511_v38  ;;  %v1540_v59 = vld [vmem:[%s2100_s0 + $0x60] ss:$8 sps:$4 sm:$0xff]   ;;  %v1541_v60 = vld [vmem:[%s2100_s0 + $0x34] ss:$8 sps:$4 sm:$0xff]   ;;  %v1545_v62 = vld [vmem:[%s2100_s0 + $0x30] ss:$8 sps:$4 sm:$0xff]   ;;  %s420_s11 = scalar_lea.vmem %s2102_s2, %s419_s8  ;;  %s423_s14 = scalar_lea.vmem %s2103_s3, %s419_s8 }
  0x39   : > { %v1543_v61 = vld [vmem:[%s2100_s0 + $0x74] ss:$8 sps:$4 sm:$0xff]   ;;  %v1546_v63 = vld [vmem:[%s2100_s0 + $0x70] ss:$8 sps:$4 sm:$0xff]   ;;  %v1871_v3 = vld [vmem:[%s420_s11] ss:$0 sm:$0xff] }
  0x3a   : > { %v1873_v9 = vld [vmem:[%s423_s14] ss:$0 sm:$0xff]  ;;  %s1321_s7 = sshll.u32 (%p1711_p6), %s1641_s17, 2 }
  0x3b   : > { %1392 = vmatpush3.bf16.msra.mxu0 %v1512_v39  ;;  %1461 = vmatpush3.bf16.msra.mxu1 %v1512_v39  ;;  %s1060_s26 = scalar_lea.vmem (%p1711_p6), %s2104_s4, %s1321_s7 }
  0x3c   : > { %1393 = vmatprep.subr.bf16.mxu0 %v1513_v40  ;;  %1454 = vmatprep.subr.bf16.mxu1 %v1513_v40 }
  0x3f   : > { %1394 = vmatpush3.bf16.msra.mxu0 %v1514_v41  ;;  %1462 = vmatpush3.bf16.msra.mxu1 %v1514_v41 }
  0x40   : > { %1395 = vmatprep.subr.bf16.mxu0 %v1515_v42  ;;  %1455 = vmatprep.subr.bf16.mxu1 %v1515_v42 }
  0x43   : > { %1396 = vmatpush3.bf16.msra.mxu0 %v1516_v43  ;;  %1463 = vmatpush3.bf16.msra.mxu1 %v1516_v43 }
  0x44   : > { %1397 = vmatprep.subr.bf16.mxu0 %v1517_v44  ;;  %1456 = vmatprep.subr.bf16.mxu1 %v1517_v44 }
  0x47   : > { %1398 = vmatpush3.bf16.msra.mxu0 %v1518_v45  ;;  %1464 = vmatpush3.bf16.msra.mxu1 %v1518_v45 }
  0x48   : > { %1399 = vmatprep.subr.bf16.mxu0 %v1519_v46  ;;  %1457 = vmatprep.subr.bf16.mxu1 %v1519_v46 }
  0x4b   : > { %1400 = vmatpush3.bf16.msra.mxu0 %v1520_v47  ;;  %1465 = vmatpush3.bf16.msra.mxu1 %v1520_v47 }
  0x4c   : > { %1401 = vmatprep.subr.bf16.mxu0 %v1521_v48  ;;  %1458 = vmatprep.subr.bf16.mxu1 %v1521_v48 }
  0x4f   : > { %1402 = vmatpush3.bf16.msra.mxu0 %v1522_v49  ;;  %1466 = vmatpush3.bf16.msra.mxu1 %v1522_v49 }
  0x52   : > { %683 = vmatmul.mubr.bf16.vlgmr.msra.gmra.mrb[0].mxu0 %v1523_v50  ;;  %715 = vmatmul.mubr.bf16.vlgmr.msra.gmra.mrb[0].mxu1 %v1526_v51 }
  0x53   : > { %690 = vmatprep.mubr.bf16.mxu0 %v1529_v52  ;;  %722 = vmatprep.mubr.bf16.mxu1 %v1531_v53 }
  0x5a   : > { %691 = vmatmul.mubr.bf16.gmra.mrb[4].mxu0 %v1533_v54  ;;  %723 = vmatmul.mubr.bf16.gmra.mrb[4].mxu1 %v1534_v55 }
  0x5b   : > { %698 = vmatprep.mubr.bf16.mxu0 %v1535_v56  ;;  %730 = vmatprep.mubr.bf16.mxu1 %v1537_v57 }
  0x62   : > { %699 = vmatmul.mubr.bf16.gmra.mrb[8].mxu0 %v1539_v58  ;;  %731 = vmatmul.mubr.bf16.gmra.mrb[8].mxu1 %v1540_v59 }
  0x63   : > { %706 = vmatprep.mubr.bf16.mxu0 %v1541_v60  ;;  %738 = vmatprep.mubr.bf16.mxu1 %v1543_v61 }
  0x6a   : > { %707 = vmatmul.mubr.bf16.gmra.mrb[12].mxu0 %v1545_v62  ;;  %739 = vmatmul.mubr.bf16.gmra.mrb[12].mxu1 %v1546_v63 }
 0x125   : > { %v1403_v0 = vpop.f32.mrb[0].mxu0  ;;  %v1427_v1 = vpop.f32.mrb[0].mxu1 }
 0x126   : > { %v1404_v2 = vpop.f32.mrb[1].mxu0  ;;  %v1428_v4 = vpop.f32.mrb[1].mxu1 }
 0x127   : > { %v1405_v5 = vadd.f32 %v1404_v2, %v1403_v0  ;;  %v1429_v6 = vadd.f32 %v1428_v4, %v1427_v1  ;;  %v1406_v7 = vpop.f32.mrb[2].mxu0  ;;  %v1430_v8 = vpop.f32.mrb[2].mxu1 }
 0x128   : > { %v1407_v10 = vpop.f32.mrb[3].mxu0  ;;  %v1431_v11 = vpop.f32.mrb[3].mxu1 }
 0x129   : > { %v754_v12 = vmul.f32 %v1405_v5, %v1871_v3  ;;  %v762_v13 = vmul.f32 %v1429_v6, %v1871_v3  ;;  %v1408_v14 = vadd.f32 %v1407_v10, %v1406_v7  ;;  %v1432_v15 = vadd.f32 %v1431_v11, %v1430_v8 }
 0x12b   : > { %v1878_v16 = vadd.f32 %v1873_v9, %v754_v12  ;;  %v1881_v17 = vadd.f32 %v1873_v9, %v762_v13  ;;  %v755_v18 = vmul.f32 %v1408_v14, %v1871_v3  ;;  %v763_v19 = vmul.f32 %v1432_v15, %v1871_v3 }
 0x12d   : > { %v793_v20 = vmin.f32 %v1878_v16, 20.0  ;;  %v801_v21 = vmin.f32 %v1881_v17, 20.0  ;;  %v1409_v22 = vpop.f32.mrb[4].mxu0  ;;  %v1433_v23 = vpop.f32.mrb[4].mxu1  ;;  %v1888_v24 = vadd.f32 %v1873_v9, %v755_v18  ;;  %v1891_v25 = vadd.f32 %v1873_v9, %v763_v19 }
 0x12e   : > { %v1410_v26 = vpop.f32.mrb[5].mxu0  ;;  %v1434_v27 = vpop.f32.mrb[5].mxu1  ;;  %vm921_vm0 = vcmp.gt.f32.partialorder %v1878_v16, 20.0  ;;  %vm929_vm1 = vcmp.gt.f32.partialorder %v1881_v17, 20.0 }
 0x12f   : > { %v809_v28 = vmul.f32 1.442695, %v793_v20  ;;  %v825_v29 = vmul.f32 1.442695, %v801_v21  ;;  %v1411_v30 = vadd.f32 %v1410_v26, %v1409_v22  ;;  %v1435_v31 = vadd.f32 %v1434_v27, %v1433_v23  ;;  %v1412_v32 = vpop.f32.mrb[6].mxu0  ;;  %v1436_v33 = vpop.f32.mrb[6].mxu1 }
 0x130   : > { %v794_v34 = vmin.f32 %v1888_v24, 20.0  ;;  %v802_v35 = vmin.f32 %v1891_v25, 20.0  ;;  %v1413_v36 = vpop.f32.mrb[7].mxu0  ;;  %v1437_v37 = vpop.f32.mrb[7].mxu1  ;;  %vm922_vm2 = vcmp.gt.f32.partialorder %v1888_v24, 20.0  ;;  %vm930_vm3 = vcmp.gt.f32.partialorder %v1891_v25, 20.0 }
 0x131   : > { %1547 = vpow2.f32 %v809_v28  ;;  %v756_v38 = vmul.f32 %v1411_v30, %v1871_v3  ;;  %v764_v39 = vmul.f32 %v1435_v31, %v1871_v3  ;;  %v1414_v40 = vadd.f32 %v1413_v36, %v1412_v32 }
 0x132   : > { %1549 = vpow2.f32 %v825_v29  ;;  %v811_v41 = vmul.f32 1.442695, %v794_v34  ;;  %v827_v42 = vmul.f32 1.442695, %v802_v35  ;;  %v1438_v43 = vadd.f32 %v1437_v37, %v1436_v33 }
 0x133   : > { %v1898_v44 = vadd.f32 %v1873_v9, %v756_v38  ;;  %v1901_v45 = vadd.f32 %v1873_v9, %v764_v39  ;;  %v757_v46 = vmul.f32 %v1414_v40, %v1871_v3 }
 0x134   : > { %1551 = vpow2.f32 %v811_v41  ;;  %v765_v47 = vmul.f32 %v1438_v43, %v1871_v3 }
 0x135   : > { %1553 = vpow2.f32 %v827_v42  ;;  %v795_v48 = vmin.f32 %v1898_v44, 20.0  ;;  %v803_v49 = vmin.f32 %v1901_v45, 20.0  ;;  %v1415_v50 = vpop.f32.mrb[8].mxu0  ;;  %v1439_v51 = vpop.f32.mrb[8].mxu1  ;;  %v1908_v52 = vadd.f32 %v1873_v9, %v757_v46 }
 0x136   : > { %v1911_v53 = vadd.f32 %v1873_v9, %v765_v47  ;;  %v1416_v54 = vpop.f32.mrb[9].mxu0  ;;  %v1440_v55 = vpop.f32.mrb[9].mxu1  ;;  %vm923_vm4 = vcmp.gt.f32.partialorder %v1898_v44, 20.0  ;;  %vm931_vm5 = vcmp.gt.f32.partialorder %v1901_v45, 20.0 }
 0x137   : > { %v813_v56 = vmul.f32 1.442695, %v795_v48  ;;  %v829_v57 = vmul.f32 1.442695, %v803_v49  ;;  %v1417_v58 = vadd.f32 %v1416_v54, %v1415_v50  ;;  %v1441_v59 = vadd.f32 %v1440_v55, %v1439_v51  ;;  %v1418_v60 = vpop.f32.mrb[10].mxu0  ;;  %v1442_v61 = vpop.f32.mrb[10].mxu1 }
 0x138   : > { %v796_v62 = vmin.f32 %v1908_v52, 20.0  ;;  %v804_v63 = vmin.f32 %v1911_v53, 20.0  ;;  %v1419_v0 = vpop.f32.mrb[11].mxu0  ;;  %v1443_v1 = vpop.f32.mrb[11].mxu1  ;;  %vm924_vm6 = vcmp.gt.f32.partialorder %v1908_v52, 20.0  ;;  %vm932_vm7 = vcmp.gt.f32.partialorder %v1911_v53, 20.0 }
 0x139   : > { %1555 = vpow2.f32 %v813_v56  ;;  %v758_v2 = vmul.f32 %v1417_v58, %v1871_v3  ;;  %v766_v4 = vmul.f32 %v1441_v59, %v1871_v3  ;;  %v1420_v5 = vadd.f32 %v1419_v0, %v1418_v60 }
 0x13a   : > { %1557 = vpow2.f32 %v829_v57  ;;  %v815_v6 = vmul.f32 1.442695, %v796_v62  ;;  %v831_v7 = vmul.f32 1.442695, %v804_v63  ;;  %v1444_v8 = vadd.f32 %v1443_v1, %v1442_v61 }
 0x13b   : > { %v1548_v10 = vpop.eup %1547  ;;  %v1918_v11 = vadd.f32 %v1873_v9, %v758_v2  ;;  %v1921_v12 = vadd.f32 %v1873_v9, %v766_v4  ;;  %v759_v13 = vmul.f32 %v1420_v5, %v1871_v3 }
 0x13c   : > { %v1550_v14 = vpop.eup %1549  ;;  %v841_v15 = vadd.f32 2.0, %v1548_v10  ;;  %1559 = vpow2.f32 %v815_v6  ;;  %v767_v18 = vmul.f32 %v1444_v8, %v1871_v3 }
 0x13d   : > { %v849_v19 = vadd.f32 2.0, %v1550_v14  ;;  %1561 = vpow2.f32 %v831_v7  ;;  %v797_v20 = vmin.f32 %v1918_v11, 20.0  ;;  %v1421_v21 = vpop.f32.mrb[12].mxu0  ;;  %v1445_v22 = vpop.f32.mrb[12].mxu1  ;;  %v805_v27 = vmin.f32 %v1921_v12, 20.0 }
 0x13e   : > { %v1552_v23 = vpop.eup %1551  ;;  %v1926_v26 = vmul.f32 %v1548_v10, %v841_v15  ;;  %v1930_v28 = vadd.f32 %v1873_v9, %v759_v13  ;;  %v1422_v29 = vpop.f32.mrb[13].mxu0  ;;  %v1935_v35 = vadd.f32 %v1873_v9, %v767_v18  ;;  %vm925_vm8 = vcmp.gt.f32.partialorder %v1918_v11, 20.0 }
 0x13f   : > { %v1446_v30 = vpop.f32.mrb[13].mxu1  ;;  %v1554_v31 = vpop.eup %1553  ;;  %v1932_v32 = vmul.f32 %v1550_v14, %v849_v19  ;;  %v842_v33 = vadd.f32 2.0, %v1552_v23  ;;  %v817_v34 = vmul.f32 1.442695, %v797_v20  ;;  %v833_v40 = vmul.f32 1.442695, %v805_v27 }
 0x140   : > { %v1424_v36 = vpop.f32.mrb[14].mxu0  ;;  %v1448_v37 = vpop.f32.mrb[14].mxu1  ;;  %v873_v38 = vadd.f32 2.0, %v1926_v26  ;;  %v850_v39 = vadd.f32 2.0, %v1554_v31  ;;  %v798_v41 = vmin.f32 %v1930_v28, 20.0  ;;  %v806_v49 = vmin.f32 %v1935_v35, 20.0 }
 0x141   : > { %v1425_v42 = vpop.f32.mrb[15].mxu0  ;;  %v881_v43 = vadd.f32 2.0, %v1932_v32  ;;  %v1940_v46 = vmul.f32 %v1552_v23, %v842_v33  ;;  %1563 = vpow2.f32 %v817_v34  ;;  %v1449_v47 = vpop.f32.mrb[15].mxu1  ;;  %v1423_v55 = vadd.f32 %v1422_v29, %v1421_v21 }
 0x142   : > { %1565 = vrcp.f32 %v873_v38  ;;  %v1942_v48 = vmul.f32 %v1554_v31, %v850_v39  ;;  %v819_v54 = vmul.f32 1.442695, %v798_v41  ;;  %v835_v59 = vmul.f32 1.442695, %v806_v49 }
 0x143   : > { %v1556_v50 = vpop.eup %1555  ;;  %1567 = vrcp.f32 %v881_v43  ;;  %v874_v51 = vadd.f32 2.0, %v1940_v46  ;;  %v760_v61 = vmul.f32 %v1423_v55, %v1871_v3  ;;  %v1447_v62 = vadd.f32 %v1446_v30, %v1445_v22 }
 0x144   : > { %v1558_v56 = vpop.eup %1557  ;;  %v882_v57 = vadd.f32 2.0, %v1942_v48  ;;  %v843_v58 = vadd.f32 2.0, %v1556_v50  ;;  %1569 = vpow2.f32 %v833_v40  ;;  %v1426_v1 = vadd.f32 %v1425_v42, %v1424_v36 }
 0x145   : > { %1571 = vrcp.f32 %v874_v51  ;;  %v851_v60 = vadd.f32 2.0, %v1558_v56  ;;  %v1450_v2 = vadd.f32 %v1449_v47, %v1448_v37  ;;  %v1953_v7 = vadd.f32 %v1873_v9, %v760_v61 }
 0x146   : > { %v1560_v63 = vpop.eup %1559  ;;  %1573 = vrcp.f32 %v882_v57  ;;  %v1948_v0 = vmul.f32 %v1556_v50, %v843_v58  ;;  %v768_v13 = vmul.f32 %v1447_v62, %v1871_v3  ;;  %v761_v21 = vmul.f32 %v1426_v1, %v1871_v3 }
 0x147   : > { %v1562_v4 = vpop.eup %1561  ;;  %v1950_v5 = vmul.f32 %v1558_v56, %v851_v60  ;;  %v844_v6 = vadd.f32 2.0, %v1560_v63  ;;  %1575 = vpow2.f32 %v819_v54  ;;  %v799_v18 = vmin.f32 %v1953_v7, 20.0 }
 0x148   : > { %v875_v8 = vadd.f32 2.0, %v1948_v0  ;;  %v852_v10 = vadd.f32 2.0, %v1562_v4  ;;  %1577 = vpow2.f32 %v835_v59  ;;  %v1965_v20 = vadd.f32 %v1873_v9, %v768_v13 }
 0x149   : > { %v883_v14 = vadd.f32 2.0, %v1950_v5  ;;  %v1959_v15 = vmul.f32 %v1560_v63, %v844_v6  ;;  %v821_v27 = vmul.f32 1.442695, %v799_v18  ;;  %v769_v29 = vmul.f32 %v1450_v2, %v1871_v3 }
 0x14a   : > { %1579 = vrcp.f32 %v875_v8  ;;  %v1962_v19 = vmul.f32 %v1562_v4, %v852_v10  ;;  %v807_v34 = vmin.f32 %v1965_v20, 20.0  ;;  %v1976_v38 = vadd.f32 %v1873_v9, %v761_v21 }
 0x14b   : > { %v1564_v22 = vpop.eup %1563  ;;  %1581 = vrcp.f32 %v883_v14  ;;  %v876_v23 = vadd.f32 2.0, %v1959_v15  ;;  %v1979_v39 = vadd.f32 %v1873_v9, %v769_v29  ;;  %vm926_vm9 = vcmp.gt.f32.partialorder %v1930_v28, 20.0 }
 0x14c   : > { %v1566_v30 = vpop.eup %1565  ;;  %v884_v31 = vadd.f32 2.0, %v1962_v19  ;;  %v845_v33 = vadd.f32 2.0, %v1564_v22  ;;  %v837_v42 = vmul.f32 1.442695, %v807_v34  ;;  %vm933_vm10 = vcmp.gt.f32.partialorder %v1921_v12, 20.0 }
 0x14d   : > { %v1568_v36 = vpop.eup %1567  ;;  %v905_v37 = vmul.f32 %v1566_v30, %v1926_v26  ;;  %1583 = vrcp.f32 %v876_v23  ;;  %v800_v26 = vmin.f32 %v1976_v38, 20.0  ;;  %v808_v4 = vmin.f32 %v1979_v39, 20.0 }
 0x14e   : > { %v1570_v40 = vpop.eup %1569  ;;  %v913_v3 = vmul.f32 %v1568_v36, %v1932_v32  ;;  %1585 = vrcp.f32 %v884_v31  ;;  %v1982_v41 = vmul.f32 %v1564_v22, %v845_v33  ;;  %vm934_vm11 = vcmp.gt.f32.partialorder %v1935_v35, 20.0 }
 0x14f   : > { %v1572_v43 = vpop.eup %1571  ;;  %v937_v47 = vmul.f32 %v905_v37, %v1878_v16  ;;  %v853_v49 = vadd.f32 2.0, %v1570_v40  ;;  %1587 = vpow2.f32 %v821_v27  ;;  %v823_v57 = vmul.f32 1.442695, %v800_v26 }
 0x150   : > { %v1574_v50 = vpop.eup %1573  ;;  %v945_v51 = vmul.f32 %v913_v3, %v1881_v17  ;;  %v906_v9 = vmul.f32 %v1572_v43, %v1940_v46  ;;  %v877_v54 = vadd.f32 2.0, %v1982_v41  ;;  %1589 = vpow2.f32 %v837_v42 }
 0x151   : > { %v1576_v32 = vpop.eup %1575  ;;  %v914_v55 = vmul.f32 %v1574_v50, %v1942_v48  ;;  %v1993_v56 = vmul.f32 %v1570_v40, %v853_v49  ;;  %v953_v59 = vsel %vm921_vm0, %v1878_v16, %v937_v47  ;;  %vm927_vm12 = vcmp.gt.f32.partialorder %v1953_v7, 20.0 }
 0x152   : > { %v1578_v58 = vpop.eup %1577  ;;  %v938_v46 = vmul.f32 %v906_v9, %v1888_v24  ;;  %1591 = vrcp.f32 %v877_v54  ;;  %v846_v60 = vadd.f32 2.0, %v1576_v32  ;;  %v961_v1 = vsel %vm929_vm1, %v1881_v17, %v945_v51 }
 0x153   : > { %v946_v61 = vmul.f32 %v914_v55, %v1891_v25  ;;  %v885_v62 = vadd.f32 2.0, %v1993_v56  ;;  %v854_v63 = vadd.f32 2.0, %v1578_v58  ;;  %1593 = vpow2.f32 %v823_v57 }
 0x154   : > { %v1580_v48 = vpop.eup %1579  ;;  %v954_v2 = vsel %vm922_vm2, %v1888_v24, %v938_v46  ;;  %v862_v16 = vmul.f32 %v1576_v32, %v846_v60  ;;  %v839_v24 = vmul.f32 1.442695, %v808_v4  ;;  %vm928_vm13 = vcmp.gt.f32.partialorder %v1976_v38, 20.0 }
 0x155   : > { %v1582_v6 = vpop.eup %1581  ;;  %v1343_v8 = vpack.c.bf16 %v954_v2, %v953_v59  ;;  %v962_v10 = vsel %vm930_vm3, %v1891_v25, %v946_v61  ;;  %v907_v13 = vmul.f32 %v1580_v48, %v1948_v0  ;;  %1595 = vrcp.f32 %v885_v62 }
 0x156   : > { %v1363_v14 = vpack.c.bf16 %v962_v10, %v961_v1  ;;  %v915_v18 = vmul.f32 %v1582_v6, %v1950_v5  ;;  %v878_v17 = vadd.f32 2.0, %v862_v16  ;;  %v870_v21 = vmul.f32 %v1578_v58, %v854_v63 }
 0x157   : > { %v1584_v22 = vpop.eup %1583  ;;  %1344 = vst [vmem:[%s2013_s15] sm:$0xff] %v1343_v8   ;;  %v939_v27 = vmul.f32 %v907_v13, %v1898_v44  ;;  %vm935_vm14 = vcmp.gt.f32.partialorder %v1965_v20, 20.0  ;;  %vm936_vm15 = vcmp.gt.f32.partialorder %v1979_v39, 20.0 }
 0x158   : > { %v1586_v23 = vpop.eup %1585  ;;  %1383 = vst [vmem:[%s2013_s15 + $0x20] sm:$0xff] %v1363_v14   ;;  %v908_v25 = vmul.f32 %v1584_v22, %v1959_v15  ;;  %1597 = vrcp.f32 %v878_v17  ;;  %v886_v0 = vadd.f32 2.0, %v870_v21  ;;  %v947_v5 = vmul.f32 %v915_v18, %v1901_v45 }
 0x159   : > { %v1588_v29 = vpop.eup %1587  ;;  %v916_v30 = vmul.f32 %v1586_v23, %v1962_v19  ;;  %1599 = vpow2.f32 %v839_v24  ;;  %v955_v40 = vsel %vm923_vm4, %v1898_v44, %v939_v27 }
 0x15a   : > { %v1590_v31 = vpop.eup %1589  ;;  %v940_v33 = vmul.f32 %v908_v25, %v1908_v52  ;;  %1601 = vrcp.f32 %v886_v0  ;;  %v847_v34 = vadd.f32 2.0, %v1588_v29  ;;  %v963_v43 = vsel %vm931_vm5, %v1901_v45, %v947_v5 }
 0x15b   : > { %v948_v15 = vmul.f32 %v916_v30, %v1911_v53  ;;  %v855_v36 = vadd.f32 2.0, %v1590_v31 }
 0x15c   : > { %v1592_v37 = vpop.eup %1591  ;;  %v956_v19 = vsel %vm924_vm6, %v1908_v52, %v940_v33  ;;  %v863_v3 = vmul.f32 %v1588_v29, %v847_v34 }
 0x15d   : > { %v1594_v42 = vpop.eup %1593  ;;  %v1348_v47 = vpack.c.bf16 %v956_v19, %v955_v40  ;;  %v964_v49 = vsel %vm932_vm7, %v1911_v53, %v948_v15  ;;  %v871_v26 = vmul.f32 %v1590_v31, %v855_v36  ;;  %v909_v44 = vmul.f32 %v1592_v37, %v1982_v41 }
 0x15e   : > { %v1368_v50 = vpack.c.bf16 %v964_v49, %v963_v43  ;;  %v879_v51 = vadd.f32 2.0, %v863_v3  ;;  %v848_v9 = vadd.f32 2.0, %v1594_v42 }
 0x15f   : > { %v1596_v54 = vpop.eup %1595  ;;  %1380 = vst [vmem:[%s2013_s15 + $0x8] sm:$0xff] %v1348_v47   ;;  %v887_v32 = vadd.f32 2.0, %v871_v26  ;;  %v941_v59 = vmul.f32 %v909_v44, %v1918_v11  ;;  %v1092_v15 = vld [vmem:[%s2013_s15 + $0x20] sm:$0xf] (%p1711_p6)  ;;  %v1094_v36 = vld [vmem:[%s2013_s15 + $0x24] sm:$0xf] (%p1711_p6) }
 0x160   : > { %1384 = vst [vmem:[%s2013_s15 + $0x28] sm:$0xff] %v1368_v50   ;;  %1603 = vrcp.f32 %v879_v51  ;;  %v864_v52 = vmul.f32 %v1594_v42, %v848_v9  ;;  %v917_v55 = vmul.f32 %v1596_v54, %v1993_v56  ;;  %1093 = vst [vmem:[%s1060_s26 + $0x40] sm:$0xf] (%p1711_p6), %v1092_v15 }
 0x161   : > { %1605 = vrcp.f32 %v887_v32  ;;  %v957_v63 = vsel %vm925_vm8, %v1918_v11, %v941_v59  ;;  %1095 = vst [vmem:[%s1060_s26 + $0x48] sm:$0xf] (%p1711_p6), %v1094_v36 }
 0x162   : > { %v1598_v57 = vpop.eup %1597  ;;  %v880_v58 = vadd.f32 2.0, %v864_v52  ;;  %v949_v61 = vmul.f32 %v917_v55, %v1921_v12 }
 0x163   : > { %v1600_v45 = vpop.eup %1599  ;;  %v910_v53 = vmul.f32 %v1598_v57, %v862_v16 }
 0x164   : > { %v1602_v46 = vpop.eup %1601  ;;  %1607 = vrcp.f32 %v880_v58  ;;  %v856_v60 = vadd.f32 2.0, %v1600_v45  ;;  %v965_v4 = vsel %vm933_vm10, %v1921_v12, %v949_v61 }
 0x165   : > { %v942_v41 = vmul.f32 %v910_v53, %v1930_v28  ;;  %v918_v62 = vmul.f32 %v1602_v46, %v870_v21 }
 0x166   : > { %v872_v56 = vmul.f32 %v1600_v45, %v856_v60 }
 0x167   : > { %v958_v48 = vsel %vm926_vm9, %v1930_v28, %v942_v41  ;;  %v950_v1 = vmul.f32 %v918_v62, %v1935_v35  ;;  %v1096_v37 = vld [vmem:[%s2013_s15 + $0x28] sm:$0xf] (%p1711_p6)  ;;  %v1098_v40 = vld [vmem:[%s2013_s15 + $0x2c] sm:$0xf] (%p1711_p6) }
 0x168   : > { %v1353_v2 = vpack.c.bf16 %v958_v48, %v957_v63  ;;  %v888_v16 = vadd.f32 2.0, %v872_v56  ;;  %1097 = vst [vmem:[%s1060_s26 + $0x50] sm:$0xf] (%p1711_p6), %v1096_v37  ;;  %1099 = vst [vmem:[%s1060_s26 + $0x58] sm:$0xf] (%p1711_p6), %v1098_v40 }
 0x169   : > { %v966_v6 = vsel %vm934_vm11, %v1935_v35, %v950_v1 }
 0x16a   : > { %v1604_v8 = vpop.eup %1603  ;;  %1381 = vst [vmem:[%s2013_s15 + $0x10] sm:$0xff] %v1353_v2   ;;  %v1373_v10 = vpack.c.bf16 %v966_v6, %v965_v4  ;;  %1609 = vrcp.f32 %v888_v16 }
 0x16b   : > { %v911_v13 = vmul.f32 %v1604_v8, %v863_v3  ;;  %v1606_v11 = vpop.eup %1605 }
 0x16c   : > { %1385 = vst [vmem:[%s2013_s15 + $0x30] sm:$0xff] %v1373_v10   ;;  %v919_v17 = vmul.f32 %v1606_v11, %v871_v26 }
 0x16d   : > { %v943_v14 = vmul.f32 %v911_v13, %v1953_v7 }
 0x16e   : > { %v1608_v28 = vpop.eup %1607  ;;  %v951_v23 = vmul.f32 %v919_v17, %v1965_v20 }
 0x16f   : > { %v912_v18 = vmul.f32 %v1608_v28, %v864_v52  ;;  %v959_v12 = vsel %vm927_vm12, %v1953_v7, %v943_v14  ;;  %v1076_v7 = vld [vmem:[%s2013_s15] sm:$0xf] (%p1711_p6) }
 0x170   : > { %v967_v0 = vsel %vm935_vm14, %v1965_v20, %v951_v23  ;;  %v1080_v20 = vld [vmem:[%s2013_s15 + $0x8] sm:$0xf] (%p1711_p6)  ;;  %1077 = vst [vmem:[%s1060_s26] sm:$0xf] (%p1711_p6), %v1076_v7 }
 0x171   : > { %v944_v21 = vmul.f32 %v912_v18, %v1976_v38  ;;  %v1084_v30 = vld [vmem:[%s2013_s15 + $0x10] sm:$0xf] (%p1711_p6)  ;;  %1081 = vst [vmem:[%s1060_s26 + $0x10] sm:$0xf] (%p1711_p6), %v1080_v20  ;;  %v1086_v31 = vld [vmem:[%s2013_s15 + $0x14] sm:$0xf] (%p1711_p6) }
 0x172   : > { %1085 = vst [vmem:[%s1060_s26 + $0x20] sm:$0xf] (%p1711_p6), %v1084_v30  ;;  %1087 = vst [vmem:[%s1060_s26 + $0x28] sm:$0xf] (%p1711_p6), %v1086_v31 }
 0x173   : > { %v960_v35 = vsel %vm928_vm13, %v1976_v38, %v944_v21  ;;  %v1078_v38 = vld [vmem:[%s2013_s15 + $0x4] sm:$0xf] (%p1711_p6)  ;;  %v1100_v19 = vld [vmem:[%s2013_s15 + $0x30] sm:$0xf] (%p1711_p6)  ;;  %v1102_v3 = vld [vmem:[%s2013_s15 + $0x34] sm:$0xf] (%p1711_p6) }
 0x174   : > { %v1610_v22 = vpop.eup %1609  ;;  %v1358_v24 = vpack.c.bf16 %v960_v35, %v959_v12  ;;  %1079 = vst [vmem:[%s1060_s26 + $0x8] sm:$0xf] (%p1711_p6), %v1078_v38  ;;  %1101 = vst [vmem:[%s1060_s26 + $0x60] sm:$0xf] (%p1711_p6), %v1100_v19 }
 0x175   : > { %v920_v27 = vmul.f32 %v1610_v22, %v872_v56  ;;  %1103 = vst [vmem:[%s1060_s26 + $0x68] sm:$0xf] (%p1711_p6), %v1102_v3 }
 0x176   : > { %1382 = vst [vmem:[%s2013_s15 + $0x18] sm:$0xff] %v1358_v24   ;;  %1055 = sbr.rel (!%p1711_p6) target bundleno = 389 (0x185), region = 81 }
 0x177   : > { %v952_v25 = vmul.f32 %v920_v27, %v1979_v39 }
 0x179   : > { %v968_v29 = vsel %vm936_vm15, %v1979_v39, %v952_v25  ;;  %v1082_v39 = vld [vmem:[%s2013_s15 + $0xc] sm:$0xf] (%p1711_p6) }
 0x17a   : > { %v1378_v5 = vpack.c.bf16 %v968_v29, %v967_v0  ;;  %1083 = vst [vmem:[%s1060_s26 + $0x18] sm:$0xf] (%p1711_p6), %v1082_v39 }
 0x17c   : > { %1386 = vst [vmem:[%s2013_s15 + $0x38] sm:$0xff] %v1378_v5  }
 0x17d   : > { %v1088_v33 = vld [vmem:[%s2013_s15 + $0x18] sm:$0xf]  ;;  %v1090_v34 = vld [vmem:[%s2013_s15 + $0x1c] sm:$0xf] }
 0x17e   : > { %1089 = vst [vmem:[%s1060_s26 + $0x30] sm:$0xf] %v1088_v33  ;;  %1091 = vst [vmem:[%s1060_s26 + $0x38] sm:$0xf] %v1090_v34 }
 0x183   : > { %v1104_v42 = vld [vmem:[%s2013_s15 + $0x38] sm:$0xf]  ;;  %v1106_v43 = vld [vmem:[%s2013_s15 + $0x3c] sm:$0xf] }
 0x184   : > { %1105 = vst [vmem:[%s1060_s26 + $0x70] sm:$0xf] %v1104_v42  ;;  %1107 = vst [vmem:[%s1060_s26 + $0x78] sm:$0xf] %v1106_v43 }
 0x185 PF: > { %s14_s19 = sadd.s32 1, %s1649_s19   ;;  %s2106_s15 = smov %s1637_s16 }
 0x186   : > { %p11_p12 = scmp.ge.s32.totalorder %s14_s19, 4   ;;  %s2107_s16 = smov %s1716_s25 }
 0x187   : > { %s2108_s17 = smov %s1645_s18  ;;  %s2109_s18 = smov %s2111_s20 }
 0x188   :  { %13 = sbr.rel (!%p11_p12) target bundleno = 3 (0x3), region = 162 }

// kernel: downsample4_forward.15
= control target key start
LH: loop header
LB: loop body
LE: loop exit
PB: predicated region body
PF: predicated region fallthrough
CT: control target
= control target key end

     0   :  { %s2245_s15 = smov 0   ;;  %s2247_s16 = smov 0   ;;  %s2786_s0 = inlined_call_operand.vmem [shape: bf16[128,512], index: 0, kind: input, shape index: {}]   ;;  %s2787_s1 = inlined_call_operand.vmem [shape: bf16[512,256], index: 1, kind: input, shape index: {}]   ;;  %s2788_s2 = inlined_call_operand.vmem [shape: f32[1,256], index: 2, kind: input, shape index: {}]   ;;  %s2789_s3 = inlined_call_operand.vmem [shape: f32[1,256], index: 3, kind: input, shape index: {}]   ;;  %s2790_s4 = inlined_call_operand.vmem [shape: bf16[128,256], index: 4, kind: output, shape index: {}]  }
   0x1   :  { %s2249_s17 = smov 0   ;;  %s2251_s18 = smov 0  }
   0x2   :  { %s2253_s19 = smov 0  }
   0x3 LB: > { %s23_s20 = sadd.s32 1, %s2214_s18  ;;  %s1709_s21 = sadd.s32 4294967295, %s2218_s19   ;;  %s2218_s19 = sphi %s2253_s19, %s14_s19   ;;  %s2214_s18 = sphi %s2251_s18, %s2795_s18   ;;  %s2210_s17 = sphi %s2249_s17, %s2794_s17   ;;  %s2206_s16 = sphi %s2247_s16, %s2793_s16   ;;  %s2202_s15 = sphi %s2245_s15, %s2792_s15  }
   0x4   : > { %p24_p0 = scmp.ge.s32.totalorder %s23_s20, 2  ;;  %p66_p1 = scmp.ne.s32.totalorder %s2206_s16, %s2202_s15 }
   0x5   : > { %p67_p2 = scmp.eq.s32.totalorder %s2218_s19, 0  ;;  %p150_p4 = scmp.eq.s32.totalorder %s1709_s21, 1 }
   0x6   : > { %s2797_s20 = smov (%p24_p0, %s23_s20), 0  ;;  %s59_s23 = sadd.s32 1, %s2206_s16 }
   0x7   : > { %p68_p3 = por %p67_p2, %p66_p1  ;;  %s56_s22 = ssub.s32 %s2214_s18, %s2797_s20 }
   0x8   : > { %p57_p5 = scmp.eq.s32.totalorder %s56_s22, 0  ;;  %p2280_p6 = por %p150_p4, %p66_p1 }
   0x9   : > { %p1713_p7 = scmp.ge.s32.totalorder %s2218_s19, 2 }
   0xa   : > { %s2285_s25 = scalar_select %p57_p5, %s2206_s16, %s59_s23  }
   0xb   : > { %182 = sbr.rel (%p1713_p7) target bundleno = 64 (0x40), region = 20 }
  0x12   : > { %185 = sbr.rel (!%p68_p3) target bundleno = 64 (0x40), region = 24  ;;  %s187_s26 = sand.u32 (%p68_p3), 1, %s2206_s16  }
  0x13   : > { %s1715_s27 = sshll.u32 (%p68_p3), %s2214_s18, 2  ;;  %s1714_s28 = sshll.u32 (%p68_p3), %s187_s26, 8 }
  0x14   : > { %s2293_s5 = scalar_lea.vmem (%p68_p3), %s2787_s1, %s1715_s27  ;;  %s2297_s6 = scalar_lea.vmem (%p68_p3), [#allocation2], %s1714_s28 }
  0x15   : > { %v207_v0 = vld [vmem:[%s2293_s5] sm:$0xf] (%p68_p3)  ;;  %v209_v1 = vld [vmem:[%s2293_s5 + $0x8] sm:$0xf] (%p68_p3)  ;;  %v211_v2 = vld [vmem:[%s2293_s5 + $0x10] sm:$0xf] (%p68_p3) }
  0x16   : > { %208 = vst [vmem:[%s2297_s6] sm:$0xf] (%p68_p3), %v207_v0  ;;  %210 = vst [vmem:[%s2297_s6 + $0x4] sm:$0xf] (%p68_p3), %v209_v1  ;;  %v213_v3 = vld [vmem:[%s2293_s5 + $0x18] sm:$0xf] (%p68_p3) }
  0x17   : > { %v215_v4 = vld [vmem:[%s2293_s5 + $0x20] sm:$0xf] (%p68_p3)  ;;  %212 = vst [vmem:[%s2297_s6 + $0x8] sm:$0xf] (%p68_p3), %v211_v2  ;;  %214 = vst [vmem:[%s2297_s6 + $0xc] sm:$0xf] (%p68_p3), %v213_v3 }
  0x18   : > { %216 = vst [vmem:[%s2297_s6 + $0x10] sm:$0xf] (%p68_p3), %v215_v4  ;;  %v217_v5 = vld [vmem:[%s2293_s5 + $0x28] sm:$0xf] (%p68_p3)  ;;  %v219_v6 = vld [vmem:[%s2293_s5 + $0x30] sm:$0xf] (%p68_p3) }
  0x19   : > { %v221_v7 = vld [vmem:[%s2293_s5 + $0x38] sm:$0xf]  ;;  %218 = vst [vmem:[%s2297_s6 + $0x14] sm:$0xf] %v217_v5  ;;  %220 = vst [vmem:[%s2297_s6 + $0x18] sm:$0xf] %v219_v6 }
  0x1a   : > { %222 = vst [vmem:[%s2297_s6 + $0x1c] sm:$0xf] %v221_v7  ;;  %v223_v8 = vld [vmem:[%s2293_s5 + $0x40] sm:$0xf]  ;;  %v225_v9 = vld [vmem:[%s2293_s5 + $0x48] sm:$0xf] }
  0x1b   : > { %v227_v10 = vld [vmem:[%s2293_s5 + $0x50] sm:$0xf]  ;;  %224 = vst [vmem:[%s2297_s6 + $0x20] sm:$0xf] %v223_v8  ;;  %226 = vst [vmem:[%s2297_s6 + $0x24] sm:$0xf] %v225_v9 }
  0x1c   : > { %228 = vst [vmem:[%s2297_s6 + $0x28] sm:$0xf] %v227_v10  ;;  %v229_v11 = vld [vmem:[%s2293_s5 + $0x58] sm:$0xf]  ;;  %v231_v12 = vld [vmem:[%s2293_s5 + $0x60] sm:$0xf] }
  0x1d   : > { %v233_v13 = vld [vmem:[%s2293_s5 + $0x68] sm:$0xf]  ;;  %230 = vst [vmem:[%s2297_s6 + $0x2c] sm:$0xf] %v229_v11  ;;  %232 = vst [vmem:[%s2297_s6 + $0x30] sm:$0xf] %v231_v12 }
  0x1e   : > { %234 = vst [vmem:[%s2297_s6 + $0x34] sm:$0xf] %v233_v13  ;;  %v235_v14 = vld [vmem:[%s2293_s5 + $0x70] sm:$0xf]  ;;  %v237_v15 = vld [vmem:[%s2293_s5 + $0x78] sm:$0xf] }
  0x1f   : > { %v239_v16 = vld [vmem:[%s2293_s5 + $0x80] sm:$0xf]  ;;  %236 = vst [vmem:[%s2297_s6 + $0x38] sm:$0xf] %v235_v14  ;;  %238 = vst [vmem:[%s2297_s6 + $0x3c] sm:$0xf] %v237_v15 }
  0x20   : > { %240 = vst [vmem:[%s2297_s6 + $0x40] sm:$0xf] %v239_v16  ;;  %v241_v17 = vld [vmem:[%s2293_s5 + $0x88] sm:$0xf]  ;;  %v243_v18 = vld [vmem:[%s2293_s5 + $0x90] sm:$0xf] }
  0x21   : > { %v245_v19 = vld [vmem:[%s2293_s5 + $0x98] sm:$0xf]  ;;  %242 = vst [vmem:[%s2297_s6 + $0x44] sm:$0xf] %v241_v17  ;;  %244 = vst [vmem:[%s2297_s6 + $0x48] sm:$0xf] %v243_v18 }
  0x22   : > { %246 = vst [vmem:[%s2297_s6 + $0x4c] sm:$0xf] %v245_v19  ;;  %v247_v20 = vld [vmem:[%s2293_s5 + $0xa0] sm:$0xf]  ;;  %v249_v21 = vld [vmem:[%s2293_s5 + $0xa8] sm:$0xf] }
  0x23   : > { %v251_v22 = vld [vmem:[%s2293_s5 + $0xb0] sm:$0xf]  ;;  %248 = vst [vmem:[%s2297_s6 + $0x50] sm:$0xf] %v247_v20  ;;  %250 = vst [vmem:[%s2297_s6 + $0x54] sm:$0xf] %v249_v21 }
  0x24   : > { %252 = vst [vmem:[%s2297_s6 + $0x58] sm:$0xf] %v251_v22  ;;  %v253_v23 = vld [vmem:[%s2293_s5 + $0xb8] sm:$0xf]  ;;  %v255_v24 = vld [vmem:[%s2293_s5 + $0xc0] sm:$0xf] }
  0x25   : > { %v257_v25 = vld [vmem:[%s2293_s5 + $0xc8] sm:$0xf]  ;;  %254 = vst [vmem:[%s2297_s6 + $0x5c] sm:$0xf] %v253_v23  ;;  %256 = vst [vmem:[%s2297_s6 + $0x60] sm:$0xf] %v255_v24 }
  0x26   : > { %258 = vst [vmem:[%s2297_s6 + $0x64] sm:$0xf] %v257_v25  ;;  %v259_v26 = vld [vmem:[%s2293_s5 + $0xd0] sm:$0xf]  ;;  %v261_v27 = vld [vmem:[%s2293_s5 + $0xd8] sm:$0xf] }
  0x27   : > { %v263_v28 = vld [vmem:[%s2293_s5 + $0xe0] sm:$0xf]  ;;  %260 = vst [vmem:[%s2297_s6 + $0x68] sm:$0xf] %v259_v26  ;;  %262 = vst [vmem:[%s2297_s6 + $0x6c] sm:$0xf] %v261_v27 }
  0x28   : > { %264 = vst [vmem:[%s2297_s6 + $0x70] sm:$0xf] %v263_v28  ;;  %v265_v29 = vld [vmem:[%s2293_s5 + $0xe8] sm:$0xf]  ;;  %v267_v30 = vld [vmem:[%s2293_s5 + $0xf0] sm:$0xf] }
  0x29   : > { %v269_v31 = vld [vmem:[%s2293_s5 + $0xf8] sm:$0xf]  ;;  %266 = vst [vmem:[%s2297_s6 + $0x74] sm:$0xf] %v265_v29  ;;  %268 = vst [vmem:[%s2297_s6 + $0x78] sm:$0xf] %v267_v30 }
  0x2a   : > { %270 = vst [vmem:[%s2297_s6 + $0x7c] sm:$0xf] %v269_v31  ;;  %v271_v32 = vld [vmem:[%s2293_s5 + $0x100] sm:$0xf]  ;;  %v273_v33 = vld [vmem:[%s2293_s5 + $0x108] sm:$0xf] }
  0x2b   : > { %v275_v34 = vld [vmem:[%s2293_s5 + $0x110] sm:$0xf]  ;;  %272 = vst [vmem:[%s2297_s6 + $0x80] sm:$0xf] %v271_v32  ;;  %274 = vst [vmem:[%s2297_s6 + $0x84] sm:$0xf] %v273_v33 }
  0x2c   : > { %276 = vst [vmem:[%s2297_s6 + $0x88] sm:$0xf] %v275_v34  ;;  %v277_v35 = vld [vmem:[%s2293_s5 + $0x118] sm:$0xf]  ;;  %v279_v36 = vld [vmem:[%s2293_s5 + $0x120] sm:$0xf] }
  0x2d   : > { %v281_v37 = vld [vmem:[%s2293_s5 + $0x128] sm:$0xf]  ;;  %278 = vst [vmem:[%s2297_s6 + $0x8c] sm:$0xf] %v277_v35  ;;  %280 = vst [vmem:[%s2297_s6 + $0x90] sm:$0xf] %v279_v36 }
  0x2e   : > { %282 = vst [vmem:[%s2297_s6 + $0x94] sm:$0xf] %v281_v37  ;;  %v283_v38 = vld [vmem:[%s2293_s5 + $0x130] sm:$0xf]  ;;  %v285_v39 = vld [vmem:[%s2293_s5 + $0x138] sm:$0xf] }
  0x2f   : > { %v287_v40 = vld [vmem:[%s2293_s5 + $0x140] sm:$0xf]  ;;  %284 = vst [vmem:[%s2297_s6 + $0x98] sm:$0xf] %v283_v38  ;;  %286 = vst [vmem:[%s2297_s6 + $0x9c] sm:$0xf] %v285_v39 }
  0x30   : > { %288 = vst [vmem:[%s2297_s6 + $0xa0] sm:$0xf] %v287_v40  ;;  %v289_v41 = vld [vmem:[%s2293_s5 + $0x148] sm:$0xf]  ;;  %v291_v42 = vld [vmem:[%s2293_s5 + $0x150] sm:$0xf] }
  0x31   : > { %v293_v43 = vld [vmem:[%s2293_s5 + $0x158] sm:$0xf]  ;;  %290 = vst [vmem:[%s2297_s6 + $0xa4] sm:$0xf] %v289_v41  ;;  %292 = vst [vmem:[%s2297_s6 + $0xa8] sm:$0xf] %v291_v42 }
  0x32   : > { %294 = vst [vmem:[%s2297_s6 + $0xac] sm:$0xf] %v293_v43  ;;  %v295_v44 = vld [vmem:[%s2293_s5 + $0x160] sm:$0xf]  ;;  %v297_v45 = vld [vmem:[%s2293_s5 + $0x168] sm:$0xf] }
  0x33   : > { %v299_v46 = vld [vmem:[%s2293_s5 + $0x170] sm:$0xf]  ;;  %296 = vst [vmem:[%s2297_s6 + $0xb0] sm:$0xf] %v295_v44  ;;  %298 = vst [vmem:[%s2297_s6 + $0xb4] sm:$0xf] %v297_v45 }
  0x34   : > { %300 = vst [vmem:[%s2297_s6 + $0xb8] sm:$0xf] %v299_v46  ;;  %v301_v47 = vld [vmem:[%s2293_s5 + $0x178] sm:$0xf]  ;;  %v303_v48 = vld [vmem:[%s2293_s5 + $0x180] sm:$0xf] }
  0x35   : > { %v305_v49 = vld [vmem:[%s2293_s5 + $0x188] sm:$0xf]  ;;  %302 = vst [vmem:[%s2297_s6 + $0xbc] sm:$0xf] %v301_v47  ;;  %304 = vst [vmem:[%s2297_s6 + $0xc0] sm:$0xf] %v303_v48 }
  0x36   : > { %306 = vst [vmem:[%s2297_s6 + $0xc4] sm:$0xf] %v305_v49  ;;  %v307_v50 = vld [vmem:[%s2293_s5 + $0x190] sm:$0xf]  ;;  %v309_v51 = vld [vmem:[%s2293_s5 + $0x198] sm:$0xf] }
  0x37   : > { %v311_v52 = vld [vmem:[%s2293_s5 + $0x1a0] sm:$0xf]  ;;  %308 = vst [vmem:[%s2297_s6 + $0xc8] sm:$0xf] %v307_v50  ;;  %310 = vst [vmem:[%s2297_s6 + $0xcc] sm:$0xf] %v309_v51 }
  0x38   : > { %312 = vst [vmem:[%s2297_s6 + $0xd0] sm:$0xf] %v311_v52  ;;  %v313_v53 = vld [vmem:[%s2293_s5 + $0x1a8] sm:$0xf]  ;;  %v315_v54 = vld [vmem:[%s2293_s5 + $0x1b0] sm:$0xf] }
  0x39   : > { %v317_v55 = vld [vmem:[%s2293_s5 + $0x1b8] sm:$0xf]  ;;  %314 = vst [vmem:[%s2297_s6 + $0xd4] sm:$0xf] %v313_v53  ;;  %316 = vst [vmem:[%s2297_s6 + $0xd8] sm:$0xf] %v315_v54 }
  0x3a   : > { %318 = vst [vmem:[%s2297_s6 + $0xdc] sm:$0xf] %v317_v55  ;;  %v319_v56 = vld [vmem:[%s2293_s5 + $0x1c0] sm:$0xf]  ;;  %v321_v57 = vld [vmem:[%s2293_s5 + $0x1c8] sm:$0xf] }
  0x3b   : > { %v323_v58 = vld [vmem:[%s2293_s5 + $0x1d0] sm:$0xf]  ;;  %320 = vst [vmem:[%s2297_s6 + $0xe0] sm:$0xf] %v319_v56  ;;  %322 = vst [vmem:[%s2297_s6 + $0xe4] sm:$0xf] %v321_v57 }
  0x3c   : > { %324 = vst [vmem:[%s2297_s6 + $0xe8] sm:$0xf] %v323_v58  ;;  %v325_v59 = vld [vmem:[%s2293_s5 + $0x1d8] sm:$0xf]  ;;  %v327_v60 = vld [vmem:[%s2293_s5 + $0x1e0] sm:$0xf] }
  0x3d   : > { %v329_v61 = vld [vmem:[%s2293_s5 + $0x1e8] sm:$0xf]  ;;  %326 = vst [vmem:[%s2297_s6 + $0xec] sm:$0xf] %v325_v59  ;;  %328 = vst [vmem:[%s2297_s6 + $0xf0] sm:$0xf] %v327_v60 }
  0x3e   : > { %330 = vst [vmem:[%s2297_s6 + $0xf4] sm:$0xf] %v329_v61  ;;  %v331_v62 = vld [vmem:[%s2293_s5 + $0x1f0] sm:$0xf]  ;;  %v333_v63 = vld [vmem:[%s2293_s5 + $0x1f8] sm:$0xf] }
  0x3f   : > { %332 = vst [vmem:[%s2297_s6 + $0xf8] sm:$0xf] %v331_v62  ;;  %334 = vst [vmem:[%s2297_s6 + $0xfc] sm:$0xf] %v333_v63 }
  0x40 PF: > { %p1716_p8 = scmp.ge.s32.totalorder %s2218_s19, 1  ;;  %p496_p9 = scmp.lt.s32.totalorder %s2218_s19, 3 }
  0x42   : > { %p497_p10 = pnand %p1716_p8, %p496_p9 }
  0x43   : > { %s503_s7 = sand.u32 (!%p497_p10), 1, %s2202_s15   ;;  %v2070_v0 = vld [vmem:[%s2786_s0 + $0x4] ss:$16 sps:$4 sm:$0xff] (!%p497_p10)   ;;  %v2073_v1 = vld [vmem:[%s2786_s0 + $0xc] ss:$16 sps:$4 sm:$0xff] (!%p497_p10)   ;;  %p546_p11 = scmp.lt.s32.totalorder (!%p497_p10), %s2210_s17, 1 }
  0x44   : > { %500 = sbr.rel (%p497_p10) target bundleno = 438 (0x1b6), region = 73  ;;  %s1717_s8 = sshll.u32 (!%p497_p10), %s503_s7, 8  ;;  %1034 = vmatprep.mubr.bf16.mxu0 (!%p497_p10), %v2070_v0  ;;  %1131 = vmatprep.mubr.bf16.mxu1 (!%p497_p10), %v2073_v1  ;;  %v2068_v32 = vld [vmem:[%s2786_s0] ss:$16 sps:$4 sm:$0xff] (!%p497_p10)   ;;  %v2071_v34 = vld [vmem:[%s2786_s0 + $0x8] ss:$16 sps:$4 sm:$0xff] (!%p497_p10)  }
  0x45   : > { %s2436_s13 = scalar_lea.vmem (!%p497_p10), [#allocation2], %s1717_s8  ;;  %v2074_v36 = vld [vmem:[%s2786_s0 + $0x24] ss:$16 sps:$4 sm:$0xff] (!%p497_p10)   ;;  %v2076_v37 = vld [vmem:[%s2786_s0 + $0x2c] ss:$16 sps:$4 sm:$0xff] (!%p497_p10)  }
  0x46   : > { %v2036_v2 = vld [vmem:[%s2436_s13 + $0x40] sm:$0xff] (!%p497_p10)   ;;  %v2040_v6 = vld [vmem:[%s2436_s13 + $0x48] sm:$0xff] (!%p497_p10)   ;;  %v2044_v10 = vld [vmem:[%s2436_s13 + $0x50] sm:$0xff] (!%p497_p10)  }
  0x47   : > { %v2037_v3 = vld [vmem:[%s2436_s13 + $0xc0] sm:$0xff] (!%p497_p10)   ;;  %1868 = vmatprep.subr.bf16.mxu0 (!%p497_p10), %v2036_v2  ;;  %v2041_v7 = vld [vmem:[%s2436_s13 + $0xc8] sm:$0xff] (!%p497_p10)   ;;  %v2045_v11 = vld [vmem:[%s2436_s13 + $0xd0] sm:$0xff] (!%p497_p10)  }
  0x48   : > { %v2038_v4 = vld [vmem:[%s2436_s13] sm:$0xff] (!%p497_p10)   ;;  %1932 = vmatprep.subr.bf16.mxu1 (!%p497_p10), %v2037_v3  ;;  %v2042_v8 = vld [vmem:[%s2436_s13 + $0x8] sm:$0xff] (!%p497_p10)   ;;  %v2046_v12 = vld [vmem:[%s2436_s13 + $0x10] sm:$0xff] (!%p497_p10)  }
  0x49   : > { %v2039_v5 = vld [vmem:[%s2436_s13 + $0x80] sm:$0xff] (!%p497_p10)   ;;  %1869 = vmatpush3.bf16.msra.mxu0 (!%p497_p10), %v2038_v4  ;;  %v2043_v9 = vld [vmem:[%s2436_s13 + $0x88] sm:$0xff] (!%p497_p10)   ;;  %v2047_v13 = vld [vmem:[%s2436_s13 + $0x90] sm:$0xff] (!%p497_p10)  }
  0x4a   : > { %1933 = vmatpush3.bf16.msra.mxu1 (!%p497_p10), %v2039_v5  ;;  %1870 = vmatprep.subr.bf16.mxu0 (!%p497_p10), %v2040_v6  ;;  %v2048_v14 = vld [vmem:[%s2436_s13 + $0x58] sm:$0xff] (!%p497_p10)   ;;  %v2052_v18 = vld [vmem:[%s2436_s13 + $0x60] sm:$0xff] (!%p497_p10)   ;;  %v2056_v22 = vld [vmem:[%s2436_s13 + $0x68] sm:$0xff] (!%p497_p10)  }
  0x4b   : > { %1934 = vmatprep.subr.bf16.mxu1 %v2041_v7  ;;  %v2049_v15 = vld [vmem:[%s2436_s13 + $0xd8] sm:$0xff]   ;;  %v2053_v19 = vld [vmem:[%s2436_s13 + $0xe0] sm:$0xff]   ;;  %v2057_v23 = vld [vmem:[%s2436_s13 + $0xe8] sm:$0xff]   ;;  %s547_s5 = scalar_select %p546_p11, %s2210_s17, 1 }
  0x4c   : > { %v2050_v16 = vld [vmem:[%s2436_s13 + $0x18] sm:$0xff]   ;;  %v2054_v20 = vld [vmem:[%s2436_s13 + $0x20] sm:$0xff]   ;;  %v2058_v24 = vld [vmem:[%s2436_s13 + $0x28] sm:$0xff]  }
  0x4d   : > { %1871 = vmatpush3.bf16.msra.mxu0 %v2042_v8  ;;  %v2051_v17 = vld [vmem:[%s2436_s13 + $0x98] sm:$0xff]   ;;  %v2055_v21 = vld [vmem:[%s2436_s13 + $0xa0] sm:$0xff]   ;;  %v2059_v25 = vld [vmem:[%s2436_s13 + $0xa8] sm:$0xff]   ;;  %s548_s9 = scalar_lea.vmem %s2788_s2, %s547_s5  ;;  %s551_s12 = scalar_lea.vmem %s2789_s3, %s547_s5 }
  0x4e   : > { %1935 = vmatpush3.bf16.msra.mxu1 %v2043_v9  ;;  %1872 = vmatprep.subr.bf16.mxu0 %v2044_v10  ;;  %v2060_v26 = vld [vmem:[%s2436_s13 + $0x70] sm:$0xff]   ;;  %v2064_v30 = vld [vmem:[%s2436_s13 + $0x78] sm:$0xff]   ;;  %v2568_v9 = vld [vmem:[%s548_s9] ss:$0 sm:$0xff] }
  0x4f   : > { %1936 = vmatprep.subr.bf16.mxu1 %v2045_v11  ;;  %v2061_v27 = vld [vmem:[%s2436_s13 + $0xf0] sm:$0xff]   ;;  %v2065_v31 = vld [vmem:[%s2436_s13 + $0xf8] sm:$0xff]  }
  0x50   : > { %v2062_v28 = vld [vmem:[%s2436_s13 + $0x30] sm:$0xff]   ;;  %v2066_v33 = vld [vmem:[%s2436_s13 + $0x38] sm:$0xff]  }
  0x51   : > { %1873 = vmatpush3.bf16.msra.mxu0 %v2046_v12  ;;  %v2063_v29 = vld [vmem:[%s2436_s13 + $0xb0] sm:$0xff]   ;;  %v2067_v35 = vld [vmem:[%s2436_s13 + $0xb8] sm:$0xff]   ;;  %s2641_s13 = sshll.u32 %s503_s7, 6  ;;  %s1802_s7 = sshll.u32 (%p2280_p6), %s2210_s17, 2 }
  0x52   : > { %1937 = vmatpush3.bf16.msra.mxu1 %v2047_v13  ;;  %1874 = vmatprep.subr.bf16.mxu0 %v2048_v14  ;;  %v2078_v38 = vld [vmem:[%s2786_s0 + $0x20] ss:$16 sps:$4 sm:$0xff]   ;;  %v2079_v39 = vld [vmem:[%s2786_s0 + $0x28] ss:$16 sps:$4 sm:$0xff]   ;;  %v2080_v40 = vld [vmem:[%s2786_s0 + $0x44] ss:$16 sps:$4 sm:$0xff]   ;;  %s1509_s22 = scalar_lea.vmem (%p2280_p6), %s2790_s4, %s1802_s7 }
  0x53   : > { %1938 = vmatprep.subr.bf16.mxu1 %v2049_v15  ;;  %v2082_v41 = vld [vmem:[%s2786_s0 + $0x4c] ss:$16 sps:$4 sm:$0xff]   ;;  %v2084_v42 = vld [vmem:[%s2786_s0 + $0x40] ss:$16 sps:$4 sm:$0xff]   ;;  %v2085_v43 = vld [vmem:[%s2786_s0 + $0x48] ss:$16 sps:$4 sm:$0xff]  }
  0x54   : > { %v2086_v44 = vld [vmem:[%s2786_s0 + $0x64] ss:$16 sps:$4 sm:$0xff]   ;;  %v2088_v45 = vld [vmem:[%s2786_s0 + $0x6c] ss:$16 sps:$4 sm:$0xff]   ;;  %v2090_v46 = vld [vmem:[%s2786_s0 + $0x60] ss:$16 sps:$4 sm:$0xff]  }
  0x55   : > { %1875 = vmatpush3.bf16.msra.mxu0 %v2050_v16  ;;  %v2091_v47 = vld [vmem:[%s2786_s0 + $0x68] ss:$16 sps:$4 sm:$0xff]   ;;  %v2092_v48 = vld [vmem:[%s2786_s0 + $0x84] ss:$16 sps:$4 sm:$0xff]   ;;  %v2094_v49 = vld [vmem:[%s2786_s0 + $0x8c] ss:$16 sps:$4 sm:$0xff]  }
  0x56   : > { %1939 = vmatpush3.bf16.msra.mxu1 %v2051_v17  ;;  %1876 = vmatprep.subr.bf16.mxu0 %v2052_v18  ;;  %v2096_v50 = vld [vmem:[%s2786_s0 + $0x80] ss:$16 sps:$4 sm:$0xff]   ;;  %v2097_v51 = vld [vmem:[%s2786_s0 + $0x88] ss:$16 sps:$4 sm:$0xff]   ;;  %v2098_v52 = vld [vmem:[%s2786_s0 + $0xa4] ss:$16 sps:$4 sm:$0xff]  }
  0x57   : > { %1940 = vmatprep.subr.bf16.mxu1 %v2053_v19  ;;  %v2100_v53 = vld [vmem:[%s2786_s0 + $0xac] ss:$16 sps:$4 sm:$0xff]   ;;  %v2102_v54 = vld [vmem:[%s2786_s0 + $0xa0] ss:$16 sps:$4 sm:$0xff]   ;;  %v2103_v55 = vld [vmem:[%s2786_s0 + $0xa8] ss:$16 sps:$4 sm:$0xff]  }
  0x58   : > { %v2104_v56 = vld [vmem:[%s2786_s0 + $0xc4] ss:$16 sps:$4 sm:$0xff]   ;;  %v2106_v57 = vld [vmem:[%s2786_s0 + $0xcc] ss:$16 sps:$4 sm:$0xff]   ;;  %v2108_v58 = vld [vmem:[%s2786_s0 + $0xc0] ss:$16 sps:$4 sm:$0xff]  }
  0x59   : > { %1877 = vmatpush3.bf16.msra.mxu0 %v2054_v20  ;;  %v2109_v59 = vld [vmem:[%s2786_s0 + $0xc8] ss:$16 sps:$4 sm:$0xff]   ;;  %v2110_v60 = vld [vmem:[%s2786_s0 + $0xe4] ss:$16 sps:$4 sm:$0xff]   ;;  %v2112_v61 = vld [vmem:[%s2786_s0 + $0xec] ss:$16 sps:$4 sm:$0xff]  }
  0x5a   : > { %1941 = vmatpush3.bf16.msra.mxu1 %v2055_v21  ;;  %1878 = vmatprep.subr.bf16.mxu0 %v2056_v22  ;;  %v2114_v62 = vld [vmem:[%s2786_s0 + $0xe0] ss:$16 sps:$4 sm:$0xff]   ;;  %v2115_v63 = vld [vmem:[%s2786_s0 + $0xe8] ss:$16 sps:$4 sm:$0xff]   ;;  %s2658_s15 = scalar_lea.vmem [#allocation3], %s2641_s13 }
  0x5b   : > { %1942 = vmatprep.subr.bf16.mxu1 %v2057_v23  ;;  %v2570_v14 = vld [vmem:[%s551_s12] ss:$0 sm:$0xff] }
  0x5d   : > { %1879 = vmatpush3.bf16.msra.mxu0 %v2058_v24 }
  0x5e   : > { %1943 = vmatpush3.bf16.msra.mxu1 %v2059_v25  ;;  %1880 = vmatprep.subr.bf16.mxu0 %v2060_v26 }
  0x5f   : > { %1944 = vmatprep.subr.bf16.mxu1 %v2061_v27 }
  0x61   : > { %1881 = vmatpush3.bf16.msra.mxu0 %v2062_v28 }
  0x62   : > { %1945 = vmatpush3.bf16.msra.mxu1 %v2063_v29  ;;  %1882 = vmatprep.subr.bf16.mxu0 %v2064_v30 }
  0x63   : > { %1946 = vmatprep.subr.bf16.mxu1 %v2065_v31 }
  0x65   : > { %1883 = vmatpush3.bf16.msra.mxu0 %v2066_v33 }
  0x66   : > { %1947 = vmatpush3.bf16.msra.mxu1 %v2067_v35 }
  0x68   : > { %1035 = vmatmul.mubr.bf16.vlgmr.msra.gmra.mrb[0].mxu0 %v2068_v32 }
  0x69   : > { %1132 = vmatmul.mubr.bf16.vlgmr.msra.gmra.mrb[0].mxu1 %v2071_v34  ;;  %1042 = vmatprep.mubr.bf16.mxu0 %v2074_v36 }
  0x6a   : > { %1139 = vmatprep.mubr.bf16.mxu1 %v2076_v37 }
  0x70   : > { %1043 = vmatmul.mubr.bf16.gmra.mrb[4].mxu0 %v2078_v38 }
  0x71   : > { %1140 = vmatmul.mubr.bf16.gmra.mrb[4].mxu1 %v2079_v39  ;;  %1050 = vmatprep.mubr.bf16.mxu0 %v2080_v40 }
  0x72   : > { %1147 = vmatprep.mubr.bf16.mxu1 %v2082_v41 }
  0x78   : > { %1051 = vmatmul.mubr.bf16.gmra.mrb[8].mxu0 %v2084_v42 }
  0x79   : > { %1148 = vmatmul.mubr.bf16.gmra.mrb[8].mxu1 %v2085_v43  ;;  %1058 = vmatprep.mubr.bf16.mxu0 %v2086_v44 }
  0x7a   : > { %1155 = vmatprep.mubr.bf16.mxu1 %v2088_v45 }
  0x80   : > { %1059 = vmatmul.mubr.bf16.gmra.mrb[12].mxu0 %v2090_v46 }
  0x81   : > { %1156 = vmatmul.mubr.bf16.gmra.mrb[12].mxu1 %v2091_v47  ;;  %1066 = vmatprep.mubr.bf16.mxu0 %v2092_v48 }
  0x82   : > { %1163 = vmatprep.mubr.bf16.mxu1 %v2094_v49 }
  0x88   : > { %1067 = vmatmul.mubr.bf16.gmra.mrb[16].mxu0 %v2096_v50 }
  0x89   : > { %1164 = vmatmul.mubr.bf16.gmra.mrb[16].mxu1 %v2097_v51  ;;  %1074 = vmatprep.mubr.bf16.mxu0 %v2098_v52 }
  0x8a   : > { %1171 = vmatprep.mubr.bf16.mxu1 %v2100_v53 }
  0x90   : > { %1075 = vmatmul.mubr.bf16.gmra.mrb[20].mxu0 %v2102_v54 }
  0x91   : > { %1172 = vmatmul.mubr.bf16.gmra.mrb[20].mxu1 %v2103_v55  ;;  %1082 = vmatprep.mubr.bf16.mxu0 %v2104_v56 }
  0x92   : > { %1179 = vmatprep.mubr.bf16.mxu1 %v2106_v57 }
  0x98   : > { %1083 = vmatmul.mubr.bf16.gmra.mrb[24].mxu0 %v2108_v58 }
  0x99   : > { %1180 = vmatmul.mubr.bf16.gmra.mrb[24].mxu1 %v2109_v59  ;;  %1090 = vmatprep.mubr.bf16.mxu0 %v2110_v60 }
  0x9a   : > { %1187 = vmatprep.mubr.bf16.mxu1 %v2112_v61 }
  0xa0   : > { %1091 = vmatmul.mubr.bf16.gmra.mrb[28].mxu0 %v2114_v62 }
  0xa1   : > { %1188 = vmatmul.mubr.bf16.gmra.mrb[28].mxu1 %v2115_v63 }
 0x13b   : > { %v1884_v0 = vpop.f32.mrb[0].mxu0 }
 0x13c   : > { %v1948_v1 = vpop.f32.mrb[0].mxu1  ;;  %v1885_v2 = vpop.f32.mrb[1].mxu0 }
 0x13d   : > { %v1886_v3 = vadd.f32 %v1885_v2, %v1884_v0  ;;  %v1949_v4 = vpop.f32.mrb[1].mxu1  ;;  %v1887_v5 = vpop.f32.mrb[2].mxu0 }
 0x13e   : > { %v1950_v6 = vadd.f32 %v1949_v4, %v1948_v1  ;;  %v1951_v7 = vpop.f32.mrb[2].mxu1  ;;  %v1888_v8 = vpop.f32.mrb[3].mxu0 }
 0x13f   : > { %v1889_v10 = vadd.f32 %v1888_v8, %v1887_v5  ;;  %v1952_v11 = vpop.f32.mrb[3].mxu1 }
 0x140   : > { %v1134_v12 = vadd.f32 %v1950_v6, %v1886_v3  ;;  %v1953_v13 = vadd.f32 %v1952_v11, %v1951_v7 }
 0x142   : > { %v1203_v15 = vmul.f32 %v2568_v9, %v1134_v12  ;;  %v1137_v16 = vadd.f32 %v1953_v13, %v1889_v10 }
 0x143   : > { %v1890_v17 = vpop.f32.mrb[4].mxu0 }
 0x144   : > { %v2574_v18 = vadd.f32 %v2570_v14, %v1203_v15  ;;  %v1204_v19 = vmul.f32 %v2568_v9, %v1137_v16  ;;  %v1954_v20 = vpop.f32.mrb[4].mxu1  ;;  %v1891_v21 = vpop.f32.mrb[5].mxu0 }
 0x145   : > { %v1892_v22 = vadd.f32 %v1891_v21, %v1890_v17  ;;  %v1955_v23 = vpop.f32.mrb[5].mxu1  ;;  %v1893_v24 = vpop.f32.mrb[6].mxu0 }
 0x146   : > { %v1242_v25 = vmin.f32 %v2574_v18, 20.0  ;;  %v2579_v26 = vadd.f32 %v2570_v14, %v1204_v19  ;;  %v1956_v27 = vadd.f32 %v1955_v23, %v1954_v20  ;;  %v1957_v28 = vpop.f32.mrb[6].mxu1  ;;  %v1894_v29 = vpop.f32.mrb[7].mxu0  ;;  %vm1370_vm0 = vcmp.gt.f32.partialorder %v2574_v18, 20.0 }
 0x147   : > { %v1895_v30 = vadd.f32 %v1894_v29, %v1893_v24  ;;  %v1958_v31 = vpop.f32.mrb[7].mxu1 }
 0x148   : > { %v1258_v32 = vmul.f32 1.442695, %v1242_v25  ;;  %v1243_v33 = vmin.f32 %v2579_v26, 20.0  ;;  %v1142_v34 = vadd.f32 %v1956_v27, %v1892_v22  ;;  %v1959_v35 = vadd.f32 %v1958_v31, %v1957_v28 }
 0x149   : > { %vm1371_vm1 = vcmp.gt.f32.partialorder %v2579_v26, 20.0 }
 0x14a   : > { %2116 = vpow2.f32 %v1258_v32  ;;  %v1260_v36 = vmul.f32 1.442695, %v1243_v33  ;;  %v1205_v37 = vmul.f32 %v2568_v9, %v1142_v34  ;;  %v1145_v38 = vadd.f32 %v1959_v35, %v1895_v30 }
 0x14b   : > { %v1896_v39 = vpop.f32.mrb[8].mxu0 }
 0x14c   : > { %2118 = vpow2.f32 %v1260_v36  ;;  %v2584_v40 = vadd.f32 %v2570_v14, %v1205_v37  ;;  %v1960_v41 = vpop.f32.mrb[8].mxu1  ;;  %v1897_v42 = vpop.f32.mrb[9].mxu0  ;;  %v1206_v43 = vmul.f32 %v2568_v9, %v1145_v38 }
 0x14d   : > { %v1898_v44 = vadd.f32 %v1897_v42, %v1896_v39  ;;  %v1961_v45 = vpop.f32.mrb[9].mxu1  ;;  %v1899_v46 = vpop.f32.mrb[10].mxu0 }
 0x14e   : > { %v1244_v47 = vmin.f32 %v2584_v40, 20.0  ;;  %v1962_v48 = vadd.f32 %v1961_v45, %v1960_v41  ;;  %v1963_v49 = vpop.f32.mrb[10].mxu1  ;;  %v1900_v50 = vpop.f32.mrb[11].mxu0  ;;  %v2589_v51 = vadd.f32 %v2570_v14, %v1206_v43  ;;  %vm1372_vm2 = vcmp.gt.f32.partialorder %v2584_v40, 20.0 }
 0x14f   : > { %v1901_v52 = vadd.f32 %v1900_v50, %v1899_v46  ;;  %v1964_v53 = vpop.f32.mrb[11].mxu1 }
 0x150   : > { %v1262_v54 = vmul.f32 1.442695, %v1244_v47  ;;  %v1150_v55 = vadd.f32 %v1962_v48, %v1898_v44  ;;  %v1965_v56 = vadd.f32 %v1964_v53, %v1963_v49  ;;  %v1245_v57 = vmin.f32 %v2589_v51, 20.0 }
 0x151   : > { %vm1373_vm3 = vcmp.gt.f32.partialorder %v2589_v51, 20.0 }
 0x152   : > { %2120 = vpow2.f32 %v1262_v54  ;;  %v1207_v58 = vmul.f32 %v2568_v9, %v1150_v55  ;;  %v1153_v59 = vadd.f32 %v1965_v56, %v1901_v52  ;;  %v1264_v60 = vmul.f32 1.442695, %v1245_v57 }
 0x153   : > { %v1902_v61 = vpop.f32.mrb[12].mxu0 }
 0x154   : > { %v2117_v62 = vpop.eup %2116  ;;  %v2594_v63 = vadd.f32 %v2570_v14, %v1207_v58  ;;  %v1208_v0 = vmul.f32 %v2568_v9, %v1153_v59  ;;  %v1966_v1 = vpop.f32.mrb[12].mxu1  ;;  %2122 = vpow2.f32 %v1264_v60 }
 0x155   : > { %v1903_v2 = vpop.f32.mrb[13].mxu0  ;;  %v1290_v3 = vadd.f32 2.0, %v2117_v62  ;;  %v1967_v5 = vpop.f32.mrb[13].mxu1 }
 0x156   : > { %v1904_v4 = vadd.f32 %v1903_v2, %v1902_v61  ;;  %v1905_v6 = vpop.f32.mrb[14].mxu0  ;;  %v2119_v7 = vpop.eup %2118  ;;  %v1246_v8 = vmin.f32 %v2594_v63, 20.0  ;;  %v2599_v10 = vadd.f32 %v2570_v14, %v1208_v0  ;;  %v1968_v11 = vadd.f32 %v1967_v5, %v1966_v1 }
 0x157   : > { %v1969_v12 = vpop.f32.mrb[14].mxu1  ;;  %v1906_v13 = vpop.f32.mrb[15].mxu0  ;;  %v2601_v15 = vmul.f32 %v2117_v62, %v1290_v3  ;;  %v1291_v16 = vadd.f32 2.0, %v2119_v7  ;;  %vm1374_vm4 = vcmp.gt.f32.partialorder %v2594_v63, 20.0 }
 0x158   : > { %v1907_v17 = vadd.f32 %v1906_v13, %v1905_v6  ;;  %v1970_v19 = vpop.f32.mrb[15].mxu1  ;;  %v1266_v20 = vmul.f32 1.442695, %v1246_v8  ;;  %v1247_v21 = vmin.f32 %v2599_v10, 20.0  ;;  %v1158_v22 = vadd.f32 %v1968_v11, %v1904_v4 }
 0x159   : > { %v1322_v23 = vadd.f32 2.0, %v2601_v15  ;;  %v2605_v24 = vmul.f32 %v2119_v7, %v1291_v16  ;;  %v1971_v25 = vadd.f32 %v1970_v19, %v1969_v12  ;;  %vm1375_vm5 = vcmp.gt.f32.partialorder %v2599_v10, 20.0 }
 0x15a   : > { %2124 = vpow2.f32 %v1266_v20  ;;  %v1268_v27 = vmul.f32 1.442695, %v1247_v21  ;;  %v1209_v28 = vmul.f32 %v2568_v9, %v1158_v22 }
 0x15b   : > { %2126 = vrcp.f32 %v1322_v23  ;;  %v1323_v29 = vadd.f32 2.0, %v2605_v24  ;;  %v1161_v30 = vadd.f32 %v1971_v25, %v1907_v17  ;;  %v1908_v31 = vpop.f32.mrb[16].mxu0 }
 0x15c   : > { %v2121_v32 = vpop.eup %2120  ;;  %2128 = vpow2.f32 %v1268_v27  ;;  %v2610_v33 = vadd.f32 %v2570_v14, %v1209_v28  ;;  %v1972_v34 = vpop.f32.mrb[16].mxu1 }
 0x15d   : > { %v1909_v35 = vpop.f32.mrb[17].mxu0  ;;  %2130 = vrcp.f32 %v1323_v29  ;;  %v1292_v36 = vadd.f32 2.0, %v2121_v32  ;;  %v1210_v37 = vmul.f32 %v2568_v9, %v1161_v30  ;;  %v1973_v39 = vpop.f32.mrb[17].mxu1 }
 0x15e   : > { %v1910_v38 = vadd.f32 %v1909_v35, %v1908_v31  ;;  %v1911_v41 = vpop.f32.mrb[18].mxu0  ;;  %v1248_v42 = vmin.f32 %v2610_v33, 20.0  ;;  %v1974_v43 = vadd.f32 %v1973_v39, %v1972_v34  ;;  %v1975_v44 = vpop.f32.mrb[18].mxu1  ;;  %vm1376_vm6 = vcmp.gt.f32.partialorder %v2610_v33, 20.0 }
 0x15f   : > { %v1912_v45 = vpop.f32.mrb[19].mxu0  ;;  %v2123_v46 = vpop.eup %2122  ;;  %v2614_v47 = vmul.f32 %v2121_v32, %v1292_v36  ;;  %v2617_v48 = vadd.f32 %v2570_v14, %v1210_v37 }
 0x160   : > { %v1913_v49 = vadd.f32 %v1912_v45, %v1911_v41  ;;  %v1976_v50 = vpop.f32.mrb[19].mxu1  ;;  %v1293_v52 = vadd.f32 2.0, %v2123_v46  ;;  %v1270_v53 = vmul.f32 1.442695, %v1248_v42  ;;  %v1166_v54 = vadd.f32 %v1974_v43, %v1910_v38 }
 0x161   : > { %v1977_v55 = vadd.f32 %v1976_v50, %v1975_v44  ;;  %v1324_v56 = vadd.f32 2.0, %v2614_v47  ;;  %v1249_v57 = vmin.f32 %v2617_v48, 20.0  ;;  %vm1377_vm7 = vcmp.gt.f32.partialorder %v2617_v48, 20.0 }
 0x162   : > { %v2621_v58 = vmul.f32 %v2123_v46, %v1293_v52  ;;  %2132 = vpow2.f32 %v1270_v53  ;;  %v1211_v59 = vmul.f32 %v2568_v9, %v1166_v54 }
 0x163   : > { %v1169_v60 = vadd.f32 %v1977_v55, %v1913_v49  ;;  %2134 = vrcp.f32 %v1324_v56  ;;  %v1272_v61 = vmul.f32 1.442695, %v1249_v57  ;;  %v1914_v62 = vpop.f32.mrb[20].mxu0 }
 0x164   : > { %v2125_v0 = vpop.eup %2124  ;;  %v1325_v1 = vadd.f32 2.0, %v2621_v58  ;;  %v2626_v2 = vadd.f32 %v2570_v14, %v1211_v59  ;;  %v1978_v4 = vpop.f32.mrb[20].mxu1 }
 0x165   : > { %v1212_v3 = vmul.f32 %v2568_v9, %v1169_v60  ;;  %v1915_v5 = vpop.f32.mrb[21].mxu0  ;;  %v2127_v6 = vpop.eup %2126  ;;  %v1294_v7 = vadd.f32 2.0, %v2125_v0  ;;  %2136 = vpow2.f32 %v1272_v61 }
 0x166   : > { %v1916_v8 = vadd.f32 %v1915_v5, %v1914_v62  ;;  %v1979_v11 = vpop.f32.mrb[21].mxu1  ;;  %v1917_v12 = vpop.f32.mrb[22].mxu0  ;;  %v1354_v16 = vmul.f32 %v2127_v6, %v2601_v15  ;;  %2138 = vrcp.f32 %v1325_v1  ;;  %v1250_v17 = vmin.f32 %v2626_v2, 20.0 }
 0x167   : > { %v2129_v13 = vpop.eup %2128  ;;  %v1981_v19 = vpop.f32.mrb[22].mxu1  ;;  %v2631_v22 = vmul.f32 %v2125_v0, %v1294_v7  ;;  %v2634_v25 = vadd.f32 %v2570_v14, %v1212_v3  ;;  %v1980_v27 = vadd.f32 %v1979_v11, %v1978_v4  ;;  %vm1378_vm8 = vcmp.gt.f32.partialorder %v2626_v2, 20.0 }
 0x168   : > { %v1918_v20 = vpop.f32.mrb[23].mxu0  ;;  %v2131_v21 = vpop.eup %2130  ;;  %v1295_v23 = vadd.f32 2.0, %v2129_v13  ;;  %v1386_v29 = vmul.f32 %v1354_v16, %v2574_v18  ;;  %v1274_v15 = vmul.f32 1.442695, %v1250_v17 }
 0x169   : > { %v1982_v28 = vpop.f32.mrb[23].mxu1  ;;  %v1355_v30 = vmul.f32 %v2131_v21, %v2605_v24  ;;  %v1919_v31 = vadd.f32 %v1918_v20, %v1917_v12  ;;  %v1326_v32 = vadd.f32 2.0, %v2631_v22  ;;  %v1251_v35 = vmin.f32 %v2634_v25, 20.0 }
 0x16a   : > { %v2644_v34 = vmul.f32 %v2129_v13, %v1295_v23  ;;  %2140 = vpow2.f32 %v1274_v15  ;;  %v1174_v37 = vadd.f32 %v1980_v27, %v1916_v8  ;;  %v1983_v39 = vadd.f32 %v1982_v28, %v1981_v19 }
 0x16b   : > { %v1387_v36 = vmul.f32 %v1355_v30, %v2579_v26  ;;  %2142 = vrcp.f32 %v1326_v32  ;;  %v1276_v38 = vmul.f32 1.442695, %v1251_v35  ;;  %v1920_v41 = vpop.f32.mrb[24].mxu0  ;;  %v1402_v43 = vsel %vm1370_vm0, %v2574_v18, %v1386_v29 }
 0x16c   : > { %v1327_v24 = vadd.f32 2.0, %v2644_v34  ;;  %v2133_v42 = vpop.eup %2132  ;;  %v1213_v45 = vmul.f32 %v2568_v9, %v1174_v37  ;;  %v1984_v46 = vpop.f32.mrb[24].mxu1  ;;  %v1177_v54 = vadd.f32 %v1983_v39, %v1919_v31  ;;  %vm1379_vm9 = vcmp.gt.f32.partialorder %v2634_v25, 20.0 }
 0x16d   : > { %v1403_v44 = vsel %vm1371_vm1, %v2579_v26, %v1387_v36  ;;  %v1921_v49 = vpop.f32.mrb[25].mxu0  ;;  %v2135_v50 = vpop.eup %2134  ;;  %v1296_v53 = vadd.f32 2.0, %v2133_v42 }
 0x16e   : > { %v1824_v52 = vpack.c.bf16 %v1403_v44, %v1402_v43  ;;  %2144 = vrcp.f32 %v1327_v24  ;;  %v1985_v55 = vpop.f32.mrb[25].mxu1  ;;  %v1923_v56 = vpop.f32.mrb[26].mxu0  ;;  %v1356_v57 = vmul.f32 %v2135_v50, %v2614_v47  ;;  %v2655_v59 = vadd.f32 %v2570_v14, %v1213_v45 }
 0x16f   : > { %2146 = vpow2.f32 %v1276_v38  ;;  %v1922_v18 = vadd.f32 %v1921_v49, %v1920_v41  ;;  %v1987_v26 = vpop.f32.mrb[26].mxu1  ;;  %v1924_v60 = vpop.f32.mrb[27].mxu0  ;;  %v2661_v62 = vmul.f32 %v2133_v42, %v1296_v53  ;;  %v1214_v0 = vmul.f32 %v2568_v9, %v1177_v54 }
 0x170   : > { %v2137_v61 = vpop.eup %2136  ;;  %1825 = vst [vmem:[%s2658_s15] sm:$0xff] %v1824_v52   ;;  %v1986_v1 = vadd.f32 %v1985_v55, %v1984_v46  ;;  %v1925_v3 = vadd.f32 %v1924_v60, %v1923_v56  ;;  %v1988_v4 = vpop.f32.mrb[27].mxu1  ;;  %v1388_v5 = vmul.f32 %v1356_v57, %v2584_v40  ;;  %v1252_v7 = vmin.f32 %v2655_v59, 20.0 }
 0x171   : > { %v2139_v47 = vpop.eup %2138  ;;  %v1297_v6 = vadd.f32 2.0, %v2137_v61  ;;  %v1328_v11 = vadd.f32 2.0, %v2661_v62  ;;  %v2670_v12 = vadd.f32 %v2570_v14, %v1214_v0  ;;  %v1989_v19 = vadd.f32 %v1988_v4, %v1987_v26 }
 0x172   : > { %v1357_v8 = vmul.f32 %v2139_v47, %v2621_v58  ;;  %v1182_v13 = vadd.f32 %v1986_v1, %v1922_v18  ;;  %v1278_v17 = vmul.f32 1.442695, %v1252_v7  ;;  %v1404_v20 = vsel %vm1372_vm2, %v2584_v40, %v1388_v5 }
 0x173   : > { %v2673_v16 = vmul.f32 %v2137_v61, %v1297_v6  ;;  %2148 = vrcp.f32 %v1328_v11  ;;  %v1253_v23 = vmin.f32 %v2670_v12, 20.0  ;;  %v1926_v58 = vpop.f32.mrb[28].mxu0  ;;  %v1185_v30 = vadd.f32 %v1989_v19, %v1925_v3 }
 0x174   : > { %v1389_v21 = vmul.f32 %v1357_v8, %v2589_v51  ;;  %v2141_v27 = vpop.eup %2140  ;;  %2150 = vpow2.f32 %v1278_v17  ;;  %v1215_v29 = vmul.f32 %v2568_v9, %v1182_v13  ;;  %v1990_v15 = vpop.f32.mrb[28].mxu1  ;;  %vm1380_vm10 = vcmp.gt.f32.partialorder %v2655_v59, 20.0 }
 0x175   : > { %v1329_v28 = vadd.f32 2.0, %v2673_v16  ;;  %v1927_v31 = vpop.f32.mrb[29].mxu0  ;;  %v2143_v32 = vpop.eup %2142  ;;  %v1298_v35 = vadd.f32 2.0, %v2141_v27  ;;  %v1280_v36 = vmul.f32 1.442695, %v1253_v23  ;;  %vm1381_vm11 = vcmp.gt.f32.partialorder %v2670_v12, 20.0 }
 0x176   : > { %v1405_v40 = vsel %vm1373_vm3, %v2589_v51, %v1389_v21  ;;  %v1928_v37 = vadd.f32 %v1927_v31, %v1926_v58  ;;  %v1991_v24 = vpop.f32.mrb[29].mxu1  ;;  %v1929_v38 = vpop.f32.mrb[30].mxu0  ;;  %v1358_v41 = vmul.f32 %v2143_v32, %v2631_v22  ;;  %v2685_v42 = vadd.f32 %v2570_v14, %v1215_v29 }
 0x177   : > { %v1829_v39 = vpack.c.bf16 %v1405_v40, %v1404_v20  ;;  %2152 = vrcp.f32 %v1329_v28  ;;  %v1993_v43 = vpop.f32.mrb[30].mxu1  ;;  %v1930_v44 = vpop.f32.mrb[31].mxu0  ;;  %v1314_v46 = vmul.f32 %v2141_v27, %v1298_v35  ;;  %v1216_v51 = vmul.f32 %v2568_v9, %v1185_v30 }
 0x178   : > { %v2145_v45 = vpop.eup %2144  ;;  %2154 = vpow2.f32 %v1280_v36  ;;  %v1992_v49 = vadd.f32 %v1991_v24, %v1990_v15  ;;  %v1994_v50 = vpop.f32.mrb[31].mxu1  ;;  %v1390_v53 = vmul.f32 %v1358_v41, %v2594_v63  ;;  %v1254_v54 = vmin.f32 %v2685_v42, 20.0 }
 0x179   : > { %v2147_v52 = vpop.eup %2146  ;;  %1861 = vst [vmem:[%s2658_s15 + $0x8] sm:$0xff] %v1829_v39   ;;  %v1359_v22 = vmul.f32 %v2145_v45, %v2644_v34  ;;  %v1330_v55 = vadd.f32 2.0, %v1314_v46  ;;  %v2694_v57 = vadd.f32 %v2570_v14, %v1216_v51  ;;  %v1931_v61 = vadd.f32 %v1930_v44, %v1929_v38 }
 0x17a   : > { %v1299_v56 = vadd.f32 2.0, %v2147_v52  ;;  %v1190_v18 = vadd.f32 %v1992_v49, %v1928_v37  ;;  %v1282_v60 = vmul.f32 1.442695, %v1254_v54  ;;  %v1406_v0 = vsel %vm1374_vm4, %v2594_v63, %v1390_v53 }
 0x17b   : > { %v1391_v26 = vmul.f32 %v1359_v22, %v2599_v10  ;;  %2156 = vrcp.f32 %v1330_v55  ;;  %v1255_v34 = vmin.f32 %v2694_v57, 20.0  ;;  %v1995_v47 = vadd.f32 %v1994_v50, %v1993_v43 }
 0x17c   : > { %v1315_v1 = vmul.f32 %v2147_v52, %v1299_v56  ;;  %2158 = vpow2.f32 %v1282_v60  ;;  %v1217_v4 = vmul.f32 %v2568_v9, %v1190_v18  ;;  %vm1382_vm12 = vcmp.gt.f32.partialorder %v2685_v42, 20.0 }
 0x17d   : > { %v1407_v3 = vsel %vm1375_vm5, %v2599_v10, %v1391_v26  ;;  %v2149_v5 = vpop.eup %2148  ;;  %v1284_v8 = vmul.f32 1.442695, %v1255_v34  ;;  %v1193_v17 = vadd.f32 %v1995_v47, %v1931_v61  ;;  %vm1383_vm13 = vcmp.gt.f32.partialorder %v2694_v57, 20.0 }
 0x17e   : > { %v1834_v6 = vpack.c.bf16 %v1407_v3, %v1406_v0  ;;  %v1331_v7 = vadd.f32 2.0, %v1315_v1  ;;  %v2151_v11 = vpop.eup %2150  ;;  %v1360_v13 = vmul.f32 %v2149_v5, %v2661_v62  ;;  %v2704_v63 = vadd.f32 %v2570_v14, %v1217_v4 }
 0x17f   : > { %v1300_v19 = vadd.f32 2.0, %v2151_v11  ;;  %v1218_v28 = vmul.f32 %v2568_v9, %v1193_v17 }
 0x180   : > { %1862 = vst [vmem:[%s2658_s15 + $0x10] sm:$0xff] %v1834_v6   ;;  %2160 = vrcp.f32 %v1331_v7  ;;  %v1256_v10 = vmin.f32 %v2704_v63, 20.0  ;;  %v1392_v23 = vmul.f32 %v1360_v13, %v2610_v33  ;;  %vm1384_vm14 = vcmp.gt.f32.partialorder %v2704_v63, 20.0 }
 0x181   : > { %v2153_v20 = vpop.eup %2152  ;;  %2162 = vpow2.f32 %v1284_v8  ;;  %v1316_v27 = vmul.f32 %v2151_v11, %v1300_v19  ;;  %v2713_v31 = vadd.f32 %v2570_v14, %v1218_v28 }
 0x182   : > { %v2155_v21 = vpop.eup %2154  ;;  %v1361_v58 = vmul.f32 %v2153_v20, %v2673_v16  ;;  %v1286_v29 = vmul.f32 1.442695, %v1256_v10  ;;  %v1408_v16 = vsel %vm1376_vm6, %v2610_v33, %v1392_v23 }
 0x183   : > { %v1301_v62 = vadd.f32 2.0, %v2155_v21  ;;  %v1332_v15 = vadd.f32 2.0, %v1316_v27  ;;  %v1257_v35 = vmin.f32 %v2713_v31, 20.0  ;;  %vm1385_vm15 = vcmp.gt.f32.partialorder %v2713_v31, 20.0 }
 0x184   : > { %v1393_v30 = vmul.f32 %v1361_v58, %v2617_v48  ;;  %2164 = vpow2.f32 %v1286_v29 }
 0x185   : > { %v1317_v32 = vmul.f32 %v2155_v21, %v1301_v62  ;;  %v2157_v40 = vpop.eup %2156  ;;  %2166 = vrcp.f32 %v1332_v15  ;;  %v1288_v39 = vmul.f32 1.442695, %v1257_v35  ;;  %v1531_v15 = vld [vmem:[%s2658_s15 + $0xc] sm:$0xf] (%p2280_p6) }
 0x186   : > { %v1409_v9 = vsel %vm1377_vm7, %v2617_v48, %v1393_v30  ;;  %v2159_v36 = vpop.eup %2158  ;;  %v1362_v24 = vmul.f32 %v2157_v40, %v1314_v46  ;;  %v1527_v30 = vld [vmem:[%s2658_s15 + $0x4] sm:$0xf] (%p2280_p6)  ;;  %1532 = vst [vmem:[%s1509_s22 + $0x18] sm:$0xf] (%p2280_p6), %v1531_v15 }
 0x187   : > { %v1839_v37 = vpack.c.bf16 %v1409_v9, %v1408_v16  ;;  %v1333_v14 = vadd.f32 2.0, %v1317_v32  ;;  %v1302_v38 = vadd.f32 2.0, %v2159_v36  ;;  %1528 = vst [vmem:[%s1509_s22 + $0x8] sm:$0xf] (%p2280_p6), %v1527_v30 }
 0x188   : > { %v1394_v45 = vmul.f32 %v1362_v24, %v2626_v2 }
 0x189   : > { %1863 = vst [vmem:[%s2658_s15 + $0x18] sm:$0xff] %v1839_v37   ;;  %2168 = vrcp.f32 %v1333_v14  ;;  %v1318_v43 = vmul.f32 %v2159_v36, %v1302_v38 }
 0x18a   : > { %v2161_v41 = vpop.eup %2160  ;;  %2170 = vpow2.f32 %v1288_v39  ;;  %v1410_v52 = vsel %vm1378_vm8, %v2626_v2, %v1394_v45 }
 0x18b   : > { %v2163_v44 = vpop.eup %2162  ;;  %v1363_v33 = vmul.f32 %v2161_v41, %v1315_v1  ;;  %v1334_v48 = vadd.f32 2.0, %v1318_v43 }
 0x18c   : > { %v1303_v51 = vadd.f32 2.0, %v2163_v44 }
 0x18d   : > { %v1395_v49 = vmul.f32 %v1363_v33, %v2634_v25  ;;  %2172 = vrcp.f32 %v1334_v48 }
 0x18e   : > { %v1319_v46 = vmul.f32 %v2163_v44, %v1303_v51  ;;  %v2165_v50 = vpop.eup %2164 }
 0x18f   : > { %v1411_v53 = vsel %vm1379_vm9, %v2634_v25, %v1395_v49  ;;  %v2167_v22 = vpop.eup %2166  ;;  %v1304_v56 = vadd.f32 2.0, %v2165_v50 }
 0x190   : > { %v1844_v54 = vpack.c.bf16 %v1411_v53, %v1410_v52  ;;  %v1335_v55 = vadd.f32 2.0, %v1319_v46  ;;  %v1364_v18 = vmul.f32 %v2167_v22, %v1316_v27  ;;  %v1537_v40 = vld [vmem:[%s2658_s15 + $0x18] sm:$0xf] (%p2280_p6)  ;;  %v1539_v16 = vld [vmem:[%s2658_s15 + $0x1c] sm:$0xf] (%p2280_p6) }
 0x191   : > { %v1320_v26 = vmul.f32 %v2165_v50, %v1304_v56  ;;  %1538 = vst [vmem:[%s1509_s22 + $0x30] sm:$0xf] (%p2280_p6), %v1537_v40  ;;  %1540 = vst [vmem:[%s1509_s22 + $0x38] sm:$0xf] (%p2280_p6), %v1539_v16 }
 0x192   : > { %1864 = vst [vmem:[%s2658_s15 + $0x20] sm:$0xff] %v1844_v54   ;;  %2174 = vrcp.f32 %v1335_v55  ;;  %v1396_v0 = vmul.f32 %v1364_v18, %v2655_v59 }
 0x193   : > { %v2169_v60 = vpop.eup %2168  ;;  %v1336_v34 = vadd.f32 2.0, %v1320_v26 }
 0x194   : > { %v2171_v61 = vpop.eup %2170  ;;  %v1365_v1 = vmul.f32 %v2169_v60, %v1317_v32  ;;  %v1412_v47 = vsel %vm1380_vm10, %v2655_v59, %v1396_v0  ;;  %v1535_v32 = vld [vmem:[%s2658_s15 + $0x14] sm:$0xf] (%p2280_p6) }
 0x195   : > { %v1305_v3 = vadd.f32 2.0, %v2171_v61  ;;  %2176 = vrcp.f32 %v1336_v34  ;;  %1536 = vst [vmem:[%s1509_s22 + $0x28] sm:$0xf] (%p2280_p6), %v1535_v32 }
 0x196   : > { %v1397_v2 = vmul.f32 %v1365_v1, %v2670_v12 }
 0x197   : > { %v1321_v25 = vmul.f32 %v2171_v61, %v1305_v3  ;;  %v2173_v4 = vpop.eup %2172 }
 0x198   : > { %v1413_v5 = vsel %vm1381_vm11, %v2670_v12, %v1397_v2  ;;  %v1366_v7 = vmul.f32 %v2173_v4, %v1318_v43 }
 0x199   : > { %v1849_v6 = vpack.c.bf16 %v1413_v5, %v1412_v47  ;;  %v1337_v8 = vadd.f32 2.0, %v1321_v25  ;;  %v1541_v9 = vld [vmem:[%s2658_s15 + $0x20] sm:$0xf] (%p2280_p6)  ;;  %v1543_v35 = vld [vmem:[%s2658_s15 + $0x24] sm:$0xf] (%p2280_p6) }
 0x19a   : > { %v1398_v13 = vmul.f32 %v1366_v7, %v2685_v42  ;;  %1542 = vst [vmem:[%s1509_s22 + $0x40] sm:$0xf] (%p2280_p6), %v1541_v9  ;;  %1544 = vst [vmem:[%s1509_s22 + $0x48] sm:$0xf] (%p2280_p6), %v1543_v35 }
 0x19b   : > { %1865 = vst [vmem:[%s2658_s15 + $0x28] sm:$0xff] %v1849_v6   ;;  %2178 = vrcp.f32 %v1337_v8 }
 0x19c   : > { %v2175_v11 = vpop.eup %2174  ;;  %v1414_v59 = vsel %vm1382_vm12, %v2685_v42, %v1398_v13 }
 0x19d   : > { %v1367_v17 = vmul.f32 %v2175_v11, %v1319_v46 }
 0x19f   : > { %v1399_v19 = vmul.f32 %v1367_v17, %v2694_v57  ;;  %v2177_v20 = vpop.eup %2176 }
 0x1a0   : > { %v1368_v21 = vmul.f32 %v2177_v20, %v1320_v26 }
 0x1a1   : > { %v1415_v12 = vsel %vm1383_vm13, %v2694_v57, %v1399_v19  ;;  %v1525_v57 = vld [vmem:[%s2658_s15] sm:$0xf] (%p2280_p6) }
 0x1a2   : > { %v1854_v10 = vpack.c.bf16 %v1415_v12, %v1414_v59  ;;  %v1400_v58 = vmul.f32 %v1368_v21, %v2704_v63  ;;  %1526 = vst [vmem:[%s1509_s22] sm:$0xf] (%p2280_p6), %v1525_v57  ;;  %v1545_v36 = vld [vmem:[%s2658_s15 + $0x28] sm:$0xf] (%p2280_p6)  ;;  %v1547_v37 = vld [vmem:[%s2658_s15 + $0x2c] sm:$0xf] (%p2280_p6) }
 0x1a3   : > { %1546 = vst [vmem:[%s1509_s22 + $0x50] sm:$0xf] (%p2280_p6), %v1545_v36  ;;  %1548 = vst [vmem:[%s1509_s22 + $0x58] sm:$0xf] (%p2280_p6), %v1547_v37 }
 0x1a4   : > { %1866 = vst [vmem:[%s2658_s15 + $0x30] sm:$0xff] %v1854_v10   ;;  %v1416_v62 = vsel %vm1384_vm14, %v2704_v63, %v1400_v58  ;;  %v1529_v63 = vld [vmem:[%s2658_s15 + $0x8] sm:$0xf] (%p2280_p6) }
 0x1a5   : > { %v2179_v23 = vpop.eup %2178  ;;  %1530 = vst [vmem:[%s1509_s22 + $0x10] sm:$0xf] (%p2280_p6), %v1529_v63 }
 0x1a6   : > { %v1369_v27 = vmul.f32 %v2179_v23, %v1321_v25 }
 0x1a7   : > { %1504 = sbr.rel (!%p2280_p6) target bundleno = 438 (0x1b6), region = 81 }
 0x1a8   : > { %v1401_v28 = vmul.f32 %v1369_v27, %v2713_v31 }
 0x1aa   : > { %v1417_v29 = vsel %vm1385_vm15, %v2713_v31, %v1401_v28  ;;  %v1533_v31 = vld [vmem:[%s2658_s15 + $0x10] sm:$0xf] (%p2280_p6) }
 0x1ab   : > { %v1859_v42 = vpack.c.bf16 %v1417_v29, %v1416_v62  ;;  %1534 = vst [vmem:[%s1509_s22 + $0x20] sm:$0xf] (%p2280_p6), %v1533_v31  ;;  %v1549_v24 = vld [vmem:[%s2658_s15 + $0x30] sm:$0xf] (%p2280_p6)  ;;  %v1551_v14 = vld [vmem:[%s2658_s15 + $0x34] sm:$0xf] (%p2280_p6) }
 0x1ac   : > { %1550 = vst [vmem:[%s1509_s22 + $0x60] sm:$0xf] (%p2280_p6), %v1549_v24  ;;  %1552 = vst [vmem:[%s1509_s22 + $0x68] sm:$0xf] (%p2280_p6), %v1551_v14 }
 0x1ad   : > { %1867 = vst [vmem:[%s2658_s15 + $0x38] sm:$0xff] %v1859_v42  }
 0x1b4   : > { %v1553_v38 = vld [vmem:[%s2658_s15 + $0x38] sm:$0xf]  ;;  %v1555_v39 = vld [vmem:[%s2658_s15 + $0x3c] sm:$0xf] }
 0x1b5   : > { %1554 = vst [vmem:[%s1509_s22 + $0x70] sm:$0xf] %v1553_v38  ;;  %1556 = vst [vmem:[%s1509_s22 + $0x78] sm:$0xf] %v1555_v39 }
 0x1b6 PF: > { %s14_s19 = sadd.s32 1, %s2218_s19   ;;  %s2792_s15 = smov %s2206_s16 }
 0x1b7   : > { %p11_p12 = scmp.ge.s32.totalorder %s14_s19, 4   ;;  %s2793_s16 = smov %s2285_s25 }
 0x1b8   : > { %s2794_s17 = smov %s2214_s18  ;;  %s2795_s18 = smov %s2797_s20 }
 0x1b9   :  { %13 = sbr.rel (!%p11_p12) target bundleno = 3 (0x3), region = 162 }

// kernel: downsample4_forward.13
= control target key start
LH: loop header
LB: loop body
LE: loop exit
PB: predicated region body
PF: predicated region fallthrough
CT: control target
= control target key end

     0   :  { %s7475_s15 = smov 0   ;;  %s7477_s16 = smov 0   ;;  %s9447_s0 = inlined_call_operand.vmem [shape: bf16[128,2304], index: 0, kind: input, shape index: {}]   ;;  %s9448_s1 = inlined_call_operand.vmem [shape: bf16[2304,512], index: 1, kind: input, shape index: {}]   ;;  %s9449_s2 = inlined_call_operand.vmem [shape: f32[1,512], index: 2, kind: input, shape index: {}]   ;;  %s9450_s3 = inlined_call_operand.vmem [shape: f32[1,512], index: 3, kind: input, shape index: {}]   ;;  %s9451_s4 = inlined_call_operand.vmem [shape: bf16[128,512], index: 4, kind: output, shape index: {}]  }
   0x1   :  { %s7479_s17 = smov 0   ;;  %s7481_s18 = smov 0  }
   0x2   :  { %s7483_s19 = smov 0  }
   0x3 LB: > { %s23_s20 = sadd.s32 1, %s7444_s18  ;;  %s5822_s21 = sadd.s32 4294967295, %s7448_s19   ;;  %s7448_s19 = sphi %s7483_s19, %s14_s19   ;;  %s7444_s18 = sphi %s7481_s18, %s9480_s18   ;;  %s7440_s17 = sphi %s7479_s17, %s9479_s17   ;;  %s7436_s16 = sphi %s7477_s16, %s9478_s16   ;;  %s7432_s15 = sphi %s7475_s15, %s9477_s15  }
   0x4   : > { %p24_p0 = scmp.ge.s32.totalorder %s23_s20, 2  ;;  %p66_p1 = scmp.ne.s32.totalorder %s7436_s16, %s7432_s15 }
   0x5   : > { %p67_p2 = scmp.eq.s32.totalorder %s7448_s19, 0  ;;  %p150_p4 = scmp.eq.s32.totalorder %s5822_s21, 1 }
   0x6   : > { %s9482_s20 = smov (%p24_p0, %s23_s20), 0  ;;  %s59_s23 = sadd.s32 1, %s7436_s16 }
   0x7   : > { %p68_p3 = por %p67_p2, %p66_p1  ;;  %s56_s22 = ssub.s32 %s7444_s18, %s9482_s20 }
   0x8   : > { %p57_p5 = scmp.eq.s32.totalorder %s56_s22, 0  ;;  %p7510_p6 = por %p150_p4, %p66_p1 }
   0x9   : > { %p5826_p7 = scmp.ge.s32.totalorder %s7448_s19, 2 }
   0xa   : > { %s7515_s25 = scalar_select %p57_p5, %s7436_s16, %s59_s23  }
   0xb   : > { %182 = sbr.rel (%p5826_p7) target bundleno = 166 (0xa6), region = 20 }
  0x12   : > { %185 = sbr.rel (!%p68_p3) target bundleno = 166 (0xa6), region = 24  ;;  %s187_s26 = sand.u32 (%p68_p3), 1, %s7436_s16  }
  0x13   : > { %s6286_s27 = sshll.u32 (%p68_p3), %s7444_s18, 3  ;;  %s6592_s28 = smul.u32 (%p68_p3), 2304, %s187_s26 }
  0x14   : > { %s7523_s5 = scalar_lea.vmem (%p68_p3), %s9448_s1, %s6286_s27 }
  0x15   : > { %v794_v0 = vld [vmem:[%s7523_s5] sm:$0xff] (%p68_p3)  ;;  %v796_v1 = vld [vmem:[%s7523_s5 + $0x10] sm:$0xff] (%p68_p3)  ;;  %s7531_s6 = scalar_lea.vmem (%p68_p3), [#allocation2], %s6592_s28 }
  0x16   : > { %v798_v2 = vld [vmem:[%s7523_s5 + $0x20] sm:$0xff] (%p68_p3)  ;;  %v800_v3 = vld [vmem:[%s7523_s5 + $0x30] sm:$0xff] (%p68_p3)  ;;  %795 = vst [vmem:[%s7531_s6] sm:$0xff] (%p68_p3), %v794_v0  ;;  %797 = vst [vmem:[%s7531_s6 + $0x8] sm:$0xff] (%p68_p3), %v796_v1 }
  0x17   : > { %v802_v4 = vld [vmem:[%s7523_s5 + $0x40] sm:$0xff] (%p68_p3)  ;;  %v804_v5 = vld [vmem:[%s7523_s5 + $0x50] sm:$0xff] (%p68_p3)  ;;  %799 = vst [vmem:[%s7531_s6 + $0x10] sm:$0xff] (%p68_p3), %v798_v2  ;;  %801 = vst [vmem:[%s7531_s6 + $0x18] sm:$0xff] (%p68_p3), %v800_v3 }
  0x18   : > { %803 = vst [vmem:[%s7531_s6 + $0x20] sm:$0xff] (%p68_p3), %v802_v4  ;;  %805 = vst [vmem:[%s7531_s6 + $0x28] sm:$0xff] (%p68_p3), %v804_v5  ;;  %v806_v6 = vld [vmem:[%s7523_s5 + $0x60] sm:$0xff] (%p68_p3)  ;;  %v808_v7 = vld [vmem:[%s7523_s5 + $0x70] sm:$0xff] (%p68_p3) }
  0x19   : > { %v810_v8 = vld [vmem:[%s7523_s5 + $0x80] sm:$0xff]  ;;  %807 = vst [vmem:[%s7531_s6 + $0x30] sm:$0xff] %v806_v6  ;;  %809 = vst [vmem:[%s7531_s6 + $0x38] sm:$0xff] %v808_v7  ;;  %v812_v9 = vld [vmem:[%s7523_s5 + $0x90] sm:$0xff] }
  0x1a   : > { %811 = vst [vmem:[%s7531_s6 + $0x40] sm:$0xff] %v810_v8  ;;  %v814_v10 = vld [vmem:[%s7523_s5 + $0xa0] sm:$0xff]  ;;  %v816_v11 = vld [vmem:[%s7523_s5 + $0xb0] sm:$0xff]  ;;  %813 = vst [vmem:[%s7531_s6 + $0x48] sm:$0xff] %v812_v9 }
  0x1b   : > { %815 = vst [vmem:[%s7531_s6 + $0x50] sm:$0xff] %v814_v10  ;;  %817 = vst [vmem:[%s7531_s6 + $0x58] sm:$0xff] %v816_v11  ;;  %v818_v12 = vld [vmem:[%s7523_s5 + $0xc0] sm:$0xff]  ;;  %v820_v13 = vld [vmem:[%s7523_s5 + $0xd0] sm:$0xff] }
  0x1c   : > { %v822_v14 = vld [vmem:[%s7523_s5 + $0xe0] sm:$0xff]  ;;  %819 = vst [vmem:[%s7531_s6 + $0x60] sm:$0xff] %v818_v12  ;;  %821 = vst [vmem:[%s7531_s6 + $0x68] sm:$0xff] %v820_v13  ;;  %v824_v15 = vld [vmem:[%s7523_s5 + $0xf0] sm:$0xff] }
  0x1d   : > { %823 = vst [vmem:[%s7531_s6 + $0x70] sm:$0xff] %v822_v14  ;;  %v826_v16 = vld [vmem:[%s7523_s5 + $0x100] sm:$0xff]  ;;  %v828_v17 = vld [vmem:[%s7523_s5 + $0x110] sm:$0xff]  ;;  %825 = vst [vmem:[%s7531_s6 + $0x78] sm:$0xff] %v824_v15 }
  0x1e   : > { %827 = vst [vmem:[%s7531_s6 + $0x80] sm:$0xff] %v826_v16  ;;  %829 = vst [vmem:[%s7531_s6 + $0x88] sm:$0xff] %v828_v17  ;;  %v830_v18 = vld [vmem:[%s7523_s5 + $0x120] sm:$0xff]  ;;  %v832_v19 = vld [vmem:[%s7523_s5 + $0x130] sm:$0xff] }
  0x1f   : > { %v834_v20 = vld [vmem:[%s7523_s5 + $0x140] sm:$0xff]  ;;  %831 = vst [vmem:[%s7531_s6 + $0x90] sm:$0xff] %v830_v18  ;;  %833 = vst [vmem:[%s7531_s6 + $0x98] sm:$0xff] %v832_v19  ;;  %v836_v21 = vld [vmem:[%s7523_s5 + $0x150] sm:$0xff] }
  0x20   : > { %835 = vst [vmem:[%s7531_s6 + $0xa0] sm:$0xff] %v834_v20  ;;  %v838_v22 = vld [vmem:[%s7523_s5 + $0x160] sm:$0xff]  ;;  %v840_v23 = vld [vmem:[%s7523_s5 + $0x170] sm:$0xff]  ;;  %837 = vst [vmem:[%s7531_s6 + $0xa8] sm:$0xff] %v836_v21 }
  0x21   : > { %839 = vst [vmem:[%s7531_s6 + $0xb0] sm:$0xff] %v838_v22  ;;  %841 = vst [vmem:[%s7531_s6 + $0xb8] sm:$0xff] %v840_v23  ;;  %v842_v24 = vld [vmem:[%s7523_s5 + $0x180] sm:$0xff]  ;;  %v844_v25 = vld [vmem:[%s7523_s5 + $0x190] sm:$0xff] }
  0x22   : > { %v846_v26 = vld [vmem:[%s7523_s5 + $0x1a0] sm:$0xff]  ;;  %843 = vst [vmem:[%s7531_s6 + $0xc0] sm:$0xff] %v842_v24  ;;  %845 = vst [vmem:[%s7531_s6 + $0xc8] sm:$0xff] %v844_v25  ;;  %v848_v27 = vld [vmem:[%s7523_s5 + $0x1b0] sm:$0xff] }
  0x23   : > { %847 = vst [vmem:[%s7531_s6 + $0xd0] sm:$0xff] %v846_v26  ;;  %v850_v28 = vld [vmem:[%s7523_s5 + $0x1c0] sm:$0xff]  ;;  %v852_v29 = vld [vmem:[%s7523_s5 + $0x1d0] sm:$0xff]  ;;  %849 = vst [vmem:[%s7531_s6 + $0xd8] sm:$0xff] %v848_v27 }
  0x24   : > { %851 = vst [vmem:[%s7531_s6 + $0xe0] sm:$0xff] %v850_v28  ;;  %853 = vst [vmem:[%s7531_s6 + $0xe8] sm:$0xff] %v852_v29  ;;  %v854_v30 = vld [vmem:[%s7523_s5 + $0x1e0] sm:$0xff]  ;;  %v856_v31 = vld [vmem:[%s7523_s5 + $0x1f0] sm:$0xff] }
  0x25   : > { %v858_v32 = vld [vmem:[%s7523_s5 + $0x200] sm:$0xff]  ;;  %855 = vst [vmem:[%s7531_s6 + $0xf0] sm:$0xff] %v854_v30  ;;  %857 = vst [vmem:[%s7531_s6 + $0xf8] sm:$0xff] %v856_v31  ;;  %v860_v33 = vld [vmem:[%s7523_s5 + $0x210] sm:$0xff] }
  0x26   : > { %859 = vst [vmem:[%s7531_s6 + $0x100] sm:$0xff] %v858_v32  ;;  %v862_v34 = vld [vmem:[%s7523_s5 + $0x220] sm:$0xff]  ;;  %v864_v35 = vld [vmem:[%s7523_s5 + $0x230] sm:$0xff]  ;;  %861 = vst [vmem:[%s7531_s6 + $0x108] sm:$0xff] %v860_v33 }
  0x27   : > { %863 = vst [vmem:[%s7531_s6 + $0x110] sm:$0xff] %v862_v34  ;;  %865 = vst [vmem:[%s7531_s6 + $0x118] sm:$0xff] %v864_v35  ;;  %v866_v36 = vld [vmem:[%s7523_s5 + $0x240] sm:$0xff]  ;;  %v868_v37 = vld [vmem:[%s7523_s5 + $0x250] sm:$0xff] }
  0x28   : > { %v870_v38 = vld [vmem:[%s7523_s5 + $0x260] sm:$0xff]  ;;  %867 = vst [vmem:[%s7531_s6 + $0x120] sm:$0xff] %v866_v36  ;;  %869 = vst [vmem:[%s7531_s6 + $0x128] sm:$0xff] %v868_v37  ;;  %v872_v39 = vld [vmem:[%s7523_s5 + $0x270] sm:$0xff] }
  0x29   : > { %871 = vst [vmem:[%s7531_s6 + $0x130] sm:$0xff] %v870_v38  ;;  %v874_v40 = vld [vmem:[%s7523_s5 + $0x280] sm:$0xff]  ;;  %v876_v41 = vld [vmem:[%s7523_s5 + $0x290] sm:$0xff]  ;;  %873 = vst [vmem:[%s7531_s6 + $0x138] sm:$0xff] %v872_v39 }
  0x2a   : > { %875 = vst [vmem:[%s7531_s6 + $0x140] sm:$0xff] %v874_v40  ;;  %877 = vst [vmem:[%s7531_s6 + $0x148] sm:$0xff] %v876_v41  ;;  %v878_v42 = vld [vmem:[%s7523_s5 + $0x2a0] sm:$0xff]  ;;  %v880_v43 = vld [vmem:[%s7523_s5 + $0x2b0] sm:$0xff] }
  0x2b   : > { %v882_v44 = vld [vmem:[%s7523_s5 + $0x2c0] sm:$0xff]  ;;  %879 = vst [vmem:[%s7531_s6 + $0x150] sm:$0xff] %v878_v42  ;;  %881 = vst [vmem:[%s7531_s6 + $0x158] sm:$0xff] %v880_v43  ;;  %v884_v45 = vld [vmem:[%s7523_s5 + $0x2d0] sm:$0xff] }
  0x2c   : > { %883 = vst [vmem:[%s7531_s6 + $0x160] sm:$0xff] %v882_v44  ;;  %v886_v46 = vld [vmem:[%s7523_s5 + $0x2e0] sm:$0xff]  ;;  %v888_v47 = vld [vmem:[%s7523_s5 + $0x2f0] sm:$0xff]  ;;  %885 = vst [vmem:[%s7531_s6 + $0x168] sm:$0xff] %v884_v45 }
  0x2d   : > { %887 = vst [vmem:[%s7531_s6 + $0x170] sm:$0xff] %v886_v46  ;;  %889 = vst [vmem:[%s7531_s6 + $0x178] sm:$0xff] %v888_v47  ;;  %v890_v48 = vld [vmem:[%s7523_s5 + $0x300] sm:$0xff]  ;;  %v892_v49 = vld [vmem:[%s7523_s5 + $0x310] sm:$0xff] }
  0x2e   : > { %v894_v50 = vld [vmem:[%s7523_s5 + $0x320] sm:$0xff]  ;;  %891 = vst [vmem:[%s7531_s6 + $0x180] sm:$0xff] %v890_v48  ;;  %893 = vst [vmem:[%s7531_s6 + $0x188] sm:$0xff] %v892_v49  ;;  %v896_v51 = vld [vmem:[%s7523_s5 + $0x330] sm:$0xff] }
  0x2f   : > { %895 = vst [vmem:[%s7531_s6 + $0x190] sm:$0xff] %v894_v50  ;;  %v898_v52 = vld [vmem:[%s7523_s5 + $0x340] sm:$0xff]  ;;  %v900_v53 = vld [vmem:[%s7523_s5 + $0x350] sm:$0xff]  ;;  %897 = vst [vmem:[%s7531_s6 + $0x198] sm:$0xff] %v896_v51 }
  0x30   : > { %899 = vst [vmem:[%s7531_s6 + $0x1a0] sm:$0xff] %v898_v52  ;;  %901 = vst [vmem:[%s7531_s6 + $0x1a8] sm:$0xff] %v900_v53  ;;  %v902_v54 = vld [vmem:[%s7523_s5 + $0x360] sm:$0xff]  ;;  %v904_v55 = vld [vmem:[%s7523_s5 + $0x370] sm:$0xff] }
  0x31   : > { %v906_v56 = vld [vmem:[%s7523_s5 + $0x380] sm:$0xff]  ;;  %903 = vst [vmem:[%s7531_s6 + $0x1b0] sm:$0xff] %v902_v54  ;;  %905 = vst [vmem:[%s7531_s6 + $0x1b8] sm:$0xff] %v904_v55  ;;  %v908_v57 = vld [vmem:[%s7523_s5 + $0x390] sm:$0xff] }
  0x32   : > { %907 = vst [vmem:[%s7531_s6 + $0x1c0] sm:$0xff] %v906_v56  ;;  %v910_v58 = vld [vmem:[%s7523_s5 + $0x3a0] sm:$0xff]  ;;  %v912_v59 = vld [vmem:[%s7523_s5 + $0x3b0] sm:$0xff]  ;;  %909 = vst [vmem:[%s7531_s6 + $0x1c8] sm:$0xff] %v908_v57 }
  0x33   : > { %911 = vst [vmem:[%s7531_s6 + $0x1d0] sm:$0xff] %v910_v58  ;;  %913 = vst [vmem:[%s7531_s6 + $0x1d8] sm:$0xff] %v912_v59  ;;  %v914_v60 = vld [vmem:[%s7523_s5 + $0x3c0] sm:$0xff]  ;;  %v916_v61 = vld [vmem:[%s7523_s5 + $0x3d0] sm:$0xff] }
  0x34   : > { %v918_v62 = vld [vmem:[%s7523_s5 + $0x3e0] sm:$0xff]  ;;  %915 = vst [vmem:[%s7531_s6 + $0x1e0] sm:$0xff] %v914_v60  ;;  %917 = vst [vmem:[%s7531_s6 + $0x1e8] sm:$0xff] %v916_v61  ;;  %v920_v63 = vld [vmem:[%s7523_s5 + $0x3f0] sm:$0xff] }
  0x35   : > { %919 = vst [vmem:[%s7531_s6 + $0x1f0] sm:$0xff] %v918_v62  ;;  %v922_v0 = vld [vmem:[%s7523_s5 + $0x400] sm:$0xff]  ;;  %v924_v1 = vld [vmem:[%s7523_s5 + $0x410] sm:$0xff]  ;;  %921 = vst [vmem:[%s7531_s6 + $0x1f8] sm:$0xff] %v920_v63 }
  0x36   : > { %923 = vst [vmem:[%s7531_s6 + $0x200] sm:$0xff] %v922_v0  ;;  %925 = vst [vmem:[%s7531_s6 + $0x208] sm:$0xff] %v924_v1  ;;  %v926_v2 = vld [vmem:[%s7523_s5 + $0x420] sm:$0xff]  ;;  %v928_v3 = vld [vmem:[%s7523_s5 + $0x430] sm:$0xff] }
  0x37   : > { %v930_v4 = vld [vmem:[%s7523_s5 + $0x440] sm:$0xff]  ;;  %927 = vst [vmem:[%s7531_s6 + $0x210] sm:$0xff] %v926_v2  ;;  %929 = vst [vmem:[%s7531_s6 + $0x218] sm:$0xff] %v928_v3  ;;  %v932_v5 = vld [vmem:[%s7523_s5 + $0x450] sm:$0xff] }
  0x38   : > { %931 = vst [vmem:[%s7531_s6 + $0x220] sm:$0xff] %v930_v4  ;;  %v934_v6 = vld [vmem:[%s7523_s5 + $0x460] sm:$0xff]  ;;  %v936_v7 = vld [vmem:[%s7523_s5 + $0x470] sm:$0xff]  ;;  %933 = vst [vmem:[%s7531_s6 + $0x228] sm:$0xff] %v932_v5 }
  0x39   : > { %935 = vst [vmem:[%s7531_s6 + $0x230] sm:$0xff] %v934_v6  ;;  %937 = vst [vmem:[%s7531_s6 + $0x238] sm:$0xff] %v936_v7  ;;  %v938_v8 = vld [vmem:[%s7523_s5 + $0x480] sm:$0xff]  ;;  %v940_v9 = vld [vmem:[%s7523_s5 + $0x490] sm:$0xff] }
  0x3a   : > { %v942_v10 = vld [vmem:[%s7523_s5 + $0x4a0] sm:$0xff]  ;;  %939 = vst [vmem:[%s7531_s6 + $0x240] sm:$0xff] %v938_v8  ;;  %941 = vst [vmem:[%s7531_s6 + $0x248] sm:$0xff] %v940_v9  ;;  %v944_v11 = vld [vmem:[%s7523_s5 + $0x4b0] sm:$0xff] }
  0x3b   : > { %943 = vst [vmem:[%s7531_s6 + $0x250] sm:$0xff] %v942_v10  ;;  %v946_v12 = vld [vmem:[%s7523_s5 + $0x4c0] sm:$0xff]  ;;  %v948_v13 = vld [vmem:[%s7523_s5 + $0x4d0] sm:$0xff]  ;;  %945 = vst [vmem:[%s7531_s6 + $0x258] sm:$0xff] %v944_v11 }
  0x3c   : > { %947 = vst [vmem:[%s7531_s6 + $0x260] sm:$0xff] %v946_v12  ;;  %949 = vst [vmem:[%s7531_s6 + $0x268] sm:$0xff] %v948_v13  ;;  %v950_v14 = vld [vmem:[%s7523_s5 + $0x4e0] sm:$0xff]  ;;  %v952_v15 = vld [vmem:[%s7523_s5 + $0x4f0] sm:$0xff] }
  0x3d   : > { %v954_v16 = vld [vmem:[%s7523_s5 + $0x500] sm:$0xff]  ;;  %951 = vst [vmem:[%s7531_s6 + $0x270] sm:$0xff] %v950_v14  ;;  %953 = vst [vmem:[%s7531_s6 + $0x278] sm:$0xff] %v952_v15  ;;  %v956_v17 = vld [vmem:[%s7523_s5 + $0x510] sm:$0xff] }
  0x3e   : > { %955 = vst [vmem:[%s7531_s6 + $0x280] sm:$0xff] %v954_v16  ;;  %v958_v18 = vld [vmem:[%s7523_s5 + $0x520] sm:$0xff]  ;;  %v960_v19 = vld [vmem:[%s7523_s5 + $0x530] sm:$0xff]  ;;  %957 = vst [vmem:[%s7531_s6 + $0x288] sm:$0xff] %v956_v17 }
  0x3f   : > { %959 = vst [vmem:[%s7531_s6 + $0x290] sm:$0xff] %v958_v18  ;;  %961 = vst [vmem:[%s7531_s6 + $0x298] sm:$0xff] %v960_v19  ;;  %v962_v20 = vld [vmem:[%s7523_s5 + $0x540] sm:$0xff]  ;;  %v964_v21 = vld [vmem:[%s7523_s5 + $0x550] sm:$0xff] }
  0x40   : > { %v966_v22 = vld [vmem:[%s7523_s5 + $0x560] sm:$0xff]  ;;  %963 = vst [vmem:[%s7531_s6 + $0x2a0] sm:$0xff] %v962_v20  ;;  %965 = vst [vmem:[%s7531_s6 + $0x2a8] sm:$0xff] %v964_v21  ;;  %v968_v23 = vld [vmem:[%s7523_s5 + $0x570] sm:$0xff] }
  0x41   : > { %967 = vst [vmem:[%s7531_s6 + $0x2b0] sm:$0xff] %v966_v22  ;;  %v970_v24 = vld [vmem:[%s7523_s5 + $0x580] sm:$0xff]  ;;  %v972_v25 = vld [vmem:[%s7523_s5 + $0x590] sm:$0xff]  ;;  %969 = vst [vmem:[%s7531_s6 + $0x2b8] sm:$0xff] %v968_v23 }
  0x42   : > { %971 = vst [vmem:[%s7531_s6 + $0x2c0] sm:$0xff] %v970_v24  ;;  %973 = vst [vmem:[%s7531_s6 + $0x2c8] sm:$0xff] %v972_v25  ;;  %v974_v26 = vld [vmem:[%s7523_s5 + $0x5a0] sm:$0xff]  ;;  %v976_v27 = vld [vmem:[%s7523_s5 + $0x5b0] sm:$0xff] }
  0x43   : > { %v978_v28 = vld [vmem:[%s7523_s5 + $0x5c0] sm:$0xff]  ;;  %975 = vst [vmem:[%s7531_s6 + $0x2d0] sm:$0xff] %v974_v26  ;;  %977 = vst [vmem:[%s7531_s6 + $0x2d8] sm:$0xff] %v976_v27  ;;  %v980_v29 = vld [vmem:[%s7523_s5 + $0x5d0] sm:$0xff] }
  0x44   : > { %979 = vst [vmem:[%s7531_s6 + $0x2e0] sm:$0xff] %v978_v28  ;;  %v982_v30 = vld [vmem:[%s7523_s5 + $0x5e0] sm:$0xff]  ;;  %v984_v31 = vld [vmem:[%s7523_s5 + $0x5f0] sm:$0xff]  ;;  %981 = vst [vmem:[%s7531_s6 + $0x2e8] sm:$0xff] %v980_v29 }
  0x45   : > { %983 = vst [vmem:[%s7531_s6 + $0x2f0] sm:$0xff] %v982_v30  ;;  %985 = vst [vmem:[%s7531_s6 + $0x2f8] sm:$0xff] %v984_v31  ;;  %v986_v32 = vld [vmem:[%s7523_s5 + $0x600] sm:$0xff]  ;;  %v988_v33 = vld [vmem:[%s7523_s5 + $0x610] sm:$0xff] }
  0x46   : > { %v990_v34 = vld [vmem:[%s7523_s5 + $0x620] sm:$0xff]  ;;  %987 = vst [vmem:[%s7531_s6 + $0x300] sm:$0xff] %v986_v32  ;;  %989 = vst [vmem:[%s7531_s6 + $0x308] sm:$0xff] %v988_v33  ;;  %v992_v35 = vld [vmem:[%s7523_s5 + $0x630] sm:$0xff] }
  0x47   : > { %991 = vst [vmem:[%s7531_s6 + $0x310] sm:$0xff] %v990_v34  ;;  %v994_v36 = vld [vmem:[%s7523_s5 + $0x640] sm:$0xff]  ;;  %v996_v37 = vld [vmem:[%s7523_s5 + $0x650] sm:$0xff]  ;;  %993 = vst [vmem:[%s7531_s6 + $0x318] sm:$0xff] %v992_v35 }
  0x48   : > { %995 = vst [vmem:[%s7531_s6 + $0x320] sm:$0xff] %v994_v36  ;;  %997 = vst [vmem:[%s7531_s6 + $0x328] sm:$0xff] %v996_v37  ;;  %v998_v38 = vld [vmem:[%s7523_s5 + $0x660] sm:$0xff]  ;;  %v1000_v39 = vld [vmem:[%s7523_s5 + $0x670] sm:$0xff] }
  0x49   : > { %v1002_v40 = vld [vmem:[%s7523_s5 + $0x680] sm:$0xff]  ;;  %999 = vst [vmem:[%s7531_s6 + $0x330] sm:$0xff] %v998_v38  ;;  %1001 = vst [vmem:[%s7531_s6 + $0x338] sm:$0xff] %v1000_v39  ;;  %v1004_v41 = vld [vmem:[%s7523_s5 + $0x690] sm:$0xff] }
  0x4a   : > { %1003 = vst [vmem:[%s7531_s6 + $0x340] sm:$0xff] %v1002_v40  ;;  %v1006_v42 = vld [vmem:[%s7523_s5 + $0x6a0] sm:$0xff]  ;;  %v1008_v43 = vld [vmem:[%s7523_s5 + $0x6b0] sm:$0xff]  ;;  %1005 = vst [vmem:[%s7531_s6 + $0x348] sm:$0xff] %v1004_v41 }
  0x4b   : > { %1007 = vst [vmem:[%s7531_s6 + $0x350] sm:$0xff] %v1006_v42  ;;  %1009 = vst [vmem:[%s7531_s6 + $0x358] sm:$0xff] %v1008_v43  ;;  %v1010_v44 = vld [vmem:[%s7523_s5 + $0x6c0] sm:$0xff]  ;;  %v1012_v45 = vld [vmem:[%s7523_s5 + $0x6d0] sm:$0xff] }
  0x4c   : > { %v1014_v46 = vld [vmem:[%s7523_s5 + $0x6e0] sm:$0xff]  ;;  %1011 = vst [vmem:[%s7531_s6 + $0x360] sm:$0xff] %v1010_v44  ;;  %1013 = vst [vmem:[%s7531_s6 + $0x368] sm:$0xff] %v1012_v45  ;;  %v1016_v47 = vld [vmem:[%s7523_s5 + $0x6f0] sm:$0xff] }
  0x4d   : > { %1015 = vst [vmem:[%s7531_s6 + $0x370] sm:$0xff] %v1014_v46  ;;  %v1018_v48 = vld [vmem:[%s7523_s5 + $0x700] sm:$0xff]  ;;  %v1020_v49 = vld [vmem:[%s7523_s5 + $0x710] sm:$0xff]  ;;  %1017 = vst [vmem:[%s7531_s6 + $0x378] sm:$0xff] %v1016_v47 }
  0x4e   : > { %1019 = vst [vmem:[%s7531_s6 + $0x380] sm:$0xff] %v1018_v48  ;;  %1021 = vst [vmem:[%s7531_s6 + $0x388] sm:$0xff] %v1020_v49  ;;  %v1022_v50 = vld [vmem:[%s7523_s5 + $0x720] sm:$0xff]  ;;  %v1024_v51 = vld [vmem:[%s7523_s5 + $0x730] sm:$0xff] }
  0x4f   : > { %v1026_v52 = vld [vmem:[%s7523_s5 + $0x740] sm:$0xff]  ;;  %1023 = vst [vmem:[%s7531_s6 + $0x390] sm:$0xff] %v1022_v50  ;;  %1025 = vst [vmem:[%s7531_s6 + $0x398] sm:$0xff] %v1024_v51  ;;  %v1028_v53 = vld [vmem:[%s7523_s5 + $0x750] sm:$0xff] }
  0x50   : > { %1027 = vst [vmem:[%s7531_s6 + $0x3a0] sm:$0xff] %v1026_v52  ;;  %v1030_v54 = vld [vmem:[%s7523_s5 + $0x760] sm:$0xff]  ;;  %v1032_v55 = vld [vmem:[%s7523_s5 + $0x770] sm:$0xff]  ;;  %1029 = vst [vmem:[%s7531_s6 + $0x3a8] sm:$0xff] %v1028_v53 }
  0x51   : > { %1031 = vst [vmem:[%s7531_s6 + $0x3b0] sm:$0xff] %v1030_v54  ;;  %1033 = vst [vmem:[%s7531_s6 + $0x3b8] sm:$0xff] %v1032_v55  ;;  %v1034_v56 = vld [vmem:[%s7523_s5 + $0x780] sm:$0xff]  ;;  %v1036_v57 = vld [vmem:[%s7523_s5 + $0x790] sm:$0xff] }
  0x52   : > { %v1038_v58 = vld [vmem:[%s7523_s5 + $0x7a0] sm:$0xff]  ;;  %1035 = vst [vmem:[%s7531_s6 + $0x3c0] sm:$0xff] %v1034_v56  ;;  %1037 = vst [vmem:[%s7531_s6 + $0x3c8] sm:$0xff] %v1036_v57  ;;  %v1040_v59 = vld [vmem:[%s7523_s5 + $0x7b0] sm:$0xff] }
  0x53   : > { %1039 = vst [vmem:[%s7531_s6 + $0x3d0] sm:$0xff] %v1038_v58  ;;  %v1042_v60 = vld [vmem:[%s7523_s5 + $0x7c0] sm:$0xff]  ;;  %v1044_v61 = vld [vmem:[%s7523_s5 + $0x7d0] sm:$0xff]  ;;  %1041 = vst [vmem:[%s7531_s6 + $0x3d8] sm:$0xff] %v1040_v59 }
  0x54   : > { %1043 = vst [vmem:[%s7531_s6 + $0x3e0] sm:$0xff] %v1042_v60  ;;  %1045 = vst [vmem:[%s7531_s6 + $0x3e8] sm:$0xff] %v1044_v61  ;;  %v1046_v62 = vld [vmem:[%s7523_s5 + $0x7e0] sm:$0xff]  ;;  %v1048_v63 = vld [vmem:[%s7523_s5 + $0x7f0] sm:$0xff] }
  0x55   : > { %v1050_v0 = vld [vmem:[%s7523_s5 + $0x800] sm:$0xff]  ;;  %1047 = vst [vmem:[%s7531_s6 + $0x3f0] sm:$0xff] %v1046_v62  ;;  %1049 = vst [vmem:[%s7531_s6 + $0x3f8] sm:$0xff] %v1048_v63  ;;  %v1052_v1 = vld [vmem:[%s7523_s5 + $0x810] sm:$0xff] }
  0x56   : > { %1051 = vst [vmem:[%s7531_s6 + $0x400] sm:$0xff] %v1050_v0  ;;  %v1054_v2 = vld [vmem:[%s7523_s5 + $0x820] sm:$0xff]  ;;  %v1056_v3 = vld [vmem:[%s7523_s5 + $0x830] sm:$0xff]  ;;  %1053 = vst [vmem:[%s7531_s6 + $0x408] sm:$0xff] %v1052_v1 }
  0x57   : > { %1055 = vst [vmem:[%s7531_s6 + $0x410] sm:$0xff] %v1054_v2  ;;  %1057 = vst [vmem:[%s7531_s6 + $0x418] sm:$0xff] %v1056_v3  ;;  %v1058_v4 = vld [vmem:[%s7523_s5 + $0x840] sm:$0xff]  ;;  %v1060_v5 = vld [vmem:[%s7523_s5 + $0x850] sm:$0xff] }
  0x58   : > { %v1062_v6 = vld [vmem:[%s7523_s5 + $0x860] sm:$0xff]  ;;  %1059 = vst [vmem:[%s7531_s6 + $0x420] sm:$0xff] %v1058_v4  ;;  %1061 = vst [vmem:[%s7531_s6 + $0x428] sm:$0xff] %v1060_v5  ;;  %v1064_v7 = vld [vmem:[%s7523_s5 + $0x870] sm:$0xff] }
  0x59   : > { %1063 = vst [vmem:[%s7531_s6 + $0x430] sm:$0xff] %v1062_v6  ;;  %v1066_v8 = vld [vmem:[%s7523_s5 + $0x880] sm:$0xff]  ;;  %v1068_v9 = vld [vmem:[%s7523_s5 + $0x890] sm:$0xff]  ;;  %1065 = vst [vmem:[%s7531_s6 + $0x438] sm:$0xff] %v1064_v7 }
  0x5a   : > { %1067 = vst [vmem:[%s7531_s6 + $0x440] sm:$0xff] %v1066_v8  ;;  %1069 = vst [vmem:[%s7531_s6 + $0x448] sm:$0xff] %v1068_v9  ;;  %v1070_v10 = vld [vmem:[%s7523_s5 + $0x8a0] sm:$0xff]  ;;  %v1072_v11 = vld [vmem:[%s7523_s5 + $0x8b0] sm:$0xff] }
  0x5b   : > { %v1074_v12 = vld [vmem:[%s7523_s5 + $0x8c0] sm:$0xff]  ;;  %1071 = vst [vmem:[%s7531_s6 + $0x450] sm:$0xff] %v1070_v10  ;;  %1073 = vst [vmem:[%s7531_s6 + $0x458] sm:$0xff] %v1072_v11  ;;  %v1076_v13 = vld [vmem:[%s7523_s5 + $0x8d0] sm:$0xff] }
  0x5c   : > { %1075 = vst [vmem:[%s7531_s6 + $0x460] sm:$0xff] %v1074_v12  ;;  %v1078_v14 = vld [vmem:[%s7523_s5 + $0x8e0] sm:$0xff]  ;;  %v1080_v15 = vld [vmem:[%s7523_s5 + $0x8f0] sm:$0xff]  ;;  %1077 = vst [vmem:[%s7531_s6 + $0x468] sm:$0xff] %v1076_v13 }
  0x5d   : > { %1079 = vst [vmem:[%s7531_s6 + $0x470] sm:$0xff] %v1078_v14  ;;  %1081 = vst [vmem:[%s7531_s6 + $0x478] sm:$0xff] %v1080_v15  ;;  %v1082_v16 = vld [vmem:[%s7523_s5 + $0x900] sm:$0xff]  ;;  %v1084_v17 = vld [vmem:[%s7523_s5 + $0x910] sm:$0xff] }
  0x5e   : > { %v1086_v18 = vld [vmem:[%s7523_s5 + $0x920] sm:$0xff]  ;;  %1083 = vst [vmem:[%s7531_s6 + $0x480] sm:$0xff] %v1082_v16  ;;  %1085 = vst [vmem:[%s7531_s6 + $0x488] sm:$0xff] %v1084_v17  ;;  %v1088_v19 = vld [vmem:[%s7523_s5 + $0x930] sm:$0xff] }
  0x5f   : > { %1087 = vst [vmem:[%s7531_s6 + $0x490] sm:$0xff] %v1086_v18  ;;  %v1090_v20 = vld [vmem:[%s7523_s5 + $0x940] sm:$0xff]  ;;  %v1092_v21 = vld [vmem:[%s7523_s5 + $0x950] sm:$0xff]  ;;  %1089 = vst [vmem:[%s7531_s6 + $0x498] sm:$0xff] %v1088_v19 }
  0x60   : > { %1091 = vst [vmem:[%s7531_s6 + $0x4a0] sm:$0xff] %v1090_v20  ;;  %1093 = vst [vmem:[%s7531_s6 + $0x4a8] sm:$0xff] %v1092_v21  ;;  %v1094_v22 = vld [vmem:[%s7523_s5 + $0x960] sm:$0xff]  ;;  %v1096_v23 = vld [vmem:[%s7523_s5 + $0x970] sm:$0xff] }
  0x61   : > { %v1098_v24 = vld [vmem:[%s7523_s5 + $0x980] sm:$0xff]  ;;  %1095 = vst [vmem:[%s7531_s6 + $0x4b0] sm:$0xff] %v1094_v22  ;;  %1097 = vst [vmem:[%s7531_s6 + $0x4b8] sm:$0xff] %v1096_v23  ;;  %v1100_v25 = vld [vmem:[%s7523_s5 + $0x990] sm:$0xff] }
  0x62   : > { %1099 = vst [vmem:[%s7531_s6 + $0x4c0] sm:$0xff] %v1098_v24  ;;  %v1102_v26 = vld [vmem:[%s7523_s5 + $0x9a0] sm:$0xff]  ;;  %v1104_v27 = vld [vmem:[%s7523_s5 + $0x9b0] sm:$0xff]  ;;  %1101 = vst [vmem:[%s7531_s6 + $0x4c8] sm:$0xff] %v1100_v25 }
  0x63   : > { %1103 = vst [vmem:[%s7531_s6 + $0x4d0] sm:$0xff] %v1102_v26  ;;  %1105 = vst [vmem:[%s7531_s6 + $0x4d8] sm:$0xff] %v1104_v27  ;;  %v1106_v28 = vld [vmem:[%s7523_s5 + $0x9c0] sm:$0xff]  ;;  %v1108_v29 = vld [vmem:[%s7523_s5 + $0x9d0] sm:$0xff] }
  0x64   : > { %v1110_v30 = vld [vmem:[%s7523_s5 + $0x9e0] sm:$0xff]  ;;  %1107 = vst [vmem:[%s7531_s6 + $0x4e0] sm:$0xff] %v1106_v28  ;;  %1109 = vst [vmem:[%s7531_s6 + $0x4e8] sm:$0xff] %v1108_v29  ;;  %v1112_v31 = vld [vmem:[%s7523_s5 + $0x9f0] sm:$0xff] }
  0x65   : > { %1111 = vst [vmem:[%s7531_s6 + $0x4f0] sm:$0xff] %v1110_v30  ;;  %v1114_v32 = vld [vmem:[%s7523_s5 + $0xa00] sm:$0xff]  ;;  %v1116_v33 = vld [vmem:[%s7523_s5 + $0xa10] sm:$0xff]  ;;  %1113 = vst [vmem:[%s7531_s6 + $0x4f8] sm:$0xff] %v1112_v31 }
  0x66   : > { %1115 = vst [vmem:[%s7531_s6 + $0x500] sm:$0xff] %v1114_v32  ;;  %1117 = vst [vmem:[%s7531_s6 + $0x508] sm:$0xff] %v1116_v33  ;;  %v1118_v34 = vld [vmem:[%s7523_s5 + $0xa20] sm:$0xff]  ;;  %v1120_v35 = vld [vmem:[%s7523_s5 + $0xa30] sm:$0xff] }
  0x67   : > { %v1122_v36 = vld [vmem:[%s7523_s5 + $0xa40] sm:$0xff]  ;;  %1119 = vst [vmem:[%s7531_s6 + $0x510] sm:$0xff] %v1118_v34  ;;  %1121 = vst [vmem:[%s7531_s6 + $0x518] sm:$0xff] %v1120_v35  ;;  %v1124_v37 = vld [vmem:[%s7523_s5 + $0xa50] sm:$0xff] }
  0x68   : > { %1123 = vst [vmem:[%s7531_s6 + $0x520] sm:$0xff] %v1122_v36  ;;  %v1126_v38 = vld [vmem:[%s7523_s5 + $0xa60] sm:$0xff]  ;;  %v1128_v39 = vld [vmem:[%s7523_s5 + $0xa70] sm:$0xff]  ;;  %1125 = vst [vmem:[%s7531_s6 + $0x528] sm:$0xff] %v1124_v37 }
  0x69   : > { %1127 = vst [vmem:[%s7531_s6 + $0x530] sm:$0xff] %v1126_v38  ;;  %1129 = vst [vmem:[%s7531_s6 + $0x538] sm:$0xff] %v1128_v39  ;;  %v1130_v40 = vld [vmem:[%s7523_s5 + $0xa80] sm:$0xff]  ;;  %v1132_v41 = vld [vmem:[%s7523_s5 + $0xa90] sm:$0xff] }
  0x6a   : > { %v1134_v42 = vld [vmem:[%s7523_s5 + $0xaa0] sm:$0xff]  ;;  %1131 = vst [vmem:[%s7531_s6 + $0x540] sm:$0xff] %v1130_v40  ;;  %1133 = vst [vmem:[%s7531_s6 + $0x548] sm:$0xff] %v1132_v41  ;;  %v1136_v43 = vld [vmem:[%s7523_s5 + $0xab0] sm:$0xff] }
  0x6b   : > { %1135 = vst [vmem:[%s7531_s6 + $0x550] sm:$0xff] %v1134_v42  ;;  %v1138_v44 = vld [vmem:[%s7523_s5 + $0xac0] sm:$0xff]  ;;  %v1140_v45 = vld [vmem:[%s7523_s5 + $0xad0] sm:$0xff]  ;;  %1137 = vst [vmem:[%s7531_s6 + $0x558] sm:$0xff] %v1136_v43 }
  0x6c   : > { %1139 = vst [vmem:[%s7531_s6 + $0x560] sm:$0xff] %v1138_v44  ;;  %1141 = vst [vmem:[%s7531_s6 + $0x568] sm:$0xff] %v1140_v45  ;;  %v1142_v46 = vld [vmem:[%s7523_s5 + $0xae0] sm:$0xff]  ;;  %v1144_v47 = vld [vmem:[%s7523_s5 + $0xaf0] sm:$0xff] }
  0x6d   : > { %v1146_v48 = vld [vmem:[%s7523_s5 + $0xb00] sm:$0xff]  ;;  %1143 = vst [vmem:[%s7531_s6 + $0x570] sm:$0xff] %v1142_v46  ;;  %1145 = vst [vmem:[%s7531_s6 + $0x578] sm:$0xff] %v1144_v47  ;;  %v1148_v49 = vld [vmem:[%s7523_s5 + $0xb10] sm:$0xff] }
  0x6e   : > { %1147 = vst [vmem:[%s7531_s6 + $0x580] sm:$0xff] %v1146_v48  ;;  %v1150_v50 = vld [vmem:[%s7523_s5 + $0xb20] sm:$0xff]  ;;  %v1152_v51 = vld [vmem:[%s7523_s5 + $0xb30] sm:$0xff]  ;;  %1149 = vst [vmem:[%s7531_s6 + $0x588] sm:$0xff] %v1148_v49 }
  0x6f   : > { %1151 = vst [vmem:[%s7531_s6 + $0x590] sm:$0xff] %v1150_v50  ;;  %1153 = vst [vmem:[%s7531_s6 + $0x598] sm:$0xff] %v1152_v51  ;;  %v1154_v52 = vld [vmem:[%s7523_s5 + $0xb40] sm:$0xff]  ;;  %v1156_v53 = vld [vmem:[%s7523_s5 + $0xb50] sm:$0xff] }
  0x70   : > { %v1158_v54 = vld [vmem:[%s7523_s5 + $0xb60] sm:$0xff]  ;;  %1155 = vst [vmem:[%s7531_s6 + $0x5a0] sm:$0xff] %v1154_v52  ;;  %1157 = vst [vmem:[%s7531_s6 + $0x5a8] sm:$0xff] %v1156_v53  ;;  %v1160_v55 = vld [vmem:[%s7523_s5 + $0xb70] sm:$0xff] }
  0x71   : > { %1159 = vst [vmem:[%s7531_s6 + $0x5b0] sm:$0xff] %v1158_v54  ;;  %v1162_v56 = vld [vmem:[%s7523_s5 + $0xb80] sm:$0xff]  ;;  %v1164_v57 = vld [vmem:[%s7523_s5 + $0xb90] sm:$0xff]  ;;  %1161 = vst [vmem:[%s7531_s6 + $0x5b8] sm:$0xff] %v1160_v55 }
  0x72   : > { %1163 = vst [vmem:[%s7531_s6 + $0x5c0] sm:$0xff] %v1162_v56  ;;  %1165 = vst [vmem:[%s7531_s6 + $0x5c8] sm:$0xff] %v1164_v57  ;;  %v1166_v58 = vld [vmem:[%s7523_s5 + $0xba0] sm:$0xff]  ;;  %v1168_v59 = vld [vmem:[%s7523_s5 + $0xbb0] sm:$0xff] }
  0x73   : > { %v1170_v60 = vld [vmem:[%s7523_s5 + $0xbc0] sm:$0xff]  ;;  %1167 = vst [vmem:[%s7531_s6 + $0x5d0] sm:$0xff] %v1166_v58  ;;  %1169 = vst [vmem:[%s7531_s6 + $0x5d8] sm:$0xff] %v1168_v59  ;;  %v1172_v61 = vld [vmem:[%s7523_s5 + $0xbd0] sm:$0xff] }
  0x74   : > { %1171 = vst [vmem:[%s7531_s6 + $0x5e0] sm:$0xff] %v1170_v60  ;;  %v1174_v62 = vld [vmem:[%s7523_s5 + $0xbe0] sm:$0xff]  ;;  %v1176_v63 = vld [vmem:[%s7523_s5 + $0xbf0] sm:$0xff]  ;;  %1173 = vst [vmem:[%s7531_s6 + $0x5e8] sm:$0xff] %v1172_v61 }
  0x75   : > { %1175 = vst [vmem:[%s7531_s6 + $0x5f0] sm:$0xff] %v1174_v62  ;;  %1177 = vst [vmem:[%s7531_s6 + $0x5f8] sm:$0xff] %v1176_v63  ;;  %v1178_v0 = vld [vmem:[%s7523_s5 + $0xc00] sm:$0xff]  ;;  %v1180_v1 = vld [vmem:[%s7523_s5 + $0xc10] sm:$0xff] }
  0x76   : > { %v1182_v2 = vld [vmem:[%s7523_s5 + $0xc20] sm:$0xff]  ;;  %1179 = vst [vmem:[%s7531_s6 + $0x600] sm:$0xff] %v1178_v0  ;;  %1181 = vst [vmem:[%s7531_s6 + $0x608] sm:$0xff] %v1180_v1  ;;  %v1184_v3 = vld [vmem:[%s7523_s5 + $0xc30] sm:$0xff] }
  0x77   : > { %1183 = vst [vmem:[%s7531_s6 + $0x610] sm:$0xff] %v1182_v2  ;;  %v1186_v4 = vld [vmem:[%s7523_s5 + $0xc40] sm:$0xff]  ;;  %v1188_v5 = vld [vmem:[%s7523_s5 + $0xc50] sm:$0xff]  ;;  %1185 = vst [vmem:[%s7531_s6 + $0x618] sm:$0xff] %v1184_v3 }
  0x78   : > { %1187 = vst [vmem:[%s7531_s6 + $0x620] sm:$0xff] %v1186_v4  ;;  %1189 = vst [vmem:[%s7531_s6 + $0x628] sm:$0xff] %v1188_v5  ;;  %v1190_v6 = vld [vmem:[%s7523_s5 + $0xc60] sm:$0xff]  ;;  %v1192_v7 = vld [vmem:[%s7523_s5 + $0xc70] sm:$0xff] }
  0x79   : > { %v1194_v8 = vld [vmem:[%s7523_s5 + $0xc80] sm:$0xff]  ;;  %1191 = vst [vmem:[%s7531_s6 + $0x630] sm:$0xff] %v1190_v6  ;;  %1193 = vst [vmem:[%s7531_s6 + $0x638] sm:$0xff] %v1192_v7  ;;  %v1196_v9 = vld [vmem:[%s7523_s5 + $0xc90] sm:$0xff] }
  0x7a   : > { %1195 = vst [vmem:[%s7531_s6 + $0x640] sm:$0xff] %v1194_v8  ;;  %v1198_v10 = vld [vmem:[%s7523_s5 + $0xca0] sm:$0xff]  ;;  %v1200_v11 = vld [vmem:[%s7523_s5 + $0xcb0] sm:$0xff]  ;;  %1197 = vst [vmem:[%s7531_s6 + $0x648] sm:$0xff] %v1196_v9 }
  0x7b   : > { %1199 = vst [vmem:[%s7531_s6 + $0x650] sm:$0xff] %v1198_v10  ;;  %1201 = vst [vmem:[%s7531_s6 + $0x658] sm:$0xff] %v1200_v11  ;;  %v1202_v12 = vld [vmem:[%s7523_s5 + $0xcc0] sm:$0xff]  ;;  %v1204_v13 = vld [vmem:[%s7523_s5 + $0xcd0] sm:$0xff] }
  0x7c   : > { %v1206_v14 = vld [vmem:[%s7523_s5 + $0xce0] sm:$0xff]  ;;  %1203 = vst [vmem:[%s7531_s6 + $0x660] sm:$0xff] %v1202_v12  ;;  %1205 = vst [vmem:[%s7531_s6 + $0x668] sm:$0xff] %v1204_v13  ;;  %v1208_v15 = vld [vmem:[%s7523_s5 + $0xcf0] sm:$0xff] }
  0x7d   : > { %1207 = vst [vmem:[%s7531_s6 + $0x670] sm:$0xff] %v1206_v14  ;;  %v1210_v16 = vld [vmem:[%s7523_s5 + $0xd00] sm:$0xff]  ;;  %v1212_v17 = vld [vmem:[%s7523_s5 + $0xd10] sm:$0xff]  ;;  %1209 = vst [vmem:[%s7531_s6 + $0x678] sm:$0xff] %v1208_v15 }
  0x7e   : > { %1211 = vst [vmem:[%s7531_s6 + $0x680] sm:$0xff] %v1210_v16  ;;  %1213 = vst [vmem:[%s7531_s6 + $0x688] sm:$0xff] %v1212_v17  ;;  %v1214_v18 = vld [vmem:[%s7523_s5 + $0xd20] sm:$0xff]  ;;  %v1216_v19 = vld [vmem:[%s7523_s5 + $0xd30] sm:$0xff] }
  0x7f   : > { %v1218_v20 = vld [vmem:[%s7523_s5 + $0xd40] sm:$0xff]  ;;  %1215 = vst [vmem:[%s7531_s6 + $0x690] sm:$0xff] %v1214_v18  ;;  %1217 = vst [vmem:[%s7531_s6 + $0x698] sm:$0xff] %v1216_v19  ;;  %v1220_v21 = vld [vmem:[%s7523_s5 + $0xd50] sm:$0xff] }
  0x80   : > { %1219 = vst [vmem:[%s7531_s6 + $0x6a0] sm:$0xff] %v1218_v20  ;;  %v1222_v22 = vld [vmem:[%s7523_s5 + $0xd60] sm:$0xff]  ;;  %v1224_v23 = vld [vmem:[%s7523_s5 + $0xd70] sm:$0xff]  ;;  %1221 = vst [vmem:[%s7531_s6 + $0x6a8] sm:$0xff] %v1220_v21 }
  0x81   : > { %1223 = vst [vmem:[%s7531_s6 + $0x6b0] sm:$0xff] %v1222_v22  ;;  %1225 = vst [vmem:[%s7531_s6 + $0x6b8] sm:$0xff] %v1224_v23  ;;  %v1226_v24 = vld [vmem:[%s7523_s5 + $0xd80] sm:$0xff]  ;;  %v1228_v25 = vld [vmem:[%s7523_s5 + $0xd90] sm:$0xff] }
  0x82   : > { %v1230_v26 = vld [vmem:[%s7523_s5 + $0xda0] sm:$0xff]  ;;  %1227 = vst [vmem:[%s7531_s6 + $0x6c0] sm:$0xff] %v1226_v24  ;;  %1229 = vst [vmem:[%s7531_s6 + $0x6c8] sm:$0xff] %v1228_v25  ;;  %v1232_v27 = vld [vmem:[%s7523_s5 + $0xdb0] sm:$0xff] }
  0x83   : > { %1231 = vst [vmem:[%s7531_s6 + $0x6d0] sm:$0xff] %v1230_v26  ;;  %v1234_v28 = vld [vmem:[%s7523_s5 + $0xdc0] sm:$0xff]  ;;  %v1236_v29 = vld [vmem:[%s7523_s5 + $0xdd0] sm:$0xff]  ;;  %1233 = vst [vmem:[%s7531_s6 + $0x6d8] sm:$0xff] %v1232_v27 }
  0x84   : > { %1235 = vst [vmem:[%s7531_s6 + $0x6e0] sm:$0xff] %v1234_v28  ;;  %1237 = vst [vmem:[%s7531_s6 + $0x6e8] sm:$0xff] %v1236_v29  ;;  %v1238_v30 = vld [vmem:[%s7523_s5 + $0xde0] sm:$0xff]  ;;  %v1240_v31 = vld [vmem:[%s7523_s5 + $0xdf0] sm:$0xff] }
  0x85   : > { %v1242_v32 = vld [vmem:[%s7523_s5 + $0xe00] sm:$0xff]  ;;  %1239 = vst [vmem:[%s7531_s6 + $0x6f0] sm:$0xff] %v1238_v30  ;;  %1241 = vst [vmem:[%s7531_s6 + $0x6f8] sm:$0xff] %v1240_v31  ;;  %v1244_v33 = vld [vmem:[%s7523_s5 + $0xe10] sm:$0xff] }
  0x86   : > { %1243 = vst [vmem:[%s7531_s6 + $0x700] sm:$0xff] %v1242_v32  ;;  %v1246_v34 = vld [vmem:[%s7523_s5 + $0xe20] sm:$0xff]  ;;  %v1248_v35 = vld [vmem:[%s7523_s5 + $0xe30] sm:$0xff]  ;;  %1245 = vst [vmem:[%s7531_s6 + $0x708] sm:$0xff] %v1244_v33 }
  0x87   : > { %1247 = vst [vmem:[%s7531_s6 + $0x710] sm:$0xff] %v1246_v34  ;;  %1249 = vst [vmem:[%s7531_s6 + $0x718] sm:$0xff] %v1248_v35  ;;  %v1250_v36 = vld [vmem:[%s7523_s5 + $0xe40] sm:$0xff]  ;;  %v1252_v37 = vld [vmem:[%s7523_s5 + $0xe50] sm:$0xff] }
  0x88   : > { %v1254_v38 = vld [vmem:[%s7523_s5 + $0xe60] sm:$0xff]  ;;  %1251 = vst [vmem:[%s7531_s6 + $0x720] sm:$0xff] %v1250_v36  ;;  %1253 = vst [vmem:[%s7531_s6 + $0x728] sm:$0xff] %v1252_v37  ;;  %v1256_v39 = vld [vmem:[%s7523_s5 + $0xe70] sm:$0xff] }
  0x89   : > { %1255 = vst [vmem:[%s7531_s6 + $0x730] sm:$0xff] %v1254_v38  ;;  %v1258_v40 = vld [vmem:[%s7523_s5 + $0xe80] sm:$0xff]  ;;  %v1260_v41 = vld [vmem:[%s7523_s5 + $0xe90] sm:$0xff]  ;;  %1257 = vst [vmem:[%s7531_s6 + $0x738] sm:$0xff] %v1256_v39 }
  0x8a   : > { %1259 = vst [vmem:[%s7531_s6 + $0x740] sm:$0xff] %v1258_v40  ;;  %1261 = vst [vmem:[%s7531_s6 + $0x748] sm:$0xff] %v1260_v41  ;;  %v1262_v42 = vld [vmem:[%s7523_s5 + $0xea0] sm:$0xff]  ;;  %v1264_v43 = vld [vmem:[%s7523_s5 + $0xeb0] sm:$0xff] }
  0x8b   : > { %v1266_v44 = vld [vmem:[%s7523_s5 + $0xec0] sm:$0xff]  ;;  %1263 = vst [vmem:[%s7531_s6 + $0x750] sm:$0xff] %v1262_v42  ;;  %1265 = vst [vmem:[%s7531_s6 + $0x758] sm:$0xff] %v1264_v43  ;;  %v1268_v45 = vld [vmem:[%s7523_s5 + $0xed0] sm:$0xff] }
  0x8c   : > { %1267 = vst [vmem:[%s7531_s6 + $0x760] sm:$0xff] %v1266_v44  ;;  %v1270_v46 = vld [vmem:[%s7523_s5 + $0xee0] sm:$0xff]  ;;  %v1272_v47 = vld [vmem:[%s7523_s5 + $0xef0] sm:$0xff]  ;;  %1269 = vst [vmem:[%s7531_s6 + $0x768] sm:$0xff] %v1268_v45 }
  0x8d   : > { %1271 = vst [vmem:[%s7531_s6 + $0x770] sm:$0xff] %v1270_v46  ;;  %1273 = vst [vmem:[%s7531_s6 + $0x778] sm:$0xff] %v1272_v47  ;;  %v1274_v48 = vld [vmem:[%s7523_s5 + $0xf00] sm:$0xff]  ;;  %v1276_v49 = vld [vmem:[%s7523_s5 + $0xf10] sm:$0xff] }
  0x8e   : > { %v1278_v50 = vld [vmem:[%s7523_s5 + $0xf20] sm:$0xff]  ;;  %1275 = vst [vmem:[%s7531_s6 + $0x780] sm:$0xff] %v1274_v48  ;;  %1277 = vst [vmem:[%s7531_s6 + $0x788] sm:$0xff] %v1276_v49  ;;  %v1280_v51 = vld [vmem:[%s7523_s5 + $0xf30] sm:$0xff] }
  0x8f   : > { %1279 = vst [vmem:[%s7531_s6 + $0x790] sm:$0xff] %v1278_v50  ;;  %v1282_v52 = vld [vmem:[%s7523_s5 + $0xf40] sm:$0xff]  ;;  %v1284_v53 = vld [vmem:[%s7523_s5 + $0xf50] sm:$0xff]  ;;  %1281 = vst [vmem:[%s7531_s6 + $0x798] sm:$0xff] %v1280_v51 }
  0x90   : > { %1283 = vst [vmem:[%s7531_s6 + $0x7a0] sm:$0xff] %v1282_v52  ;;  %1285 = vst [vmem:[%s7531_s6 + $0x7a8] sm:$0xff] %v1284_v53  ;;  %v1286_v54 = vld [vmem:[%s7523_s5 + $0xf60] sm:$0xff]  ;;  %v1288_v55 = vld [vmem:[%s7523_s5 + $0xf70] sm:$0xff] }
  0x91   : > { %v1290_v56 = vld [vmem:[%s7523_s5 + $0xf80] sm:$0xff]  ;;  %1287 = vst [vmem:[%s7531_s6 + $0x7b0] sm:$0xff] %v1286_v54  ;;  %1289 = vst [vmem:[%s7531_s6 + $0x7b8] sm:$0xff] %v1288_v55  ;;  %v1292_v57 = vld [vmem:[%s7523_s5 + $0xf90] sm:$0xff] }
  0x92   : > { %1291 = vst [vmem:[%s7531_s6 + $0x7c0] sm:$0xff] %v1290_v56  ;;  %v1294_v58 = vld [vmem:[%s7523_s5 + $0xfa0] sm:$0xff]  ;;  %v1296_v59 = vld [vmem:[%s7523_s5 + $0xfb0] sm:$0xff]  ;;  %1293 = vst [vmem:[%s7531_s6 + $0x7c8] sm:$0xff] %v1292_v57 }
  0x93   : > { %1295 = vst [vmem:[%s7531_s6 + $0x7d0] sm:$0xff] %v1294_v58  ;;  %1297 = vst [vmem:[%s7531_s6 + $0x7d8] sm:$0xff] %v1296_v59  ;;  %v1298_v60 = vld [vmem:[%s7523_s5 + $0xfc0] sm:$0xff]  ;;  %v1300_v61 = vld [vmem:[%s7523_s5 + $0xfd0] sm:$0xff] }
  0x94   : > { %v1302_v62 = vld [vmem:[%s7523_s5 + $0xfe0] sm:$0xff]  ;;  %1299 = vst [vmem:[%s7531_s6 + $0x7e0] sm:$0xff] %v1298_v60  ;;  %1301 = vst [vmem:[%s7531_s6 + $0x7e8] sm:$0xff] %v1300_v61  ;;  %v1304_v63 = vld [vmem:[%s7523_s5 + $0xff0] sm:$0xff] }
  0x95   : > { %1303 = vst [vmem:[%s7531_s6 + $0x7f0] sm:$0xff] %v1302_v62  ;;  %v1306_v0 = vld [vmem:[%s7523_s5 + $0x1000] sm:$0xff]  ;;  %v1308_v1 = vld [vmem:[%s7523_s5 + $0x1010] sm:$0xff]  ;;  %1305 = vst [vmem:[%s7531_s6 + $0x7f8] sm:$0xff] %v1304_v63 }
  0x96   : > { %1307 = vst [vmem:[%s7531_s6 + $0x800] sm:$0xff] %v1306_v0  ;;  %1309 = vst [vmem:[%s7531_s6 + $0x808] sm:$0xff] %v1308_v1  ;;  %v1310_v2 = vld [vmem:[%s7523_s5 + $0x1020] sm:$0xff]  ;;  %v1312_v3 = vld [vmem:[%s7523_s5 + $0x1030] sm:$0xff] }
  0x97   : > { %v1314_v4 = vld [vmem:[%s7523_s5 + $0x1040] sm:$0xff]  ;;  %1311 = vst [vmem:[%s7531_s6 + $0x810] sm:$0xff] %v1310_v2  ;;  %1313 = vst [vmem:[%s7531_s6 + $0x818] sm:$0xff] %v1312_v3  ;;  %v1316_v5 = vld [vmem:[%s7523_s5 + $0x1050] sm:$0xff] }
  0x98   : > { %1315 = vst [vmem:[%s7531_s6 + $0x820] sm:$0xff] %v1314_v4  ;;  %v1318_v6 = vld [vmem:[%s7523_s5 + $0x1060] sm:$0xff]  ;;  %v1320_v7 = vld [vmem:[%s7523_s5 + $0x1070] sm:$0xff]  ;;  %1317 = vst [vmem:[%s7531_s6 + $0x828] sm:$0xff] %v1316_v5 }
  0x99   : > { %1319 = vst [vmem:[%s7531_s6 + $0x830] sm:$0xff] %v1318_v6  ;;  %1321 = vst [vmem:[%s7531_s6 + $0x838] sm:$0xff] %v1320_v7  ;;  %v1322_v8 = vld [vmem:[%s7523_s5 + $0x1080] sm:$0xff]  ;;  %v1324_v9 = vld [vmem:[%s7523_s5 + $0x1090] sm:$0xff] }
  0x9a   : > { %v1326_v10 = vld [vmem:[%s7523_s5 + $0x10a0] sm:$0xff]  ;;  %1323 = vst [vmem:[%s7531_s6 + $0x840] sm:$0xff] %v1322_v8  ;;  %1325 = vst [vmem:[%s7531_s6 + $0x848] sm:$0xff] %v1324_v9  ;;  %v1328_v11 = vld [vmem:[%s7523_s5 + $0x10b0] sm:$0xff] }
  0x9b   : > { %1327 = vst [vmem:[%s7531_s6 + $0x850] sm:$0xff] %v1326_v10  ;;  %v1330_v12 = vld [vmem:[%s7523_s5 + $0x10c0] sm:$0xff]  ;;  %v1332_v13 = vld [vmem:[%s7523_s5 + $0x10d0] sm:$0xff]  ;;  %1329 = vst [vmem:[%s7531_s6 + $0x858] sm:$0xff] %v1328_v11 }
  0x9c   : > { %1331 = vst [vmem:[%s7531_s6 + $0x860] sm:$0xff] %v1330_v12  ;;  %1333 = vst [vmem:[%s7531_s6 + $0x868] sm:$0xff] %v1332_v13  ;;  %v1334_v14 = vld [vmem:[%s7523_s5 + $0x10e0] sm:$0xff]  ;;  %v1336_v15 = vld [vmem:[%s7523_s5 + $0x10f0] sm:$0xff] }
  0x9d   : > { %v1338_v16 = vld [vmem:[%s7523_s5 + $0x1100] sm:$0xff]  ;;  %1335 = vst [vmem:[%s7531_s6 + $0x870] sm:$0xff] %v1334_v14  ;;  %1337 = vst [vmem:[%s7531_s6 + $0x878] sm:$0xff] %v1336_v15  ;;  %v1340_v17 = vld [vmem:[%s7523_s5 + $0x1110] sm:$0xff] }
  0x9e   : > { %1339 = vst [vmem:[%s7531_s6 + $0x880] sm:$0xff] %v1338_v16  ;;  %v1342_v18 = vld [vmem:[%s7523_s5 + $0x1120] sm:$0xff]  ;;  %v1344_v19 = vld [vmem:[%s7523_s5 + $0x1130] sm:$0xff]  ;;  %1341 = vst [vmem:[%s7531_s6 + $0x888] sm:$0xff] %v1340_v17 }
  0x9f   : > { %1343 = vst [vmem:[%s7531_s6 + $0x890] sm:$0xff] %v1342_v18  ;;  %1345 = vst [vmem:[%s7531_s6 + $0x898] sm:$0xff] %v1344_v19  ;;  %v1346_v20 = vld [vmem:[%s7523_s5 + $0x1140] sm:$0xff]  ;;  %v1348_v21 = vld [vmem:[%s7523_s5 + $0x1150] sm:$0xff] }
  0xa0   : > { %v1350_v22 = vld [vmem:[%s7523_s5 + $0x1160] sm:$0xff]  ;;  %1347 = vst [vmem:[%s7531_s6 + $0x8a0] sm:$0xff] %v1346_v20  ;;  %1349 = vst [vmem:[%s7531_s6 + $0x8a8] sm:$0xff] %v1348_v21  ;;  %v1352_v23 = vld [vmem:[%s7523_s5 + $0x1170] sm:$0xff] }
  0xa1   : > { %1351 = vst [vmem:[%s7531_s6 + $0x8b0] sm:$0xff] %v1350_v22  ;;  %v1354_v24 = vld [vmem:[%s7523_s5 + $0x1180] sm:$0xff]  ;;  %v1356_v25 = vld [vmem:[%s7523_s5 + $0x1190] sm:$0xff]  ;;  %1353 = vst [vmem:[%s7531_s6 + $0x8b8] sm:$0xff] %v1352_v23 }
  0xa2   : > { %1355 = vst [vmem:[%s7531_s6 + $0x8c0] sm:$0xff] %v1354_v24  ;;  %1357 = vst [vmem:[%s7531_s6 + $0x8c8] sm:$0xff] %v1356_v25  ;;  %v1358_v26 = vld [vmem:[%s7523_s5 + $0x11a0] sm:$0xff]  ;;  %v1360_v27 = vld [vmem:[%s7523_s5 + $0x11b0] sm:$0xff] }
  0xa3   : > { %v1362_v28 = vld [vmem:[%s7523_s5 + $0x11c0] sm:$0xff]  ;;  %1359 = vst [vmem:[%s7531_s6 + $0x8d0] sm:$0xff] %v1358_v26  ;;  %1361 = vst [vmem:[%s7531_s6 + $0x8d8] sm:$0xff] %v1360_v27  ;;  %v1364_v29 = vld [vmem:[%s7523_s5 + $0x11d0] sm:$0xff] }
  0xa4   : > { %1363 = vst [vmem:[%s7531_s6 + $0x8e0] sm:$0xff] %v1362_v28  ;;  %v1366_v30 = vld [vmem:[%s7523_s5 + $0x11e0] sm:$0xff]  ;;  %v1368_v31 = vld [vmem:[%s7523_s5 + $0x11f0] sm:$0xff]  ;;  %1365 = vst [vmem:[%s7531_s6 + $0x8e8] sm:$0xff] %v1364_v29 }
  0xa5   : > { %1367 = vst [vmem:[%s7531_s6 + $0x8f0] sm:$0xff] %v1366_v30  ;;  %1369 = vst [vmem:[%s7531_s6 + $0x8f8] sm:$0xff] %v1368_v31 }
  0xa6 PF: > { %p5829_p8 = scmp.ge.s32.totalorder %s7448_s19, 1  ;;  %p1390_p9 = scmp.lt.s32.totalorder %s7448_s19, 3 }
  0xa8   : > { %p1391_p10 = pnand %p5829_p8, %p1390_p9 }
  0xaa   : > { %1394 = sbr.rel (%p1391_p10) target bundleno = 865 (0x361), region = 70 }
  0xb1   : > { %s1397_s7 = sand.u32 1, %s7432_s15   ;;  %v6732_v32 = vld [vmem:[%s9447_s0 + $0x4] ss:$72 sps:$4 sm:$0xff]   ;;  %s5831_s6 = sshll.u32 %s7440_s17, 1 }
  0xb2   : > { %s6593_s8 = smul.u32 2304, %s1397_s7  ;;  %v6735_v33 = vld [vmem:[%s9447_s0 + $0x24] ss:$72 sps:$4 sm:$0xff]   ;;  %4079 = vmatprep.mubr.bf16.mxu1 %v6732_v32  ;;  %p1444_p11 = scmp.lt.s32.totalorder %s5831_s6, 3 }
  0xb3   : > { %4531 = vmatprep.mubr.bf16.mxu0 %v6735_v33  ;;  %s5830_s21 = sshll.u32 %s1397_s7, 7  ;;  %s6303_s7 = sshll.u32 (%p7510_p6), %s7440_s17, 3 }
  0xb4   : > { %s8114_s13 = scalar_lea.vmem [#allocation2], %s6593_s8  ;;  %s9484_s6 = smov (!%p1444_p11, %s5831_s6), 3 }
  0xb5   : > { %v6634_v34 = vld [vmem:[%s8114_s13 + $0x4] ss:$8 sps:$4 sm:$0xff]   ;;  %v6638_v36 = vld [vmem:[%s8114_s13] ss:$8 sps:$4 sm:$0xff]   ;;  %v6640_v38 = vld [vmem:[%s8114_s13 + $0x14] ss:$8 sps:$4 sm:$0xff]   ;;  %s1446_s10 = scalar_lea.vmem %s9449_s2, %s9484_s6  ;;  %s1451_s14 = scalar_lea.vmem %s9450_s3, %s9484_s6 }
  0xb6   : > { %v6636_v35 = vld [vmem:[%s8114_s13 + $0x404] ss:$8 sps:$4 sm:$0xff]   ;;  %4047 = vmatprep.subr.bf16.mxu1 %v6634_v34  ;;  %v6639_v37 = vld [vmem:[%s8114_s13 + $0x400] ss:$8 sps:$4 sm:$0xff]   ;;  %v6642_v39 = vld [vmem:[%s8114_s13 + $0x414] ss:$8 sps:$4 sm:$0xff]   ;;  %s5628_s26 = scalar_lea.vmem (%p7510_p6), %s9451_s4, %s6303_s7 }
  0xb7   : > { %4499 = vmatprep.subr.bf16.mxu0 %v6636_v35  ;;  %4048 = vmatpush1.bf16.msra.mxu1 %v6638_v36  ;;  %v6644_v40 = vld [vmem:[%s8114_s13 + $0x10] ss:$8 sps:$4 sm:$0xff]   ;;  %v6646_v42 = vld [vmem:[%s8114_s13 + $0x24] ss:$8 sps:$4 sm:$0xff]   ;;  %v6650_v44 = vld [vmem:[%s8114_s13 + $0x20] ss:$8 sps:$4 sm:$0xff]  }
  0xb8   : > { %4500 = vmatpush1.bf16.msra.mxu0 %v6639_v37  ;;  %4049 = vmatprep.subr.bf16.mxu1 %v6640_v38  ;;  %v6645_v41 = vld [vmem:[%s8114_s13 + $0x410] ss:$8 sps:$4 sm:$0xff]   ;;  %v6648_v43 = vld [vmem:[%s8114_s13 + $0x424] ss:$8 sps:$4 sm:$0xff]   ;;  %v6651_v45 = vld [vmem:[%s8114_s13 + $0x420] ss:$8 sps:$4 sm:$0xff]  }
  0xb9   : > { %4501 = vmatprep.subr.bf16.mxu0 %v6642_v39  ;;  %v6652_v46 = vld [vmem:[%s8114_s13 + $0x34] ss:$8 sps:$4 sm:$0xff]   ;;  %v6656_v48 = vld [vmem:[%s8114_s13 + $0x30] ss:$8 sps:$4 sm:$0xff]   ;;  %v6658_v50 = vld [vmem:[%s8114_s13 + $0x44] ss:$8 sps:$4 sm:$0xff]  }
  0xba   : > { %v6654_v47 = vld [vmem:[%s8114_s13 + $0x434] ss:$8 sps:$4 sm:$0xff]   ;;  %v6657_v49 = vld [vmem:[%s8114_s13 + $0x430] ss:$8 sps:$4 sm:$0xff]   ;;  %v6660_v51 = vld [vmem:[%s8114_s13 + $0x444] ss:$8 sps:$4 sm:$0xff]  }
  0xbb   : > { %4050 = vmatpush1.bf16.msra.mxu1 %v6644_v40  ;;  %v6662_v52 = vld [vmem:[%s8114_s13 + $0x40] ss:$8 sps:$4 sm:$0xff]   ;;  %v6664_v54 = vld [vmem:[%s8114_s13 + $0x54] ss:$8 sps:$4 sm:$0xff]   ;;  %v6668_v56 = vld [vmem:[%s8114_s13 + $0x50] ss:$8 sps:$4 sm:$0xff]  }
  0xbc   : > { %4502 = vmatpush1.bf16.msra.mxu0 %v6645_v41  ;;  %4051 = vmatprep.subr.bf16.mxu1 %v6646_v42  ;;  %v6663_v53 = vld [vmem:[%s8114_s13 + $0x440] ss:$8 sps:$4 sm:$0xff]   ;;  %v6666_v55 = vld [vmem:[%s8114_s13 + $0x454] ss:$8 sps:$4 sm:$0xff]   ;;  %v6669_v57 = vld [vmem:[%s8114_s13 + $0x450] ss:$8 sps:$4 sm:$0xff]  }
  0xbd   : > { %4503 = vmatprep.subr.bf16.mxu0 %v6648_v43  ;;  %v6670_v58 = vld [vmem:[%s8114_s13 + $0x64] ss:$8 sps:$4 sm:$0xff]   ;;  %v6674_v60 = vld [vmem:[%s8114_s13 + $0x60] ss:$8 sps:$4 sm:$0xff]   ;;  %v6676_v62 = vld [vmem:[%s8114_s13 + $0x74] ss:$8 sps:$4 sm:$0xff]  }
  0xbe   : > { %v6672_v59 = vld [vmem:[%s8114_s13 + $0x464] ss:$8 sps:$4 sm:$0xff]   ;;  %v6675_v61 = vld [vmem:[%s8114_s13 + $0x460] ss:$8 sps:$4 sm:$0xff]   ;;  %v6678_v63 = vld [vmem:[%s8114_s13 + $0x474] ss:$8 sps:$4 sm:$0xff]  }
  0xbf   : > { %4052 = vmatpush1.bf16.msra.mxu1 %v6650_v44  ;;  %v6680_v0 = vld [vmem:[%s8114_s13 + $0x70] ss:$8 sps:$4 sm:$0xff]   ;;  %v6682_v2 = vld [vmem:[%s8114_s13 + $0x84] ss:$8 sps:$4 sm:$0xff]   ;;  %v6686_v4 = vld [vmem:[%s8114_s13 + $0x80] ss:$8 sps:$4 sm:$0xff]  }
  0xc0   : > { %4504 = vmatpush1.bf16.msra.mxu0 %v6651_v45  ;;  %4053 = vmatprep.subr.bf16.mxu1 %v6652_v46  ;;  %v6681_v1 = vld [vmem:[%s8114_s13 + $0x470] ss:$8 sps:$4 sm:$0xff]   ;;  %v6684_v3 = vld [vmem:[%s8114_s13 + $0x484] ss:$8 sps:$4 sm:$0xff]   ;;  %v6687_v5 = vld [vmem:[%s8114_s13 + $0x480] ss:$8 sps:$4 sm:$0xff]  }
  0xc1   : > { %4505 = vmatprep.subr.bf16.mxu0 %v6654_v47  ;;  %v6688_v6 = vld [vmem:[%s8114_s13 + $0x94] ss:$8 sps:$4 sm:$0xff]   ;;  %v6692_v8 = vld [vmem:[%s8114_s13 + $0x90] ss:$8 sps:$4 sm:$0xff]   ;;  %v6694_v10 = vld [vmem:[%s8114_s13 + $0xa4] ss:$8 sps:$4 sm:$0xff]  }
  0xc2   : > { %v6690_v7 = vld [vmem:[%s8114_s13 + $0x494] ss:$8 sps:$4 sm:$0xff]   ;;  %v6693_v9 = vld [vmem:[%s8114_s13 + $0x490] ss:$8 sps:$4 sm:$0xff]   ;;  %v6696_v11 = vld [vmem:[%s8114_s13 + $0x4a4] ss:$8 sps:$4 sm:$0xff]  }
  0xc3   : > { %4054 = vmatpush1.bf16.msra.mxu1 %v6656_v48  ;;  %v6698_v12 = vld [vmem:[%s8114_s13 + $0xa0] ss:$8 sps:$4 sm:$0xff]   ;;  %v6700_v14 = vld [vmem:[%s8114_s13 + $0xb4] ss:$8 sps:$4 sm:$0xff]   ;;  %v6704_v16 = vld [vmem:[%s8114_s13 + $0xb0] ss:$8 sps:$4 sm:$0xff]  }
  0xc4   : > { %4506 = vmatpush1.bf16.msra.mxu0 %v6657_v49  ;;  %4055 = vmatprep.subr.bf16.mxu1 %v6658_v50  ;;  %v6699_v13 = vld [vmem:[%s8114_s13 + $0x4a0] ss:$8 sps:$4 sm:$0xff]   ;;  %v6702_v15 = vld [vmem:[%s8114_s13 + $0x4b4] ss:$8 sps:$4 sm:$0xff]   ;;  %v6705_v17 = vld [vmem:[%s8114_s13 + $0x4b0] ss:$8 sps:$4 sm:$0xff]  }
  0xc5   : > { %4507 = vmatprep.subr.bf16.mxu0 %v6660_v51  ;;  %v6706_v18 = vld [vmem:[%s8114_s13 + $0xc4] ss:$8 sps:$4 sm:$0xff]   ;;  %v6710_v20 = vld [vmem:[%s8114_s13 + $0xc0] ss:$8 sps:$4 sm:$0xff]   ;;  %v6712_v22 = vld [vmem:[%s8114_s13 + $0xd4] ss:$8 sps:$4 sm:$0xff]  }
  0xc6   : > { %v6708_v19 = vld [vmem:[%s8114_s13 + $0x4c4] ss:$8 sps:$4 sm:$0xff]   ;;  %v6711_v21 = vld [vmem:[%s8114_s13 + $0x4c0] ss:$8 sps:$4 sm:$0xff]   ;;  %v6714_v23 = vld [vmem:[%s8114_s13 + $0x4d4] ss:$8 sps:$4 sm:$0xff]  }
  0xc7   : > { %4056 = vmatpush1.bf16.msra.mxu1 %v6662_v52  ;;  %v6716_v24 = vld [vmem:[%s8114_s13 + $0xd0] ss:$8 sps:$4 sm:$0xff]   ;;  %v6718_v26 = vld [vmem:[%s8114_s13 + $0xe4] ss:$8 sps:$4 sm:$0xff]   ;;  %v6722_v28 = vld [vmem:[%s8114_s13 + $0xe0] ss:$8 sps:$4 sm:$0xff]  }
  0xc8   : > { %4508 = vmatpush1.bf16.msra.mxu0 %v6663_v53  ;;  %4057 = vmatprep.subr.bf16.mxu1 %v6664_v54  ;;  %v6717_v25 = vld [vmem:[%s8114_s13 + $0x4d0] ss:$8 sps:$4 sm:$0xff]   ;;  %v6720_v27 = vld [vmem:[%s8114_s13 + $0x4e4] ss:$8 sps:$4 sm:$0xff]   ;;  %v6723_v29 = vld [vmem:[%s8114_s13 + $0x4e0] ss:$8 sps:$4 sm:$0xff]  }
  0xc9   : > { %4509 = vmatprep.subr.bf16.mxu0 %v6666_v55  ;;  %v6724_v30 = vld [vmem:[%s8114_s13 + $0xf4] ss:$8 sps:$4 sm:$0xff]   ;;  %v6728_v32 = vld [vmem:[%s8114_s13 + $0xf0] ss:$8 sps:$4 sm:$0xff]   ;;  %v6738_v34 = vld [vmem:[%s8114_s13 + $0x104] ss:$8 sps:$4 sm:$0xff]  }
  0xca   : > { %v6726_v31 = vld [vmem:[%s8114_s13 + $0x4f4] ss:$8 sps:$4 sm:$0xff]   ;;  %v6729_v33 = vld [vmem:[%s8114_s13 + $0x4f0] ss:$8 sps:$4 sm:$0xff]   ;;  %v6741_v35 = vld [vmem:[%s8114_s13 + $0x504] ss:$8 sps:$4 sm:$0xff]  }
  0xcb   : > { %4058 = vmatpush1.bf16.msra.mxu1 %v6668_v56  ;;  %v6730_v36 = vld [vmem:[%s9447_s0] ss:$72 sps:$4 sm:$0xff]   ;;  %v6744_v40 = vld [vmem:[%s8114_s13 + $0x114] ss:$8 sps:$4 sm:$0xff]   ;;  %v6742_v44 = vld [vmem:[%s8114_s13 + $0x110] ss:$8 sps:$4 sm:$0xff]  }
  0xcc   : > { %4510 = vmatpush1.bf16.msra.mxu0 %v6669_v57  ;;  %4059 = vmatprep.subr.bf16.mxu1 %v6670_v58  ;;  %v6733_v37 = vld [vmem:[%s9447_s0 + $0x20] ss:$72 sps:$4 sm:$0xff]   ;;  %v6747_v41 = vld [vmem:[%s8114_s13 + $0x514] ss:$8 sps:$4 sm:$0xff]   ;;  %v6745_v45 = vld [vmem:[%s8114_s13 + $0x510] ss:$8 sps:$4 sm:$0xff]  }
  0xcd   : > { %4511 = vmatprep.subr.bf16.mxu0 %v6672_v59  ;;  %v6736_v38 = vld [vmem:[%s8114_s13 + $0x100] ss:$8 sps:$4 sm:$0xff]   ;;  %v6748_v42 = vld [vmem:[%s9447_s0 + $0x94] ss:$72 sps:$4 sm:$0xff]   ;;  %v6755_v46 = vld [vmem:[%s8114_s13 + $0x124] ss:$8 sps:$4 sm:$0xff]  }
  0xce   : > { %v6739_v39 = vld [vmem:[%s8114_s13 + $0x500] ss:$8 sps:$4 sm:$0xff]   ;;  %v6750_v43 = vld [vmem:[%s9447_s0 + $0xb4] ss:$72 sps:$4 sm:$0xff]   ;;  %v6759_v47 = vld [vmem:[%s8114_s13 + $0x524] ss:$8 sps:$4 sm:$0xff]  }
  0xcf   : > { %4060 = vmatpush1.bf16.msra.mxu1 %v6674_v60  ;;  %v6752_v48 = vld [vmem:[%s9447_s0 + $0x90] ss:$72 sps:$4 sm:$0xff]   ;;  %v6753_v49 = vld [vmem:[%s8114_s13 + $0x120] ss:$8 sps:$4 sm:$0xff]   ;;  %v6762_v52 = vld [vmem:[%s8114_s13 + $0x134] ss:$8 sps:$4 sm:$0xff]  }
  0xd0   : > { %4512 = vmatpush1.bf16.msra.mxu0 %v6675_v61  ;;  %4061 = vmatprep.subr.bf16.mxu1 %v6676_v62  ;;  %v6756_v50 = vld [vmem:[%s9447_s0 + $0xb0] ss:$72 sps:$4 sm:$0xff]   ;;  %v6757_v51 = vld [vmem:[%s8114_s13 + $0x520] ss:$8 sps:$4 sm:$0xff]   ;;  %v6765_v53 = vld [vmem:[%s8114_s13 + $0x534] ss:$8 sps:$4 sm:$0xff]  }
  0xd1   : > { %4513 = vmatprep.subr.bf16.mxu0 %v6678_v63  ;;  %v6766_v54 = vld [vmem:[%s9447_s0 + $0x124] ss:$72 sps:$4 sm:$0xff]   ;;  %v6760_v56 = vld [vmem:[%s8114_s13 + $0x130] ss:$8 sps:$4 sm:$0xff]   ;;  %v6770_v60 = vld [vmem:[%s9447_s0 + $0x120] ss:$72 sps:$4 sm:$0xff]  }
  0xd2   : > { %v6768_v55 = vld [vmem:[%s9447_s0 + $0x144] ss:$72 sps:$4 sm:$0xff]   ;;  %v6763_v57 = vld [vmem:[%s8114_s13 + $0x530] ss:$8 sps:$4 sm:$0xff]   ;;  %v6771_v61 = vld [vmem:[%s8114_s13 + $0x140] ss:$8 sps:$4 sm:$0xff]  }
  0xd3   : > { %4062 = vmatpush1.bf16.msra.mxu1 %v6680_v0  ;;  %v6773_v58 = vld [vmem:[%s8114_s13 + $0x144] ss:$8 sps:$4 sm:$0xff]   ;;  %v6774_v62 = vld [vmem:[%s9447_s0 + $0x140] ss:$72 sps:$4 sm:$0xff]   ;;  %v6780_v0 = vld [vmem:[%s8114_s13 + $0x154] ss:$8 sps:$4 sm:$0xff]  }
  0xd4   : > { %4514 = vmatpush1.bf16.msra.mxu0 %v6681_v1  ;;  %4063 = vmatprep.subr.bf16.mxu1 %v6682_v2  ;;  %v6777_v59 = vld [vmem:[%s8114_s13 + $0x544] ss:$8 sps:$4 sm:$0xff]   ;;  %v6775_v63 = vld [vmem:[%s8114_s13 + $0x540] ss:$8 sps:$4 sm:$0xff]   ;;  %v6783_v1 = vld [vmem:[%s8114_s13 + $0x554] ss:$8 sps:$4 sm:$0xff]  }
  0xd5   : > { %4515 = vmatprep.subr.bf16.mxu0 %v6684_v3  ;;  %v6784_v2 = vld [vmem:[%s9447_s0 + $0x1b4] ss:$72 sps:$4 sm:$0xff]   ;;  %s9127_s15 = scalar_lea.vmem [#allocation3], %s5830_s21 }
  0xd6   : > { %v6786_v3 = vld [vmem:[%s9447_s0 + $0x1d4] ss:$72 sps:$4 sm:$0xff]  }
  0xd7   : > { %4064 = vmatpush1.bf16.msra.mxu1 %v6686_v4  ;;  %v6778_v4 = vld [vmem:[%s8114_s13 + $0x150] ss:$8 sps:$4 sm:$0xff]  }
  0xd8   : > { %4516 = vmatpush1.bf16.msra.mxu0 %v6687_v5  ;;  %4065 = vmatprep.subr.bf16.mxu1 %v6688_v6  ;;  %v6781_v5 = vld [vmem:[%s8114_s13 + $0x550] ss:$8 sps:$4 sm:$0xff]   ;;  %v6791_v6 = vld [vmem:[%s8114_s13 + $0x164] ss:$8 sps:$4 sm:$0xff]  }
  0xd9   : > { %4517 = vmatprep.subr.bf16.mxu0 %v6690_v7  ;;  %v6795_v7 = vld [vmem:[%s8114_s13 + $0x564] ss:$8 sps:$4 sm:$0xff]  }
  0xdb   : > { %4066 = vmatpush1.bf16.msra.mxu1 %v6692_v8  ;;  %v6788_v8 = vld [vmem:[%s9447_s0 + $0x1b0] ss:$72 sps:$4 sm:$0xff]  }
  0xdc   : > { %4518 = vmatpush1.bf16.msra.mxu0 %v6693_v9  ;;  %4067 = vmatprep.subr.bf16.mxu1 %v6694_v10  ;;  %v6789_v9 = vld [vmem:[%s8114_s13 + $0x160] ss:$8 sps:$4 sm:$0xff]   ;;  %v6792_v10 = vld [vmem:[%s9447_s0 + $0x1d0] ss:$72 sps:$4 sm:$0xff]  }
  0xdd   : > { %4519 = vmatprep.subr.bf16.mxu0 %v6696_v11  ;;  %v6793_v11 = vld [vmem:[%s8114_s13 + $0x560] ss:$8 sps:$4 sm:$0xff]  }
  0xdf   : > { %4068 = vmatpush1.bf16.msra.mxu1 %v6698_v12  ;;  %v6798_v12 = vld [vmem:[%s8114_s13 + $0x174] ss:$8 sps:$4 sm:$0xff]  }
  0xe0   : > { %4520 = vmatpush1.bf16.msra.mxu0 %v6699_v13  ;;  %4069 = vmatprep.subr.bf16.mxu1 %v6700_v14  ;;  %v6801_v13 = vld [vmem:[%s8114_s13 + $0x574] ss:$8 sps:$4 sm:$0xff]   ;;  %v6802_v14 = vld [vmem:[%s9447_s0 + $0x244] ss:$72 sps:$4 sm:$0xff]  }
  0xe1   : > { %4521 = vmatprep.subr.bf16.mxu0 %v6702_v15  ;;  %v6804_v15 = vld [vmem:[%s9447_s0 + $0x264] ss:$72 sps:$4 sm:$0xff]  }
  0xe3   : > { %4070 = vmatpush1.bf16.msra.mxu1 %v6704_v16  ;;  %v6796_v16 = vld [vmem:[%s8114_s13 + $0x170] ss:$8 sps:$4 sm:$0xff]  }
  0xe4   : > { %4522 = vmatpush1.bf16.msra.mxu0 %v6705_v17  ;;  %4071 = vmatprep.subr.bf16.mxu1 %v6706_v18  ;;  %v6799_v17 = vld [vmem:[%s8114_s13 + $0x570] ss:$8 sps:$4 sm:$0xff]   ;;  %v6809_v18 = vld [vmem:[%s8114_s13 + $0x184] ss:$8 sps:$4 sm:$0xff]  }
  0xe5   : > { %4523 = vmatprep.subr.bf16.mxu0 %v6708_v19  ;;  %v6813_v19 = vld [vmem:[%s8114_s13 + $0x584] ss:$8 sps:$4 sm:$0xff]  }
  0xe7   : > { %4072 = vmatpush1.bf16.msra.mxu1 %v6710_v20  ;;  %v6806_v20 = vld [vmem:[%s9447_s0 + $0x240] ss:$72 sps:$4 sm:$0xff]  }
  0xe8   : > { %4524 = vmatpush1.bf16.msra.mxu0 %v6711_v21  ;;  %4073 = vmatprep.subr.bf16.mxu1 %v6712_v22  ;;  %v6807_v21 = vld [vmem:[%s8114_s13 + $0x180] ss:$8 sps:$4 sm:$0xff]  }
  0xe9   : > { %4525 = vmatprep.subr.bf16.mxu0 %v6714_v23  ;;  %v6810_v22 = vld [vmem:[%s9447_s0 + $0x260] ss:$72 sps:$4 sm:$0xff]  }
  0xea   : > { %v6811_v23 = vld [vmem:[%s8114_s13 + $0x580] ss:$8 sps:$4 sm:$0xff]  }
  0xeb   : > { %4074 = vmatpush1.bf16.msra.mxu1 %v6716_v24  ;;  %v6816_v24 = vld [vmem:[%s8114_s13 + $0x194] ss:$8 sps:$4 sm:$0xff]  }
  0xec   : > { %4526 = vmatpush1.bf16.msra.mxu0 %v6717_v25  ;;  %4075 = vmatprep.subr.bf16.mxu1 %v6718_v26  ;;  %v6819_v25 = vld [vmem:[%s8114_s13 + $0x594] ss:$8 sps:$4 sm:$0xff]  }
  0xed   : > { %4527 = vmatprep.subr.bf16.mxu0 %v6720_v27  ;;  %v6820_v26 = vld [vmem:[%s9447_s0 + $0x2d4] ss:$72 sps:$4 sm:$0xff]  }
  0xee   : > { %v6822_v27 = vld [vmem:[%s9447_s0 + $0x2f4] ss:$72 sps:$4 sm:$0xff]  }
  0xef   : > { %4076 = vmatpush1.bf16.msra.mxu1 %v6722_v28  ;;  %v6814_v28 = vld [vmem:[%s8114_s13 + $0x190] ss:$8 sps:$4 sm:$0xff]  }
  0xf0   : > { %4528 = vmatpush1.bf16.msra.mxu0 %v6723_v29  ;;  %4077 = vmatprep.subr.bf16.mxu1 %v6724_v30  ;;  %v6817_v29 = vld [vmem:[%s8114_s13 + $0x590] ss:$8 sps:$4 sm:$0xff]   ;;  %v6827_v30 = vld [vmem:[%s8114_s13 + $0x1a4] ss:$8 sps:$4 sm:$0xff]  }
  0xf1   : > { %4529 = vmatprep.subr.bf16.mxu0 %v6726_v31  ;;  %v6831_v31 = vld [vmem:[%s8114_s13 + $0x5a4] ss:$8 sps:$4 sm:$0xff]  }
  0xf3   : > { %4078 = vmatpush1.bf16.msra.mxu1 %v6728_v32  ;;  %v6824_v32 = vld [vmem:[%s9447_s0 + $0x2d0] ss:$72 sps:$4 sm:$0xff]  }
  0xf4   : > { %4530 = vmatpush1.bf16.msra.mxu0 %v6729_v33  ;;  %4160 = vmatprep.subr.bf16.mxu1 %v6738_v34  ;;  %v6825_v33 = vld [vmem:[%s8114_s13 + $0x1a0] ss:$8 sps:$4 sm:$0xff]   ;;  %v6828_v34 = vld [vmem:[%s9447_s0 + $0x2f0] ss:$72 sps:$4 sm:$0xff]  }
  0xf5   : > { %4612 = vmatprep.subr.bf16.mxu0 %v6741_v35  ;;  %v6829_v35 = vld [vmem:[%s8114_s13 + $0x5a0] ss:$8 sps:$4 sm:$0xff]  }
  0xf6   : > { %4080 = vmatmul.mubr.bf16.vlgmr.msra.gmra.mrb[0].mxu1 %v6730_v36  ;;  %v6834_v36 = vld [vmem:[%s8114_s13 + $0x1b4] ss:$8 sps:$4 sm:$0xff]  }
  0xf7   : > { %4532 = vmatmul.mubr.bf16.vlgmr.msra.gmra.mrb[0].mxu0 %v6733_v37  ;;  %4161 = vmatpush1.bf16.msra.mxu1 %v6736_v38  ;;  %v6837_v37 = vld [vmem:[%s8114_s13 + $0x5b4] ss:$8 sps:$4 sm:$0xff]   ;;  %v6838_v38 = vld [vmem:[%s9447_s0 + $0x364] ss:$72 sps:$4 sm:$0xff]  }
  0xf8   : > { %4613 = vmatpush1.bf16.msra.mxu0 %v6739_v39  ;;  %4162 = vmatprep.subr.bf16.mxu1 %v6744_v40  ;;  %v6840_v39 = vld [vmem:[%s9447_s0 + $0x384] ss:$72 sps:$4 sm:$0xff]   ;;  %v6832_v40 = vld [vmem:[%s8114_s13 + $0x1b0] ss:$8 sps:$4 sm:$0xff]  }
  0xf9   : > { %4614 = vmatprep.subr.bf16.mxu0 %v6747_v41  ;;  %4089 = vmatprep.mubr.bf16.mxu1 %v6748_v42  ;;  %v6835_v41 = vld [vmem:[%s8114_s13 + $0x5b0] ss:$8 sps:$4 sm:$0xff]   ;;  %v6845_v42 = vld [vmem:[%s8114_s13 + $0x1c4] ss:$8 sps:$4 sm:$0xff]  }
  0xfa   : > { %4541 = vmatprep.mubr.bf16.mxu0 %v6750_v43  ;;  %v6849_v43 = vld [vmem:[%s8114_s13 + $0x5c4] ss:$8 sps:$4 sm:$0xff]  }
  0xfb   : > { %4163 = vmatpush1.bf16.msra.mxu1 %v6742_v44  ;;  %v6842_v44 = vld [vmem:[%s9447_s0 + $0x360] ss:$72 sps:$4 sm:$0xff]  }
  0xfc   : > { %4615 = vmatpush1.bf16.msra.mxu0 %v6745_v45  ;;  %4164 = vmatprep.subr.bf16.mxu1 %v6755_v46  ;;  %v6843_v45 = vld [vmem:[%s8114_s13 + $0x1c0] ss:$8 sps:$4 sm:$0xff]  }
  0xfd   : > { %4616 = vmatprep.subr.bf16.mxu0 %v6759_v47  ;;  %v6846_v46 = vld [vmem:[%s9447_s0 + $0x380] ss:$72 sps:$4 sm:$0xff]  }
  0xfe   : > { %4090 = vmatmul.mubr.bf16.gmra.mrb[4].mxu1 %v6752_v48  ;;  %v6847_v47 = vld [vmem:[%s8114_s13 + $0x5c0] ss:$8 sps:$4 sm:$0xff]   ;;  %v6852_v48 = vld [vmem:[%s8114_s13 + $0x1d4] ss:$8 sps:$4 sm:$0xff]  }
  0xff   : > { %4542 = vmatmul.mubr.bf16.gmra.mrb[4].mxu0 %v6756_v50  ;;  %4165 = vmatpush1.bf16.msra.mxu1 %v6753_v49  ;;  %v6855_v49 = vld [vmem:[%s8114_s13 + $0x5d4] ss:$8 sps:$4 sm:$0xff]  }
 0x100   : > { %4617 = vmatpush1.bf16.msra.mxu0 %v6757_v51  ;;  %4166 = vmatprep.subr.bf16.mxu1 %v6762_v52  ;;  %v6856_v50 = vld [vmem:[%s9447_s0 + $0x3f4] ss:$72 sps:$4 sm:$0xff]   ;;  %v6850_v52 = vld [vmem:[%s8114_s13 + $0x1d0] ss:$8 sps:$4 sm:$0xff]  }
 0x101   : > { %4618 = vmatprep.subr.bf16.mxu0 %v6765_v53  ;;  %4099 = vmatprep.mubr.bf16.mxu1 %v6766_v54  ;;  %v6858_v51 = vld [vmem:[%s9447_s0 + $0x414] ss:$72 sps:$4 sm:$0xff]   ;;  %v6853_v53 = vld [vmem:[%s8114_s13 + $0x5d0] ss:$8 sps:$4 sm:$0xff]   ;;  %v6863_v54 = vld [vmem:[%s8114_s13 + $0x1e4] ss:$8 sps:$4 sm:$0xff]  }
 0x102   : > { %4551 = vmatprep.mubr.bf16.mxu0 %v6768_v55  ;;  %v6867_v55 = vld [vmem:[%s8114_s13 + $0x5e4] ss:$8 sps:$4 sm:$0xff]  }
 0x103   : > { %4167 = vmatpush1.bf16.msra.mxu1 %v6760_v56  ;;  %v6860_v56 = vld [vmem:[%s9447_s0 + $0x3f0] ss:$72 sps:$4 sm:$0xff]  }
 0x104   : > { %4619 = vmatpush1.bf16.msra.mxu0 %v6763_v57  ;;  %4168 = vmatprep.subr.bf16.mxu1 %v6773_v58  ;;  %v6861_v57 = vld [vmem:[%s8114_s13 + $0x1e0] ss:$8 sps:$4 sm:$0xff]   ;;  %v6864_v58 = vld [vmem:[%s9447_s0 + $0x410] ss:$72 sps:$4 sm:$0xff]  }
 0x105   : > { %4620 = vmatprep.subr.bf16.mxu0 %v6777_v59  ;;  %v6865_v59 = vld [vmem:[%s8114_s13 + $0x5e0] ss:$8 sps:$4 sm:$0xff]  }
 0x106   : > { %4100 = vmatmul.mubr.bf16.gmra.mrb[8].mxu1 %v6770_v60  ;;  %v6870_v60 = vld [vmem:[%s8114_s13 + $0x1f4] ss:$8 sps:$4 sm:$0xff]  }
 0x107   : > { %4552 = vmatmul.mubr.bf16.gmra.mrb[8].mxu0 %v6774_v62  ;;  %4169 = vmatpush1.bf16.msra.mxu1 %v6771_v61  ;;  %v6873_v61 = vld [vmem:[%s8114_s13 + $0x5f4] ss:$8 sps:$4 sm:$0xff]  }
 0x108   : > { %4621 = vmatpush1.bf16.msra.mxu0 %v6775_v63  ;;  %4170 = vmatprep.subr.bf16.mxu1 %v6780_v0  ;;  %v6876_v62 = vld [vmem:[%s9447_s0 + $0xc] ss:$72 sps:$4 sm:$0xff]   ;;  %v6868_v0 = vld [vmem:[%s8114_s13 + $0x1f0] ss:$8 sps:$4 sm:$0xff]  }
 0x109   : > { %4622 = vmatprep.subr.bf16.mxu0 %v6783_v1  ;;  %4109 = vmatprep.mubr.bf16.mxu1 %v6784_v2  ;;  %v6879_v63 = vld [vmem:[%s9447_s0 + $0x2c] ss:$72 sps:$4 sm:$0xff]   ;;  %v6871_v1 = vld [vmem:[%s8114_s13 + $0x5f0] ss:$8 sps:$4 sm:$0xff]  }
 0x10a   : > { %4561 = vmatprep.mubr.bf16.mxu0 %v6786_v3  ;;  %v6882_v2 = vld [vmem:[%s8114_s13 + $0x204] ss:$8 sps:$4 sm:$0xff]  }
 0x10b   : > { %4171 = vmatpush1.bf16.msra.mxu1 %v6778_v4  ;;  %v6885_v3 = vld [vmem:[%s8114_s13 + $0x604] ss:$8 sps:$4 sm:$0xff]   ;;  %v6874_v4 = vld [vmem:[%s9447_s0 + $0x8] ss:$72 sps:$4 sm:$0xff]  }
 0x10c   : > { %4623 = vmatpush1.bf16.msra.mxu0 %v6781_v5  ;;  %4172 = vmatprep.subr.bf16.mxu1 %v6791_v6  ;;  %v6877_v5 = vld [vmem:[%s9447_s0 + $0x28] ss:$72 sps:$4 sm:$0xff]  }
 0x10d   : > { %4624 = vmatprep.subr.bf16.mxu0 %v6795_v7  ;;  %v6880_v6 = vld [vmem:[%s8114_s13 + $0x200] ss:$8 sps:$4 sm:$0xff]  }
 0x10e   : > { %4110 = vmatmul.mubr.bf16.gmra.mrb[12].mxu1 %v6788_v8  ;;  %v6883_v7 = vld [vmem:[%s8114_s13 + $0x600] ss:$8 sps:$4 sm:$0xff]   ;;  %v6888_v8 = vld [vmem:[%s8114_s13 + $0x214] ss:$8 sps:$4 sm:$0xff]  }
 0x10f   : > { %4562 = vmatmul.mubr.bf16.gmra.mrb[12].mxu0 %v6792_v10  ;;  %4173 = vmatpush1.bf16.msra.mxu1 %v6789_v9  ;;  %v6891_v9 = vld [vmem:[%s8114_s13 + $0x614] ss:$8 sps:$4 sm:$0xff]  }
 0x110   : > { %4625 = vmatpush1.bf16.msra.mxu0 %v6793_v11  ;;  %4174 = vmatprep.subr.bf16.mxu1 %v6798_v12  ;;  %v6892_v10 = vld [vmem:[%s9447_s0 + $0x9c] ss:$72 sps:$4 sm:$0xff]   ;;  %v6886_v12 = vld [vmem:[%s8114_s13 + $0x210] ss:$8 sps:$4 sm:$0xff]  }
 0x111   : > { %4626 = vmatprep.subr.bf16.mxu0 %v6801_v13  ;;  %4119 = vmatprep.mubr.bf16.mxu1 %v6802_v14  ;;  %v6894_v11 = vld [vmem:[%s9447_s0 + $0xbc] ss:$72 sps:$4 sm:$0xff]   ;;  %v6889_v13 = vld [vmem:[%s8114_s13 + $0x610] ss:$8 sps:$4 sm:$0xff]  }
 0x112   : > { %4571 = vmatprep.mubr.bf16.mxu0 %v6804_v15  ;;  %v6899_v14 = vld [vmem:[%s8114_s13 + $0x224] ss:$8 sps:$4 sm:$0xff]  }
 0x113   : > { %4175 = vmatpush1.bf16.msra.mxu1 %v6796_v16  ;;  %v6903_v15 = vld [vmem:[%s8114_s13 + $0x624] ss:$8 sps:$4 sm:$0xff]   ;;  %v6896_v16 = vld [vmem:[%s9447_s0 + $0x98] ss:$72 sps:$4 sm:$0xff]  }
 0x114   : > { %4627 = vmatpush1.bf16.msra.mxu0 %v6799_v17  ;;  %4176 = vmatprep.subr.bf16.mxu1 %v6809_v18  ;;  %v6897_v17 = vld [vmem:[%s8114_s13 + $0x220] ss:$8 sps:$4 sm:$0xff]  }
 0x115   : > { %4628 = vmatprep.subr.bf16.mxu0 %v6813_v19  ;;  %v6900_v18 = vld [vmem:[%s9447_s0 + $0xb8] ss:$72 sps:$4 sm:$0xff]  }
 0x116   : > { %4120 = vmatmul.mubr.bf16.gmra.mrb[16].mxu1 %v6806_v20  ;;  %v6901_v19 = vld [vmem:[%s8114_s13 + $0x620] ss:$8 sps:$4 sm:$0xff]   ;;  %v6906_v20 = vld [vmem:[%s8114_s13 + $0x234] ss:$8 sps:$4 sm:$0xff]  }
 0x117   : > { %4572 = vmatmul.mubr.bf16.gmra.mrb[16].mxu0 %v6810_v22  ;;  %4177 = vmatpush1.bf16.msra.mxu1 %v6807_v21  ;;  %v6909_v21 = vld [vmem:[%s8114_s13 + $0x634] ss:$8 sps:$4 sm:$0xff]  }
 0x118   : > { %4629 = vmatpush1.bf16.msra.mxu0 %v6811_v23  ;;  %4178 = vmatprep.subr.bf16.mxu1 %v6816_v24  ;;  %v6910_v22 = vld [vmem:[%s9447_s0 + $0x12c] ss:$72 sps:$4 sm:$0xff]   ;;  %v6904_v24 = vld [vmem:[%s8114_s13 + $0x230] ss:$8 sps:$4 sm:$0xff]  }
 0x119   : > { %4630 = vmatprep.subr.bf16.mxu0 %v6819_v25  ;;  %4129 = vmatprep.mubr.bf16.mxu1 %v6820_v26  ;;  %v6912_v23 = vld [vmem:[%s9447_s0 + $0x14c] ss:$72 sps:$4 sm:$0xff]   ;;  %v6907_v25 = vld [vmem:[%s8114_s13 + $0x630] ss:$8 sps:$4 sm:$0xff]  }
 0x11a   : > { %4581 = vmatprep.mubr.bf16.mxu0 %v6822_v27  ;;  %v6917_v26 = vld [vmem:[%s8114_s13 + $0x244] ss:$8 sps:$4 sm:$0xff]  }
 0x11b   : > { %4179 = vmatpush1.bf16.msra.mxu1 %v6814_v28  ;;  %v6921_v27 = vld [vmem:[%s8114_s13 + $0x644] ss:$8 sps:$4 sm:$0xff]   ;;  %v6914_v28 = vld [vmem:[%s9447_s0 + $0x128] ss:$72 sps:$4 sm:$0xff]  }
 0x11c   : > { %4631 = vmatpush1.bf16.msra.mxu0 %v6817_v29  ;;  %4180 = vmatprep.subr.bf16.mxu1 %v6827_v30  ;;  %v6915_v29 = vld [vmem:[%s8114_s13 + $0x240] ss:$8 sps:$4 sm:$0xff]  }
 0x11d   : > { %4632 = vmatprep.subr.bf16.mxu0 %v6831_v31  ;;  %v6918_v30 = vld [vmem:[%s9447_s0 + $0x148] ss:$72 sps:$4 sm:$0xff]  }
 0x11e   : > { %4130 = vmatmul.mubr.bf16.gmra.mrb[20].mxu1 %v6824_v32  ;;  %v6919_v31 = vld [vmem:[%s8114_s13 + $0x640] ss:$8 sps:$4 sm:$0xff]   ;;  %v6924_v32 = vld [vmem:[%s8114_s13 + $0x254] ss:$8 sps:$4 sm:$0xff]  }
 0x11f   : > { %4582 = vmatmul.mubr.bf16.gmra.mrb[20].mxu0 %v6828_v34  ;;  %4181 = vmatpush1.bf16.msra.mxu1 %v6825_v33  ;;  %v6927_v33 = vld [vmem:[%s8114_s13 + $0x654] ss:$8 sps:$4 sm:$0xff]  }
 0x120   : > { %4633 = vmatpush1.bf16.msra.mxu0 %v6829_v35  ;;  %4182 = vmatprep.subr.bf16.mxu1 %v6834_v36  ;;  %v6928_v34 = vld [vmem:[%s9447_s0 + $0x1bc] ss:$72 sps:$4 sm:$0xff]   ;;  %v6922_v36 = vld [vmem:[%s8114_s13 + $0x250] ss:$8 sps:$4 sm:$0xff]  }
 0x121   : > { %4634 = vmatprep.subr.bf16.mxu0 %v6837_v37  ;;  %4139 = vmatprep.mubr.bf16.mxu1 %v6838_v38  ;;  %v6930_v35 = vld [vmem:[%s9447_s0 + $0x1dc] ss:$72 sps:$4 sm:$0xff]   ;;  %v6925_v37 = vld [vmem:[%s8114_s13 + $0x650] ss:$8 sps:$4 sm:$0xff]  }
 0x122   : > { %4591 = vmatprep.mubr.bf16.mxu0 %v6840_v39  ;;  %v6935_v38 = vld [vmem:[%s8114_s13 + $0x264] ss:$8 sps:$4 sm:$0xff]  }
 0x123   : > { %4183 = vmatpush1.bf16.msra.mxu1 %v6832_v40  ;;  %v6939_v39 = vld [vmem:[%s8114_s13 + $0x664] ss:$8 sps:$4 sm:$0xff]   ;;  %v6932_v40 = vld [vmem:[%s9447_s0 + $0x1b8] ss:$72 sps:$4 sm:$0xff]  }
 0x124   : > { %4635 = vmatpush1.bf16.msra.mxu0 %v6835_v41  ;;  %4184 = vmatprep.subr.bf16.mxu1 %v6845_v42  ;;  %v6933_v41 = vld [vmem:[%s8114_s13 + $0x260] ss:$8 sps:$4 sm:$0xff]  }
 0x125   : > { %4636 = vmatprep.subr.bf16.mxu0 %v6849_v43  ;;  %v6936_v42 = vld [vmem:[%s9447_s0 + $0x1d8] ss:$72 sps:$4 sm:$0xff]  }
 0x126   : > { %4140 = vmatmul.mubr.bf16.gmra.mrb[24].mxu1 %v6842_v44  ;;  %v6937_v43 = vld [vmem:[%s8114_s13 + $0x660] ss:$8 sps:$4 sm:$0xff]   ;;  %v6942_v44 = vld [vmem:[%s8114_s13 + $0x274] ss:$8 sps:$4 sm:$0xff]  }
 0x127   : > { %4592 = vmatmul.mubr.bf16.gmra.mrb[24].mxu0 %v6846_v46  ;;  %4185 = vmatpush1.bf16.msra.mxu1 %v6843_v45  ;;  %v6945_v45 = vld [vmem:[%s8114_s13 + $0x674] ss:$8 sps:$4 sm:$0xff]  }
 0x128   : > { %4637 = vmatpush1.bf16.msra.mxu0 %v6847_v47  ;;  %4186 = vmatprep.subr.bf16.mxu1 %v6852_v48  ;;  %v6946_v46 = vld [vmem:[%s9447_s0 + $0x24c] ss:$72 sps:$4 sm:$0xff]   ;;  %v6940_v48 = vld [vmem:[%s8114_s13 + $0x270] ss:$8 sps:$4 sm:$0xff]  }
 0x129   : > { %4638 = vmatprep.subr.bf16.mxu0 %v6855_v49  ;;  %4149 = vmatprep.mubr.bf16.mxu1 %v6856_v50  ;;  %v6948_v47 = vld [vmem:[%s9447_s0 + $0x26c] ss:$72 sps:$4 sm:$0xff]   ;;  %v6943_v49 = vld [vmem:[%s8114_s13 + $0x670] ss:$8 sps:$4 sm:$0xff]  }
 0x12a   : > { %4601 = vmatprep.mubr.bf16.mxu0 %v6858_v51  ;;  %v6953_v50 = vld [vmem:[%s8114_s13 + $0x284] ss:$8 sps:$4 sm:$0xff]  }
 0x12b   : > { %4187 = vmatpush1.bf16.msra.mxu1 %v6850_v52  ;;  %v6957_v51 = vld [vmem:[%s8114_s13 + $0x684] ss:$8 sps:$4 sm:$0xff]   ;;  %v6950_v52 = vld [vmem:[%s9447_s0 + $0x248] ss:$72 sps:$4 sm:$0xff]  }
 0x12c   : > { %4639 = vmatpush1.bf16.msra.mxu0 %v6853_v53  ;;  %4188 = vmatprep.subr.bf16.mxu1 %v6863_v54  ;;  %v6951_v53 = vld [vmem:[%s8114_s13 + $0x280] ss:$8 sps:$4 sm:$0xff]  }
 0x12d   : > { %4640 = vmatprep.subr.bf16.mxu0 %v6867_v55  ;;  %v6954_v54 = vld [vmem:[%s9447_s0 + $0x268] ss:$72 sps:$4 sm:$0xff]  }
 0x12e   : > { %4150 = vmatmul.mubr.bf16.gmra.mrb[28].mxu1 %v6860_v56  ;;  %v6955_v55 = vld [vmem:[%s8114_s13 + $0x680] ss:$8 sps:$4 sm:$0xff]   ;;  %v6960_v56 = vld [vmem:[%s8114_s13 + $0x294] ss:$8 sps:$4 sm:$0xff]  }
 0x12f   : > { %4602 = vmatmul.mubr.bf16.gmra.mrb[28].mxu0 %v6864_v58  ;;  %4189 = vmatpush1.bf16.msra.mxu1 %v6861_v57  ;;  %v6963_v57 = vld [vmem:[%s8114_s13 + $0x694] ss:$8 sps:$4 sm:$0xff]  }
 0x130   : > { %4641 = vmatpush1.bf16.msra.mxu0 %v6865_v59  ;;  %4190 = vmatprep.subr.bf16.mxu1 %v6870_v60  ;;  %v6964_v58 = vld [vmem:[%s9447_s0 + $0x2dc] ss:$72 sps:$4 sm:$0xff]   ;;  %v6958_v60 = vld [vmem:[%s8114_s13 + $0x290] ss:$8 sps:$4 sm:$0xff]  }
 0x131   : > { %4642 = vmatprep.subr.bf16.mxu0 %v6873_v61  ;;  %4192 = vmatprep.mubr.bf16.mxu1 %v6876_v62  ;;  %v6966_v59 = vld [vmem:[%s9447_s0 + $0x2fc] ss:$72 sps:$4 sm:$0xff]   ;;  %v6961_v61 = vld [vmem:[%s8114_s13 + $0x690] ss:$8 sps:$4 sm:$0xff]  }
 0x132   : > { %4644 = vmatprep.mubr.bf16.mxu0 %v6879_v63  ;;  %v6971_v62 = vld [vmem:[%s8114_s13 + $0x2a4] ss:$8 sps:$4 sm:$0xff]  }
 0x133   : > { %4191 = vmatpush1.bf16.msra.mxu1 %v6868_v0  ;;  %v6975_v63 = vld [vmem:[%s8114_s13 + $0x6a4] ss:$8 sps:$4 sm:$0xff]   ;;  %v6968_v0 = vld [vmem:[%s9447_s0 + $0x2d8] ss:$72 sps:$4 sm:$0xff]  }
 0x134   : > { %4643 = vmatpush1.bf16.msra.mxu0 %v6871_v1  ;;  %4273 = vmatprep.subr.bf16.mxu1 %v6882_v2  ;;  %v6969_v1 = vld [vmem:[%s8114_s13 + $0x2a0] ss:$8 sps:$4 sm:$0xff]  }
 0x135   : > { %4725 = vmatprep.subr.bf16.mxu0 %v6885_v3  ;;  %v6972_v2 = vld [vmem:[%s9447_s0 + $0x2f8] ss:$72 sps:$4 sm:$0xff]  }
 0x136   : > { %4193 = vmatmul.mubr.bf16.vlgmr.msra.gmra.mrb[0].mxu1 %v6874_v4  ;;  %v6973_v3 = vld [vmem:[%s8114_s13 + $0x6a0] ss:$8 sps:$4 sm:$0xff]   ;;  %v6978_v4 = vld [vmem:[%s8114_s13 + $0x2b4] ss:$8 sps:$4 sm:$0xff]  }
 0x137   : > { %4645 = vmatmul.mubr.bf16.vlgmr.msra.gmra.mrb[0].mxu0 %v6877_v5  ;;  %4274 = vmatpush1.bf16.msra.mxu1 %v6880_v6  ;;  %v6981_v5 = vld [vmem:[%s8114_s13 + $0x6b4] ss:$8 sps:$4 sm:$0xff]  }
 0x138   : > { %4726 = vmatpush1.bf16.msra.mxu0 %v6883_v7  ;;  %4275 = vmatprep.subr.bf16.mxu1 %v6888_v8  ;;  %v6982_v6 = vld [vmem:[%s9447_s0 + $0x36c] ss:$72 sps:$4 sm:$0xff]   ;;  %v6976_v8 = vld [vmem:[%s8114_s13 + $0x2b0] ss:$8 sps:$4 sm:$0xff]  }
 0x139   : > { %4727 = vmatprep.subr.bf16.mxu0 %v6891_v9  ;;  %4202 = vmatprep.mubr.bf16.mxu1 %v6892_v10  ;;  %v6984_v7 = vld [vmem:[%s9447_s0 + $0x38c] ss:$72 sps:$4 sm:$0xff]   ;;  %v6979_v9 = vld [vmem:[%s8114_s13 + $0x6b0] ss:$8 sps:$4 sm:$0xff]  }
 0x13a   : > { %4654 = vmatprep.mubr.bf16.mxu0 %v6894_v11  ;;  %v6989_v10 = vld [vmem:[%s8114_s13 + $0x2c4] ss:$8 sps:$4 sm:$0xff]  }
 0x13b   : > { %4276 = vmatpush1.bf16.msra.mxu1 %v6886_v12  ;;  %v6993_v11 = vld [vmem:[%s8114_s13 + $0x6c4] ss:$8 sps:$4 sm:$0xff]   ;;  %v6986_v12 = vld [vmem:[%s9447_s0 + $0x368] ss:$72 sps:$4 sm:$0xff]  }
 0x13c   : > { %4728 = vmatpush1.bf16.msra.mxu0 %v6889_v13  ;;  %4277 = vmatprep.subr.bf16.mxu1 %v6899_v14  ;;  %v6987_v13 = vld [vmem:[%s8114_s13 + $0x2c0] ss:$8 sps:$4 sm:$0xff]  }
 0x13d   : > { %4729 = vmatprep.subr.bf16.mxu0 %v6903_v15  ;;  %v6990_v14 = vld [vmem:[%s9447_s0 + $0x388] ss:$72 sps:$4 sm:$0xff]  }
 0x13e   : > { %4203 = vmatmul.mubr.bf16.gmra.mrb[4].mxu1 %v6896_v16  ;;  %v6991_v15 = vld [vmem:[%s8114_s13 + $0x6c0] ss:$8 sps:$4 sm:$0xff]   ;;  %v6996_v16 = vld [vmem:[%s8114_s13 + $0x2d4] ss:$8 sps:$4 sm:$0xff]  }
 0x13f   : > { %4655 = vmatmul.mubr.bf16.gmra.mrb[4].mxu0 %v6900_v18  ;;  %4278 = vmatpush1.bf16.msra.mxu1 %v6897_v17  ;;  %v6999_v17 = vld [vmem:[%s8114_s13 + $0x6d4] ss:$8 sps:$4 sm:$0xff]  }
 0x140   : > { %4730 = vmatpush1.bf16.msra.mxu0 %v6901_v19  ;;  %4279 = vmatprep.subr.bf16.mxu1 %v6906_v20  ;;  %v7000_v18 = vld [vmem:[%s9447_s0 + $0x3fc] ss:$72 sps:$4 sm:$0xff]   ;;  %v6994_v20 = vld [vmem:[%s8114_s13 + $0x2d0] ss:$8 sps:$4 sm:$0xff]  }
 0x141   : > { %4731 = vmatprep.subr.bf16.mxu0 %v6909_v21  ;;  %4212 = vmatprep.mubr.bf16.mxu1 %v6910_v22  ;;  %v7002_v19 = vld [vmem:[%s9447_s0 + $0x41c] ss:$72 sps:$4 sm:$0xff]   ;;  %v6997_v21 = vld [vmem:[%s8114_s13 + $0x6d0] ss:$8 sps:$4 sm:$0xff]  }
 0x142   : > { %4664 = vmatprep.mubr.bf16.mxu0 %v6912_v23  ;;  %v7007_v22 = vld [vmem:[%s8114_s13 + $0x2e4] ss:$8 sps:$4 sm:$0xff]  }
 0x143   : > { %4280 = vmatpush1.bf16.msra.mxu1 %v6904_v24  ;;  %v7011_v23 = vld [vmem:[%s8114_s13 + $0x6e4] ss:$8 sps:$4 sm:$0xff]   ;;  %v7004_v24 = vld [vmem:[%s9447_s0 + $0x3f8] ss:$72 sps:$4 sm:$0xff]  }
 0x144   : > { %4732 = vmatpush1.bf16.msra.mxu0 %v6907_v25  ;;  %4281 = vmatprep.subr.bf16.mxu1 %v6917_v26  ;;  %v7005_v25 = vld [vmem:[%s8114_s13 + $0x2e0] ss:$8 sps:$4 sm:$0xff]  }
 0x145   : > { %4733 = vmatprep.subr.bf16.mxu0 %v6921_v27  ;;  %v7008_v26 = vld [vmem:[%s9447_s0 + $0x418] ss:$72 sps:$4 sm:$0xff]  }
 0x146   : > { %4213 = vmatmul.mubr.bf16.gmra.mrb[8].mxu1 %v6914_v28  ;;  %v7009_v27 = vld [vmem:[%s8114_s13 + $0x6e0] ss:$8 sps:$4 sm:$0xff]   ;;  %v7014_v28 = vld [vmem:[%s8114_s13 + $0x2f4] ss:$8 sps:$4 sm:$0xff]  }
 0x147   : > { %4665 = vmatmul.mubr.bf16.gmra.mrb[8].mxu0 %v6918_v30  ;;  %4282 = vmatpush1.bf16.msra.mxu1 %v6915_v29  ;;  %v7017_v29 = vld [vmem:[%s8114_s13 + $0x6f4] ss:$8 sps:$4 sm:$0xff]  }
 0x148   : > { %4734 = vmatpush1.bf16.msra.mxu0 %v6919_v31  ;;  %4283 = vmatprep.subr.bf16.mxu1 %v6924_v32  ;;  %v7020_v30 = vld [vmem:[%s9447_s0 + $0x14] ss:$72 sps:$4 sm:$0xff]   ;;  %v7012_v32 = vld [vmem:[%s8114_s13 + $0x2f0] ss:$8 sps:$4 sm:$0xff]  }
 0x149   : > { %4735 = vmatprep.subr.bf16.mxu0 %v6927_v33  ;;  %4222 = vmatprep.mubr.bf16.mxu1 %v6928_v34  ;;  %v7023_v31 = vld [vmem:[%s9447_s0 + $0x34] ss:$72 sps:$4 sm:$0xff]   ;;  %v7015_v33 = vld [vmem:[%s8114_s13 + $0x6f0] ss:$8 sps:$4 sm:$0xff]   ;;  %v7026_v34 = vld [vmem:[%s8114_s13 + $0x304] ss:$8 sps:$4 sm:$0xff]  }
 0x14a   : > { %4674 = vmatprep.mubr.bf16.mxu0 %v6930_v35  ;;  %v7029_v35 = vld [vmem:[%s8114_s13 + $0x704] ss:$8 sps:$4 sm:$0xff]  }
 0x14b   : > { %4284 = vmatpush1.bf16.msra.mxu1 %v6922_v36  ;;  %v7018_v36 = vld [vmem:[%s9447_s0 + $0x10] ss:$72 sps:$4 sm:$0xff]  }
 0x14c   : > { %4736 = vmatpush1.bf16.msra.mxu0 %v6925_v37  ;;  %4285 = vmatprep.subr.bf16.mxu1 %v6935_v38  ;;  %v7021_v37 = vld [vmem:[%s9447_s0 + $0x30] ss:$72 sps:$4 sm:$0xff]   ;;  %v7024_v38 = vld [vmem:[%s8114_s13 + $0x300] ss:$8 sps:$4 sm:$0xff]  }
 0x14d   : > { %4737 = vmatprep.subr.bf16.mxu0 %v6939_v39  ;;  %v7027_v39 = vld [vmem:[%s8114_s13 + $0x700] ss:$8 sps:$4 sm:$0xff]  }
 0x14e   : > { %4223 = vmatmul.mubr.bf16.gmra.mrb[12].mxu1 %v6932_v40  ;;  %v7032_v40 = vld [vmem:[%s8114_s13 + $0x314] ss:$8 sps:$4 sm:$0xff]  }
 0x14f   : > { %4675 = vmatmul.mubr.bf16.gmra.mrb[12].mxu0 %v6936_v42  ;;  %4286 = vmatpush1.bf16.msra.mxu1 %v6933_v41  ;;  %v7035_v41 = vld [vmem:[%s8114_s13 + $0x714] ss:$8 sps:$4 sm:$0xff]   ;;  %v7036_v42 = vld [vmem:[%s9447_s0 + $0xa4] ss:$72 sps:$4 sm:$0xff]  }
 0x150   : > { %4738 = vmatpush1.bf16.msra.mxu0 %v6937_v43  ;;  %4287 = vmatprep.subr.bf16.mxu1 %v6942_v44  ;;  %v7038_v43 = vld [vmem:[%s9447_s0 + $0xc4] ss:$72 sps:$4 sm:$0xff]   ;;  %v7030_v44 = vld [vmem:[%s8114_s13 + $0x310] ss:$8 sps:$4 sm:$0xff]  }
 0x151   : > { %4739 = vmatprep.subr.bf16.mxu0 %v6945_v45  ;;  %4232 = vmatprep.mubr.bf16.mxu1 %v6946_v46  ;;  %v7033_v45 = vld [vmem:[%s8114_s13 + $0x710] ss:$8 sps:$4 sm:$0xff]   ;;  %v7043_v46 = vld [vmem:[%s8114_s13 + $0x324] ss:$8 sps:$4 sm:$0xff]  }
 0x152   : > { %4684 = vmatprep.mubr.bf16.mxu0 %v6948_v47  ;;  %v7047_v47 = vld [vmem:[%s8114_s13 + $0x724] ss:$8 sps:$4 sm:$0xff]  }
 0x153   : > { %4288 = vmatpush1.bf16.msra.mxu1 %v6940_v48  ;;  %v7040_v48 = vld [vmem:[%s9447_s0 + $0xa0] ss:$72 sps:$4 sm:$0xff]  }
 0x154   : > { %4740 = vmatpush1.bf16.msra.mxu0 %v6943_v49  ;;  %4289 = vmatprep.subr.bf16.mxu1 %v6953_v50  ;;  %v7041_v49 = vld [vmem:[%s8114_s13 + $0x320] ss:$8 sps:$4 sm:$0xff]  }
 0x155   : > { %4741 = vmatprep.subr.bf16.mxu0 %v6957_v51  ;;  %v7044_v50 = vld [vmem:[%s9447_s0 + $0xc0] ss:$72 sps:$4 sm:$0xff]  }
 0x156   : > { %4233 = vmatmul.mubr.bf16.gmra.mrb[16].mxu1 %v6950_v52  ;;  %v7045_v51 = vld [vmem:[%s8114_s13 + $0x720] ss:$8 sps:$4 sm:$0xff]   ;;  %v7050_v52 = vld [vmem:[%s8114_s13 + $0x334] ss:$8 sps:$4 sm:$0xff]  }
 0x157   : > { %4685 = vmatmul.mubr.bf16.gmra.mrb[16].mxu0 %v6954_v54  ;;  %4290 = vmatpush1.bf16.msra.mxu1 %v6951_v53  ;;  %v7053_v53 = vld [vmem:[%s8114_s13 + $0x734] ss:$8 sps:$4 sm:$0xff]  }
 0x158   : > { %4742 = vmatpush1.bf16.msra.mxu0 %v6955_v55  ;;  %4291 = vmatprep.subr.bf16.mxu1 %v6960_v56  ;;  %v7054_v54 = vld [vmem:[%s9447_s0 + $0x134] ss:$72 sps:$4 sm:$0xff]   ;;  %v7048_v56 = vld [vmem:[%s8114_s13 + $0x330] ss:$8 sps:$4 sm:$0xff]  }
 0x159   : > { %4743 = vmatprep.subr.bf16.mxu0 %v6963_v57  ;;  %4242 = vmatprep.mubr.bf16.mxu1 %v6964_v58  ;;  %v7056_v55 = vld [vmem:[%s9447_s0 + $0x154] ss:$72 sps:$4 sm:$0xff]   ;;  %v7051_v57 = vld [vmem:[%s8114_s13 + $0x730] ss:$8 sps:$4 sm:$0xff]   ;;  %v7061_v58 = vld [vmem:[%s8114_s13 + $0x344] ss:$8 sps:$4 sm:$0xff]  }
 0x15a   : > { %4694 = vmatprep.mubr.bf16.mxu0 %v6966_v59  ;;  %v7065_v59 = vld [vmem:[%s8114_s13 + $0x744] ss:$8 sps:$4 sm:$0xff]  }
 0x15b   : > { %4292 = vmatpush1.bf16.msra.mxu1 %v6958_v60  ;;  %v7058_v60 = vld [vmem:[%s9447_s0 + $0x130] ss:$72 sps:$4 sm:$0xff]  }
 0x15c   : > { %4744 = vmatpush1.bf16.msra.mxu0 %v6961_v61  ;;  %4293 = vmatprep.subr.bf16.mxu1 %v6971_v62  ;;  %v7059_v61 = vld [vmem:[%s8114_s13 + $0x340] ss:$8 sps:$4 sm:$0xff]   ;;  %v7062_v62 = vld [vmem:[%s9447_s0 + $0x150] ss:$72 sps:$4 sm:$0xff]  }
 0x15d   : > { %4745 = vmatprep.subr.bf16.mxu0 %v6975_v63  ;;  %v7063_v63 = vld [vmem:[%s8114_s13 + $0x740] ss:$8 sps:$4 sm:$0xff]  }
 0x15e   : > { %4243 = vmatmul.mubr.bf16.gmra.mrb[20].mxu1 %v6968_v0  ;;  %v7068_v0 = vld [vmem:[%s8114_s13 + $0x354] ss:$8 sps:$4 sm:$0xff]  }
 0x15f   : > { %4695 = vmatmul.mubr.bf16.gmra.mrb[20].mxu0 %v6972_v2  ;;  %4294 = vmatpush1.bf16.msra.mxu1 %v6969_v1  ;;  %v7071_v1 = vld [vmem:[%s8114_s13 + $0x754] ss:$8 sps:$4 sm:$0xff]   ;;  %v7072_v2 = vld [vmem:[%s9447_s0 + $0x1c4] ss:$72 sps:$4 sm:$0xff]  }
 0x160   : > { %4746 = vmatpush1.bf16.msra.mxu0 %v6973_v3  ;;  %4295 = vmatprep.subr.bf16.mxu1 %v6978_v4  ;;  %v7074_v3 = vld [vmem:[%s9447_s0 + $0x1e4] ss:$72 sps:$4 sm:$0xff]   ;;  %v7066_v4 = vld [vmem:[%s8114_s13 + $0x350] ss:$8 sps:$4 sm:$0xff]  }
 0x161   : > { %4747 = vmatprep.subr.bf16.mxu0 %v6981_v5  ;;  %4252 = vmatprep.mubr.bf16.mxu1 %v6982_v6  ;;  %v7069_v5 = vld [vmem:[%s8114_s13 + $0x750] ss:$8 sps:$4 sm:$0xff]   ;;  %v7079_v6 = vld [vmem:[%s8114_s13 + $0x364] ss:$8 sps:$4 sm:$0xff]  }
 0x162   : > { %4704 = vmatprep.mubr.bf16.mxu0 %v6984_v7  ;;  %v7083_v7 = vld [vmem:[%s8114_s13 + $0x764] ss:$8 sps:$4 sm:$0xff]  }
 0x163   : > { %4296 = vmatpush1.bf16.msra.mxu1 %v6976_v8  ;;  %v7076_v8 = vld [vmem:[%s9447_s0 + $0x1c0] ss:$72 sps:$4 sm:$0xff]  }
 0x164   : > { %4748 = vmatpush1.bf16.msra.mxu0 %v6979_v9  ;;  %4297 = vmatprep.subr.bf16.mxu1 %v6989_v10  ;;  %v7077_v9 = vld [vmem:[%s8114_s13 + $0x360] ss:$8 sps:$4 sm:$0xff]  }
 0x165   : > { %4749 = vmatprep.subr.bf16.mxu0 %v6993_v11  ;;  %v7080_v10 = vld [vmem:[%s9447_s0 + $0x1e0] ss:$72 sps:$4 sm:$0xff]  }
 0x166   : > { %4253 = vmatmul.mubr.bf16.gmra.mrb[24].mxu1 %v6986_v12  ;;  %v7081_v11 = vld [vmem:[%s8114_s13 + $0x760] ss:$8 sps:$4 sm:$0xff]   ;;  %v7086_v12 = vld [vmem:[%s8114_s13 + $0x374] ss:$8 sps:$4 sm:$0xff]  }
 0x167   : > { %4705 = vmatmul.mubr.bf16.gmra.mrb[24].mxu0 %v6990_v14  ;;  %4298 = vmatpush1.bf16.msra.mxu1 %v6987_v13  ;;  %v7089_v13 = vld [vmem:[%s8114_s13 + $0x774] ss:$8 sps:$4 sm:$0xff]  }
 0x168   : > { %4750 = vmatpush1.bf16.msra.mxu0 %v6991_v15  ;;  %4299 = vmatprep.subr.bf16.mxu1 %v6996_v16  ;;  %v7090_v14 = vld [vmem:[%s9447_s0 + $0x254] ss:$72 sps:$4 sm:$0xff]   ;;  %v7084_v16 = vld [vmem:[%s8114_s13 + $0x370] ss:$8 sps:$4 sm:$0xff]  }
 0x169   : > { %4751 = vmatprep.subr.bf16.mxu0 %v6999_v17  ;;  %4262 = vmatprep.mubr.bf16.mxu1 %v7000_v18  ;;  %v7092_v15 = vld [vmem:[%s9447_s0 + $0x274] ss:$72 sps:$4 sm:$0xff]   ;;  %v7087_v17 = vld [vmem:[%s8114_s13 + $0x770] ss:$8 sps:$4 sm:$0xff]   ;;  %v7097_v18 = vld [vmem:[%s8114_s13 + $0x384] ss:$8 sps:$4 sm:$0xff]  }
 0x16a   : > { %4714 = vmatprep.mubr.bf16.mxu0 %v7002_v19  ;;  %v7101_v19 = vld [vmem:[%s8114_s13 + $0x784] ss:$8 sps:$4 sm:$0xff]  }
 0x16b   : > { %4300 = vmatpush1.bf16.msra.mxu1 %v6994_v20  ;;  %v7094_v20 = vld [vmem:[%s9447_s0 + $0x250] ss:$72 sps:$4 sm:$0xff]  }
 0x16c   : > { %4752 = vmatpush1.bf16.msra.mxu0 %v6997_v21  ;;  %4301 = vmatprep.subr.bf16.mxu1 %v7007_v22  ;;  %v7095_v21 = vld [vmem:[%s8114_s13 + $0x380] ss:$8 sps:$4 sm:$0xff]   ;;  %v7098_v22 = vld [vmem:[%s9447_s0 + $0x270] ss:$72 sps:$4 sm:$0xff]  }
 0x16d   : > { %4753 = vmatprep.subr.bf16.mxu0 %v7011_v23  ;;  %v7099_v23 = vld [vmem:[%s8114_s13 + $0x780] ss:$8 sps:$4 sm:$0xff]  }
 0x16e   : > { %4263 = vmatmul.mubr.bf16.gmra.mrb[28].mxu1 %v7004_v24  ;;  %v7104_v24 = vld [vmem:[%s8114_s13 + $0x394] ss:$8 sps:$4 sm:$0xff]  }
 0x16f   : > { %4715 = vmatmul.mubr.bf16.gmra.mrb[28].mxu0 %v7008_v26  ;;  %4302 = vmatpush1.bf16.msra.mxu1 %v7005_v25  ;;  %v7107_v25 = vld [vmem:[%s8114_s13 + $0x794] ss:$8 sps:$4 sm:$0xff]   ;;  %v7108_v26 = vld [vmem:[%s9447_s0 + $0x2e4] ss:$72 sps:$4 sm:$0xff]  }
 0x170   : > { %4754 = vmatpush1.bf16.msra.mxu0 %v7009_v27  ;;  %4303 = vmatprep.subr.bf16.mxu1 %v7014_v28  ;;  %v7110_v27 = vld [vmem:[%s9447_s0 + $0x304] ss:$72 sps:$4 sm:$0xff]   ;;  %v7102_v28 = vld [vmem:[%s8114_s13 + $0x390] ss:$8 sps:$4 sm:$0xff]  }
 0x171   : > { %4755 = vmatprep.subr.bf16.mxu0 %v7017_v29  ;;  %4305 = vmatprep.mubr.bf16.mxu1 %v7020_v30  ;;  %v7105_v29 = vld [vmem:[%s8114_s13 + $0x790] ss:$8 sps:$4 sm:$0xff]   ;;  %v7115_v30 = vld [vmem:[%s8114_s13 + $0x3a4] ss:$8 sps:$4 sm:$0xff]  }
 0x172   : > { %4757 = vmatprep.mubr.bf16.mxu0 %v7023_v31  ;;  %v7119_v31 = vld [vmem:[%s8114_s13 + $0x7a4] ss:$8 sps:$4 sm:$0xff]  }
 0x173   : > { %4304 = vmatpush1.bf16.msra.mxu1 %v7012_v32  ;;  %v7112_v32 = vld [vmem:[%s9447_s0 + $0x2e0] ss:$72 sps:$4 sm:$0xff]  }
 0x174   : > { %4756 = vmatpush1.bf16.msra.mxu0 %v7015_v33  ;;  %4386 = vmatprep.subr.bf16.mxu1 %v7026_v34  ;;  %v7113_v33 = vld [vmem:[%s8114_s13 + $0x3a0] ss:$8 sps:$4 sm:$0xff]  }
 0x175   : > { %4838 = vmatprep.subr.bf16.mxu0 %v7029_v35  ;;  %v7116_v34 = vld [vmem:[%s9447_s0 + $0x300] ss:$72 sps:$4 sm:$0xff]  }
 0x176   : > { %4306 = vmatmul.mubr.bf16.vlgmr.msra.gmra.mrb[0].mxu1 %v7018_v36  ;;  %v7117_v35 = vld [vmem:[%s8114_s13 + $0x7a0] ss:$8 sps:$4 sm:$0xff]   ;;  %v7122_v36 = vld [vmem:[%s8114_s13 + $0x3b4] ss:$8 sps:$4 sm:$0xff]  }
 0x177   : > { %4758 = vmatmul.mubr.bf16.vlgmr.msra.gmra.mrb[0].mxu0 %v7021_v37  ;;  %4387 = vmatpush1.bf16.msra.mxu1 %v7024_v38  ;;  %v7125_v37 = vld [vmem:[%s8114_s13 + $0x7b4] ss:$8 sps:$4 sm:$0xff]  }
 0x178   : > { %4839 = vmatpush1.bf16.msra.mxu0 %v7027_v39  ;;  %4388 = vmatprep.subr.bf16.mxu1 %v7032_v40  ;;  %v7126_v38 = vld [vmem:[%s9447_s0 + $0x374] ss:$72 sps:$4 sm:$0xff]   ;;  %v7120_v40 = vld [vmem:[%s8114_s13 + $0x3b0] ss:$8 sps:$4 sm:$0xff]  }
 0x179   : > { %4840 = vmatprep.subr.bf16.mxu0 %v7035_v41  ;;  %4315 = vmatprep.mubr.bf16.mxu1 %v7036_v42  ;;  %v7128_v39 = vld [vmem:[%s9447_s0 + $0x394] ss:$72 sps:$4 sm:$0xff]   ;;  %v7123_v41 = vld [vmem:[%s8114_s13 + $0x7b0] ss:$8 sps:$4 sm:$0xff]   ;;  %v7133_v42 = vld [vmem:[%s8114_s13 + $0x3c4] ss:$8 sps:$4 sm:$0xff]  }
 0x17a   : > { %4767 = vmatprep.mubr.bf16.mxu0 %v7038_v43  ;;  %v7130_v43 = vld [vmem:[%s9447_s0 + $0x370] ss:$72 sps:$4 sm:$0xff]  }
 0x17b   : > { %4389 = vmatpush1.bf16.msra.mxu1 %v7030_v44  ;;  %v7137_v44 = vld [vmem:[%s8114_s13 + $0x7c4] ss:$8 sps:$4 sm:$0xff]  }
 0x17c   : > { %4841 = vmatpush1.bf16.msra.mxu0 %v7033_v45  ;;  %4390 = vmatprep.subr.bf16.mxu1 %v7043_v46  ;;  %v7131_v45 = vld [vmem:[%s8114_s13 + $0x3c0] ss:$8 sps:$4 sm:$0xff]   ;;  %v7134_v46 = vld [vmem:[%s9447_s0 + $0x390] ss:$72 sps:$4 sm:$0xff]  }
 0x17d   : > { %4842 = vmatprep.subr.bf16.mxu0 %v7047_v47  ;;  %v7135_v47 = vld [vmem:[%s8114_s13 + $0x7c0] ss:$8 sps:$4 sm:$0xff]  }
 0x17e   : > { %4316 = vmatmul.mubr.bf16.gmra.mrb[4].mxu1 %v7040_v48  ;;  %v7140_v48 = vld [vmem:[%s8114_s13 + $0x3d4] ss:$8 sps:$4 sm:$0xff]  }
 0x17f   : > { %4768 = vmatmul.mubr.bf16.gmra.mrb[4].mxu0 %v7044_v50  ;;  %4391 = vmatpush1.bf16.msra.mxu1 %v7041_v49  ;;  %v7143_v49 = vld [vmem:[%s8114_s13 + $0x7d4] ss:$8 sps:$4 sm:$0xff]   ;;  %v7144_v50 = vld [vmem:[%s9447_s0 + $0x404] ss:$72 sps:$4 sm:$0xff]  }
 0x180   : > { %4843 = vmatpush1.bf16.msra.mxu0 %v7045_v51  ;;  %4392 = vmatprep.subr.bf16.mxu1 %v7050_v52  ;;  %v7146_v51 = vld [vmem:[%s9447_s0 + $0x424] ss:$72 sps:$4 sm:$0xff]   ;;  %v7138_v52 = vld [vmem:[%s8114_s13 + $0x3d0] ss:$8 sps:$4 sm:$0xff]  }
 0x181   : > { %4844 = vmatprep.subr.bf16.mxu0 %v7053_v53  ;;  %4325 = vmatprep.mubr.bf16.mxu1 %v7054_v54  ;;  %v7141_v53 = vld [vmem:[%s8114_s13 + $0x7d0] ss:$8 sps:$4 sm:$0xff]   ;;  %v7151_v54 = vld [vmem:[%s8114_s13 + $0x3e4] ss:$8 sps:$4 sm:$0xff]  }
 0x182   : > { %4777 = vmatprep.mubr.bf16.mxu0 %v7056_v55  ;;  %v7155_v55 = vld [vmem:[%s8114_s13 + $0x7e4] ss:$8 sps:$4 sm:$0xff]  }
 0x183   : > { %4393 = vmatpush1.bf16.msra.mxu1 %v7048_v56  ;;  %v7148_v56 = vld [vmem:[%s9447_s0 + $0x400] ss:$72 sps:$4 sm:$0xff]  }
 0x184   : > { %4845 = vmatpush1.bf16.msra.mxu0 %v7051_v57  ;;  %4394 = vmatprep.subr.bf16.mxu1 %v7061_v58  ;;  %v7149_v57 = vld [vmem:[%s8114_s13 + $0x3e0] ss:$8 sps:$4 sm:$0xff]  }
 0x185   : > { %4846 = vmatprep.subr.bf16.mxu0 %v7065_v59  ;;  %v7152_v58 = vld [vmem:[%s9447_s0 + $0x420] ss:$72 sps:$4 sm:$0xff]  }
 0x186   : > { %4326 = vmatmul.mubr.bf16.gmra.mrb[8].mxu1 %v7058_v60  ;;  %v7153_v59 = vld [vmem:[%s8114_s13 + $0x7e0] ss:$8 sps:$4 sm:$0xff]   ;;  %v7158_v60 = vld [vmem:[%s8114_s13 + $0x3f4] ss:$8 sps:$4 sm:$0xff]  }
 0x187   : > { %4778 = vmatmul.mubr.bf16.gmra.mrb[8].mxu0 %v7062_v62  ;;  %4395 = vmatpush1.bf16.msra.mxu1 %v7059_v61  ;;  %v7161_v61 = vld [vmem:[%s8114_s13 + $0x7f4] ss:$8 sps:$4 sm:$0xff]  }
 0x188   : > { %4847 = vmatpush1.bf16.msra.mxu0 %v7063_v63  ;;  %4396 = vmatprep.subr.bf16.mxu1 %v7068_v0  ;;  %v7164_v62 = vld [vmem:[%s9447_s0 + $0x1c] ss:$72 sps:$4 sm:$0xff]   ;;  %v7156_v0 = vld [vmem:[%s8114_s13 + $0x3f0] ss:$8 sps:$4 sm:$0xff]  }
 0x189   : > { %4848 = vmatprep.subr.bf16.mxu0 %v7071_v1  ;;  %4335 = vmatprep.mubr.bf16.mxu1 %v7072_v2  ;;  %v7167_v63 = vld [vmem:[%s9447_s0 + $0x3c] ss:$72 sps:$4 sm:$0xff]   ;;  %v7159_v1 = vld [vmem:[%s8114_s13 + $0x7f0] ss:$8 sps:$4 sm:$0xff]  }
 0x18a   : > { %4787 = vmatprep.mubr.bf16.mxu0 %v7074_v3  ;;  %v7170_v2 = vld [vmem:[%s8114_s13 + $0x804] ss:$8 sps:$4 sm:$0xff]   ;;  %v7162_v3 = vld [vmem:[%s9447_s0 + $0x18] ss:$72 sps:$4 sm:$0xff]  }
 0x18b   : > { %4397 = vmatpush1.bf16.msra.mxu1 %v7066_v4  ;;  %v7165_v4 = vld [vmem:[%s9447_s0 + $0x38] ss:$72 sps:$4 sm:$0xff]  }
 0x18c   : > { %4849 = vmatpush1.bf16.msra.mxu0 %v7069_v5  ;;  %4398 = vmatprep.subr.bf16.mxu1 %v7079_v6  ;;  %v7168_v5 = vld [vmem:[%s8114_s13 + $0x800] ss:$8 sps:$4 sm:$0xff]   ;;  %v7173_v6 = vld [vmem:[%s8114_s13 + $0x814] ss:$8 sps:$4 sm:$0xff]  }
 0x18d   : > { %4850 = vmatprep.subr.bf16.mxu0 %v7083_v7  ;;  %v7174_v7 = vld [vmem:[%s9447_s0 + $0xac] ss:$72 sps:$4 sm:$0xff]  }
 0x18e   : > { %4336 = vmatmul.mubr.bf16.gmra.mrb[12].mxu1 %v7076_v8  ;;  %v7176_v8 = vld [vmem:[%s9447_s0 + $0xcc] ss:$72 sps:$4 sm:$0xff]  }
 0x18f   : > { %4788 = vmatmul.mubr.bf16.gmra.mrb[12].mxu0 %v7080_v10  ;;  %4399 = vmatpush1.bf16.msra.mxu1 %v7077_v9  ;;  %v7171_v9 = vld [vmem:[%s8114_s13 + $0x810] ss:$8 sps:$4 sm:$0xff]   ;;  %v7182_v10 = vld [vmem:[%s8114_s13 + $0x824] ss:$8 sps:$4 sm:$0xff]  }
 0x190   : > { %4851 = vmatpush1.bf16.msra.mxu0 %v7081_v11  ;;  %4400 = vmatprep.subr.bf16.mxu1 %v7086_v12  ;;  %v7178_v11 = vld [vmem:[%s9447_s0 + $0xa8] ss:$72 sps:$4 sm:$0xff]  }
 0x191   : > { %4852 = vmatprep.subr.bf16.mxu0 %v7089_v13  ;;  %4345 = vmatprep.mubr.bf16.mxu1 %v7090_v14  ;;  %v7179_v12 = vld [vmem:[%s9447_s0 + $0xc8] ss:$72 sps:$4 sm:$0xff]   ;;  %v7185_v14 = vld [vmem:[%s8114_s13 + $0x834] ss:$8 sps:$4 sm:$0xff]  }
 0x192   : > { %4797 = vmatprep.mubr.bf16.mxu0 %v7092_v15  ;;  %v7180_v13 = vld [vmem:[%s8114_s13 + $0x820] ss:$8 sps:$4 sm:$0xff]   ;;  %v7186_v15 = vld [vmem:[%s9447_s0 + $0x13c] ss:$72 sps:$4 sm:$0xff]  }
 0x193   : > { %4401 = vmatpush1.bf16.msra.mxu1 %v7084_v16  ;;  %v7188_v16 = vld [vmem:[%s9447_s0 + $0x15c] ss:$72 sps:$4 sm:$0xff]  }
 0x194   : > { %4853 = vmatpush1.bf16.msra.mxu0 %v7087_v17  ;;  %4402 = vmatprep.subr.bf16.mxu1 %v7097_v18  ;;  %v7183_v17 = vld [vmem:[%s8114_s13 + $0x830] ss:$8 sps:$4 sm:$0xff]   ;;  %v7194_v18 = vld [vmem:[%s8114_s13 + $0x844] ss:$8 sps:$4 sm:$0xff]  }
 0x195   : > { %4854 = vmatprep.subr.bf16.mxu0 %v7101_v19  ;;  %v7190_v19 = vld [vmem:[%s9447_s0 + $0x138] ss:$72 sps:$4 sm:$0xff]  }
 0x196   : > { %4346 = vmatmul.mubr.bf16.gmra.mrb[16].mxu1 %v7094_v20  ;;  %v7191_v20 = vld [vmem:[%s9447_s0 + $0x158] ss:$72 sps:$4 sm:$0xff]  }
 0x197   : > { %4798 = vmatmul.mubr.bf16.gmra.mrb[16].mxu0 %v7098_v22  ;;  %4403 = vmatpush1.bf16.msra.mxu1 %v7095_v21  ;;  %v7192_v21 = vld [vmem:[%s8114_s13 + $0x840] ss:$8 sps:$4 sm:$0xff]   ;;  %v7197_v22 = vld [vmem:[%s8114_s13 + $0x854] ss:$8 sps:$4 sm:$0xff]  }
 0x198   : > { %4855 = vmatpush1.bf16.msra.mxu0 %v7099_v23  ;;  %4404 = vmatprep.subr.bf16.mxu1 %v7104_v24  ;;  %v7198_v23 = vld [vmem:[%s9447_s0 + $0x1cc] ss:$72 sps:$4 sm:$0xff]  }
 0x199   : > { %4856 = vmatprep.subr.bf16.mxu0 %v7107_v25  ;;  %4355 = vmatprep.mubr.bf16.mxu1 %v7108_v26  ;;  %v7200_v24 = vld [vmem:[%s9447_s0 + $0x1ec] ss:$72 sps:$4 sm:$0xff]   ;;  %v7195_v25 = vld [vmem:[%s8114_s13 + $0x850] ss:$8 sps:$4 sm:$0xff]  }
 0x19a   : > { %4807 = vmatprep.mubr.bf16.mxu0 %v7110_v27  ;;  %v7206_v26 = vld [vmem:[%s8114_s13 + $0x864] ss:$8 sps:$4 sm:$0xff]   ;;  %v7202_v27 = vld [vmem:[%s9447_s0 + $0x1c8] ss:$72 sps:$4 sm:$0xff]  }
 0x19b   : > { %4405 = vmatpush1.bf16.msra.mxu1 %v7102_v28  ;;  %v7203_v28 = vld [vmem:[%s9447_s0 + $0x1e8] ss:$72 sps:$4 sm:$0xff]  }
 0x19c   : > { %4857 = vmatpush1.bf16.msra.mxu0 %v7105_v29  ;;  %4406 = vmatprep.subr.bf16.mxu1 %v7115_v30  ;;  %v7204_v29 = vld [vmem:[%s8114_s13 + $0x860] ss:$8 sps:$4 sm:$0xff]   ;;  %v7209_v30 = vld [vmem:[%s8114_s13 + $0x874] ss:$8 sps:$4 sm:$0xff]  }
 0x19d   : > { %4858 = vmatprep.subr.bf16.mxu0 %v7119_v31  ;;  %v7210_v31 = vld [vmem:[%s9447_s0 + $0x25c] ss:$72 sps:$4 sm:$0xff]  }
 0x19e   : > { %4356 = vmatmul.mubr.bf16.gmra.mrb[20].mxu1 %v7112_v32  ;;  %v7212_v32 = vld [vmem:[%s9447_s0 + $0x27c] ss:$72 sps:$4 sm:$0xff]  }
 0x19f   : > { %4808 = vmatmul.mubr.bf16.gmra.mrb[20].mxu0 %v7116_v34  ;;  %4407 = vmatpush1.bf16.msra.mxu1 %v7113_v33  ;;  %v7207_v33 = vld [vmem:[%s8114_s13 + $0x870] ss:$8 sps:$4 sm:$0xff]   ;;  %v7218_v34 = vld [vmem:[%s8114_s13 + $0x884] ss:$8 sps:$4 sm:$0xff]  }
 0x1a0   : > { %4859 = vmatpush1.bf16.msra.mxu0 %v7117_v35  ;;  %4408 = vmatprep.subr.bf16.mxu1 %v7122_v36  ;;  %v7214_v35 = vld [vmem:[%s9447_s0 + $0x258] ss:$72 sps:$4 sm:$0xff]  }
 0x1a1   : > { %4860 = vmatprep.subr.bf16.mxu0 %v7125_v37  ;;  %4365 = vmatprep.mubr.bf16.mxu1 %v7126_v38  ;;  %v7215_v36 = vld [vmem:[%s9447_s0 + $0x278] ss:$72 sps:$4 sm:$0xff]   ;;  %v7221_v38 = vld [vmem:[%s8114_s13 + $0x894] ss:$8 sps:$4 sm:$0xff]  }
 0x1a2   : > { %4817 = vmatprep.mubr.bf16.mxu0 %v7128_v39  ;;  %v7216_v37 = vld [vmem:[%s8114_s13 + $0x880] ss:$8 sps:$4 sm:$0xff]   ;;  %v7222_v39 = vld [vmem:[%s9447_s0 + $0x2ec] ss:$72 sps:$4 sm:$0xff]  }
 0x1a3   : > { %4409 = vmatpush1.bf16.msra.mxu1 %v7120_v40  ;;  %v7224_v40 = vld [vmem:[%s9447_s0 + $0x30c] ss:$72 sps:$4 sm:$0xff]  }
 0x1a4   : > { %4861 = vmatpush1.bf16.msra.mxu0 %v7123_v41  ;;  %4410 = vmatprep.subr.bf16.mxu1 %v7133_v42  ;;  %v7219_v41 = vld [vmem:[%s8114_s13 + $0x890] ss:$8 sps:$4 sm:$0xff]   ;;  %v7230_v42 = vld [vmem:[%s8114_s13 + $0x8a4] ss:$8 sps:$4 sm:$0xff]  }
 0x1a5   : > { %4862 = vmatprep.subr.bf16.mxu0 %v7137_v44  ;;  %v7227_v44 = vld [vmem:[%s9447_s0 + $0x308] ss:$72 sps:$4 sm:$0xff]  }
 0x1a6   : > { %4366 = vmatmul.mubr.bf16.gmra.mrb[24].mxu1 %v7130_v43  ;;  %v7226_v43 = vld [vmem:[%s9447_s0 + $0x2e8] ss:$72 sps:$4 sm:$0xff]  }
 0x1a7   : > { %4818 = vmatmul.mubr.bf16.gmra.mrb[24].mxu0 %v7134_v46  ;;  %4411 = vmatpush1.bf16.msra.mxu1 %v7131_v45  ;;  %v7228_v45 = vld [vmem:[%s8114_s13 + $0x8a0] ss:$8 sps:$4 sm:$0xff]   ;;  %v7233_v46 = vld [vmem:[%s8114_s13 + $0x8b4] ss:$8 sps:$4 sm:$0xff]  }
 0x1a8   : > { %4863 = vmatpush1.bf16.msra.mxu0 %v7135_v47  ;;  %4412 = vmatprep.subr.bf16.mxu1 %v7140_v48  ;;  %v7234_v47 = vld [vmem:[%s9447_s0 + $0x37c] ss:$72 sps:$4 sm:$0xff]  }
 0x1a9   : > { %4864 = vmatprep.subr.bf16.mxu0 %v7143_v49  ;;  %4375 = vmatprep.mubr.bf16.mxu1 %v7144_v50  ;;  %v7236_v48 = vld [vmem:[%s9447_s0 + $0x39c] ss:$72 sps:$4 sm:$0xff]   ;;  %v7231_v49 = vld [vmem:[%s8114_s13 + $0x8b0] ss:$8 sps:$4 sm:$0xff]  }
 0x1aa   : > { %4827 = vmatprep.mubr.bf16.mxu0 %v7146_v51  ;;  %v7242_v50 = vld [vmem:[%s8114_s13 + $0x8c4] ss:$8 sps:$4 sm:$0xff]   ;;  %v7238_v51 = vld [vmem:[%s9447_s0 + $0x378] ss:$72 sps:$4 sm:$0xff]  }
 0x1ab   : > { %4413 = vmatpush1.bf16.msra.mxu1 %v7138_v52  ;;  %v7239_v52 = vld [vmem:[%s9447_s0 + $0x398] ss:$72 sps:$4 sm:$0xff]  }
 0x1ac   : > { %4865 = vmatpush1.bf16.msra.mxu0 %v7141_v53  ;;  %4414 = vmatprep.subr.bf16.mxu1 %v7151_v54  ;;  %v7240_v53 = vld [vmem:[%s8114_s13 + $0x8c0] ss:$8 sps:$4 sm:$0xff]   ;;  %v7245_v54 = vld [vmem:[%s8114_s13 + $0x8d4] ss:$8 sps:$4 sm:$0xff]  }
 0x1ad   : > { %4866 = vmatprep.subr.bf16.mxu0 %v7155_v55  ;;  %v7246_v55 = vld [vmem:[%s9447_s0 + $0x40c] ss:$72 sps:$4 sm:$0xff]  }
 0x1ae   : > { %4376 = vmatmul.mubr.bf16.gmra.mrb[28].mxu1 %v7148_v56  ;;  %v7248_v56 = vld [vmem:[%s9447_s0 + $0x42c] ss:$72 sps:$4 sm:$0xff]  }
 0x1af   : > { %4828 = vmatmul.mubr.bf16.gmra.mrb[28].mxu0 %v7152_v58  ;;  %4415 = vmatpush1.bf16.msra.mxu1 %v7149_v57  ;;  %v7243_v57 = vld [vmem:[%s8114_s13 + $0x8d0] ss:$8 sps:$4 sm:$0xff]   ;;  %v7254_v58 = vld [vmem:[%s8114_s13 + $0x8e4] ss:$8 sps:$4 sm:$0xff]  }
 0x1b0   : > { %4867 = vmatpush1.bf16.msra.mxu0 %v7153_v59  ;;  %4416 = vmatprep.subr.bf16.mxu1 %v7158_v60  ;;  %v7250_v59 = vld [vmem:[%s9447_s0 + $0x408] ss:$72 sps:$4 sm:$0xff]  }
 0x1b1   : > { %4868 = vmatprep.subr.bf16.mxu0 %v7161_v61  ;;  %4418 = vmatprep.mubr.bf16.mxu1 %v7164_v62  ;;  %v7251_v60 = vld [vmem:[%s9447_s0 + $0x428] ss:$72 sps:$4 sm:$0xff]   ;;  %v7257_v62 = vld [vmem:[%s8114_s13 + $0x8f4] ss:$8 sps:$4 sm:$0xff]  }
 0x1b2   : > { %4870 = vmatprep.mubr.bf16.mxu0 %v7167_v63  ;;  %v7252_v61 = vld [vmem:[%s8114_s13 + $0x8e0] ss:$8 sps:$4 sm:$0xff]   ;;  %v7260_v63 = vld [vmem:[%s9447_s0 + $0x44] ss:$72 sps:$4 sm:$0xff]  }
 0x1b3   : > { %4417 = vmatpush1.bf16.msra.mxu1 %v7156_v0  ;;  %v7263_v0 = vld [vmem:[%s9447_s0 + $0x284] ss:$72 sps:$4 sm:$0xff]  }
 0x1b4   : > { %4869 = vmatpush1.bf16.msra.mxu0 %v7159_v1  ;;  %6304 = vmatprep.subr.bf16.mxu1 %v7170_v2  ;;  %v7255_v1 = vld [vmem:[%s8114_s13 + $0x8f0] ss:$8 sps:$4 sm:$0xff]  }
 0x1b5   : > { %4951 = vmatprep.subr.bf16.mxu0 %v7170_v2  ;;  %v7258_v2 = vld [vmem:[%s9447_s0 + $0x40] ss:$72 sps:$4 sm:$0xff]  }
 0x1b6   : > { %4419 = vmatmul.mubr.bf16.vlgmr.msra.gmra.mrb[0].mxu1 %v7162_v3  ;;  %v7261_v3 = vld [vmem:[%s9447_s0 + $0x280] ss:$72 sps:$4 sm:$0xff]  }
 0x1b7   : > { %4871 = vmatmul.mubr.bf16.vlgmr.msra.gmra.mrb[0].mxu0 %v7165_v4  ;;  %6320 = vmatpush1.bf16.msra.mxu1 %v7168_v5  ;;  %v7264_v4 = vld [vmem:[%s9447_s0 + $0xd4] ss:$72 sps:$4 sm:$0xff]  }
 0x1b8   : > { %4952 = vmatpush1.bf16.msra.mxu0 %v7168_v5  ;;  %6305 = vmatprep.subr.bf16.mxu1 %v7173_v6  ;;  %v7266_v5 = vld [vmem:[%s9447_s0 + $0x314] ss:$72 sps:$4 sm:$0xff]  }
 0x1b9   : > { %4953 = vmatprep.subr.bf16.mxu0 %v7173_v6  ;;  %4428 = vmatprep.mubr.bf16.mxu1 %v7174_v7  ;;  %v7268_v6 = vld [vmem:[%s9447_s0 + $0xd0] ss:$72 sps:$4 sm:$0xff]  }
 0x1ba   : > { %4880 = vmatprep.mubr.bf16.mxu0 %v7176_v8  ;;  %v7269_v7 = vld [vmem:[%s9447_s0 + $0x310] ss:$72 sps:$4 sm:$0xff]   ;;  %v7270_v8 = vld [vmem:[%s9447_s0 + $0x164] ss:$72 sps:$4 sm:$0xff]  }
 0x1bb   : > { %6321 = vmatpush1.bf16.msra.mxu1 %v7171_v9 }
 0x1bc   : > { %4954 = vmatpush1.bf16.msra.mxu0 %v7171_v9  ;;  %6306 = vmatprep.subr.bf16.mxu1 %v7182_v10  ;;  %v7272_v9 = vld [vmem:[%s9447_s0 + $0x3a4] ss:$72 sps:$4 sm:$0xff]  }
 0x1bd   : > { %4955 = vmatprep.subr.bf16.mxu0 %v7182_v10  ;;  %v7274_v10 = vld [vmem:[%s9447_s0 + $0x160] ss:$72 sps:$4 sm:$0xff]  }
 0x1be   : > { %4429 = vmatmul.mubr.bf16.gmra.mrb[4].mxu1 %v7178_v11  ;;  %v7275_v11 = vld [vmem:[%s9447_s0 + $0x3a0] ss:$72 sps:$4 sm:$0xff]  }
 0x1bf   : > { %4881 = vmatmul.mubr.bf16.gmra.mrb[4].mxu0 %v7179_v12  ;;  %6322 = vmatpush1.bf16.msra.mxu1 %v7180_v13  ;;  %v7276_v12 = vld [vmem:[%s9447_s0 + $0x1f4] ss:$72 sps:$4 sm:$0xff]  }
 0x1c0   : > { %4956 = vmatpush1.bf16.msra.mxu0 %v7180_v13  ;;  %6307 = vmatprep.subr.bf16.mxu1 %v7185_v14  ;;  %v7278_v13 = vld [vmem:[%s9447_s0 + $0x434] ss:$72 sps:$4 sm:$0xff]  }
 0x1c1   : > { %4957 = vmatprep.subr.bf16.mxu0 %v7185_v14  ;;  %4438 = vmatprep.mubr.bf16.mxu1 %v7186_v15  ;;  %v7280_v14 = vld [vmem:[%s9447_s0 + $0x1f0] ss:$72 sps:$4 sm:$0xff]  }
 0x1c2   : > { %4890 = vmatprep.mubr.bf16.mxu0 %v7188_v16  ;;  %v7281_v15 = vld [vmem:[%s9447_s0 + $0x430] ss:$72 sps:$4 sm:$0xff]  }
 0x1c3   : > { %6323 = vmatpush1.bf16.msra.mxu1 %v7183_v17 }
 0x1c4   : > { %4958 = vmatpush1.bf16.msra.mxu0 %v7183_v17  ;;  %6308 = vmatprep.subr.bf16.mxu1 %v7194_v18 }
 0x1c5   : > { %4959 = vmatprep.subr.bf16.mxu0 %v7194_v18 }
 0x1c6   : > { %4439 = vmatmul.mubr.bf16.gmra.mrb[8].mxu1 %v7190_v19 }
 0x1c7   : > { %4891 = vmatmul.mubr.bf16.gmra.mrb[8].mxu0 %v7191_v20  ;;  %6324 = vmatpush1.bf16.msra.mxu1 %v7192_v21 }
 0x1c8   : > { %4960 = vmatpush1.bf16.msra.mxu0 %v7192_v21  ;;  %6309 = vmatprep.subr.bf16.mxu1 %v7197_v22 }
 0x1c9   : > { %4961 = vmatprep.subr.bf16.mxu0 %v7197_v22  ;;  %4448 = vmatprep.mubr.bf16.mxu1 %v7198_v23 }
 0x1ca   : > { %4900 = vmatprep.mubr.bf16.mxu0 %v7200_v24 }
 0x1cb   : > { %6325 = vmatpush1.bf16.msra.mxu1 %v7195_v25 }
 0x1cc   : > { %4962 = vmatpush1.bf16.msra.mxu0 %v7195_v25  ;;  %6310 = vmatprep.subr.bf16.mxu1 %v7206_v26 }
 0x1cd   : > { %4963 = vmatprep.subr.bf16.mxu0 %v7206_v26 }
 0x1ce   : > { %4449 = vmatmul.mubr.bf16.gmra.mrb[12].mxu1 %v7202_v27 }
 0x1cf   : > { %4901 = vmatmul.mubr.bf16.gmra.mrb[12].mxu0 %v7203_v28  ;;  %6326 = vmatpush1.bf16.msra.mxu1 %v7204_v29 }
 0x1d0   : > { %4964 = vmatpush1.bf16.msra.mxu0 %v7204_v29  ;;  %6311 = vmatprep.subr.bf16.mxu1 %v7209_v30 }
 0x1d1   : > { %4965 = vmatprep.subr.bf16.mxu0 %v7209_v30  ;;  %4458 = vmatprep.mubr.bf16.mxu1 %v7210_v31 }
 0x1d2   : > { %4910 = vmatprep.mubr.bf16.mxu0 %v7212_v32 }
 0x1d3   : > { %6327 = vmatpush1.bf16.msra.mxu1 %v7207_v33 }
 0x1d4   : > { %4966 = vmatpush1.bf16.msra.mxu0 %v7207_v33  ;;  %6312 = vmatprep.subr.bf16.mxu1 %v7218_v34 }
 0x1d5   : > { %4967 = vmatprep.subr.bf16.mxu0 %v7218_v34 }
 0x1d6   : > { %4459 = vmatmul.mubr.bf16.gmra.mrb[16].mxu1 %v7214_v35 }
 0x1d7   : > { %4911 = vmatmul.mubr.bf16.gmra.mrb[16].mxu0 %v7215_v36  ;;  %6328 = vmatpush1.bf16.msra.mxu1 %v7216_v37 }
 0x1d8   : > { %4968 = vmatpush1.bf16.msra.mxu0 %v7216_v37  ;;  %6313 = vmatprep.subr.bf16.mxu1 %v7221_v38 }
 0x1d9   : > { %4969 = vmatprep.subr.bf16.mxu0 %v7221_v38  ;;  %4468 = vmatprep.mubr.bf16.mxu1 %v7222_v39 }
 0x1da   : > { %4920 = vmatprep.mubr.bf16.mxu0 %v7224_v40 }
 0x1db   : > { %6329 = vmatpush1.bf16.msra.mxu1 %v7219_v41 }
 0x1dc   : > { %4970 = vmatpush1.bf16.msra.mxu0 %v7219_v41  ;;  %6314 = vmatprep.subr.bf16.mxu1 %v7230_v42 }
 0x1dd   : > { %4971 = vmatprep.subr.bf16.mxu0 %v7230_v42 }
 0x1de   : > { %4469 = vmatmul.mubr.bf16.gmra.mrb[20].mxu1 %v7226_v43 }
 0x1df   : > { %4921 = vmatmul.mubr.bf16.gmra.mrb[20].mxu0 %v7227_v44  ;;  %6330 = vmatpush1.bf16.msra.mxu1 %v7228_v45 }
 0x1e0   : > { %4972 = vmatpush1.bf16.msra.mxu0 %v7228_v45  ;;  %6315 = vmatprep.subr.bf16.mxu1 %v7233_v46 }
 0x1e1   : > { %4973 = vmatprep.subr.bf16.mxu0 %v7233_v46  ;;  %4478 = vmatprep.mubr.bf16.mxu1 %v7234_v47 }
 0x1e2   : > { %4930 = vmatprep.mubr.bf16.mxu0 %v7236_v48 }
 0x1e3   : > { %6331 = vmatpush1.bf16.msra.mxu1 %v7231_v49 }
 0x1e4   : > { %4974 = vmatpush1.bf16.msra.mxu0 %v7231_v49  ;;  %6316 = vmatprep.subr.bf16.mxu1 %v7242_v50 }
 0x1e5   : > { %4975 = vmatprep.subr.bf16.mxu0 %v7242_v50 }
 0x1e6   : > { %4479 = vmatmul.mubr.bf16.gmra.mrb[24].mxu1 %v7238_v51 }
 0x1e7   : > { %4931 = vmatmul.mubr.bf16.gmra.mrb[24].mxu0 %v7239_v52  ;;  %6332 = vmatpush1.bf16.msra.mxu1 %v7240_v53 }
 0x1e8   : > { %4976 = vmatpush1.bf16.msra.mxu0 %v7240_v53  ;;  %6317 = vmatprep.subr.bf16.mxu1 %v7245_v54 }
 0x1e9   : > { %4977 = vmatprep.subr.bf16.mxu0 %v7245_v54  ;;  %4488 = vmatprep.mubr.bf16.mxu1 %v7246_v55 }
 0x1ea   : > { %4940 = vmatprep.mubr.bf16.mxu0 %v7248_v56 }
 0x1eb   : > { %6333 = vmatpush1.bf16.msra.mxu1 %v7243_v57 }
 0x1ec   : > { %4978 = vmatpush1.bf16.msra.mxu0 %v7243_v57  ;;  %6318 = vmatprep.subr.bf16.mxu1 %v7254_v58 }
 0x1ed   : > { %4979 = vmatprep.subr.bf16.mxu0 %v7254_v58 }
 0x1ee   : > { %4489 = vmatmul.mubr.bf16.gmra.mrb[28].mxu1 %v7250_v59 }
 0x1ef   : > { %4941 = vmatmul.mubr.bf16.gmra.mrb[28].mxu0 %v7251_v60  ;;  %6334 = vmatpush1.bf16.msra.mxu1 %v7252_v61 }
 0x1f0   : > { %4980 = vmatpush1.bf16.msra.mxu0 %v7252_v61  ;;  %6319 = vmatprep.subr.bf16.mxu1 %v7257_v62 }
 0x1f1   : > { %4981 = vmatprep.subr.bf16.mxu0 %v7257_v62  ;;  %4983 = vmatprep.mubr.bf16.mxu0 %v7260_v63 }
 0x1f2   : > { %5023 = vmatprep.mubr.bf16.mxu1 %v7263_v0 }
 0x1f3   : > { %6335 = vmatpush1.bf16.msra.mxu1 %v7255_v1 }
 0x1f4   : > { %4982 = vmatpush1.bf16.msra.mxu0 %v7255_v1 }
 0x1f6   : > { %5024 = vmatmul.mubr.bf16.vlgmr.msra.gmra.mrb[32].mxu1 %v7261_v3  ;;  %v5066_v3 = vlaneseq }
 0x1f7   : > { %4984 = vmatmul.mubr.bf16.vlgmr.msra.gmra.mrb[0].mxu0 %v7258_v2  ;;  %5033 = vmatprep.mubr.bf16.mxu1 %v7266_v5 }
 0x1f8   : > { %4993 = vmatprep.mubr.bf16.mxu0 %v7264_v4  ;;  %v5067_v5 = vshrl.u32 %v5066_v3, 7 }
 0x1fe   : > { %5034 = vmatmul.mubr.bf16.gmra.mrb[36].mxu1 %v7269_v7 }
 0x1ff   : > { %4994 = vmatmul.mubr.bf16.gmra.mrb[4].mxu0 %v7268_v6  ;;  %5043 = vmatprep.mubr.bf16.mxu1 %v7272_v9 }
 0x200   : > { %5003 = vmatprep.mubr.bf16.mxu0 %v7270_v8 }
 0x206   : > { %5044 = vmatmul.mubr.bf16.gmra.mrb[40].mxu1 %v7275_v11 }
 0x207   : > { %5004 = vmatmul.mubr.bf16.gmra.mrb[8].mxu0 %v7274_v10  ;;  %5053 = vmatprep.mubr.bf16.mxu1 %v7278_v13 }
 0x208   : > { %5013 = vmatprep.mubr.bf16.mxu0 %v7276_v12 }
 0x20e   : > { %5054 = vmatmul.mubr.bf16.gmra.mrb[44].mxu1 %v7281_v15 }
 0x20f   : > { %5014 = vmatmul.mubr.bf16.gmra.mrb[12].mxu0 %v7280_v14 }
 0x289   : > { %v8830_v16 = vpop.f32.mrb[0].mxu1 }
 0x28a   : > { %v8832_v17 = vpop.f32.mrb[1].mxu1 }
 0x28b   : > { %v8834_v18 = vpop.f32.mrb[2].mxu1 }
 0x28c   : > { %v8836_v19 = vpop.f32.mrb[3].mxu1 }
 0x291   : > { %v8838_v20 = vpop.f32.mrb[4].mxu1 }
 0x292   : > { %v8840_v21 = vpop.f32.mrb[5].mxu1 }
 0x293   : > { %v8842_v22 = vpop.f32.mrb[6].mxu1 }
 0x294   : > { %v8844_v23 = vpop.f32.mrb[7].mxu1 }
 0x299   : > { %v8846_v24 = vpop.f32.mrb[8].mxu1 }
 0x29a   : > { %v8848_v25 = vpop.f32.mrb[9].mxu1 }
 0x29b   : > { %v8850_v26 = vpop.f32.mrb[10].mxu1 }
 0x29c   : > { %v8852_v27 = vpop.f32.mrb[11].mxu1 }
 0x2a1   : > { %v8854_v28 = vpop.f32.mrb[12].mxu1 }
 0x2a2   : > { %v8856_v29 = vpop.f32.mrb[13].mxu1 }
 0x2a3   : > { %9453 = vst [vmem:[#allocation4_spill] sm:$0xff] %v8856_v29  ;;  %v8858_v30 = vpop.f32.mrb[14].mxu1 }
 0x2a4   : > { %9454 = vst [vmem:[#allocation5_spill] sm:$0xff] %v8858_v30  ;;  %v8860_v31 = vpop.f32.mrb[15].mxu1 }
 0x2a5   : > { %9455 = vst [vmem:[#allocation6_spill] sm:$0xff] %v8860_v31 }
 0x2a9   : > { %v4460_v32 = vpop.f32.mrb[16].mxu1 }
 0x2aa   : > { %v4912_v33 = vpop.f32.mrb[16].mxu0  ;;  %v4462_v35 = vpop.f32.mrb[17].mxu1 }
 0x2ab   : > { %v8862_v34 = vadd.f32 %v4912_v33, %v4460_v32  ;;  %v4914_v36 = vpop.f32.mrb[17].mxu0  ;;  %v4464_v38 = vpop.f32.mrb[18].mxu1  ;;  %v5068_v33 = vsub.s32 0, %v5067_v5 }
 0x2ac   : > { %v8864_v37 = vadd.f32 %v4914_v36, %v4462_v35  ;;  %v4916_v39 = vpop.f32.mrb[18].mxu0  ;;  %v4466_v41 = vpop.f32.mrb[19].mxu1  ;;  %v5064_v36 = vld [vmem:[%s1446_s10] sm:$0x3] }
 0x2ad   : > { %v8866_v40 = vadd.f32 %v4916_v39, %v4464_v38  ;;  %v4918_v42 = vpop.f32.mrb[19].mxu0  ;;  %v5072_v38 = vsub.s32 1, %v5067_v5  ;;  %v5108_v39 = vld [vmem:[%s1451_s14] sm:$0x3] }
 0x2ae   : > { %v8868_v43 = vadd.f32 %v4918_v42, %v4466_v41  ;;  %v8901_v41 = vrot.slane %v5064_v36, %v5068_v33 }
 0x2b1   : > { %v4470_v44 = vpop.f32.mrb[20].mxu1 }
 0x2b2   : > { %v4922_v45 = vpop.f32.mrb[20].mxu0  ;;  %v4472_v47 = vpop.f32.mrb[21].mxu1 }
 0x2b3   : > { %v8870_v46 = vadd.f32 %v4922_v45, %v4470_v44  ;;  %v4924_v48 = vpop.f32.mrb[21].mxu0  ;;  %v4474_v50 = vpop.f32.mrb[22].mxu1  ;;  %v8903_v45 = vrot.slane %v5064_v36, %v5072_v38 }
 0x2b4   : > { %v8872_v49 = vadd.f32 %v4924_v48, %v4472_v47  ;;  %v4926_v51 = vpop.f32.mrb[22].mxu0  ;;  %v4476_v53 = vpop.f32.mrb[23].mxu1  ;;  %v8906_v48 = vrot.slane %v5108_v39, %v5068_v33 }
 0x2b5   : > { %v8874_v52 = vadd.f32 %v4926_v51, %v4474_v50  ;;  %v4928_v54 = vpop.f32.mrb[23].mxu0 }
 0x2b6   : > { %v8876_v55 = vadd.f32 %v4928_v54, %v4476_v53 }
 0x2b9   : > { %v4480_v56 = vpop.f32.mrb[24].mxu1 }
 0x2ba   : > { %v4932_v57 = vpop.f32.mrb[24].mxu0  ;;  %v4482_v59 = vpop.f32.mrb[25].mxu1 }
 0x2bb   : > { %v8879_v58 = vadd.f32 %v4932_v57, %v4480_v56  ;;  %v4934_v60 = vpop.f32.mrb[25].mxu0  ;;  %v4484_v62 = vpop.f32.mrb[26].mxu1  ;;  %v8910_v56 = vrot.slane %v5108_v39, %v5072_v38 }
 0x2bc   : > { %v8881_v61 = vadd.f32 %v4934_v60, %v4482_v59  ;;  %v4936_v63 = vpop.f32.mrb[26].mxu0  ;;  %v4486_v1 = vpop.f32.mrb[27].mxu1 }
 0x2bd   : > { %v8883_v0 = vadd.f32 %v4936_v63, %v4484_v62  ;;  %v4938_v2 = vpop.f32.mrb[27].mxu0 }
 0x2be   : > { %v8885_v4 = vadd.f32 %v4938_v2, %v4486_v1 }
 0x2c1   : > { %v4490_v6 = vpop.f32.mrb[28].mxu1 }
 0x2c2   : > { %v4942_v7 = vpop.f32.mrb[28].mxu0  ;;  %v4492_v9 = vpop.f32.mrb[29].mxu1 }
 0x2c3   : > { %v8887_v8 = vadd.f32 %v4942_v7, %v4490_v6  ;;  %v4944_v10 = vpop.f32.mrb[29].mxu0  ;;  %v4494_v12 = vpop.f32.mrb[30].mxu1 }
 0x2c4   : > { %v8892_v11 = vadd.f32 %v4944_v10, %v4492_v9  ;;  %v4946_v13 = vpop.f32.mrb[30].mxu0  ;;  %v4496_v15 = vpop.f32.mrb[31].mxu1 }
 0x2c5   : > { %v8894_v14 = vadd.f32 %v4946_v13, %v4494_v12  ;;  %v4948_v32 = vpop.f32.mrb[31].mxu0 }
 0x2c6   : > { %9456 = vst [vmem:[#allocation7_spill] sm:$0xff] %v8892_v11  ;;  %v8899_v35 = vadd.f32 %v4948_v32, %v4496_v15 }
 0x2c7   : > { %9457 = vst [vmem:[#allocation8_spill] sm:$0xff] %v8894_v14 }
 0x2c8   : > { %9458 = vst [vmem:[#allocation9_spill] sm:$0xff] %v8899_v35 }
 0x2c9   : > { %v5025_v44 = vpop.f32.mrb[32].mxu1 }
 0x2ca   : > { %v4985_v42 = vpop.f32.mrb[0].mxu0  ;;  %v6353_v50 = vadd.f32 %v8862_v34, %v5025_v44  ;;  %v5027_v53 = vpop.f32.mrb[33].mxu1 }
 0x2cb   : > { %v6336_v47 = vadd.f32 %v4985_v42, %v8830_v16  ;;  %v4987_v51 = vpop.f32.mrb[1].mxu0  ;;  %v6355_v57 = vadd.f32 %v8864_v37, %v5027_v53  ;;  %v5029_v60 = vpop.f32.mrb[34].mxu1 }
 0x2cc   : > { %v6337_v54 = vadd.f32 %v4987_v51, %v8832_v17  ;;  %v4989_v59 = vpop.f32.mrb[2].mxu0  ;;  %v5092_v63 = vmul.f32 %v6353_v50, %v8901_v41  ;;  %v6357_v1 = vadd.f32 %v8866_v40, %v5029_v60  ;;  %v5031_v34 = vpop.f32.mrb[35].mxu1 }
 0x2cd   : > { %v5076_v62 = vmul.f32 %v6336_v47, %v8901_v41  ;;  %v6338_v16 = vadd.f32 %v4989_v59, %v8834_v18  ;;  %v4991_v2 = vpop.f32.mrb[3].mxu0  ;;  %v5093_v17 = vmul.f32 %v6355_v57, %v8903_v45  ;;  %v6359_v37 = vadd.f32 %v8868_v43, %v5031_v34 }
 0x2ce   : > { %v5077_v3 = vmul.f32 %v6337_v54, %v8903_v45  ;;  %v6339_v5 = vadd.f32 %v4991_v2, %v8836_v19  ;;  %v8925_v7 = vadd.f32 %v8906_v48, %v5092_v63  ;;  %v5094_v40 = vmul.f32 %v6357_v1, %v8901_v41 }
 0x2cf   : > { %v8922_v6 = vadd.f32 %v8906_v48, %v5076_v62  ;;  %v5078_v18 = vmul.f32 %v6338_v16, %v8901_v41  ;;  %v8933_v10 = vadd.f32 %v8910_v56, %v5093_v17  ;;  %v5095_v43 = vmul.f32 %v6359_v37, %v8903_v45 }
 0x2d0   : > { %v8930_v9 = vadd.f32 %v8910_v56, %v5077_v3  ;;  %v5079_v19 = vmul.f32 %v6339_v5, %v8903_v45  ;;  %v5168_v13 = vmin.f32 %v8925_v7, 20.0  ;;  %v8945_v44 = vadd.f32 %v8906_v48, %v5094_v40 }
 0x2d1   : > { %v5152_v12 = vmin.f32 %v8922_v6, 20.0  ;;  %v5169_v32 = vmin.f32 %v8933_v10, 20.0  ;;  %v5035_v36 = vpop.f32.mrb[36].mxu1  ;;  %v8942_v42 = vadd.f32 %v8906_v48, %v5078_v18  ;;  %v8951_v57 = vadd.f32 %v8910_v56, %v5095_v43 }
 0x2d2   : > { %v5153_v15 = vmin.f32 %v8930_v9, 20.0  ;;  %v4995_v33 = vpop.f32.mrb[4].mxu0  ;;  %v5216_v39 = vmul.f32 1.442695, %v5168_v13  ;;  %v5037_v50 = vpop.f32.mrb[37].mxu1  ;;  %v8948_v54 = vadd.f32 %v8910_v56, %v5079_v19  ;;  %v5170_v63 = vmin.f32 %v8945_v44, 20.0 }
 0x2d3   : > { %v5184_v38 = vmul.f32 1.442695, %v5152_v12  ;;  %v4997_v47 = vpop.f32.mrb[5].mxu0  ;;  %v5218_v53 = vmul.f32 1.442695, %v5169_v32  ;;  %v5039_v60 = vpop.f32.mrb[38].mxu1  ;;  %v6340_v37 = vadd.f32 %v4995_v33, %v8838_v20  ;;  %v6361_v40 = vadd.f32 %v8870_v46, %v5035_v36 }
 0x2d4   : > { %v5186_v51 = vmul.f32 1.442695, %v5153_v15  ;;  %v4999_v59 = vpop.f32.mrb[6].mxu0  ;;  %v5154_v62 = vmin.f32 %v8942_v42, 20.0  ;;  %v8955_v1 = vpop.f32.mrb[39].mxu1  ;;  %v5155_v2 = vmin.f32 %v8948_v54, 20.0  ;;  %v6341_v19 = vadd.f32 %v4997_v47, %v8840_v21 }
 0x2d5   : > { %7282 = vpow2.f32 %v5184_v38  ;;  %v5001_v16 = vpop.f32.mrb[7].mxu0  ;;  %v5220_v3 = vmul.f32 1.442695, %v5170_v63  ;;  %v5171_v17 = vmin.f32 %v8951_v57, 20.0  ;;  %v5080_v43 = vmul.f32 %v6340_v37, %v8901_v41 }
 0x2d6   : > { %7284 = vpow2.f32 %v5216_v39  ;;  %v5188_v34 = vmul.f32 1.442695, %v5154_v62  ;;  %v5190_v5 = vmul.f32 1.442695, %v5155_v2  ;;  %v6363_v12 = vadd.f32 %v8872_v49, %v5037_v50 }
 0x2d7   : > { %7286 = vpow2.f32 %v5186_v51  ;;  %v5222_v18 = vmul.f32 1.442695, %v5171_v17  ;;  %v6342_v13 = vadd.f32 %v4999_v59, %v8842_v22  ;;  %v5096_v20 = vmul.f32 %v6361_v40, %v8901_v41 }
 0x2d8   : > { %7288 = vpow2.f32 %v5218_v53  ;;  %v5081_v33 = vmul.f32 %v6341_v19, %v8903_v45  ;;  %v6365_v46 = vadd.f32 %v8874_v52, %v5039_v60  ;;  %v8977_v49 = vadd.f32 %v8906_v48, %v5080_v43 }
 0x2d9   : > { %7290 = vpow2.f32 %v5188_v34  ;;  %v8967_v32 = vpop.f32.mrb[40].mxu1  ;;  %v5097_v22 = vmul.f32 %v6363_v12, %v8903_v45  ;;  %v5082_v38 = vmul.f32 %v6342_v13, %v8901_v41  ;;  %v8986_v50 = vadd.f32 %v8906_v48, %v5096_v20 }
 0x2da   : > { %7292 = vpow2.f32 %v5220_v3  ;;  %v8965_v15 = vpop.f32.mrb[8].mxu0  ;;  %v8974_v21 = vpop.f32.mrb[41].mxu1  ;;  %v8989_v52 = vadd.f32 %v8910_v56, %v5081_v33  ;;  %v8992_v51 = vadd.f32 %v5001_v16, %v8844_v23  ;;  %v5156_v60 = vmin.f32 %v8977_v49, 20.0 }
 0x2db   : > { %7294 = vpow2.f32 %v5190_v5  ;;  %v8972_v36 = vpop.f32.mrb[9].mxu0  ;;  %v8983_v47 = vpop.f32.mrb[42].mxu1  ;;  %v9000_v62 = vadd.f32 %v8910_v56, %v5097_v22  ;;  %v5172_v2 = vmin.f32 %v8986_v50, 20.0  ;;  %v9005_v3 = vadd.f32 %v8906_v48, %v5082_v38 }
 0x2dc   : > { %7296 = vpow2.f32 %v5222_v18  ;;  %v8981_v39 = vpop.f32.mrb[10].mxu0  ;;  %v8996_v59 = vpop.f32.mrb[43].mxu1  ;;  %v5157_v34 = vmin.f32 %v8989_v52, 20.0  ;;  %v5192_v16 = vmul.f32 1.442695, %v5156_v60  ;;  %v5098_v43 = vmul.f32 %v6365_v46, %v8901_v41 }
 0x2dd   : > { %v8994_v53 = vpop.f32.mrb[11].mxu0  ;;  %v5173_v5 = vmin.f32 %v9000_v62, 20.0  ;;  %v5224_v40 = vmul.f32 1.442695, %v5172_v2  ;;  %v5158_v2 = vmin.f32 %v9005_v3, 20.0  ;;  %vm5408_vm0 = vcmp.gt.f32.partialorder %v8922_v6, 20.0 }
 0x2de   : > { %v5194_v19 = vmul.f32 1.442695, %v5157_v34  ;;  %7298 = vpow2.f32 %v5192_v16  ;;  %vm5424_vm1 = vcmp.gt.f32.partialorder %v8925_v7, 20.0  ;;  %vm5409_vm2 = vcmp.gt.f32.partialorder %v8930_v9, 20.0 }
 0x2df   : > { %v7283_v63 = vpop.eup %7282  ;;  %v5226_v33 = vmul.f32 1.442695, %v5173_v5  ;;  %7300 = vpow2.f32 %v5224_v40  ;;  %vm5425_vm3 = vcmp.gt.f32.partialorder %v8933_v10, 20.0  ;;  %vm5410_vm4 = vcmp.gt.f32.partialorder %v8942_v42, 20.0 }
 0x2e0   : > { %v7285_v17 = vpop.eup %7284  ;;  %v5248_v23 = vadd.f32 2.0, %v7283_v63  ;;  %7302 = vpow2.f32 %v5194_v19  ;;  %vm5426_vm5 = vcmp.gt.f32.partialorder %v8945_v44, 20.0  ;;  %vm5411_vm6 = vcmp.gt.f32.partialorder %v8948_v54, 20.0 }
 0x2e1   : > { %v7287_v37 = vpop.eup %7286  ;;  %v5264_v18 = vadd.f32 2.0, %v7285_v17  ;;  %v9013_v38 = vpop.f32.mrb[44].mxu1  ;;  %7304 = vpow2.f32 %v5226_v33  ;;  %vm5427_vm7 = vcmp.gt.f32.partialorder %v8951_v57, 20.0  ;;  %vm5412_vm8 = vcmp.gt.f32.partialorder %v8977_v49, 20.0 }
 0x2e2   : > { %v7289_v12 = vpop.eup %7288  ;;  %v9009_v13 = vmul.f32 %v7283_v63, %v5248_v23  ;;  %v5249_v20 = vadd.f32 2.0, %v7287_v37  ;;  %v9011_v22 = vpop.f32.mrb[12].mxu0  ;;  %vm5428_vm9 = vcmp.gt.f32.partialorder %v8986_v50, 20.0  ;;  %vm5413_vm10 = vcmp.gt.f32.partialorder %v8989_v52, 20.0 }
 0x2e3   : > { %v7291_v35 = vpop.eup %7290  ;;  %v9015_v60 = vmul.f32 %v7285_v17, %v5264_v18  ;;  %v5265_v31 = vadd.f32 2.0, %v7289_v12  ;;  %v9018_v34 = vpop.f32.mrb[13].mxu0  ;;  %vm5429_vm11 = vcmp.gt.f32.partialorder %v9000_v62, 20.0  ;;  %vm5414_vm12 = vcmp.gt.f32.partialorder %v9005_v3, 20.0 }
 0x2e4   : > { %9459 = vst [vmem:[#allocation10_spill] sm:$0xff] %v9018_v34  ;;  %v9020_v46 = vpop.f32.mrb[45].mxu1  ;;  %v7293_v63 = vpop.eup %7292  ;;  %v5312_v23 = vadd.f32 2.0, %v9009_v13  ;;  %v9023_v16 = vmul.f32 %v7287_v37, %v5249_v20  ;;  %v5250_v5 = vadd.f32 2.0, %v7291_v35 }
 0x2e5   : > { %9460 = vst [vmem:[#allocation11_spill] sm:$0xff] %v9020_v46  ;;  %v9025_v14 = vpop.f32.mrb[14].mxu0  ;;  %v9027_v30 = vpop.f32.mrb[46].mxu1  ;;  %v5328_v18 = vadd.f32 2.0, %v9015_v60  ;;  %v9030_v40 = vmul.f32 %v7289_v12, %v5265_v31  ;;  %v5266_v11 = vadd.f32 2.0, %v7293_v63 }
 0x2e6   : > { %9461 = vst [vmem:[#allocation12_spill] sm:$0xff] %v9025_v14  ;;  %9462 = vst [vmem:[#allocation13_spill] sm:$0xff] %v9027_v30  ;;  %v7295_v17 = vpop.eup %7294  ;;  %v9032_v34 = vpop.f32.mrb[15].mxu0  ;;  %7306 = vrcp.f32 %v5312_v23  ;;  %v5313_v37 = vadd.f32 2.0, %v9023_v16  ;;  %v9037_v19 = vmul.f32 %v7291_v35, %v5250_v5  ;;  %v9049_v35 = vadd.f32 %v8906_v48, %v5098_v43 }
 0x2e7   : > { %9463 = vst [vmem:[#allocation14_spill] sm:$0xff] %v9032_v34  ;;  %v9034_v46 = vpop.f32.mrb[47].mxu1  ;;  %v7297_v29 = vpop.eup %7296  ;;  %v5251_v20 = vadd.f32 2.0, %v7295_v17  ;;  %7308 = vrcp.f32 %v5328_v18  ;;  %v5329_v30 = vadd.f32 2.0, %v9030_v40  ;;  %v9040_v14 = vmul.f32 %v7293_v63, %v5266_v11 }
 0x2e8   : > { %9464 = vst [vmem:[#allocation15_spill] sm:$0xff] %v9034_v46  ;;  %v5267_v31 = vadd.f32 2.0, %v7297_v29  ;;  %7310 = vrcp.f32 %v5313_v37  ;;  %v5314_v12 = vadd.f32 2.0, %v9037_v19  ;;  %v5196_v34 = vmul.f32 1.442695, %v5158_v2 }
 0x2e9   : > { %v9043_v33 = vmul.f32 %v7295_v17, %v5251_v20  ;;  %7312 = vrcp.f32 %v5329_v30  ;;  %v5330_v23 = vadd.f32 2.0, %v9040_v14  ;;  %v5083_v11 = vmul.f32 %v8992_v51, %v8903_v45  ;;  %v7299_v17 = vpop.eup %7298 }
 0x2ea   : > { %v9046_v46 = vmul.f32 %v7297_v29, %v5267_v31  ;;  %7314 = vrcp.f32 %v5314_v12  ;;  %v6367_v63 = vadd.f32 %v8876_v55, %v8955_v1  ;;  %v5174_v30 = vmin.f32 %v9049_v35, 20.0  ;;  %v7301_v18 = vpop.eup %7300 }
 0x2eb   : > { %v5315_v5 = vadd.f32 2.0, %v9043_v33  ;;  %7316 = vrcp.f32 %v5330_v23  ;;  %v9060_v29 = vadd.f32 %v8910_v56, %v5083_v11  ;;  %v6344_v51 = vadd.f32 %v8965_v15, %v8846_v24  ;;  %v7303_v20 = vpop.eup %7302 }
 0x2ec   : > { %v5331_v2 = vadd.f32 2.0, %v9046_v46  ;;  %v5099_v43 = vmul.f32 %v6367_v63, %v8903_v45  ;;  %v5252_v55 = vadd.f32 2.0, %v7299_v17  ;;  %v5228_v1 = vmul.f32 1.442695, %v5174_v30  ;;  %v7305_v23 = vpop.eup %7304 }
 0x2ed   : > { %7318 = vrcp.f32 %v5315_v5  ;;  %v9068_v37 = vadd.f32 %v8879_v58, %v8967_v32  ;;  %v5268_v31 = vadd.f32 2.0, %v7301_v18  ;;  %v5159_v12 = vmin.f32 %v9060_v29, 20.0 }
 0x2ee   : > { %7320 = vrcp.f32 %v5331_v2  ;;  %v9073_v24 = vmul.f32 %v7299_v17, %v5252_v55  ;;  %v5253_v15 = vadd.f32 2.0, %v7303_v20  ;;  %v9076_v5 = vadd.f32 %v8910_v56, %v5099_v43 }
 0x2ef   : > { %7322 = vpow2.f32 %v5196_v34  ;;  %v9079_v58 = vmul.f32 %v7301_v18, %v5268_v31  ;;  %v5269_v32 = vadd.f32 2.0, %v7305_v23  ;;  %v5198_v63 = vmul.f32 1.442695, %v5159_v12 }
 0x2f0   : > { %7324 = vpow2.f32 %v5228_v1  ;;  %v7307_v11 = vpop.eup %7306  ;;  %v5084_v34 = vmul.f32 %v6344_v51, %v8901_v41  ;;  %v5316_v17 = vadd.f32 2.0, %v9073_v24  ;;  %v9085_v55 = vmul.f32 %v7303_v20, %v5253_v15 }
 0x2f1   : > { %v7309_v2 = vpop.eup %7308  ;;  %v5376_v30 = vmul.f32 %v7307_v11, %v9009_v13  ;;  %v5175_v43 = vmin.f32 %v9076_v5, 20.0  ;;  %v5332_v31 = vadd.f32 2.0, %v9079_v58  ;;  %v9091_v51 = vmul.f32 %v7305_v23, %v5269_v32 }
 0x2f2   : > { %v7311_v1 = vpop.eup %7310  ;;  %v5392_v18 = vmul.f32 %v7309_v2, %v9015_v60  ;;  %7326 = vpow2.f32 %v5198_v63  ;;  %v5317_v20 = vadd.f32 2.0, %v9085_v55  ;;  %vm5430_vm13 = vcmp.gt.f32.partialorder %v9049_v35, 20.0 }
 0x2f3   : > { %v7313_v13 = vpop.eup %7312  ;;  %v5440_v12 = vmul.f32 %v5376_v30, %v8922_v6  ;;  %v5377_v11 = vmul.f32 %v7311_v1, %v9023_v16  ;;  %7328 = vrcp.f32 %v5316_v17  ;;  %v5333_v23 = vadd.f32 2.0, %v9091_v51 }
 0x2f4   : > { %v7315_v15 = vpop.eup %7314  ;;  %v5456_v60 = vmul.f32 %v5392_v18, %v8925_v7  ;;  %v5393_v2 = vmul.f32 %v7313_v13, %v9030_v40  ;;  %7330 = vrcp.f32 %v5332_v31  ;;  %vm5415_vm14 = vcmp.gt.f32.partialorder %v9060_v29, 20.0 }
 0x2f5   : > { %v7317_v32 = vpop.eup %7316  ;;  %v5472_v16 = vsel %vm5408_vm0, %v8922_v6, %v5440_v12  ;;  %v5441_v63 = vmul.f32 %v5377_v11, %v8930_v9  ;;  %v5378_v30 = vmul.f32 %v7315_v15, %v9037_v19  ;;  %7332 = vrcp.f32 %v5317_v20 }
 0x2f6   : > { %v5488_v1 = vsel %vm5424_vm1, %v8925_v7, %v5456_v60  ;;  %v5457_v40 = vmul.f32 %v5393_v2, %v8933_v10  ;;  %v5394_v18 = vmul.f32 %v7317_v32, %v9040_v14  ;;  %7334 = vrcp.f32 %v5333_v23 }
 0x2f7   : > { %v7319_v17 = vpop.eup %7318  ;;  %v5473_v6 = vsel %vm5409_vm2, %v8930_v9, %v5441_v63  ;;  %v5442_v13 = vmul.f32 %v5378_v30, %v8942_v42  ;;  %v5230_v12 = vmul.f32 1.442695, %v5175_v43  ;;  %vm5431_vm15 = vcmp.gt.f32.partialorder %v9076_v5, 20.0 }
 0x2f8   : > { %v7321_v31 = vpop.eup %7320  ;;  %v5379_v19 = vmul.f32 %v7319_v17, %v9043_v33  ;;  %v6287_v20 = vpack.c.bf16 %v5473_v6, %v5472_v16  ;;  %v5489_v7 = vsel %vm5425_vm3, %v8933_v10, %v5457_v40  ;;  %v5458_v15 = vmul.f32 %v5394_v18, %v8945_v44 }
 0x2f9   : > { %v7323_v11 = vpop.eup %7322  ;;  %v5395_v14 = vmul.f32 %v7321_v31, %v9046_v46  ;;  %v6295_v2 = vpack.c.bf16 %v5489_v7, %v5488_v1  ;;  %v5474_v9 = vsel %vm5410_vm4, %v8942_v42, %v5442_v13  ;;  %7336 = vpow2.f32 %v5230_v12 }
 0x2fa   : > { %v7325_v60 = vpop.eup %7324  ;;  %v5443_v23 = vmul.f32 %v5379_v19, %v8948_v54  ;;  %v5254_v33 = vadd.f32 2.0, %v7323_v11  ;;  %5600 = vst [vmem:[%s9127_s15] sm:$0xff] %v6287_v20  ;;  %v5490_v10 = vsel %vm5426_vm5, %v8945_v44, %v5458_v15  ;;  %v9142_v16 = vadd.f32 %v8906_v48, %v5084_v34 }
 0x2fb   : > { %v5459_v46 = vmul.f32 %v5395_v14, %v8951_v57  ;;  %v5270_v43 = vadd.f32 2.0, %v7325_v60  ;;  %5608 = vst [vmem:[%s9127_s15 + $0x40] sm:$0xff] %v6295_v2  ;;  %v5100_v1 = vmul.f32 %v9068_v37, %v8901_v41 }
 0x2fc   : > { %v5475_v42 = vsel %vm5411_vm6, %v8948_v54, %v5443_v23  ;;  %v9139_v32 = vmul.f32 %v7323_v11, %v5254_v33  ;;  %v7327_v63 = vpop.eup %7326  ;;  %v5160_v34 = vmin.f32 %v9142_v16, 20.0  ;;  %vm5416_vm0 = vcmp.gt.f32.partialorder %v9142_v16, 20.0 }
 0x2fd   : > { %v6288_v30 = vpack.c.bf16 %v5475_v42, %v5474_v9  ;;  %v5491_v44 = vsel %vm5427_vm7, %v8951_v57, %v5459_v46  ;;  %v9147_v17 = vmul.f32 %v7325_v60, %v5270_v43  ;;  %v7329_v54 = vpop.eup %7328  ;;  %v5255_v31 = vadd.f32 2.0, %v7327_v63 }
 0x2fe   : > { %v6296_v40 = vpack.c.bf16 %v5491_v44, %v5490_v10  ;;  %v5318_v18 = vadd.f32 2.0, %v9139_v32  ;;  %v7331_v6 = vpop.eup %7330  ;;  %v5380_v13 = vmul.f32 %v7329_v54, %v9073_v24  ;;  %v9158_v19 = vadd.f32 %v8906_v48, %v5100_v1 }
 0x2ff   : > { %5601 = vst [vmem:[%s9127_s15 + $0x8] sm:$0xff] %v6288_v30  ;;  %v5334_v57 = vadd.f32 2.0, %v9147_v17  ;;  %v7333_v12 = vpop.eup %7332  ;;  %v5396_v37 = vmul.f32 %v7331_v6, %v9079_v58  ;;  %v9162_v11 = vmul.f32 %v7327_v63, %v5255_v31  ;;  %v5200_v20 = vmul.f32 1.442695, %v5160_v34 }
 0x300   : > { %5609 = vst [vmem:[%s9127_s15 + $0x48] sm:$0xff] %v6296_v40  ;;  %7338 = vrcp.f32 %v5318_v18  ;;  %v7335_v7 = vpop.eup %7334  ;;  %v5444_v15 = vmul.f32 %v5380_v13, %v8977_v49  ;;  %v5381_v24 = vmul.f32 %v7333_v12, %v9085_v55  ;;  %v5176_v14 = vmin.f32 %v9158_v19, 20.0 }
 0x301   : > { %7340 = vrcp.f32 %v5334_v57  ;;  %v5460_v60 = vmul.f32 %v5396_v37, %v8986_v50  ;;  %v5397_v2 = vmul.f32 %v7335_v7, %v9091_v51  ;;  %v5319_v9 = vadd.f32 2.0, %v9162_v11 }
 0x302   : > { %7342 = vpow2.f32 %v5200_v20  ;;  %v5476_v58 = vsel %vm5412_vm8, %v8977_v49, %v5444_v15  ;;  %v5445_v23 = vmul.f32 %v5381_v24, %v8989_v52  ;;  %v5232_v33 = vmul.f32 1.442695, %v5176_v14 }
 0x303   : > { %v5492_v55 = vsel %vm5428_vm9, %v8986_v50, %v5460_v60  ;;  %v5461_v10 = vmul.f32 %v5397_v2, %v9000_v62  ;;  %7344 = vrcp.f32 %v5319_v9  ;;  %v6345_v51 = vadd.f32 %v8972_v36, %v8848_v25  ;;  %v7337_v46 = vpop.eup %7336 }
 0x304   : > { %v5477_v49 = vsel %vm5413_vm10, %v8989_v52, %v5445_v23  ;;  %7346 = vpow2.f32 %v5232_v33  ;;  %v6371_v43 = vadd.f32 %v8881_v61, %v8974_v21  ;;  %v6346_v50 = vadd.f32 %v8981_v39, %v8850_v26 }
 0x305   : > { %v6289_v42 = vpack.c.bf16 %v5477_v49, %v5476_v58  ;;  %v5493_v63 = vsel %vm5429_vm11, %v9000_v62, %v5461_v10  ;;  %v5271_v30 = vadd.f32 2.0, %v7337_v46  ;;  %v5085_v44 = vmul.f32 %v6345_v51, %v8903_v45 }
 0x306   : > { %v6297_v25 = vpack.c.bf16 %v5493_v63, %v5492_v55  ;;  %v5101_v36 = vmul.f32 %v6371_v43, %v8903_v45  ;;  %v5086_v1 = vmul.f32 %v6346_v50, %v8901_v41  ;;  %v6373_v52 = vadd.f32 %v8883_v0, %v8983_v47 }
 0x307   : > { %5602 = vst [vmem:[%s9127_s15 + $0x10] sm:$0xff] %v6289_v42  ;;  %v9195_v54 = vmul.f32 %v7337_v46, %v5271_v30  ;;  %v9198_v61 = vadd.f32 %v8910_v56, %v5085_v44  ;;  %v6347_v26 = vadd.f32 %v8994_v53, %v8852_v27  ;;  %v6375_v21 = vadd.f32 %v8885_v4, %v8996_v59  ;;  %v9465_v30 = vld [vmem:[#allocation4_spill] sm:$0xff] }
 0x308   : > { %5610 = vst [vmem:[%s9127_s15 + $0x50] sm:$0xff] %v6297_v25  ;;  %v9206_v39 = vadd.f32 %v8910_v56, %v5101_v36  ;;  %v9209_v62 = vadd.f32 %v8906_v48, %v5086_v1  ;;  %v6348_v0 = vadd.f32 %v9011_v22, %v8854_v28  ;;  %v5102_v27 = vmul.f32 %v6373_v52, %v8901_v41  ;;  %v9467_v1 = vld [vmem:[#allocation11_spill] sm:$0xff] }
 0x309   : > { %v5335_v40 = vadd.f32 2.0, %v9195_v54  ;;  %v5161_v18 = vmin.f32 %v9198_v61, 20.0  ;;  %v5087_v53 = vmul.f32 %v6347_v26, %v8903_v45  ;;  %v5103_v10 = vmul.f32 %v6375_v21, %v8903_v45  ;;  %v9468_v52 = vld [vmem:[#allocation7_spill] sm:$0xff] }
 0x30a   : > { %v7339_v47 = vpop.eup %7338  ;;  %v5177_v31 = vmin.f32 %v9206_v39, 20.0  ;;  %v5162_v34 = vmin.f32 %v9209_v62, 20.0  ;;  %v6377_v63 = vadd.f32 %v8887_v8, %v9013_v38  ;;  %v6379_v26 = vadd.f32 %v9468_v52, %v9467_v1  ;;  %v9471_v52 = vld [vmem:[#allocation13_spill] sm:$0xff] }
 0x30b   : > { %v7341_v4 = vpop.eup %7340  ;;  %v5382_v59 = vmul.f32 %v7339_v47, %v9139_v32  ;;  %7348 = vrcp.f32 %v5335_v40  ;;  %v5202_v28 = vmul.f32 1.442695, %v5161_v18  ;;  %v9224_v32 = vadd.f32 %v8906_v48, %v5102_v27 }
 0x30c   : > { %v7343_v6 = vpop.eup %7342  ;;  %v5234_v57 = vmul.f32 1.442695, %v5177_v31  ;;  %v5204_v12 = vmul.f32 1.442695, %v5162_v34  ;;  %v5398_v20 = vmul.f32 %v7341_v4, %v9147_v17  ;;  %v9227_v7 = vadd.f32 %v8910_v56, %v5087_v53  ;;  %v9469_v53 = vld [vmem:[#allocation5_spill] sm:$0xff]  ;;  %v9470_v4 = vld [vmem:[#allocation12_spill] sm:$0xff] }
 0x30d   : > { %v5446_v22 = vmul.f32 %v5382_v59, %v9005_v3  ;;  %v5256_v13 = vadd.f32 2.0, %v7343_v6  ;;  %v7345_v37 = vpop.eup %7344  ;;  %7350 = vpow2.f32 %v5202_v28  ;;  %v5178_v17 = vmin.f32 %v9224_v32, 20.0 }
 0x30e   : > { %v7347_v15 = vpop.eup %7346  ;;  %v5383_v24 = vmul.f32 %v7345_v37, %v9162_v11  ;;  %7352 = vpow2.f32 %v5234_v57  ;;  %v5163_v23 = vmin.f32 %v9227_v7, 20.0  ;;  %v5462_v11 = vmul.f32 %v5398_v20, %v9049_v35 }
 0x30f   : > { %v9231_v14 = vmul.f32 %v7343_v6, %v5256_v13  ;;  %v5272_v60 = vadd.f32 2.0, %v7347_v15  ;;  %7354 = vpow2.f32 %v5204_v12  ;;  %v5478_v2 = vsel %vm5414_vm12, %v9005_v3, %v5446_v22 }
 0x310   : > { %v5447_v9 = vmul.f32 %v5383_v24, %v9060_v29  ;;  %v5236_v55 = vmul.f32 1.442695, %v5178_v17  ;;  %v5206_v46 = vmul.f32 1.442695, %v5163_v23  ;;  %v5088_v3 = vmul.f32 %v6348_v0, %v8901_v41 }
 0x311   : > { %v5320_v58 = vadd.f32 2.0, %v9231_v14  ;;  %v9242_v33 = vmul.f32 %v7347_v15, %v5272_v60  ;;  %v9249_v50 = vadd.f32 %v8910_v56, %v5103_v10  ;;  %v5494_v21 = vsel %vm5430_vm13, %v9049_v35, %v5462_v11 }
 0x312   : > { %v5479_v51 = vsel %vm5415_vm14, %v9060_v29, %v5447_v9  ;;  %v9252_v42 = vadd.f32 %v8906_v48, %v5088_v3  ;;  %v9466_v29 = vld [vmem:[#allocation10_spill] sm:$0xff]  ;;  %v5104_v38 = vmul.f32 %v6377_v63, %v8901_v41  ;;  %v5105_v27 = vmul.f32 %v6379_v26, %v8903_v45  ;;  %v9472_v26 = vld [vmem:[#allocation8_spill] sm:$0xff] }
 0x313   : > { %7356 = vrcp.f32 %v5320_v58  ;;  %v6290_v49 = vpack.c.bf16 %v5479_v51, %v5478_v2  ;;  %v5336_v43 = vadd.f32 2.0, %v9242_v33  ;;  %v6349_v44 = vadd.f32 %v9466_v29, %v9465_v30 }
 0x314   : > { %7358 = vpow2.f32 %v5236_v55  ;;  %v5179_v36 = vmin.f32 %v9249_v50, 20.0  ;;  %v5164_v8 = vmin.f32 %v9252_v42, 20.0  ;;  %v6350_v59 = vadd.f32 %v9470_v4, %v9469_v53 }
 0x315   : > { %7360 = vpow2.f32 %v5206_v46  ;;  %v7349_v25 = vpop.eup %7348  ;;  %5603 = vst [vmem:[%s9127_s15 + $0x18] sm:$0xff] %v6290_v49  ;;  %v5089_v18 = vmul.f32 %v6349_v44, %v8903_v45  ;;  %v9281_v57 = vadd.f32 %v8910_v56, %v5105_v27  ;;  %vm5432_vm1 = vcmp.gt.f32.partialorder %v9158_v19, 20.0 }
 0x316   : > { %7362 = vrcp.f32 %v5336_v43  ;;  %v5399_v0 = vmul.f32 %v7349_v25, %v9195_v54  ;;  %v5238_v40 = vmul.f32 1.442695, %v5179_v36  ;;  %v5208_v35 = vmul.f32 1.442695, %v5164_v8 }
 0x317   : > { %v7351_v47 = vpop.eup %7350  ;;  %v9275_v54 = vadd.f32 %v8906_v48, %v5104_v38  ;;  %v9278_v13 = vadd.f32 %v8910_v56, %v5089_v18  ;;  %v5181_v55 = vmin.f32 %v9281_v57, 20.0  ;;  %v5090_v25 = vmul.f32 %v6350_v59, %v8901_v41  ;;  %v9473_v38 = vld [vmem:[#allocation6_spill] sm:$0xff] }
 0x318   : > { %v7353_v31 = vpop.eup %7352  ;;  %v5463_v34 = vmul.f32 %v5399_v0, %v9076_v5  ;;  %v5257_v6 = vadd.f32 2.0, %v7351_v47  ;;  %7364 = vpow2.f32 %v5238_v40  ;;  %vm5417_vm2 = vcmp.gt.f32.partialorder %v9198_v61, 20.0 }
 0x319   : > { %v7355_v28 = vpop.eup %7354  ;;  %v5273_v22 = vadd.f32 2.0, %v7353_v31  ;;  %7366 = vpow2.f32 %v5208_v35  ;;  %v5180_v60 = vmin.f32 %v9275_v54, 20.0  ;;  %v5165_v58 = vmin.f32 %v9278_v13, 20.0  ;;  %v9475_v35 = vld [vmem:[#allocation15_spill] sm:$0xff] }
 0x31a   : > { %v5495_v12 = vsel %vm5431_vm15, %v9076_v5, %v5463_v34  ;;  %v9286_v37 = vmul.f32 %v7351_v47, %v5257_v6  ;;  %v5258_v20 = vadd.f32 2.0, %v7355_v28  ;;  %v5242_v63 = vmul.f32 1.442695, %v5181_v55  ;;  %v9474_v47 = vld [vmem:[#allocation14_spill] sm:$0xff] }
 0x31b   : > { %v6298_v15 = vpack.c.bf16 %v5495_v12, %v5494_v21  ;;  %v9288_v24 = vmul.f32 %v7353_v31, %v5273_v22  ;;  %v5240_v11 = vmul.f32 1.442695, %v5180_v60  ;;  %v5210_v3 = vmul.f32 1.442695, %v5165_v58 }
 0x31c   : > { %v5321_v2 = vadd.f32 2.0, %v9286_v37  ;;  %v9292_v9 = vmul.f32 %v7355_v28, %v5258_v20  ;;  %v9313_v8 = vadd.f32 %v8906_v48, %v5090_v25  ;;  %v6351_v40 = vadd.f32 %v9474_v47, %v9473_v38  ;;  %v9476_v28 = vld [vmem:[#allocation9_spill] sm:$0xff] }
 0x31d   : > { %v7357_v17 = vpop.eup %7356  ;;  %5611 = vst [vmem:[%s9127_s15 + $0x58] sm:$0xff] %v6298_v15  ;;  %v5337_v5 = vadd.f32 2.0, %v9288_v24  ;;  %v6383_v22 = vadd.f32 %v9476_v28, %v9475_v35  ;;  %vm5433_vm3 = vcmp.gt.f32.partialorder %v9206_v39, 20.0  ;;  %vm5418_vm4 = vcmp.gt.f32.partialorder %v9209_v62, 20.0 }
 0x31e   : > { %v7359_v23 = vpop.eup %7358  ;;  %7368 = vrcp.f32 %v5321_v2  ;;  %v5322_v51 = vadd.f32 2.0, %v9292_v9  ;;  %v5384_v30 = vmul.f32 %v7357_v17, %v9231_v14  ;;  %v6381_v14 = vadd.f32 %v9472_v26, %v9471_v52 }
 0x31f   : > { %v7361_v10 = vpop.eup %7360  ;;  %v5274_v46 = vadd.f32 2.0, %v7359_v23  ;;  %7370 = vrcp.f32 %v5337_v5  ;;  %v5166_v59 = vmin.f32 %v9313_v8, 20.0  ;;  %v5091_v6 = vmul.f32 %v6351_v40, %v8903_v45 }
 0x320   : > { %v7363_v49 = vpop.eup %7362  ;;  %v5259_v43 = vadd.f32 2.0, %v7361_v10  ;;  %7372 = vrcp.f32 %v5322_v51  ;;  %v5106_v53 = vmul.f32 %v6381_v14, %v8901_v41  ;;  %vm5419_vm5 = vcmp.gt.f32.partialorder %v9227_v7, 20.0 }
 0x321   : > { %v9300_v29 = vmul.f32 %v7359_v23, %v5274_v46  ;;  %7374 = vpow2.f32 %v5240_v11  ;;  %v5400_v36 = vmul.f32 %v7363_v49, %v9242_v33  ;;  %v5448_v33 = vmul.f32 %v5384_v30, %v9142_v16 }
 0x322   : > { %v9303_v44 = vmul.f32 %v7361_v10, %v5259_v43  ;;  %7376 = vpow2.f32 %v5210_v3  ;;  %v7365_v21 = vpop.eup %7364  ;;  %v9324_v34 = vadd.f32 %v8906_v48, %v5106_v53  ;;  %v5212_v20 = vmul.f32 1.442695, %v5166_v59 }
 0x323   : > { %v5338_v1 = vadd.f32 2.0, %v9300_v29  ;;  %7378 = vpow2.f32 %v5242_v63  ;;  %v7367_v18 = vpop.eup %7366  ;;  %v5275_v27 = vadd.f32 2.0, %v7365_v21  ;;  %v5464_v12 = vmul.f32 %v5400_v36, %v9158_v19 }
 0x324   : > { %v5323_v0 = vadd.f32 2.0, %v9303_v44  ;;  %v5260_v4 = vadd.f32 2.0, %v7367_v18  ;;  %v5480_v60 = vsel %vm5416_vm0, %v9142_v16, %v5448_v33  ;;  %v5182_v17 = vmin.f32 %v9324_v34, 20.0 }
 0x325   : > { %7380 = vrcp.f32 %v5338_v1  ;;  %v9321_v31 = vmul.f32 %v7365_v21, %v5275_v27  ;;  %v9339_v2 = vadd.f32 %v8910_v56, %v5091_v6  ;;  %v5107_v11 = vmul.f32 %v6383_v22, %v8903_v45 }
 0x326   : > { %7382 = vrcp.f32 %v5323_v0  ;;  %v9331_v41 = vmul.f32 %v7367_v18, %v5260_v4  ;;  %v5244_v16 = vmul.f32 1.442695, %v5182_v17  ;;  %v5496_v3 = vsel %vm5432_vm1, %v9158_v19, %v5464_v12 }
 0x327   : > { %v5339_v48 = vadd.f32 2.0, %v9321_v31  ;;  %7384 = vpow2.f32 %v5212_v20  ;;  %v5167_v51 = vmin.f32 %v9339_v2, 20.0  ;;  %v9357_v1 = vadd.f32 %v8910_v56, %v5107_v11 }
 0x328   : > { %v7369_v15 = vpop.eup %7368  ;;  %v5324_v5 = vadd.f32 2.0, %v9331_v41  ;;  %vm5434_vm6 = vcmp.gt.f32.partialorder %v9224_v32, 20.0  ;;  %vm5435_vm7 = vcmp.gt.f32.partialorder %v9249_v50, 20.0  ;;  %vm5420_vm8 = vcmp.gt.f32.partialorder %v9252_v42, 20.0 }
 0x329   : > { %v7371_v58 = vpop.eup %7370  ;;  %v5385_v23 = vmul.f32 %v7369_v15, %v9286_v37  ;;  %7386 = vrcp.f32 %v5339_v48  ;;  %v5183_v27 = vmin.f32 %v9357_v1, 20.0  ;;  %vm5436_vm9 = vcmp.gt.f32.partialorder %v9275_v54, 20.0 }
 0x32a   : > { %v7373_v55 = vpop.eup %7372  ;;  %v5401_v10 = vmul.f32 %v7371_v58, %v9288_v24  ;;  %7388 = vrcp.f32 %v5324_v5  ;;  %v5214_v24 = vmul.f32 1.442695, %v5167_v51  ;;  %vm5421_vm10 = vcmp.gt.f32.partialorder %v9278_v13, 20.0 }
 0x32b   : > { %v7375_v46 = vpop.eup %7374  ;;  %v5449_v49 = vmul.f32 %v5385_v23, %v9198_v61  ;;  %v5386_v37 = vmul.f32 %v7373_v55, %v9292_v9  ;;  %7390 = vpow2.f32 %v5244_v16  ;;  %vm5437_vm11 = vcmp.gt.f32.partialorder %v9281_v57, 20.0 }
 0x32c   : > { %v7377_v43 = vpop.eup %7376  ;;  %v5465_v45 = vmul.f32 %v5401_v10, %v9206_v39  ;;  %v5276_v63 = vadd.f32 2.0, %v7375_v46  ;;  %7392 = vpow2.f32 %v5214_v24  ;;  %vm5422_vm12 = vcmp.gt.f32.partialorder %v9313_v8, 20.0 }
 0x32d   : > { %v7379_v30 = vpop.eup %7378  ;;  %v5481_v25 = vsel %vm5417_vm2, %v9198_v61, %v5449_v49  ;;  %v5450_v36 = vmul.f32 %v5386_v37, %v9209_v62  ;;  %v5261_v19 = vadd.f32 2.0, %v7377_v43  ;;  %vm5423_vm13 = vcmp.gt.f32.partialorder %v9339_v2, 20.0 }
 0x32e   : > { %v6291_v52 = vpack.c.bf16 %v5481_v25, %v5480_v60  ;;  %v5497_v26 = vsel %vm5433_vm3, %v9206_v39, %v5465_v45  ;;  %v5308_v14 = vmul.f32 %v7375_v46, %v5276_v63  ;;  %v5277_v21 = vadd.f32 2.0, %v7379_v30 }
 0x32f   : > { %v7381_v9 = vpop.eup %7380  ;;  %v6299_v38 = vpack.c.bf16 %v5497_v26, %v5496_v3  ;;  %v5293_v61 = vmul.f32 %v7377_v43, %v5261_v19  ;;  %v5482_v39 = vsel %vm5418_vm4, %v9209_v62, %v5450_v36  ;;  %vm5438_vm14 = vcmp.gt.f32.partialorder %v9324_v34, 20.0 }
 0x330   : > { %v7383_v0 = vpop.eup %7382  ;;  %v5402_v47 = vmul.f32 %v7381_v9, %v9300_v29  ;;  %5604 = vst [vmem:[%s9127_s15 + $0x20] sm:$0xff] %v6291_v52  ;;  %v5340_v18 = vadd.f32 2.0, %v5308_v14  ;;  %v5309_v33 = vmul.f32 %v7379_v30, %v5277_v21  ;;  %vm5439_vm15 = vcmp.gt.f32.partialorder %v9357_v1, 20.0 }
 0x331   : > { %v5387_v40 = vmul.f32 %v7383_v0, %v9303_v44  ;;  %5612 = vst [vmem:[%s9127_s15 + $0x60] sm:$0xff] %v6299_v38  ;;  %v5325_v56 = vadd.f32 2.0, %v5293_v61  ;;  %v7385_v29 = vpop.eup %7384  ;;  %v5246_v44 = vmul.f32 1.442695, %v5183_v27 }
 0x332   : > { %7394 = vrcp.f32 %v5340_v18  ;;  %v5341_v4 = vadd.f32 2.0, %v5309_v33  ;;  %v5466_v59 = vmul.f32 %v5402_v47, %v9224_v32  ;;  %v5262_v28 = vadd.f32 2.0, %v7385_v29 }
 0x333   : > { %v5451_v53 = vmul.f32 %v5387_v40, %v9227_v7  ;;  %7396 = vrcp.f32 %v5325_v56  ;;  %v7387_v6 = vpop.eup %7386 }
 0x334   : > { %7398 = vrcp.f32 %v5341_v4  ;;  %v7389_v22 = vpop.eup %7388  ;;  %v5403_v62 = vmul.f32 %v7387_v6, %v9321_v31  ;;  %v5294_v15 = vmul.f32 %v7385_v29, %v5262_v28  ;;  %v5498_v60 = vsel %vm5434_vm6, %v9224_v32, %v5466_v59  ;;  %v5690_v59 = vld [vmem:[%s9127_s15 + $0x10] sm:$0xff] (%p7510_p6) }
 0x335   : > { %v5483_v35 = vsel %vm5419_vm5, %v9227_v7, %v5451_v53  ;;  %7400 = vpow2.f32 %v5246_v44  ;;  %v7391_v20 = vpop.eup %7390  ;;  %v5388_v7 = vmul.f32 %v7389_v22, %v9331_v41  ;;  %5691 = vst [vmem:[%s5628_s26 + $0x20] sm:$0xff] (%p7510_p6), %v5690_v59  ;;  %v5702_v22 = vld [vmem:[%s9127_s15 + $0x40] sm:$0xff] (%p7510_p6) }
 0x336   : > { %v6292_v12 = vpack.c.bf16 %v5483_v35, %v5482_v39  ;;  %v5467_v48 = vmul.f32 %v5403_v62, %v9249_v50  ;;  %v5278_v17 = vadd.f32 2.0, %v7391_v20  ;;  %v5326_v58 = vadd.f32 2.0, %v5294_v15  ;;  %v7393_v5 = vpop.eup %7392  ;;  %5703 = vst [vmem:[%s5628_s26 + $0x80] sm:$0xff] (%p7510_p6), %v5702_v22  ;;  %v5706_v62 = vld [vmem:[%s9127_s15 + $0x50] sm:$0xff] (%p7510_p6) }
 0x337   : > { %v5263_v10 = vadd.f32 2.0, %v7393_v5  ;;  %v5452_v32 = vmul.f32 %v5388_v7, %v9252_v42  ;;  %v5694_v44 = vld [vmem:[%s9127_s15 + $0x20] sm:$0xff] (%p7510_p6)  ;;  %5707 = vst [vmem:[%s5628_s26 + $0xa0] sm:$0xff] (%p7510_p6), %v5706_v62 }
 0x338   : > { %5605 = vst [vmem:[%s9127_s15 + $0x28] sm:$0xff] %v6292_v12  ;;  %v5499_v23 = vsel %vm5435_vm7, %v9249_v50, %v5467_v48  ;;  %v5310_v31 = vmul.f32 %v7391_v20, %v5278_v17  ;;  %7402 = vrcp.f32 %v5326_v58  ;;  %5695 = vst [vmem:[%s5628_s26 + $0x40] sm:$0xff] (%p7510_p6), %v5694_v44  ;;  %v5704_v12 = vld [vmem:[%s9127_s15 + $0x48] sm:$0xff] (%p7510_p6)  ;;  %v5708_v20 = vld [vmem:[%s9127_s15 + $0x58] sm:$0xff] (%p7510_p6) }
 0x339   : > { %v6300_v11 = vpack.c.bf16 %v5499_v23, %v5498_v60  ;;  %v5295_v3 = vmul.f32 %v7393_v5, %v5263_v10  ;;  %v5484_v63 = vsel %vm5420_vm8, %v9252_v42, %v5452_v32  ;;  %5705 = vst [vmem:[%s5628_s26 + $0x90] sm:$0xff] (%p7510_p6), %v5704_v12  ;;  %5709 = vst [vmem:[%s5628_s26 + $0xb0] sm:$0xff] (%p7510_p6), %v5708_v20 }
 0x33a   : > { %v5342_v55 = vadd.f32 2.0, %v5310_v31 }
 0x33b   : > { %5613 = vst [vmem:[%s9127_s15 + $0x68] sm:$0xff] %v6300_v11  ;;  %v5327_v45 = vadd.f32 2.0, %v5295_v3 }
 0x33c   : > { %v7395_v16 = vpop.eup %7394  ;;  %7404 = vrcp.f32 %v5342_v55 }
 0x33d   : > { %v7397_v51 = vpop.eup %7396  ;;  %v5404_v46 = vmul.f32 %v7395_v16, %v5308_v14  ;;  %7406 = vrcp.f32 %v5327_v45 }
 0x33e   : > { %v7399_v49 = vpop.eup %7398  ;;  %v5389_v37 = vmul.f32 %v7397_v51, %v5293_v61 }
 0x33f   : > { %v7401_v41 = vpop.eup %7400  ;;  %v5468_v50 = vmul.f32 %v5404_v46, %v9275_v54  ;;  %v5405_v43 = vmul.f32 %v7399_v49, %v5309_v33  ;;  %v5696_v6 = vld [vmem:[%s9127_s15 + $0x28] sm:$0xff] (%p7510_p6) }
 0x340   : > { %v5453_v24 = vmul.f32 %v5389_v37, %v9278_v13  ;;  %v5279_v30 = vadd.f32 2.0, %v7401_v41  ;;  %5697 = vst [vmem:[%s5628_s26 + $0x50] sm:$0xff] (%p7510_p6), %v5696_v6 }
 0x341   : > { %v5500_v25 = vsel %vm5436_vm9, %v9275_v54, %v5468_v50  ;;  %v5469_v36 = vmul.f32 %v5405_v43, %v9281_v57 }
 0x342   : > { %v5485_v19 = vsel %vm5421_vm10, %v9278_v13, %v5453_v24  ;;  %v5311_v9 = vmul.f32 %v7401_v41, %v5279_v30  ;;  %v7403_v26 = vpop.eup %7402  ;;  %v5712_v60 = vld [vmem:[%s9127_s15 + $0x68] sm:$0xff] (%p7510_p6) }
 0x343   : > { %v6293_v42 = vpack.c.bf16 %v5485_v19, %v5484_v63  ;;  %v5501_v52 = vsel %vm5437_vm11, %v9281_v57, %v5469_v36  ;;  %v5390_v0 = vmul.f32 %v7403_v26, %v5294_v15  ;;  %v5710_v15 = vld [vmem:[%s9127_s15 + $0x60] sm:$0xff] (%p7510_p6)  ;;  %5713 = vst [vmem:[%s5628_s26 + $0xd0] sm:$0xff] (%p7510_p6), %v5712_v60 }
 0x344   : > { %v6301_v14 = vpack.c.bf16 %v5501_v52, %v5500_v25  ;;  %v5343_v21 = vadd.f32 2.0, %v5311_v9  ;;  %5711 = vst [vmem:[%s5628_s26 + $0xc0] sm:$0xff] (%p7510_p6), %v5710_v15 }
 0x345   : > { %5606 = vst [vmem:[%s9127_s15 + $0x30] sm:$0xff] %v6293_v42  ;;  %v5454_v38 = vmul.f32 %v5390_v0, %v9313_v8 }
 0x346   : > { %5614 = vst [vmem:[%s9127_s15 + $0x70] sm:$0xff] %v6301_v14  ;;  %7408 = vrcp.f32 %v5343_v21  ;;  %v7405_v54 = vpop.eup %7404 }
 0x347   : > { %v7407_v47 = vpop.eup %7406  ;;  %v5406_v61 = vmul.f32 %v7405_v54, %v5310_v31  ;;  %v5486_v40 = vsel %vm5422_vm12, %v9313_v8, %v5454_v38 }
 0x348   : > { %v5391_v13 = vmul.f32 %v7407_v47, %v5295_v3 }
 0x349   : > { %v5470_v18 = vmul.f32 %v5406_v61, %v9324_v34 }
 0x34a   : > { %v5455_v57 = vmul.f32 %v5391_v13, %v9339_v2 }
 0x34b   : > { %v5502_v53 = vsel %vm5438_vm14, %v9324_v34, %v5470_v18  ;;  %v5686_v34 = vld [vmem:[%s9127_s15] sm:$0xff] (%p7510_p6) }
 0x34c   : > { %v5487_v56 = vsel %vm5423_vm13, %v9339_v2, %v5455_v57  ;;  %v5688_v2 = vld [vmem:[%s9127_s15 + $0x8] sm:$0xff] (%p7510_p6)  ;;  %5687 = vst [vmem:[%s5628_s26] sm:$0xff] (%p7510_p6), %v5686_v34  ;;  %v5698_v35 = vld [vmem:[%s9127_s15 + $0x30] sm:$0xff] (%p7510_p6) }
 0x34d   : > { %v6294_v27 = vpack.c.bf16 %v5487_v56, %v5486_v40  ;;  %5689 = vst [vmem:[%s5628_s26 + $0x10] sm:$0xff] (%p7510_p6), %v5688_v2  ;;  %5699 = vst [vmem:[%s5628_s26 + $0x60] sm:$0xff] (%p7510_p6), %v5698_v35  ;;  %v5714_v48 = vld [vmem:[%s9127_s15 + $0x70] sm:$0xff] (%p7510_p6) }
 0x34e   : > { %5715 = vst [vmem:[%s5628_s26 + $0xe0] sm:$0xff] (%p7510_p6), %v5714_v48 }
 0x34f   : > { %5607 = vst [vmem:[%s9127_s15 + $0x38] sm:$0xff] %v6294_v27 }
 0x350   : > { %v7409_v33 = vpop.eup %7408 }
 0x351   : > { %v5407_v39 = vmul.f32 %v7409_v33, %v5311_v9 }
 0x352   : > { %5622 = sbr.rel (!%p7510_p6) target bundleno = 865 (0x361), region = 78 }
 0x353   : > { %v5471_v4 = vmul.f32 %v5407_v39, %v9357_v1 }
 0x355   : > { %v5503_v8 = vsel %vm5439_vm15, %v9357_v1, %v5471_v4  ;;  %v5692_v1 = vld [vmem:[%s9127_s15 + $0x18] sm:$0xff] (%p7510_p6) }
 0x356   : > { %v6302_v29 = vpack.c.bf16 %v5503_v8, %v5502_v53  ;;  %5693 = vst [vmem:[%s5628_s26 + $0x30] sm:$0xff] (%p7510_p6), %v5692_v1  ;;  %v5700_v28 = vld [vmem:[%s9127_s15 + $0x38] sm:$0xff] (%p7510_p6) }
 0x357   : > { %5701 = vst [vmem:[%s5628_s26 + $0x70] sm:$0xff] (%p7510_p6), %v5700_v28 }
 0x358   : > { %5615 = vst [vmem:[%s9127_s15 + $0x78] sm:$0xff] %v6302_v29 }
 0x35f   : > { %v5716_v17 = vld [vmem:[%s9127_s15 + $0x78] sm:$0xff] }
 0x360   : > { %5717 = vst [vmem:[%s5628_s26 + $0xf0] sm:$0xff] %v5716_v17 }
 0x361 PF: > { %s14_s19 = sadd.s32 1, %s7448_s19   ;;  %s9477_s15 = smov %s7436_s16 }
 0x362   : > { %p11_p12 = scmp.ge.s32.totalorder %s14_s19, 4   ;;  %s9478_s16 = smov %s7515_s25 }
 0x363   : > { %s9479_s17 = smov %s7444_s18  ;;  %s9480_s18 = smov %s9482_s20 }
 0x364   :  { %13 = sbr.rel (!%p11_p12) target bundleno = 3 (0x3), region = 156 }

// kernel: downsample4_forward.25
= control target key start
LH: loop header
LB: loop body
LE: loop exit
PB: predicated region body
PF: predicated region fallthrough
CT: control target
= control target key end

     0   :  { %11 = vsyncpa [#allocation5], 0  ;;  %s3707_s0 = inlined_call_operand.vmem [shape: bf16[128,256], index: 0, kind: input, shape index: {}]   ;;  %s3708_s1 = inlined_call_operand.vmem [shape: bf16[128,256], index: 1, kind: input, shape index: {}]   ;;  %s3709_s2 = inlined_call_operand.vmem [shape: bf16[256,512], index: 2, kind: input, shape index: {}]   ;;  %s3710_s3 = inlined_call_operand.vmem [shape: bf16[256,512], index: 3, kind: input, shape index: {}]   ;;  %s3711_s4 = inlined_call_operand.vmem [shape: f32[1,512], index: 4, kind: input, shape index: {}]   ;;  %s3712_s5 = inlined_call_operand.vmem [shape: f32[1,512], index: 5, kind: input, shape index: {}]   ;;  %s3713_s6 = inlined_call_operand.hbm [shape: f32[128,512], index: 6, kind: output, shape index: {}]  }
   0x1   :  { %13 = vsyncpa [#allocation5 + $0x1], 0  ;;  %s2733_s21 = smov 0   ;;  %s2735_s22 = smov 0  }
   0x2   :  { %s2737_s23 = smov 0   ;;  %s2739_s24 = smov 0  }
   0x3   :  { %s2741_s25 = smov 0   ;;  %s2743_s26 = smov 0  }
   0x4 LB: > { %s2130_s27 = sadd.s32 4294967295, %s2692_s26   ;;  %s2131_s28 = sadd.s32 4294967294, %s2692_s26   ;;  %s2692_s26 = sphi %s2743_s26, %s19_s26   ;;  %s2688_s25 = sphi %s2741_s25, %s3721_s25   ;;  %s2684_s24 = sphi %s2739_s24, %s3720_s24   ;;  %s2680_s23 = sphi %s2737_s23, %s3719_s23   ;;  %s2676_s22 = sphi %s2735_s22, %s3718_s22   ;;  %s2672_s21 = sphi %s2733_s21, %s3717_s21  }
   0x5   : > { %s28_s29 = sadd.s32 1, %s2688_s25  ;;  %s90_s30 = sadd.s32 1, %s2680_s23 }
   0x6   : > { %p29_p0 = scmp.ge.s32.totalorder %s28_s29, 2  ;;  %p97_p1 = scmp.ne.s32.totalorder %s2680_s23, %s2676_s22 }
   0x7   : > { %p98_p2 = scmp.eq.s32.totalorder %s2692_s26, 0  ;;  %p207_p3 = scmp.eq.s32.totalorder %s2130_s27, 1 }
   0x8   : > { %s3723_s29 = smov (%p29_p0, %s28_s29), 0  ;;  %p212_p6 = scmp.ne.s32.totalorder %s2676_s22, %s2672_s21 }
   0x9   : > { %p2772_p4 = por %p98_p2, %p97_p1  ;;  %p2776_p5 = por %p207_p3, %p97_p1 }
   0xa   : > { %s87_s9 = ssub.s32 %s2688_s25, %s3723_s29  ;;  %p213_p8 = scmp.eq.s32.totalorder %s2131_s28, 1 }
   0xb   : > { %p88_p7 = scmp.eq.s32.totalorder %s87_s9, 0  ;;  %p2135_p10 = scmp.ge.s32.totalorder %s2692_s26, 2 }
   0xc   : > { %p2787_p9 = por %p213_p8, %p212_p6 }
   0xd   : > { %s2785_s10 = scalar_select %p88_p7, %s2680_s23, %s90_s30  }
   0xe   : > { %249 = sbr.rel (%p2135_p10) target bundleno = 61 (0x3d), region = 24 }
  0x15   : > { %252 = sbr.rel (!%p2772_p4) target bundleno = 41 (0x29), region = 28  ;;  %s254_s12 = sand.u32 (%p2772_p4), 1, %s2680_s23  }
  0x16   : > { %s2249_s13 = sshll.u32 (%p2772_p4), %s2688_s25, 3  ;;  %s2136_s14 = sshll.u32 (%p2772_p4), %s254_s12, 8 }
  0x17   : > { %s2801_s17 = scalar_lea.vmem (%p2772_p4), %s3709_s2, %s2249_s13  ;;  %s2806_s18 = scalar_lea.vmem (%p2772_p4), [#allocation2], %s2136_s14 }
  0x18   : > { %v349_v0 = vld [vmem:[%s2801_s17] sm:$0xff] (%p2772_p4)  ;;  %v351_v1 = vld [vmem:[%s2801_s17 + $0x10] sm:$0xff] (%p2772_p4) }
  0x19   : > { %v353_v2 = vld [vmem:[%s2801_s17 + $0x20] sm:$0xff] (%p2772_p4)  ;;  %350 = vst [vmem:[%s2806_s18] sm:$0xff] (%p2772_p4), %v349_v0  ;;  %352 = vst [vmem:[%s2806_s18 + $0x8] sm:$0xff] (%p2772_p4), %v351_v1  ;;  %v355_v3 = vld [vmem:[%s2801_s17 + $0x30] sm:$0xff] (%p2772_p4) }
  0x1a   : > { %354 = vst [vmem:[%s2806_s18 + $0x10] sm:$0xff] (%p2772_p4), %v353_v2  ;;  %v357_v4 = vld [vmem:[%s2801_s17 + $0x40] sm:$0xff] (%p2772_p4)  ;;  %v359_v5 = vld [vmem:[%s2801_s17 + $0x50] sm:$0xff] (%p2772_p4)  ;;  %356 = vst [vmem:[%s2806_s18 + $0x18] sm:$0xff] (%p2772_p4), %v355_v3 }
  0x1b   : > { %358 = vst [vmem:[%s2806_s18 + $0x20] sm:$0xff] (%p2772_p4), %v357_v4  ;;  %360 = vst [vmem:[%s2806_s18 + $0x28] sm:$0xff] (%p2772_p4), %v359_v5  ;;  %v361_v6 = vld [vmem:[%s2801_s17 + $0x60] sm:$0xff] (%p2772_p4)  ;;  %v363_v7 = vld [vmem:[%s2801_s17 + $0x70] sm:$0xff] (%p2772_p4) }
  0x1c   : > { %v365_v8 = vld [vmem:[%s2801_s17 + $0x80] sm:$0xff]  ;;  %362 = vst [vmem:[%s2806_s18 + $0x30] sm:$0xff] %v361_v6  ;;  %364 = vst [vmem:[%s2806_s18 + $0x38] sm:$0xff] %v363_v7  ;;  %v367_v9 = vld [vmem:[%s2801_s17 + $0x90] sm:$0xff] }
  0x1d   : > { %366 = vst [vmem:[%s2806_s18 + $0x40] sm:$0xff] %v365_v8  ;;  %v369_v10 = vld [vmem:[%s2801_s17 + $0xa0] sm:$0xff]  ;;  %v371_v11 = vld [vmem:[%s2801_s17 + $0xb0] sm:$0xff]  ;;  %368 = vst [vmem:[%s2806_s18 + $0x48] sm:$0xff] %v367_v9 }
  0x1e   : > { %370 = vst [vmem:[%s2806_s18 + $0x50] sm:$0xff] %v369_v10  ;;  %372 = vst [vmem:[%s2806_s18 + $0x58] sm:$0xff] %v371_v11  ;;  %v373_v12 = vld [vmem:[%s2801_s17 + $0xc0] sm:$0xff]  ;;  %v375_v13 = vld [vmem:[%s2801_s17 + $0xd0] sm:$0xff] }
  0x1f   : > { %v377_v14 = vld [vmem:[%s2801_s17 + $0xe0] sm:$0xff]  ;;  %374 = vst [vmem:[%s2806_s18 + $0x60] sm:$0xff] %v373_v12  ;;  %376 = vst [vmem:[%s2806_s18 + $0x68] sm:$0xff] %v375_v13  ;;  %v379_v15 = vld [vmem:[%s2801_s17 + $0xf0] sm:$0xff] }
  0x20   : > { %378 = vst [vmem:[%s2806_s18 + $0x70] sm:$0xff] %v377_v14  ;;  %v381_v16 = vld [vmem:[%s2801_s17 + $0x100] sm:$0xff]  ;;  %v383_v17 = vld [vmem:[%s2801_s17 + $0x110] sm:$0xff]  ;;  %380 = vst [vmem:[%s2806_s18 + $0x78] sm:$0xff] %v379_v15 }
  0x21   : > { %382 = vst [vmem:[%s2806_s18 + $0x80] sm:$0xff] %v381_v16  ;;  %384 = vst [vmem:[%s2806_s18 + $0x88] sm:$0xff] %v383_v17  ;;  %v385_v18 = vld [vmem:[%s2801_s17 + $0x120] sm:$0xff]  ;;  %v387_v19 = vld [vmem:[%s2801_s17 + $0x130] sm:$0xff] }
  0x22   : > { %v389_v20 = vld [vmem:[%s2801_s17 + $0x140] sm:$0xff]  ;;  %386 = vst [vmem:[%s2806_s18 + $0x90] sm:$0xff] %v385_v18  ;;  %388 = vst [vmem:[%s2806_s18 + $0x98] sm:$0xff] %v387_v19  ;;  %v391_v21 = vld [vmem:[%s2801_s17 + $0x150] sm:$0xff] }
  0x23   : > { %390 = vst [vmem:[%s2806_s18 + $0xa0] sm:$0xff] %v389_v20  ;;  %v393_v22 = vld [vmem:[%s2801_s17 + $0x160] sm:$0xff]  ;;  %v395_v23 = vld [vmem:[%s2801_s17 + $0x170] sm:$0xff]  ;;  %392 = vst [vmem:[%s2806_s18 + $0xa8] sm:$0xff] %v391_v21 }
  0x24   : > { %394 = vst [vmem:[%s2806_s18 + $0xb0] sm:$0xff] %v393_v22  ;;  %396 = vst [vmem:[%s2806_s18 + $0xb8] sm:$0xff] %v395_v23  ;;  %v397_v24 = vld [vmem:[%s2801_s17 + $0x180] sm:$0xff]  ;;  %v399_v25 = vld [vmem:[%s2801_s17 + $0x190] sm:$0xff] }
  0x25   : > { %v401_v26 = vld [vmem:[%s2801_s17 + $0x1a0] sm:$0xff]  ;;  %398 = vst [vmem:[%s2806_s18 + $0xc0] sm:$0xff] %v397_v24  ;;  %400 = vst [vmem:[%s2806_s18 + $0xc8] sm:$0xff] %v399_v25  ;;  %v403_v27 = vld [vmem:[%s2801_s17 + $0x1b0] sm:$0xff] }
  0x26   : > { %402 = vst [vmem:[%s2806_s18 + $0xd0] sm:$0xff] %v401_v26  ;;  %v405_v28 = vld [vmem:[%s2801_s17 + $0x1c0] sm:$0xff]  ;;  %v407_v29 = vld [vmem:[%s2801_s17 + $0x1d0] sm:$0xff]  ;;  %404 = vst [vmem:[%s2806_s18 + $0xd8] sm:$0xff] %v403_v27 }
  0x27   : > { %406 = vst [vmem:[%s2806_s18 + $0xe0] sm:$0xff] %v405_v28  ;;  %408 = vst [vmem:[%s2806_s18 + $0xe8] sm:$0xff] %v407_v29  ;;  %v409_v30 = vld [vmem:[%s2801_s17 + $0x1e0] sm:$0xff]  ;;  %v411_v31 = vld [vmem:[%s2801_s17 + $0x1f0] sm:$0xff] }
  0x28   : > { %410 = vst [vmem:[%s2806_s18 + $0xf0] sm:$0xff] %v409_v30  ;;  %412 = vst [vmem:[%s2806_s18 + $0xf8] sm:$0xff] %v411_v31 }
  0x29 PF: > { %418 = sbr.rel (!%p2772_p4) target bundleno = 61 (0x3d), region = 66  ;;  %s420_s19 = sand.u32 (%p2772_p4), 1, %s2680_s23  }
  0x2a   : > { %s2250_s20 = sshll.u32 (%p2772_p4), %s2688_s25, 3  ;;  %s2139_s27 = sshll.u32 (%p2772_p4), %s420_s19, 8 }
  0x2b   : > { %s2876_s9 = scalar_lea.vmem (%p2772_p4), %s3710_s3, %s2250_s20  ;;  %s2881_s7 = scalar_lea.vmem (%p2772_p4), [#allocation3], %s2139_s27 }
  0x2c   : > { %v515_v32 = vld [vmem:[%s2876_s9] sm:$0xff] (%p2772_p4)  ;;  %v517_v33 = vld [vmem:[%s2876_s9 + $0x10] sm:$0xff] (%p2772_p4) }
  0x2d   : > { %v519_v34 = vld [vmem:[%s2876_s9 + $0x20] sm:$0xff] (%p2772_p4)  ;;  %516 = vst [vmem:[%s2881_s7] sm:$0xff] (%p2772_p4), %v515_v32  ;;  %518 = vst [vmem:[%s2881_s7 + $0x8] sm:$0xff] (%p2772_p4), %v517_v33  ;;  %v521_v35 = vld [vmem:[%s2876_s9 + $0x30] sm:$0xff] (%p2772_p4) }
  0x2e   : > { %520 = vst [vmem:[%s2881_s7 + $0x10] sm:$0xff] (%p2772_p4), %v519_v34  ;;  %v523_v36 = vld [vmem:[%s2876_s9 + $0x40] sm:$0xff] (%p2772_p4)  ;;  %v525_v37 = vld [vmem:[%s2876_s9 + $0x50] sm:$0xff] (%p2772_p4)  ;;  %522 = vst [vmem:[%s2881_s7 + $0x18] sm:$0xff] (%p2772_p4), %v521_v35 }
  0x2f   : > { %524 = vst [vmem:[%s2881_s7 + $0x20] sm:$0xff] (%p2772_p4), %v523_v36  ;;  %526 = vst [vmem:[%s2881_s7 + $0x28] sm:$0xff] (%p2772_p4), %v525_v37  ;;  %v527_v38 = vld [vmem:[%s2876_s9 + $0x60] sm:$0xff] (%p2772_p4)  ;;  %v529_v39 = vld [vmem:[%s2876_s9 + $0x70] sm:$0xff] (%p2772_p4) }
  0x30   : > { %v531_v40 = vld [vmem:[%s2876_s9 + $0x80] sm:$0xff]  ;;  %528 = vst [vmem:[%s2881_s7 + $0x30] sm:$0xff] %v527_v38  ;;  %530 = vst [vmem:[%s2881_s7 + $0x38] sm:$0xff] %v529_v39  ;;  %v533_v41 = vld [vmem:[%s2876_s9 + $0x90] sm:$0xff] }
  0x31   : > { %532 = vst [vmem:[%s2881_s7 + $0x40] sm:$0xff] %v531_v40  ;;  %v535_v42 = vld [vmem:[%s2876_s9 + $0xa0] sm:$0xff]  ;;  %v537_v43 = vld [vmem:[%s2876_s9 + $0xb0] sm:$0xff]  ;;  %534 = vst [vmem:[%s2881_s7 + $0x48] sm:$0xff] %v533_v41 }
  0x32   : > { %536 = vst [vmem:[%s2881_s7 + $0x50] sm:$0xff] %v535_v42  ;;  %538 = vst [vmem:[%s2881_s7 + $0x58] sm:$0xff] %v537_v43  ;;  %v539_v44 = vld [vmem:[%s2876_s9 + $0xc0] sm:$0xff]  ;;  %v541_v45 = vld [vmem:[%s2876_s9 + $0xd0] sm:$0xff] }
  0x33   : > { %v543_v46 = vld [vmem:[%s2876_s9 + $0xe0] sm:$0xff]  ;;  %540 = vst [vmem:[%s2881_s7 + $0x60] sm:$0xff] %v539_v44  ;;  %542 = vst [vmem:[%s2881_s7 + $0x68] sm:$0xff] %v541_v45  ;;  %v545_v47 = vld [vmem:[%s2876_s9 + $0xf0] sm:$0xff] }
  0x34   : > { %544 = vst [vmem:[%s2881_s7 + $0x70] sm:$0xff] %v543_v46  ;;  %v547_v48 = vld [vmem:[%s2876_s9 + $0x100] sm:$0xff]  ;;  %v549_v49 = vld [vmem:[%s2876_s9 + $0x110] sm:$0xff]  ;;  %546 = vst [vmem:[%s2881_s7 + $0x78] sm:$0xff] %v545_v47 }
  0x35   : > { %548 = vst [vmem:[%s2881_s7 + $0x80] sm:$0xff] %v547_v48  ;;  %550 = vst [vmem:[%s2881_s7 + $0x88] sm:$0xff] %v549_v49  ;;  %v551_v50 = vld [vmem:[%s2876_s9 + $0x120] sm:$0xff]  ;;  %v553_v51 = vld [vmem:[%s2876_s9 + $0x130] sm:$0xff] }
  0x36   : > { %v555_v52 = vld [vmem:[%s2876_s9 + $0x140] sm:$0xff]  ;;  %552 = vst [vmem:[%s2881_s7 + $0x90] sm:$0xff] %v551_v50  ;;  %554 = vst [vmem:[%s2881_s7 + $0x98] sm:$0xff] %v553_v51  ;;  %v557_v53 = vld [vmem:[%s2876_s9 + $0x150] sm:$0xff] }
  0x37   : > { %556 = vst [vmem:[%s2881_s7 + $0xa0] sm:$0xff] %v555_v52  ;;  %v559_v54 = vld [vmem:[%s2876_s9 + $0x160] sm:$0xff]  ;;  %v561_v55 = vld [vmem:[%s2876_s9 + $0x170] sm:$0xff]  ;;  %558 = vst [vmem:[%s2881_s7 + $0xa8] sm:$0xff] %v557_v53 }
  0x38   : > { %560 = vst [vmem:[%s2881_s7 + $0xb0] sm:$0xff] %v559_v54  ;;  %562 = vst [vmem:[%s2881_s7 + $0xb8] sm:$0xff] %v561_v55  ;;  %v563_v56 = vld [vmem:[%s2876_s9 + $0x180] sm:$0xff]  ;;  %v565_v57 = vld [vmem:[%s2876_s9 + $0x190] sm:$0xff] }
  0x39   : > { %v567_v58 = vld [vmem:[%s2876_s9 + $0x1a0] sm:$0xff]  ;;  %564 = vst [vmem:[%s2881_s7 + $0xc0] sm:$0xff] %v563_v56  ;;  %566 = vst [vmem:[%s2881_s7 + $0xc8] sm:$0xff] %v565_v57  ;;  %v569_v59 = vld [vmem:[%s2876_s9 + $0x1b0] sm:$0xff] }
  0x3a   : > { %568 = vst [vmem:[%s2881_s7 + $0xd0] sm:$0xff] %v567_v58  ;;  %v571_v60 = vld [vmem:[%s2876_s9 + $0x1c0] sm:$0xff]  ;;  %v573_v61 = vld [vmem:[%s2876_s9 + $0x1d0] sm:$0xff]  ;;  %570 = vst [vmem:[%s2881_s7 + $0xd8] sm:$0xff] %v569_v59 }
  0x3b   : > { %572 = vst [vmem:[%s2881_s7 + $0xe0] sm:$0xff] %v571_v60  ;;  %574 = vst [vmem:[%s2881_s7 + $0xe8] sm:$0xff] %v573_v61  ;;  %v575_v62 = vld [vmem:[%s2876_s9 + $0x1e0] sm:$0xff]  ;;  %v577_v63 = vld [vmem:[%s2876_s9 + $0x1f0] sm:$0xff] }
  0x3c   : > { %576 = vst [vmem:[%s2881_s7 + $0xf0] sm:$0xff] %v575_v62  ;;  %578 = vst [vmem:[%s2881_s7 + $0xf8] sm:$0xff] %v577_v63 }
  0x3d PF: > { %p2142_p11 = scmp.ge.s32.totalorder %s2692_s26, 1  ;;  %p599_p12 = scmp.lt.s32.totalorder %s2692_s26, 3 }
  0x3f   : > { %p600_p13 = pnand %p2142_p11, %p599_p12 }
  0x40   : > { %s606_s12 = sand.u32 (!%p600_p13), 1, %s2676_s22   ;;  %v2440_v0 = vld [vmem:[%s3708_s1 + $0x4] ss:$8 sps:$4 sm:$0xff] (!%p600_p13)   ;;  %s2146_s20 = sshll.u32 (!%p600_p13), %s2684_s24, 1 }
  0x41   : > { %603 = sbr.rel (%p600_p13) target bundleno = 501 (0x1f5), region = 112  ;;  %s2949_s13 = sshll.u32 (!%p600_p13), %s606_s12, 8  ;;  %v2443_v1 = vld [vmem:[%s3707_s0 + $0x4] ss:$8 sps:$4 sm:$0xff] (!%p600_p13)   ;;  %1062 = vmatprep.mubr.bf16.mxu1 (!%p600_p13), %v2440_v0 }
  0x42   : > { %s2958_s18 = scalar_lea.vmem (!%p600_p13), [#allocation3], %s2949_s13  ;;  %s2962_s19 = scalar_lea.vmem (!%p600_p13), [#allocation2], %s2949_s13  ;;  %1415 = vmatprep.mubr.bf16.mxu0 (!%p600_p13), %v2443_v1 }
  0x43   : > { %v2342_v2 = vld [vmem:[%s2958_s18 + $0x4] ss:$8 sps:$4 sm:$0xff] (!%p600_p13)   ;;  %v2346_v4 = vld [vmem:[%s2958_s18] ss:$8 sps:$4 sm:$0xff] (!%p600_p13)   ;;  %v2348_v6 = vld [vmem:[%s2958_s18 + $0x14] ss:$8 sps:$4 sm:$0xff] (!%p600_p13)  }
  0x44   : > { %v2344_v3 = vld [vmem:[%s2962_s19 + $0x4] ss:$8 sps:$4 sm:$0xff] (!%p600_p13)   ;;  %1030 = vmatprep.subr.bf16.mxu1 (!%p600_p13), %v2342_v2  ;;  %v2347_v5 = vld [vmem:[%s2962_s19] ss:$8 sps:$4 sm:$0xff] (!%p600_p13)   ;;  %v2350_v7 = vld [vmem:[%s2962_s19 + $0x14] ss:$8 sps:$4 sm:$0xff] (!%p600_p13)  }
  0x45   : > { %1383 = vmatprep.subr.bf16.mxu0 (!%p600_p13), %v2344_v3  ;;  %1031 = vmatpush1.bf16.msra.mxu1 (!%p600_p13), %v2346_v4  ;;  %v2352_v8 = vld [vmem:[%s2958_s18 + $0x10] ss:$8 sps:$4 sm:$0xff] (!%p600_p13)   ;;  %v2354_v10 = vld [vmem:[%s2958_s18 + $0x24] ss:$8 sps:$4 sm:$0xff] (!%p600_p13)   ;;  %v2358_v12 = vld [vmem:[%s2958_s18 + $0x20] ss:$8 sps:$4 sm:$0xff] (!%p600_p13)  }
  0x46   : > { %1384 = vmatpush1.bf16.msra.mxu0 (!%p600_p13), %v2347_v5  ;;  %1032 = vmatprep.subr.bf16.mxu1 (!%p600_p13), %v2348_v6  ;;  %v2353_v9 = vld [vmem:[%s2962_s19 + $0x10] ss:$8 sps:$4 sm:$0xff] (!%p600_p13)   ;;  %v2356_v11 = vld [vmem:[%s2962_s19 + $0x24] ss:$8 sps:$4 sm:$0xff] (!%p600_p13)   ;;  %v2359_v13 = vld [vmem:[%s2962_s19 + $0x20] ss:$8 sps:$4 sm:$0xff] (!%p600_p13)  }
  0x47   : > { %1385 = vmatprep.subr.bf16.mxu0 (!%p600_p13), %v2350_v7  ;;  %v2360_v14 = vld [vmem:[%s2958_s18 + $0x34] ss:$8 sps:$4 sm:$0xff] (!%p600_p13)   ;;  %v2364_v16 = vld [vmem:[%s2958_s18 + $0x30] ss:$8 sps:$4 sm:$0xff] (!%p600_p13)   ;;  %v2366_v18 = vld [vmem:[%s2958_s18 + $0x44] ss:$8 sps:$4 sm:$0xff] (!%p600_p13)  }
  0x48   : > { %v2362_v15 = vld [vmem:[%s2962_s19 + $0x34] ss:$8 sps:$4 sm:$0xff]   ;;  %v2365_v17 = vld [vmem:[%s2962_s19 + $0x30] ss:$8 sps:$4 sm:$0xff]   ;;  %v2368_v19 = vld [vmem:[%s2962_s19 + $0x44] ss:$8 sps:$4 sm:$0xff]  }
  0x49   : > { %1033 = vmatpush1.bf16.msra.mxu1 %v2352_v8  ;;  %v2370_v20 = vld [vmem:[%s2958_s18 + $0x40] ss:$8 sps:$4 sm:$0xff]   ;;  %v2372_v22 = vld [vmem:[%s2958_s18 + $0x54] ss:$8 sps:$4 sm:$0xff]   ;;  %v2376_v24 = vld [vmem:[%s2958_s18 + $0x50] ss:$8 sps:$4 sm:$0xff]  }
  0x4a   : > { %1386 = vmatpush1.bf16.msra.mxu0 %v2353_v9  ;;  %1034 = vmatprep.subr.bf16.mxu1 %v2354_v10  ;;  %v2371_v21 = vld [vmem:[%s2962_s19 + $0x40] ss:$8 sps:$4 sm:$0xff]   ;;  %v2374_v23 = vld [vmem:[%s2962_s19 + $0x54] ss:$8 sps:$4 sm:$0xff]   ;;  %v2377_v25 = vld [vmem:[%s2962_s19 + $0x50] ss:$8 sps:$4 sm:$0xff]  }
  0x4b   : > { %1387 = vmatprep.subr.bf16.mxu0 %v2356_v11  ;;  %v2378_v26 = vld [vmem:[%s2958_s18 + $0x64] ss:$8 sps:$4 sm:$0xff]   ;;  %v2382_v28 = vld [vmem:[%s2958_s18 + $0x60] ss:$8 sps:$4 sm:$0xff]   ;;  %v2384_v30 = vld [vmem:[%s2958_s18 + $0x74] ss:$8 sps:$4 sm:$0xff]  }
  0x4c   : > { %v2380_v27 = vld [vmem:[%s2962_s19 + $0x64] ss:$8 sps:$4 sm:$0xff]   ;;  %v2383_v29 = vld [vmem:[%s2962_s19 + $0x60] ss:$8 sps:$4 sm:$0xff]   ;;  %v2386_v31 = vld [vmem:[%s2962_s19 + $0x74] ss:$8 sps:$4 sm:$0xff]  }
  0x4d   : > { %1035 = vmatpush1.bf16.msra.mxu1 %v2358_v12  ;;  %v2388_v32 = vld [vmem:[%s2958_s18 + $0x70] ss:$8 sps:$4 sm:$0xff]   ;;  %v2390_v34 = vld [vmem:[%s2958_s18 + $0x84] ss:$8 sps:$4 sm:$0xff]   ;;  %v2394_v36 = vld [vmem:[%s2958_s18 + $0x80] ss:$8 sps:$4 sm:$0xff]  }
  0x4e   : > { %1388 = vmatpush1.bf16.msra.mxu0 %v2359_v13  ;;  %1036 = vmatprep.subr.bf16.mxu1 %v2360_v14  ;;  %v2389_v33 = vld [vmem:[%s2962_s19 + $0x70] ss:$8 sps:$4 sm:$0xff]   ;;  %v2392_v35 = vld [vmem:[%s2962_s19 + $0x84] ss:$8 sps:$4 sm:$0xff]   ;;  %v2395_v37 = vld [vmem:[%s2962_s19 + $0x80] ss:$8 sps:$4 sm:$0xff]  }
  0x4f   : > { %1389 = vmatprep.subr.bf16.mxu0 %v2362_v15  ;;  %v2396_v38 = vld [vmem:[%s2958_s18 + $0x94] ss:$8 sps:$4 sm:$0xff]   ;;  %v2400_v40 = vld [vmem:[%s2958_s18 + $0x90] ss:$8 sps:$4 sm:$0xff]   ;;  %v2402_v42 = vld [vmem:[%s2958_s18 + $0xa4] ss:$8 sps:$4 sm:$0xff]  }
  0x50   : > { %v2398_v39 = vld [vmem:[%s2962_s19 + $0x94] ss:$8 sps:$4 sm:$0xff]   ;;  %v2401_v41 = vld [vmem:[%s2962_s19 + $0x90] ss:$8 sps:$4 sm:$0xff]   ;;  %v2404_v43 = vld [vmem:[%s2962_s19 + $0xa4] ss:$8 sps:$4 sm:$0xff]  }
  0x51   : > { %1037 = vmatpush1.bf16.msra.mxu1 %v2364_v16  ;;  %v2406_v44 = vld [vmem:[%s2958_s18 + $0xa0] ss:$8 sps:$4 sm:$0xff]   ;;  %v2408_v46 = vld [vmem:[%s2958_s18 + $0xb4] ss:$8 sps:$4 sm:$0xff]   ;;  %v2412_v48 = vld [vmem:[%s2958_s18 + $0xb0] ss:$8 sps:$4 sm:$0xff]  }
  0x52   : > { %1390 = vmatpush1.bf16.msra.mxu0 %v2365_v17  ;;  %1038 = vmatprep.subr.bf16.mxu1 %v2366_v18  ;;  %v2407_v45 = vld [vmem:[%s2962_s19 + $0xa0] ss:$8 sps:$4 sm:$0xff]   ;;  %v2410_v47 = vld [vmem:[%s2962_s19 + $0xb4] ss:$8 sps:$4 sm:$0xff]   ;;  %v2413_v49 = vld [vmem:[%s2962_s19 + $0xb0] ss:$8 sps:$4 sm:$0xff]  }
  0x53   : > { %1391 = vmatprep.subr.bf16.mxu0 %v2368_v19  ;;  %v2414_v50 = vld [vmem:[%s2958_s18 + $0xc4] ss:$8 sps:$4 sm:$0xff]   ;;  %v2418_v52 = vld [vmem:[%s2958_s18 + $0xc0] ss:$8 sps:$4 sm:$0xff]   ;;  %v2420_v54 = vld [vmem:[%s2958_s18 + $0xd4] ss:$8 sps:$4 sm:$0xff]  }
  0x54   : > { %v2416_v51 = vld [vmem:[%s2962_s19 + $0xc4] ss:$8 sps:$4 sm:$0xff]   ;;  %v2419_v53 = vld [vmem:[%s2962_s19 + $0xc0] ss:$8 sps:$4 sm:$0xff]   ;;  %v2422_v55 = vld [vmem:[%s2962_s19 + $0xd4] ss:$8 sps:$4 sm:$0xff]  }
  0x55   : > { %1039 = vmatpush1.bf16.msra.mxu1 %v2370_v20  ;;  %v2424_v56 = vld [vmem:[%s2958_s18 + $0xd0] ss:$8 sps:$4 sm:$0xff]   ;;  %v2426_v58 = vld [vmem:[%s2958_s18 + $0xe4] ss:$8 sps:$4 sm:$0xff]   ;;  %v2430_v60 = vld [vmem:[%s2958_s18 + $0xe0] ss:$8 sps:$4 sm:$0xff]  }
  0x56   : > { %1392 = vmatpush1.bf16.msra.mxu0 %v2371_v21  ;;  %1040 = vmatprep.subr.bf16.mxu1 %v2372_v22  ;;  %v2425_v57 = vld [vmem:[%s2962_s19 + $0xd0] ss:$8 sps:$4 sm:$0xff]   ;;  %v2428_v59 = vld [vmem:[%s2962_s19 + $0xe4] ss:$8 sps:$4 sm:$0xff]   ;;  %v2431_v61 = vld [vmem:[%s2962_s19 + $0xe0] ss:$8 sps:$4 sm:$0xff]  }
  0x57   : > { %1393 = vmatprep.subr.bf16.mxu0 %v2374_v23  ;;  %v2432_v62 = vld [vmem:[%s2958_s18 + $0xf4] ss:$8 sps:$4 sm:$0xff]   ;;  %v2436_v0 = vld [vmem:[%s2958_s18 + $0xf0] ss:$8 sps:$4 sm:$0xff]   ;;  %v2438_v2 = vld [vmem:[%s3708_s1] ss:$8 sps:$4 sm:$0xff]  }
  0x58   : > { %v2434_v63 = vld [vmem:[%s2962_s19 + $0xf4] ss:$8 sps:$4 sm:$0xff]   ;;  %v2437_v1 = vld [vmem:[%s2962_s19 + $0xf0] ss:$8 sps:$4 sm:$0xff]   ;;  %v2441_v3 = vld [vmem:[%s3707_s0] ss:$8 sps:$4 sm:$0xff]  }
  0x59   : > { %1041 = vmatpush1.bf16.msra.mxu1 %v2376_v24  ;;  %v2444_v4 = vld [vmem:[%s3708_s1 + $0x14] ss:$8 sps:$4 sm:$0xff]   ;;  %v2448_v6 = vld [vmem:[%s3708_s1 + $0x10] ss:$8 sps:$4 sm:$0xff]   ;;  %v2450_v8 = vld [vmem:[%s3708_s1 + $0x24] ss:$8 sps:$4 sm:$0xff]  }
  0x5a   : > { %1394 = vmatpush1.bf16.msra.mxu0 %v2377_v25  ;;  %1042 = vmatprep.subr.bf16.mxu1 %v2378_v26  ;;  %v2446_v5 = vld [vmem:[%s3707_s0 + $0x14] ss:$8 sps:$4 sm:$0xff]   ;;  %v2449_v7 = vld [vmem:[%s3707_s0 + $0x10] ss:$8 sps:$4 sm:$0xff]   ;;  %v2452_v9 = vld [vmem:[%s3707_s0 + $0x24] ss:$8 sps:$4 sm:$0xff]  }
  0x5b   : > { %1395 = vmatprep.subr.bf16.mxu0 %v2380_v27  ;;  %v2454_v10 = vld [vmem:[%s3708_s1 + $0x20] ss:$8 sps:$4 sm:$0xff]   ;;  %v2456_v12 = vld [vmem:[%s3708_s1 + $0x34] ss:$8 sps:$4 sm:$0xff]   ;;  %v2460_v14 = vld [vmem:[%s3708_s1 + $0x30] ss:$8 sps:$4 sm:$0xff]  }
  0x5c   : > { %v2455_v11 = vld [vmem:[%s3707_s0 + $0x20] ss:$8 sps:$4 sm:$0xff]   ;;  %v2458_v13 = vld [vmem:[%s3707_s0 + $0x34] ss:$8 sps:$4 sm:$0xff]   ;;  %v2461_v15 = vld [vmem:[%s3707_s0 + $0x30] ss:$8 sps:$4 sm:$0xff]  }
  0x5d   : > { %1043 = vmatpush1.bf16.msra.mxu1 %v2382_v28  ;;  %v2462_v16 = vld [vmem:[%s3708_s1 + $0x44] ss:$8 sps:$4 sm:$0xff]   ;;  %v2466_v18 = vld [vmem:[%s3708_s1 + $0x40] ss:$8 sps:$4 sm:$0xff]   ;;  %v2468_v20 = vld [vmem:[%s3708_s1 + $0x54] ss:$8 sps:$4 sm:$0xff]  }
  0x5e   : > { %1396 = vmatpush1.bf16.msra.mxu0 %v2383_v29  ;;  %1044 = vmatprep.subr.bf16.mxu1 %v2384_v30  ;;  %v2464_v17 = vld [vmem:[%s3707_s0 + $0x44] ss:$8 sps:$4 sm:$0xff]   ;;  %v2467_v19 = vld [vmem:[%s3707_s0 + $0x40] ss:$8 sps:$4 sm:$0xff]   ;;  %v2470_v21 = vld [vmem:[%s3707_s0 + $0x54] ss:$8 sps:$4 sm:$0xff]  }
  0x5f   : > { %1397 = vmatprep.subr.bf16.mxu0 %v2386_v31  ;;  %v2472_v22 = vld [vmem:[%s3708_s1 + $0x50] ss:$8 sps:$4 sm:$0xff]   ;;  %v2474_v24 = vld [vmem:[%s3708_s1 + $0x64] ss:$8 sps:$4 sm:$0xff]   ;;  %v2478_v26 = vld [vmem:[%s3708_s1 + $0x60] ss:$8 sps:$4 sm:$0xff]  }
  0x60   : > { %v2473_v23 = vld [vmem:[%s3707_s0 + $0x50] ss:$8 sps:$4 sm:$0xff]   ;;  %v2476_v25 = vld [vmem:[%s3707_s0 + $0x64] ss:$8 sps:$4 sm:$0xff]   ;;  %v2479_v27 = vld [vmem:[%s3707_s0 + $0x60] ss:$8 sps:$4 sm:$0xff]  }
  0x61   : > { %1045 = vmatpush1.bf16.msra.mxu1 %v2388_v32  ;;  %v2480_v28 = vld [vmem:[%s3708_s1 + $0x74] ss:$8 sps:$4 sm:$0xff]   ;;  %v2484_v30 = vld [vmem:[%s3708_s1 + $0x70] ss:$8 sps:$4 sm:$0xff]   ;;  %p683_p0 = scmp.lt.s32.totalorder %s2146_s20, 3  ;;  %v1498_v32 = vlaneseq  ;;  %s3280_s15 = scalar_lea.vmem [#allocation4], %s2949_s13 }
  0x62   : > { %1398 = vmatpush1.bf16.msra.mxu0 %v2389_v33  ;;  %1046 = vmatprep.subr.bf16.mxu1 %v2390_v34  ;;  %v2482_v29 = vld [vmem:[%s3707_s0 + $0x74] ss:$8 sps:$4 sm:$0xff]   ;;  %v2485_v31 = vld [vmem:[%s3707_s0 + $0x70] ss:$8 sps:$4 sm:$0xff]   ;;  %s2251_s13 = sshll.u32 %s2684_s24, 8  ;;  %s1985_s16 = sshll.u32 %s3280_s15, 4  ;;  %s3653_s16 = int_to_ptr.vmem [resolvable:$true] %s1985_s16 }
  0x63   : > { %1399 = vmatprep.subr.bf16.mxu0 %v2392_v35  ;;  %s3725_s20 = smov (!%p683_p0, %s2146_s20), 3  ;;  %v1499_v33 = vshrl.u32 %v1498_v32, 7  ;;  %s3650_s19 = scalar_lea.hbm %s3713_s6, %s2251_s13 }
  0x64   : > { %s685_s30 = scalar_lea.vmem %s3711_s4, %s3725_s20  ;;  %s690_s14 = scalar_lea.vmem %s3712_s5, %s3725_s20 }
  0x65   : > { %1047 = vmatpush1.bf16.msra.mxu1 %v2394_v36  ;;  %v1500_v34 = vsub.s32 0, %v1499_v33  ;;  %v1496_v35 = vld [vmem:[%s685_s30] sm:$0x3]  ;;  %v1504_v36 = vsub.s32 1, %v1499_v33  ;;  %s3660_s24 = scalar_lea.sflag [#allocation5], %s606_s12  ;;  %s2614_s20 = scalar_lea.vmem %s3653_s16, 4096 }
  0x66   : > { %1400 = vmatpush1.bf16.msra.mxu0 %v2395_v37  ;;  %1048 = vmatprep.subr.bf16.mxu1 %v2396_v38  ;;  %v1540_v37 = vld [vmem:[%s690_s14] sm:$0x3]  ;;  %p2615_p1 = scmp.ne.s32.totalorder %s3653_s16, %s2614_s20  ;;  %s2694_s27 = smov [#allocation4]  }
  0x67   : > { %1401 = vmatprep.subr.bf16.mxu0 %v2398_v39  ;;  %v3124_v38 = vrot.slane %v1496_v35, %v1500_v34  ;;  %s2618_s28 = sshll.u32 %s2694_s27, 4  ;;  %s2619_s28 = int_to_ptr.vmem [resolvable:$false] %s2618_s28 }
  0x68   : > { %p2616_p2 = pnand %p2615_p1, %p2776_p5  ;;  %s2620_s30 = scalar_lea.vmem %s2619_s28, 8192 }
  0x69   : > { %1049 = vmatpush1.bf16.msra.mxu1 %v2400_v40  ;;  %p2621_p4 = scmp.lt.s32.totalorder %s3653_s16, %s2619_s28  ;;  %p2622_p6 = scmp.lt.s32.totalorder %s2620_s30, %s2614_s20 }
  0x6a   : > { %1402 = vmatpush1.bf16.msra.mxu0 %v2401_v41  ;;  %1050 = vmatprep.subr.bf16.mxu1 %v2402_v42  ;;  %v3126_v41 = vrot.slane %v1496_v35, %v1504_v36  ;;  %p2617_p3 = pneg %p2616_p2 }
  0x6b   : > { %1403 = vmatprep.subr.bf16.mxu0 %v2404_v43  ;;  %v3128_v43 = vrot.slane %v1540_v37, %v1500_v34  ;;  %p2623_p7 = por %p2622_p6, %p2621_p4 }
  0x6d   : > { %1051 = vmatpush1.bf16.msra.mxu1 %v2406_v44  ;;  %p2624_p8 = pnand %p2623_p7, %p2617_p3 }
  0x6e   : > { %1404 = vmatpush1.bf16.msra.mxu0 %v2407_v45  ;;  %1052 = vmatprep.subr.bf16.mxu1 %v2408_v46 }
  0x6f   : > { %1405 = vmatprep.subr.bf16.mxu0 %v2410_v47  ;;  %v3130_v47 = vrot.slane %v1540_v37, %v1504_v36 }
  0x71   : > { %1053 = vmatpush1.bf16.msra.mxu1 %v2412_v48 }
  0x72   : > { %1406 = vmatpush1.bf16.msra.mxu0 %v2413_v49  ;;  %1054 = vmatprep.subr.bf16.mxu1 %v2414_v50 }
  0x73   : > { %1407 = vmatprep.subr.bf16.mxu0 %v2416_v51 }
  0x75   : > { %1055 = vmatpush1.bf16.msra.mxu1 %v2418_v52 }
  0x76   : > { %1408 = vmatpush1.bf16.msra.mxu0 %v2419_v53  ;;  %1056 = vmatprep.subr.bf16.mxu1 %v2420_v54 }
  0x77   : > { %1409 = vmatprep.subr.bf16.mxu0 %v2422_v55 }
  0x79   : > { %1057 = vmatpush1.bf16.msra.mxu1 %v2424_v56 }
  0x7a   : > { %1410 = vmatpush1.bf16.msra.mxu0 %v2425_v57  ;;  %1058 = vmatprep.subr.bf16.mxu1 %v2426_v58 }
  0x7b   : > { %1411 = vmatprep.subr.bf16.mxu0 %v2428_v59 }
  0x7d   : > { %1059 = vmatpush1.bf16.msra.mxu1 %v2430_v60 }
  0x7e   : > { %1412 = vmatpush1.bf16.msra.mxu0 %v2431_v61  ;;  %1060 = vmatprep.subr.bf16.mxu1 %v2432_v62 }
  0x7f   : > { %1413 = vmatprep.subr.bf16.mxu0 %v2434_v63 }
  0x81   : > { %1061 = vmatpush1.bf16.msra.mxu1 %v2436_v0 }
  0x82   : > { %1414 = vmatpush1.bf16.msra.mxu0 %v2437_v1 }
  0x84   : > { %1063 = vmatmul.mubr.bf16.vlgmr.msra.gmra.mrb[0].mxu1 %v2438_v2 }
  0x85   : > { %1416 = vmatmul.mubr.bf16.vlgmr.msra.gmra.mrb[0].mxu0 %v2441_v3  ;;  %1072 = vmatprep.mubr.bf16.mxu1 %v2444_v4 }
  0x86   : > { %1425 = vmatprep.mubr.bf16.mxu0 %v2446_v5 }
  0x8c   : > { %1073 = vmatmul.mubr.bf16.gmra.mrb[4].mxu1 %v2448_v6 }
  0x8d   : > { %1426 = vmatmul.mubr.bf16.gmra.mrb[4].mxu0 %v2449_v7  ;;  %1082 = vmatprep.mubr.bf16.mxu1 %v2450_v8 }
  0x8e   : > { %1435 = vmatprep.mubr.bf16.mxu0 %v2452_v9 }
  0x94   : > { %1083 = vmatmul.mubr.bf16.gmra.mrb[8].mxu1 %v2454_v10 }
  0x95   : > { %1436 = vmatmul.mubr.bf16.gmra.mrb[8].mxu0 %v2455_v11  ;;  %1092 = vmatprep.mubr.bf16.mxu1 %v2456_v12 }
  0x96   : > { %1445 = vmatprep.mubr.bf16.mxu0 %v2458_v13 }
  0x9c   : > { %1093 = vmatmul.mubr.bf16.gmra.mrb[12].mxu1 %v2460_v14 }
  0x9d   : > { %1446 = vmatmul.mubr.bf16.gmra.mrb[12].mxu0 %v2461_v15  ;;  %1102 = vmatprep.mubr.bf16.mxu1 %v2462_v16 }
  0x9e   : > { %1455 = vmatprep.mubr.bf16.mxu0 %v2464_v17 }
  0xa4   : > { %1103 = vmatmul.mubr.bf16.gmra.mrb[16].mxu1 %v2466_v18 }
  0xa5   : > { %1456 = vmatmul.mubr.bf16.gmra.mrb[16].mxu0 %v2467_v19  ;;  %1112 = vmatprep.mubr.bf16.mxu1 %v2468_v20 }
  0xa6   : > { %1465 = vmatprep.mubr.bf16.mxu0 %v2470_v21 }
  0xac   : > { %1113 = vmatmul.mubr.bf16.gmra.mrb[20].mxu1 %v2472_v22 }
  0xad   : > { %1466 = vmatmul.mubr.bf16.gmra.mrb[20].mxu0 %v2473_v23  ;;  %1122 = vmatprep.mubr.bf16.mxu1 %v2474_v24 }
  0xae   : > { %1475 = vmatprep.mubr.bf16.mxu0 %v2476_v25 }
  0xb4   : > { %1123 = vmatmul.mubr.bf16.gmra.mrb[24].mxu1 %v2478_v26 }
  0xb5   : > { %1476 = vmatmul.mubr.bf16.gmra.mrb[24].mxu0 %v2479_v27  ;;  %1132 = vmatprep.mubr.bf16.mxu1 %v2480_v28 }
  0xb6   : > { %1485 = vmatprep.mubr.bf16.mxu0 %v2482_v29 }
  0xbc   : > { %1133 = vmatmul.mubr.bf16.gmra.mrb[28].mxu1 %v2484_v30 }
  0xbd   : > { %1486 = vmatmul.mubr.bf16.gmra.mrb[28].mxu0 %v2485_v31 }
 0x157   : > { %v1064_v39 = vpop.f32.mrb[0].mxu1 }
 0x158   : > { %v1417_v40 = vpop.f32.mrb[0].mxu0  ;;  %v1066_v44 = vpop.f32.mrb[1].mxu1 }
 0x159   : > { %v1418_v42 = vadd.f32 %v1417_v40, %v1064_v39  ;;  %v1419_v45 = vpop.f32.mrb[1].mxu0  ;;  %v1068_v48 = vpop.f32.mrb[2].mxu1 }
 0x15a   : > { %v1420_v46 = vadd.f32 %v1419_v45, %v1066_v44  ;;  %v1421_v49 = vpop.f32.mrb[2].mxu0  ;;  %v1070_v52 = vpop.f32.mrb[3].mxu1 }
 0x15b   : > { %v1508_v50 = vmul.f32 %v3124_v38, %v1418_v42  ;;  %v1422_v51 = vadd.f32 %v1421_v49, %v1068_v48  ;;  %v1423_v53 = vpop.f32.mrb[3].mxu0 }
 0x15c   : > { %v1509_v54 = vmul.f32 %v3126_v41, %v1420_v46  ;;  %v1424_v55 = vadd.f32 %v1423_v53, %v1070_v52 }
 0x15d   : > { %v3135_v56 = vadd.f32 %v3128_v43, %v1508_v50  ;;  %v1510_v57 = vmul.f32 %v3124_v38, %v1422_v51 }
 0x15e   : > { %v3139_v58 = vadd.f32 %v3130_v47, %v1509_v54  ;;  %v1511_v59 = vmul.f32 %v3126_v41, %v1424_v55 }
 0x15f   : > { %v1584_v60 = vmin.f32 %v3135_v56, 20.0  ;;  %v3144_v61 = vadd.f32 %v3128_v43, %v1510_v57  ;;  %v1074_v0 = vpop.f32.mrb[4].mxu1  ;;  %vm1840_vm0 = vcmp.gt.f32.partialorder %v3135_v56, 20.0 }
 0x160   : > { %v1585_v62 = vmin.f32 %v3139_v58, 20.0  ;;  %v3148_v63 = vadd.f32 %v3130_v47, %v1511_v59  ;;  %v1427_v1 = vpop.f32.mrb[4].mxu0  ;;  %v1076_v5 = vpop.f32.mrb[5].mxu1  ;;  %vm1841_vm1 = vcmp.gt.f32.partialorder %v3139_v58, 20.0 }
 0x161   : > { %v1616_v2 = vmul.f32 1.442695, %v1584_v60  ;;  %v1586_v3 = vmin.f32 %v3144_v61, 20.0  ;;  %v1428_v4 = vadd.f32 %v1427_v1, %v1074_v0  ;;  %v1429_v6 = vpop.f32.mrb[5].mxu0  ;;  %v1078_v10 = vpop.f32.mrb[6].mxu1  ;;  %vm1842_vm2 = vcmp.gt.f32.partialorder %v3144_v61, 20.0 }
 0x162   : > { %v1618_v7 = vmul.f32 1.442695, %v1585_v62  ;;  %v1587_v8 = vmin.f32 %v3148_v63, 20.0  ;;  %v1430_v9 = vadd.f32 %v1429_v6, %v1076_v5  ;;  %v1431_v11 = vpop.f32.mrb[6].mxu0  ;;  %v1080_v15 = vpop.f32.mrb[7].mxu1  ;;  %vm1843_vm3 = vcmp.gt.f32.partialorder %v3148_v63, 20.0 }
 0x163   : > { %2486 = vpow2.f32 %v1616_v2  ;;  %v1620_v12 = vmul.f32 1.442695, %v1586_v3  ;;  %v1512_v13 = vmul.f32 %v3124_v38, %v1428_v4  ;;  %v1432_v14 = vadd.f32 %v1431_v11, %v1078_v10  ;;  %v1433_v16 = vpop.f32.mrb[7].mxu0 }
 0x164   : > { %2488 = vpow2.f32 %v1618_v7  ;;  %v1622_v17 = vmul.f32 1.442695, %v1587_v8  ;;  %v1513_v18 = vmul.f32 %v3126_v41, %v1430_v9  ;;  %v1434_v19 = vadd.f32 %v1433_v16, %v1080_v15 }
 0x165   : > { %2490 = vpow2.f32 %v1620_v12  ;;  %v3155_v20 = vadd.f32 %v3128_v43, %v1512_v13  ;;  %v1514_v21 = vmul.f32 %v3124_v38, %v1432_v14 }
 0x166   : > { %2492 = vpow2.f32 %v1622_v17  ;;  %v3159_v22 = vadd.f32 %v3130_v47, %v1513_v18  ;;  %v1515_v23 = vmul.f32 %v3126_v41, %v1434_v19 }
 0x167   : > { %v1588_v24 = vmin.f32 %v3155_v20, 20.0  ;;  %v3164_v25 = vadd.f32 %v3128_v43, %v1514_v21  ;;  %v1084_v28 = vpop.f32.mrb[8].mxu1  ;;  %vm1844_vm4 = vcmp.gt.f32.partialorder %v3155_v20, 20.0 }
 0x168   : > { %v1589_v26 = vmin.f32 %v3159_v22, 20.0  ;;  %v3168_v27 = vadd.f32 %v3130_v47, %v1515_v23  ;;  %v1437_v29 = vpop.f32.mrb[8].mxu0  ;;  %v1086_v33 = vpop.f32.mrb[9].mxu1  ;;  %vm1845_vm5 = vcmp.gt.f32.partialorder %v3159_v22, 20.0 }
 0x169   : > { %v1624_v30 = vmul.f32 1.442695, %v1588_v24  ;;  %v1590_v31 = vmin.f32 %v3164_v25, 20.0  ;;  %v1438_v32 = vadd.f32 %v1437_v29, %v1084_v28  ;;  %v1439_v34 = vpop.f32.mrb[9].mxu0  ;;  %v1088_v39 = vpop.f32.mrb[10].mxu1  ;;  %vm1846_vm6 = vcmp.gt.f32.partialorder %v3164_v25, 20.0 }
 0x16a   : > { %v1626_v35 = vmul.f32 1.442695, %v1589_v26  ;;  %v1591_v36 = vmin.f32 %v3168_v27, 20.0  ;;  %v1440_v37 = vadd.f32 %v1439_v34, %v1086_v33  ;;  %v1441_v40 = vpop.f32.mrb[10].mxu0  ;;  %v1090_v46 = vpop.f32.mrb[11].mxu1  ;;  %vm1847_vm7 = vcmp.gt.f32.partialorder %v3168_v27, 20.0 }
 0x16b   : > { %2494 = vpow2.f32 %v1624_v30  ;;  %v1628_v42 = vmul.f32 1.442695, %v1590_v31  ;;  %v1516_v44 = vmul.f32 %v3124_v38, %v1438_v32  ;;  %v1442_v45 = vadd.f32 %v1441_v40, %v1088_v39  ;;  %v1443_v48 = vpop.f32.mrb[11].mxu0 }
 0x16c   : > { %2496 = vpow2.f32 %v1626_v35  ;;  %v1630_v49 = vmul.f32 1.442695, %v1591_v36  ;;  %v1517_v50 = vmul.f32 %v3126_v41, %v1440_v37  ;;  %v1444_v51 = vadd.f32 %v1443_v48, %v1090_v46 }
 0x16d   : > { %v2487_v52 = vpop.eup %2486  ;;  %2498 = vpow2.f32 %v1628_v42  ;;  %v3175_v53 = vadd.f32 %v3128_v43, %v1516_v44  ;;  %v1518_v54 = vmul.f32 %v3124_v38, %v1442_v45 }
 0x16e   : > { %v2489_v55 = vpop.eup %2488  ;;  %v1680_v57 = vadd.f32 2.0, %v2487_v52  ;;  %2500 = vpow2.f32 %v1630_v49  ;;  %v3179_v59 = vadd.f32 %v3130_v47, %v1517_v50  ;;  %v1519_v6 = vmul.f32 %v3126_v41, %v1444_v51 }
 0x16f   : > { %v2491_v60 = vpop.eup %2490  ;;  %v1681_v62 = vadd.f32 2.0, %v2489_v55  ;;  %v1592_v0 = vmin.f32 %v3175_v53, 20.0  ;;  %v3183_v1 = vadd.f32 %v3128_v43, %v1518_v54  ;;  %v1094_v7 = vpop.f32.mrb[12].mxu1  ;;  %vm1848_vm8 = vcmp.gt.f32.partialorder %v3175_v53, 20.0 }
 0x170   : > { %v2493_v2 = vpop.eup %2492  ;;  %v3185_v3 = vmul.f32 %v2487_v52, %v1680_v57  ;;  %v1682_v4 = vadd.f32 2.0, %v2491_v60  ;;  %v1593_v5 = vmin.f32 %v3179_v59, 20.0  ;;  %v1447_v8 = vpop.f32.mrb[12].mxu0  ;;  %v3200_v30 = vadd.f32 %v3130_v47, %v1519_v6 }
 0x171   : > { %v3189_v9 = vmul.f32 %v2489_v55, %v1681_v62  ;;  %v1683_v10 = vadd.f32 2.0, %v2493_v2  ;;  %v1632_v11 = vmul.f32 1.442695, %v1592_v0  ;;  %v1594_v12 = vmin.f32 %v3183_v1, 20.0  ;;  %v1096_v13 = vpop.f32.mrb[13].mxu1  ;;  %v1449_v14 = vpop.f32.mrb[13].mxu0 }
 0x172   : > { %v1744_v15 = vadd.f32 2.0, %v3185_v3  ;;  %v3193_v16 = vmul.f32 %v2491_v60, %v1682_v4  ;;  %v1634_v17 = vmul.f32 1.442695, %v1593_v5  ;;  %v1098_v18 = vpop.f32.mrb[14].mxu1  ;;  %v1451_v19 = vpop.f32.mrb[14].mxu0  ;;  %v1448_v31 = vadd.f32 %v1447_v8, %v1094_v7 }
 0x173   : > { %v1745_v21 = vadd.f32 2.0, %v3189_v9  ;;  %v3196_v23 = vmul.f32 %v2493_v2, %v1683_v10  ;;  %2502 = vpow2.f32 %v1632_v11  ;;  %v1636_v24 = vmul.f32 1.442695, %v1594_v12  ;;  %v1100_v26 = vpop.f32.mrb[15].mxu1  ;;  %v1453_v28 = vpop.f32.mrb[15].mxu0 }
 0x174   : > { %2504 = vrcp.f32 %v1744_v15  ;;  %v1746_v29 = vadd.f32 2.0, %v3193_v16  ;;  %v1450_v34 = vadd.f32 %v1449_v14, %v1096_v13  ;;  %v1452_v35 = vadd.f32 %v1451_v19, %v1098_v18 }
 0x175   : > { %v2495_v32 = vpop.eup %2494  ;;  %2506 = vrcp.f32 %v1745_v21  ;;  %v1747_v33 = vadd.f32 2.0, %v3196_v23  ;;  %v1595_v39 = vmin.f32 %v3200_v30, 20.0  ;;  %v1520_v44 = vmul.f32 %v3124_v38, %v1448_v31 }
 0x176   : > { %v2497_v36 = vpop.eup %2496  ;;  %2508 = vrcp.f32 %v1746_v29  ;;  %v1684_v37 = vadd.f32 2.0, %v2495_v32  ;;  %v1521_v45 = vmul.f32 %v3126_v41, %v1450_v34  ;;  %v1522_v19 = vmul.f32 %v3124_v38, %v1452_v35 }
 0x177   : > { %v2499_v40 = vpop.eup %2498  ;;  %2510 = vrcp.f32 %v1747_v33  ;;  %v1685_v42 = vadd.f32 2.0, %v2497_v36  ;;  %v1638_v50 = vmul.f32 1.442695, %v1595_v39  ;;  %v1104_v51 = vpop.f32.mrb[16].mxu1  ;;  %v3211_v57 = vadd.f32 %v3128_v43, %v1520_v44 }
 0x178   : > { %v2501_v46 = vpop.eup %2500  ;;  %v3206_v48 = vmul.f32 %v2495_v32, %v1684_v37  ;;  %v1686_v49 = vadd.f32 2.0, %v2499_v40  ;;  %2512 = vpow2.f32 %v1634_v17  ;;  %v1457_v52 = vpop.f32.mrb[16].mxu0  ;;  %v3222_v4 = vadd.f32 %v3130_v47, %v1521_v45 }
 0x179   : > { %v3208_v54 = vmul.f32 %v2497_v36, %v1685_v42  ;;  %v1687_v55 = vadd.f32 2.0, %v2501_v46  ;;  %2514 = vpow2.f32 %v1636_v24  ;;  %v3213_v60 = vpop.f32.mrb[17].mxu1  ;;  %v3215_v62 = vpop.f32.mrb[17].mxu0  ;;  %v1596_v10 = vmin.f32 %v3211_v57, 20.0 }
 0x17a   : > { %v1748_v0 = vadd.f32 2.0, %v3206_v48  ;;  %v3219_v2 = vmul.f32 %v2499_v40, %v1686_v49  ;;  %2516 = vpow2.f32 %v1638_v50  ;;  %v3224_v5 = vpop.f32.mrb[18].mxu1  ;;  %v3226_v6 = vpop.f32.mrb[18].mxu0  ;;  %v1597_v14 = vmin.f32 %v3222_v4, 20.0 }
 0x17b   : > { %v1749_v7 = vadd.f32 2.0, %v3208_v54  ;;  %v3230_v8 = vmul.f32 %v2501_v46, %v1687_v55  ;;  %v3233_v11 = vpop.f32.mrb[19].mxu1  ;;  %v3235_v12 = vpop.f32.mrb[19].mxu0  ;;  %v1640_v18 = vmul.f32 1.442695, %v1596_v10  ;;  %v1454_v31 = vadd.f32 %v1453_v28, %v1100_v26 }
 0x17c   : > { %2518 = vrcp.f32 %v1748_v0  ;;  %v1750_v13 = vadd.f32 2.0, %v3219_v2  ;;  %v1642_v29 = vmul.f32 1.442695, %v1597_v14  ;;  %v3244_v34 = vadd.f32 %v3128_v43, %v1522_v19 }
 0x17d   : > { %v2503_v15 = vpop.eup %2502  ;;  %2520 = vrcp.f32 %v1749_v7  ;;  %v1751_v17 = vadd.f32 2.0, %v3230_v8  ;;  %v1458_v36 = vadd.f32 %v1457_v52, %v1104_v51  ;;  %v1523_v52 = vmul.f32 %v3126_v41, %v1454_v31 }
 0x17e   : > { %v2505_v21 = vpop.eup %2504  ;;  %2522 = vrcp.f32 %v1750_v13  ;;  %v1688_v24 = vadd.f32 2.0, %v2503_v15  ;;  %v1598_v44 = vmin.f32 %v3244_v34, 20.0  ;;  %vm1849_vm9 = vcmp.gt.f32.partialorder %v3179_v59, 20.0 }
 0x17f   : > { %v2507_v32 = vpop.eup %2506  ;;  %v1808_v33 = vmul.f32 %v2505_v21, %v3185_v3  ;;  %2524 = vrcp.f32 %v1751_v17  ;;  %v3250_v35 = vpop.f32.mrb[20].mxu1  ;;  %vm1850_vm10 = vcmp.gt.f32.partialorder %v3183_v1, 20.0  ;;  %vm1851_vm11 = vcmp.gt.f32.partialorder %v3200_v30, 20.0 }
 0x180   : > { %v2509_v37 = vpop.eup %2508  ;;  %v1809_v39 = vmul.f32 %v2507_v32, %v3189_v9  ;;  %v3248_v40 = vmul.f32 %v2503_v15, %v1688_v24  ;;  %2526 = vpow2.f32 %v1640_v18  ;;  %v3252_v42 = vpop.f32.mrb[20].mxu0  ;;  %v1644_v13 = vmul.f32 1.442695, %v1598_v44 }
 0x181   : > { %v2511_v26 = vpop.eup %2510  ;;  %v1872_v3 = vmul.f32 %v1808_v33, %v3135_v56  ;;  %v1810_v28 = vmul.f32 %v2509_v37, %v3193_v16  ;;  %2528 = vpow2.f32 %v1642_v29  ;;  %v3257_v45 = vpop.f32.mrb[21].mxu1  ;;  %v3302_v33 = vadd.f32 %v3130_v47, %v1523_v52 }
 0x182   : > { %v3259_v9 = vpop.f32.mrb[21].mxu0  ;;  %v2513_v46 = vpop.eup %2512  ;;  %v1873_v49 = vmul.f32 %v1809_v39, %v3139_v58  ;;  %v1811_v50 = vmul.f32 %v2511_v26, %v3196_v23  ;;  %v1752_v51 = vadd.f32 2.0, %v3248_v40  ;;  %vm1852_vm12 = vcmp.gt.f32.partialorder %v3211_v57, 20.0 }
 0x183   : > { %v3266_v16 = vpop.f32.mrb[22].mxu1  ;;  %v3268_v55 = vpop.f32.mrb[22].mxu0  ;;  %v1904_v7 = vsel %vm1840_vm0, %v3135_v56, %v1872_v3  ;;  %v1874_v10 = vmul.f32 %v1810_v28, %v3144_v61  ;;  %v1689_v23 = vadd.f32 2.0, %v2513_v46  ;;  %v1460_v3 = vadd.f32 %v3215_v62, %v3213_v60 }
 0x184   : > { %v2515_v0 = vpop.eup %2514  ;;  %v3275_v14 = vpop.f32.mrb[23].mxu1  ;;  %1936 = vst [vmem:[%s3280_s15] sm:$0xff] %v1904_v7  ;;  %v1905_v56 = vsel %vm1841_vm1, %v3139_v58, %v1873_v49  ;;  %v1875_v18 = vmul.f32 %v1811_v50, %v3148_v63  ;;  %2530 = vrcp.f32 %v1752_v51  ;;  %v1524_v49 = vmul.f32 %v3124_v38, %v1458_v36 }
 0x185   : > { %v3277_v15 = vpop.f32.mrb[23].mxu0  ;;  %v2517_v17 = vpop.eup %2516  ;;  %v1690_v19 = vadd.f32 2.0, %v2515_v0  ;;  %1937 = vst [vmem:[%s3280_s15 + $0x8] sm:$0xff] %v1905_v56  ;;  %v1906_v21 = vsel %vm1842_vm2, %v3144_v61, %v1874_v10  ;;  %v3292_v24 = vmul.f32 %v2513_v46, %v1689_v23  ;;  %2532 = vpow2.f32 %v1644_v13 }
 0x186   : > { %v1691_v29 = vadd.f32 2.0, %v2517_v17  ;;  %v2519_v31 = vpop.eup %2518  ;;  %1938 = vst [vmem:[%s3280_s15 + $0x10] sm:$0xff] %v1906_v21  ;;  %v1907_v58 = vsel %vm1843_vm3, %v3148_v63, %v1875_v18  ;;  %v1599_v46 = vmin.f32 %v3302_v33, 20.0  ;;  %vm1853_vm13 = vcmp.gt.f32.partialorder %v3222_v4, 20.0 }
 0x187   : > { %v3299_v32 = vmul.f32 %v2515_v0, %v1690_v19  ;;  %v2521_v37 = vpop.eup %2520  ;;  %1939 = vst [vmem:[%s3280_s15 + $0x18] sm:$0xff] %v1907_v58  ;;  %v1812_v61 = vmul.f32 %v2519_v31, %v3206_v48  ;;  %v1753_v39 = vadd.f32 2.0, %v3292_v24  ;;  %v3315_v50 = vpop.f32.mrb[24].mxu1  ;;  %vm1854_vm14 = vcmp.gt.f32.partialorder %v3244_v34, 20.0 }
 0x188   : > { %v3307_v26 = vmul.f32 %v2517_v17, %v1691_v29  ;;  %v2523_v28 = vpop.eup %2522  ;;  %v1813_v63 = vmul.f32 %v2521_v37, %v3208_v54  ;;  %v3317_v51 = vpop.f32.mrb[24].mxu0  ;;  %v1646_v23 = vmul.f32 1.442695, %v1599_v46  ;;  %vm1855_vm15 = vcmp.gt.f32.partialorder %v3302_v33, 20.0 }
 0x189   : > { %v1754_v44 = vadd.f32 2.0, %v3299_v32  ;;  %v2525_v48 = vpop.eup %2524  ;;  %v1876_v52 = vmul.f32 %v1812_v61, %v3155_v20  ;;  %v1814_v0 = vmul.f32 %v2523_v28, %v3219_v2  ;;  %2534 = vrcp.f32 %v1753_v39  ;;  %v3322_v62 = vpop.f32.mrb[25].mxu1 }
 0x18a   : > { %v1755_v60 = vadd.f32 2.0, %v3307_v26  ;;  %v3324_v54 = vpop.f32.mrb[25].mxu0  ;;  %v2527_v7 = vpop.eup %2526  ;;  %v1877_v36 = vmul.f32 %v1813_v63, %v3159_v22  ;;  %v1815_v10 = vmul.f32 %v2525_v48, %v3230_v8  ;;  %v3352_v61 = vadd.f32 %v3128_v43, %v1524_v49 }
 0x18b   : > { %2536 = vrcp.f32 %v1754_v44  ;;  %v3328_v13 = vpop.f32.mrb[26].mxu1  ;;  %v3330_v17 = vpop.f32.mrb[26].mxu0  ;;  %v1908_v56 = vsel %vm1844_vm4, %v3155_v20, %v1876_v52  ;;  %v1878_v18 = vmul.f32 %v1814_v0, %v3164_v25  ;;  %v1692_v19 = vadd.f32 2.0, %v2527_v7 }
 0x18c   : > { %v2529_v2 = vpop.eup %2528  ;;  %2538 = vrcp.f32 %v1755_v60  ;;  %v3336_v21 = vpop.f32.mrb[27].mxu1  ;;  %1940 = vst [vmem:[%s3280_s15 + $0x20] sm:$0xff] %v1908_v56  ;;  %v1909_v29 = vsel %vm1845_vm5, %v3159_v22, %v1877_v36  ;;  %v1879_v31 = vmul.f32 %v1815_v10, %v3168_v27  ;;  %v1525_v39 = vmul.f32 %v3126_v41, %v1460_v3 }
 0x18d   : > { %v3338_v8 = vpop.f32.mrb[27].mxu0  ;;  %v1693_v58 = vadd.f32 2.0, %v2529_v2  ;;  %2540 = vpow2.f32 %v1646_v23  ;;  %1941 = vst [vmem:[%s3280_s15 + $0x28] sm:$0xff] %v1909_v29  ;;  %v1910_v20 = vsel %vm1846_vm6, %v3164_v25, %v1878_v18  ;;  %v3349_v37 = vmul.f32 %v2527_v7, %v1692_v19 }
 0x18e   : > { %v2531_v28 = vpop.eup %2530  ;;  %1942 = vst [vmem:[%s3280_s15 + $0x30] sm:$0xff] %v1910_v20  ;;  %v1911_v22 = vsel %vm1847_vm7, %v3168_v27, %v1879_v31  ;;  %v1462_v44 = vadd.f32 %v3226_v6, %v3224_v5  ;;  %v1464_v25 = vadd.f32 %v3235_v12, %v3233_v11  ;;  %v1600_v48 = vmin.f32 %v3352_v61, 20.0 }
 0x18f   : > { %v3359_v63 = vmul.f32 %v2529_v2, %v1693_v58  ;;  %v2533_v46 = vpop.eup %2532  ;;  %1943 = vst [vmem:[%s3280_s15 + $0x38] sm:$0xff] %v1911_v22  ;;  %v1816_v49 = vmul.f32 %v2531_v28, %v3248_v40  ;;  %v1756_v3 = vadd.f32 2.0, %v3349_v37  ;;  %v3372_v0 = vadd.f32 %v3130_v47, %v1525_v39  ;;  %v3375_v6 = vpop.f32.mrb[28].mxu1 }
 0x190   : > { %v1694_v52 = vadd.f32 2.0, %v2533_v46  ;;  %v1526_v5 = vmul.f32 %v3124_v38, %v1462_v44  ;;  %v3377_v11 = vpop.f32.mrb[28].mxu0  ;;  %v1648_v40 = vmul.f32 1.442695, %v1600_v48  ;;  %v1527_v60 = vmul.f32 %v3126_v41, %v1464_v25  ;;  %v3381_v7 = vpop.f32.mrb[29].mxu1 }
 0x191   : > { %v1757_v27 = vadd.f32 2.0, %v3359_v63  ;;  %v1880_v12 = vmul.f32 %v1816_v49, %v3175_v53  ;;  %2542 = vrcp.f32 %v1756_v3  ;;  %v3383_v36 = vpop.f32.mrb[29].mxu0  ;;  %v1601_v23 = vmin.f32 %v3372_v0, 20.0  ;;  %v3389_v2 = vpop.f32.mrb[30].mxu1 }
 0x192   : > { %v3386_v10 = vmul.f32 %v2533_v46, %v1694_v52  ;;  %v3391_v56 = vpop.f32.mrb[30].mxu0  ;;  %v3397_v29 = vadd.f32 %v3128_v43, %v1526_v5  ;;  %v3400_v31 = vadd.f32 %v3130_v47, %v1527_v60  ;;  %v3402_v58 = vpop.f32.mrb[31].mxu1  ;;  %vm1856_vm0 = vcmp.gt.f32.partialorder %v3352_v61, 20.0 }
 0x193   : > { %2544 = vrcp.f32 %v1757_v27  ;;  %v2535_v18 = vpop.eup %2534  ;;  %v1912_v19 = vsel %vm1848_vm8, %v3175_v53, %v1880_v12  ;;  %v3404_v20 = vpop.f32.mrb[31].mxu0  ;;  %v1650_v44 = vmul.f32 1.442695, %v1601_v23  ;;  %v1468_v53 = vadd.f32 %v3252_v42, %v3250_v35 }
 0x194   : > { %2546 = vpow2.f32 %v1648_v40  ;;  %1944 = vst [vmem:[%s3280_s15 + $0x40] sm:$0xff] %v1912_v19  ;;  %v1817_v28 = vmul.f32 %v2535_v18, %v3292_v24  ;;  %v1758_v22 = vadd.f32 2.0, %v3386_v10  ;;  %v1602_v49 = vmin.f32 %v3397_v29, 20.0 }
 0x195   : > { %v2537_v39 = vpop.eup %2536  ;;  %v1603_v3 = vmin.f32 %v3400_v31, 20.0  ;;  %v1528_v40 = vmul.f32 %v3124_v38, %v1468_v53  ;;  %v1470_v23 = vadd.f32 %v3259_v9, %v3257_v45  ;;  %v1472_v19 = vadd.f32 %v3268_v55, %v3266_v16 }
 0x196   : > { %v2539_v25 = vpop.eup %2538  ;;  %v1818_v46 = vmul.f32 %v2537_v39, %v3299_v32  ;;  %v1881_v27 = vmul.f32 %v1817_v28, %v3179_v59  ;;  %2548 = vrcp.f32 %v1758_v22  ;;  %v1652_v32 = vmul.f32 1.442695, %v1602_v49 }
 0x197   : > { %v2541_v48 = vpop.eup %2540  ;;  %v1819_v24 = vmul.f32 %v2539_v25, %v3307_v26  ;;  %2550 = vpow2.f32 %v1650_v44  ;;  %v1654_v12 = vmul.f32 1.442695, %v1603_v3  ;;  %v3437_v18 = vadd.f32 %v3128_v43, %v1528_v40 }
 0x198   : > { %v1882_v35 = vmul.f32 %v1818_v46, %v3183_v1  ;;  %v1695_v42 = vadd.f32 2.0, %v2541_v48  ;;  %v1913_v52 = vsel %vm1849_vm9, %v3179_v59, %v1881_v27  ;;  %2552 = vpow2.f32 %v1652_v32 }
 0x199   : > { %v1883_v5 = vmul.f32 %v1819_v24, %v3200_v30  ;;  %1945 = vst [vmem:[%s3280_s15 + $0x48] sm:$0xff] %v1913_v52  ;;  %2554 = vpow2.f32 %v1654_v12  ;;  %v1529_v28 = vmul.f32 %v3126_v41, %v1470_v23  ;;  %v1474_v45 = vadd.f32 %v3277_v15, %v3275_v14 }
 0x19a   : > { %v1914_v26 = vsel %vm1850_vm10, %v3183_v1, %v1882_v35  ;;  %v3428_v60 = vmul.f32 %v2541_v48, %v1695_v42  ;;  %v1478_v9 = vadd.f32 %v3317_v51, %v3315_v50  ;;  %v1604_v44 = vmin.f32 %v3437_v18, 20.0 }
 0x19b   : > { %1946 = vst [vmem:[%s3280_s15 + $0x50] sm:$0xff] %v1914_v26  ;;  %v1915_v59 = vsel %vm1851_vm11, %v3200_v30, %v1883_v5  ;;  %v2543_v39 = vpop.eup %2542  ;;  %v1530_v16 = vmul.f32 %v3124_v38, %v1472_v19  ;;  %v3454_v25 = vadd.f32 %v3130_v47, %v1529_v28  ;;  %v1531_v14 = vmul.f32 %v3126_v41, %v1474_v45 }
 0x19c   : > { %1947 = vst [vmem:[%s3280_s15 + $0x58] sm:$0xff] %v1915_v59  ;;  %v1759_v1 = vadd.f32 2.0, %v3428_v60  ;;  %v1820_v22 = vmul.f32 %v2543_v39, %v3349_v37  ;;  %v1656_v51 = vmul.f32 1.442695, %v1604_v44  ;;  %v1532_v59 = vmul.f32 %v3124_v38, %v1478_v9 }
 0x19d   : > { %v2545_v30 = vpop.eup %2544  ;;  %v3459_v37 = vadd.f32 %v3128_v43, %v1530_v16  ;;  %v3465_v49 = vadd.f32 %v3130_v47, %v1531_v14  ;;  %v1480_v9 = vadd.f32 %v3324_v54, %v3322_v62  ;;  %vm1857_vm1 = vcmp.gt.f32.partialorder %v3372_v0, 20.0 }
 0x19e   : > { %v2547_v55 = vpop.eup %2546  ;;  %v1821_v53 = vmul.f32 %v2545_v30, %v3359_v63  ;;  %2556 = vrcp.f32 %v1759_v1  ;;  %v1884_v15 = vmul.f32 %v1820_v22, %v3211_v57  ;;  %v1605_v63 = vmin.f32 %v3454_v25, 20.0 }
 0x19f   : > { %v1696_v50 = vadd.f32 2.0, %v2547_v55  ;;  %2558 = vpow2.f32 %v1656_v51  ;;  %v1606_v24 = vmin.f32 %v3459_v37, 20.0  ;;  %v3486_v45 = vadd.f32 %v3128_v43, %v1532_v59 }
 0x1a0   : > { %v1885_v46 = vmul.f32 %v1821_v53, %v3222_v4  ;;  %v2549_v3 = vpop.eup %2548  ;;  %v1916_v48 = vsel %vm1852_vm12, %v3211_v57, %v1884_v15  ;;  %v1658_v52 = vmul.f32 1.442695, %v1605_v63  ;;  %v1607_v57 = vmin.f32 %v3465_v49, 20.0 }
 0x1a1   : > { %v3470_v27 = vmul.f32 %v2547_v55, %v1696_v50  ;;  %v2551_v35 = vpop.eup %2550  ;;  %1948 = vst [vmem:[%s3280_s15 + $0x60] sm:$0xff] %v1916_v48  ;;  %v1822_v32 = vmul.f32 %v2549_v3, %v3386_v10  ;;  %v1660_v40 = vmul.f32 1.442695, %v1606_v24  ;;  %v1482_v55 = vadd.f32 %v3330_v17, %v3328_v13 }
 0x1a2   : > { %v1917_v42 = vsel %vm1853_vm13, %v3222_v4, %v1885_v46  ;;  %v1697_v12 = vadd.f32 2.0, %v2551_v35  ;;  %v2553_v26 = vpop.eup %2552  ;;  %2560 = vpow2.f32 %v1658_v52  ;;  %v1662_v39 = vmul.f32 1.442695, %v1607_v57 }
 0x1a3   : > { %1949 = vst [vmem:[%s3280_s15 + $0x68] sm:$0xff] %v1917_v42  ;;  %v1760_v5 = vadd.f32 2.0, %v3470_v27  ;;  %v1886_v23 = vmul.f32 %v1822_v32, %v3244_v34  ;;  %v2555_v4 = vpop.eup %2554  ;;  %v1698_v19 = vadd.f32 2.0, %v2553_v26  ;;  %v1533_v15 = vmul.f32 %v3126_v41, %v1480_v9 }
 0x1a4   : > { %v3482_v10 = vmul.f32 %v2551_v35, %v1697_v12  ;;  %v1699_v28 = vadd.f32 2.0, %v2555_v4  ;;  %v1534_v54 = vmul.f32 %v3124_v38, %v1482_v55  ;;  %v1484_v51 = vadd.f32 %v3338_v8, %v3336_v21 }
 0x1a5   : > { %2562 = vrcp.f32 %v1760_v5  ;;  %v1918_v1 = vsel %vm1854_vm14, %v3244_v34, %v1886_v23  ;;  %v3490_v22 = vmul.f32 %v2553_v26, %v1698_v19  ;;  %v1608_v34 = vmin.f32 %v3486_v45, 20.0 }
 0x1a6   : > { %2564 = vpow2.f32 %v1660_v40  ;;  %1950 = vst [vmem:[%s3280_s15 + $0x70] sm:$0xff] %v1918_v1  ;;  %v1761_v30 = vadd.f32 2.0, %v3482_v10  ;;  %v3495_v16 = vmul.f32 %v2555_v4, %v1699_v28  ;;  %v3509_v13 = vadd.f32 %v3130_v47, %v1533_v15 }
 0x1a7   : > { %2566 = vpow2.f32 %v1662_v39  ;;  %v1762_v14 = vadd.f32 2.0, %v3490_v22  ;;  %v1664_v62 = vmul.f32 1.442695, %v1608_v34  ;;  %v1488_v17 = vadd.f32 %v3377_v11, %v3375_v6 }
 0x1a8   : > { %v2557_v44 = vpop.eup %2556  ;;  %2568 = vrcp.f32 %v1761_v30  ;;  %v1763_v50 = vadd.f32 2.0, %v3495_v16  ;;  %v3514_v3 = vadd.f32 %v3128_v43, %v1534_v54  ;;  %v1535_v48 = vmul.f32 %v3126_v41, %v1484_v51 }
 0x1a9   : > { %v1823_v53 = vmul.f32 %v2557_v44, %v3428_v60  ;;  %v2559_v46 = vpop.eup %2558  ;;  %2570 = vrcp.f32 %v1762_v14  ;;  %v1609_v8 = vmin.f32 %v3509_v13, 20.0  ;;  %v1536_v5 = vmul.f32 %v3124_v38, %v1488_v17 }
 0x1aa   : > { %2572 = vrcp.f32 %v1763_v50  ;;  %v1700_v60 = vadd.f32 2.0, %v2559_v46  ;;  %v1610_v6 = vmin.f32 %v3514_v3, 20.0  ;;  %v3527_v11 = vadd.f32 %v3130_v47, %v1535_v48 }
 0x1ab   : > { %v1887_v63 = vmul.f32 %v1823_v53, %v3302_v33  ;;  %2574 = vpow2.f32 %v1664_v62  ;;  %v1666_v52 = vmul.f32 1.442695, %v1609_v8  ;;  %v3543_v30 = vadd.f32 %v3128_v43, %v1536_v5 }
 0x1ac   : > { %v2561_v24 = vpop.eup %2560  ;;  %v3523_v35 = vmul.f32 %v2559_v46, %v1700_v60  ;;  %v1668_v26 = vmul.f32 1.442695, %v1610_v6  ;;  %v1611_v23 = vmin.f32 %v3527_v11, 20.0  ;;  %vm1858_vm2 = vcmp.gt.f32.partialorder %v3397_v29, 20.0 }
 0x1ad   : > { %v1919_v21 = vsel %vm1855_vm15, %v3302_v33, %v1887_v63  ;;  %v1701_v32 = vadd.f32 2.0, %v2561_v24  ;;  %v1490_v33 = vadd.f32 %v3383_v36, %v3381_v7  ;;  %2576 = vpow2.f32 %v1666_v52 }
 0x1ae   : > { %1951 = vst [vmem:[%s3280_s15 + $0x78] sm:$0xff] %v1919_v21  ;;  %v1764_v57 = vadd.f32 2.0, %v3523_v35  ;;  %v1670_v36 = vmul.f32 1.442695, %v1611_v23  ;;  %v1612_v14 = vmin.f32 %v3543_v30, 20.0  ;;  %v1492_v63 = vadd.f32 %v3391_v56, %v3389_v2 }
 0x1af   : > { %v2563_v42 = vpop.eup %2562  ;;  %v3536_v4 = vmul.f32 %v2561_v24, %v1701_v32  ;;  %v1537_v62 = vmul.f32 %v3126_v41, %v1490_v33  ;;  %vm1859_vm3 = vcmp.gt.f32.partialorder %v3400_v31, 20.0  ;;  %v1494_v56 = vadd.f32 %v3404_v20, %v3402_v58 }
 0x1b0   : > { %v2565_v12 = vpop.eup %2564  ;;  %v1824_v40 = vmul.f32 %v2563_v42, %v3470_v27  ;;  %2578 = vrcp.f32 %v1764_v57  ;;  %v1672_v46 = vmul.f32 1.442695, %v1612_v14  ;;  %v1538_v21 = vmul.f32 %v3124_v38, %v1492_v63 }
 0x1b1   : > { %v2567_v59 = vpop.eup %2566  ;;  %v1702_v19 = vadd.f32 2.0, %v2565_v12  ;;  %v1765_v27 = vadd.f32 2.0, %v3536_v4  ;;  %2580 = vpow2.f32 %v1668_v26  ;;  %v1539_v52 = vmul.f32 %v3126_v41, %v1494_v56 }
 0x1b2   : > { %v1888_v39 = vmul.f32 %v1824_v40, %v3352_v61  ;;  %v1703_v7 = vadd.f32 2.0, %v2567_v59  ;;  %v2569_v1 = vpop.eup %2568  ;;  %2582 = vpow2.f32 %v1670_v36  ;;  %v3584_v42 = vadd.f32 %v3128_v43, %v1538_v21 }
 0x1b3   : > { %v3540_v28 = vmul.f32 %v2565_v12, %v1702_v19  ;;  %v1825_v44 = vmul.f32 %v2569_v1, %v3482_v10  ;;  %v2571_v55 = vpop.eup %2570  ;;  %2584 = vrcp.f32 %v1765_v27  ;;  %vm1860_vm4 = vcmp.gt.f32.partialorder %v3437_v18, 20.0 }
 0x1b4   : > { %v1920_v9 = vsel %vm1856_vm0, %v3352_v61, %v1888_v39  ;;  %v3549_v34 = vmul.f32 %v2567_v59, %v1703_v7  ;;  %v2573_v15 = vpop.eup %2572  ;;  %v1826_v61 = vmul.f32 %v2571_v55, %v3490_v22  ;;  %v3593_v40 = vadd.f32 %v3130_v47, %v1539_v52 }
 0x1b5   : > { %1952 = vst [vmem:[%s3280_s15 + $0x80] sm:$0xff] %v1920_v9  ;;  %v1766_v53 = vadd.f32 2.0, %v3540_v28  ;;  %v1889_v50 = vmul.f32 %v1825_v44, %v3372_v0  ;;  %v2575_v54 = vpop.eup %2574  ;;  %v1827_v51 = vmul.f32 %v2573_v15, %v3495_v16  ;;  %v3569_v16 = vadd.f32 %v3130_v47, %v1537_v62 }
 0x1b6   : > { %v1767_v10 = vadd.f32 2.0, %v3549_v34  ;;  %v1890_v60 = vmul.f32 %v1826_v61, %v3397_v29  ;;  %v1704_v22 = vadd.f32 2.0, %v2575_v54  ;;  %v1615_v39 = vmin.f32 %v3593_v40, 20.0 }
 0x1b7   : > { %2586 = vrcp.f32 %v1766_v53  ;;  %v1921_v17 = vsel %vm1857_vm1, %v3372_v0, %v1889_v50  ;;  %v1891_v48 = vmul.f32 %v1827_v51, %v3400_v31  ;;  %v2577_v8 = vpop.eup %2576  ;;  %v1613_v6 = vmin.f32 %v3569_v16, 20.0 }
 0x1b8   : > { %2588 = vrcp.f32 %v1767_v10  ;;  %1953 = vst [vmem:[%s3280_s15 + $0x88] sm:$0xff] %v1921_v17  ;;  %v1922_v2 = vsel %vm1858_vm2, %v3397_v29, %v1890_v60  ;;  %v3576_v0 = vmul.f32 %v2575_v54, %v1704_v22  ;;  %v1705_v32 = vadd.f32 2.0, %v2577_v8 }
 0x1b9   : > { %2590 = vpow2.f32 %v1672_v46  ;;  %1954 = vst [vmem:[%s3280_s15 + $0x90] sm:$0xff] %v1922_v2  ;;  %v1923_v24 = vsel %vm1859_vm3, %v3400_v31, %v1891_v48  ;;  %v1674_v58 = vmul.f32 1.442695, %v1613_v6  ;;  %v1614_v31 = vmin.f32 %v3584_v42, 20.0 }
 0x1ba   : > { %v2579_v38 = vpop.eup %2578  ;;  %1955 = vst [vmem:[%s3280_s15 + $0x98] sm:$0xff] %v1923_v24  ;;  %v1768_v29 = vadd.f32 2.0, %v3576_v0  ;;  %v1737_v12 = vmul.f32 %v2577_v8, %v1705_v32  ;;  %vm1861_vm5 = vcmp.gt.f32.partialorder %v3454_v25, 20.0  ;;  %v1678_v14 = vmul.f32 1.442695, %v1615_v39 }
 0x1bb   : > { %v2581_v5 = vpop.eup %2580  ;;  %v1828_v33 = vmul.f32 %v2579_v38, %v3523_v35  ;;  %v1676_v23 = vmul.f32 1.442695, %v1614_v31  ;;  %vm1862_vm6 = vcmp.gt.f32.partialorder %v3459_v37, 20.0  ;;  %vm1863_vm7 = vcmp.gt.f32.partialorder %v3465_v49, 20.0 }
 0x1bc   : > { %v2583_v20 = vpop.eup %2582  ;;  %2592 = vrcp.f32 %v1768_v29  ;;  %v1706_v43 = vadd.f32 2.0, %v2581_v5  ;;  %v1769_v59 = vadd.f32 2.0, %v1737_v12  ;;  %vm1864_vm8 = vcmp.gt.f32.partialorder %v3486_v45, 20.0 }
 0x1bd   : > { %v2585_v57 = vpop.eup %2584  ;;  %v1892_v26 = vmul.f32 %v1828_v33, %v3437_v18  ;;  %v1707_v41 = vadd.f32 2.0, %v2583_v20  ;;  %2594 = vpow2.f32 %v1674_v58  ;;  %vm1865_vm9 = vcmp.gt.f32.partialorder %v3509_v13, 20.0 }
 0x1be   : > { %v1829_v35 = vmul.f32 %v2585_v57, %v3536_v4  ;;  %v1738_v19 = vmul.f32 %v2581_v5, %v1706_v43  ;;  %2596 = vpow2.f32 %v1676_v23  ;;  %vm1866_vm10 = vcmp.gt.f32.partialorder %v3514_v3, 20.0 }
 0x1bf   : > { %v1924_v36 = vsel %vm1860_vm4, %v3437_v18, %v1892_v26  ;;  %v1739_v1 = vmul.f32 %v2583_v20, %v1707_v41  ;;  %2598 = vrcp.f32 %v1769_v59  ;;  %vm1867_vm11 = vcmp.gt.f32.partialorder %v3527_v11, 20.0 }
 0x1c0   : > { %1956 = vst [vmem:[%s3280_s15 + $0xa0] sm:$0xff] %v1924_v36  ;;  %v1893_v27 = vmul.f32 %v1829_v35, %v3454_v25  ;;  %v1770_v4 = vadd.f32 2.0, %v1738_v19  ;;  %vm1868_vm12 = vcmp.gt.f32.partialorder %v3543_v30, 20.0  ;;  %vm1869_vm13 = vcmp.gt.f32.partialorder %v3569_v16, 20.0 }
 0x1c1   : > { %v2587_v7 = vpop.eup %2586  ;;  %v1771_v53 = vadd.f32 2.0, %v1739_v1  ;;  %vm1870_vm14 = vcmp.gt.f32.partialorder %v3584_v42, 20.0  ;;  %vm1871_vm15 = vcmp.gt.f32.partialorder %v3593_v40, 20.0 }
 0x1c2   : > { %v2589_v47 = vpop.eup %2588  ;;  %v1830_v9 = vmul.f32 %v2587_v7, %v3540_v28  ;;  %v1925_v18 = vsel %vm1861_vm5, %v3454_v25, %v1893_v27  ;;  %2600 = vrcp.f32 %v1770_v4 }
 0x1c3   : > { %v2591_v44 = vpop.eup %2590  ;;  %v1831_v55 = vmul.f32 %v2589_v47, %v3549_v34  ;;  %1957 = vst [vmem:[%s3280_s15 + $0xa8] sm:$0xff] %v1925_v18  ;;  %2602 = vrcp.f32 %v1771_v53 }
 0x1c4   : > { %v1894_v15 = vmul.f32 %v1830_v9, %v3459_v37  ;;  %v1708_v50 = vadd.f32 2.0, %v2591_v44  ;;  %2604 = vpow2.f32 %v1678_v14 }
 0x1c5   : > { %v1895_v28 = vmul.f32 %v1831_v55, %v3465_v49 }
 0x1c6   : > { %v1926_v61 = vsel %vm1862_vm6, %v3459_v37, %v1894_v15  ;;  %v1740_v34 = vmul.f32 %v2591_v44, %v1708_v50  ;;  %v2593_v25 = vpop.eup %2592 }
 0x1c7   : > { %1958 = vst [vmem:[%s3280_s15 + $0xb0] sm:$0xff] %v1926_v61  ;;  %v1927_v10 = vsel %vm1863_vm7, %v3465_v49, %v1895_v28  ;;  %v2595_v54 = vpop.eup %2594  ;;  %v1832_v51 = vmul.f32 %v2593_v25, %v3576_v0 }
 0x1c8   : > { %1959 = vst [vmem:[%s3280_s15 + $0xb8] sm:$0xff] %v1927_v10  ;;  %v1772_v62 = vadd.f32 2.0, %v1740_v34  ;;  %v1709_v46 = vadd.f32 2.0, %v2595_v54  ;;  %v2597_v63 = vpop.eup %2596 }
 0x1c9   : > { %v1896_v17 = vmul.f32 %v1832_v51, %v3486_v45  ;;  %v2599_v37 = vpop.eup %2598  ;;  %v1710_v22 = vadd.f32 2.0, %v2597_v63 }
 0x1ca   : > { %2606 = vrcp.f32 %v1772_v62  ;;  %v1741_v60 = vmul.f32 %v2595_v54, %v1709_v46  ;;  %v1833_v49 = vmul.f32 %v2599_v37, %v1737_v12 }
 0x1cb   : > { %v1928_v48 = vsel %vm1864_vm8, %v3486_v45, %v1896_v17  ;;  %v1742_v56 = vmul.f32 %v2597_v63, %v1710_v22 }
 0x1cc   : > { %v2601_v21 = vpop.eup %2600  ;;  %1960 = vst [vmem:[%s3280_s15 + $0xc0] sm:$0xff] %v1928_v48  ;;  %v1773_v2 = vadd.f32 2.0, %v1741_v60  ;;  %v1897_v0 = vmul.f32 %v1833_v49, %v3509_v13 }
 0x1cd   : > { %v2603_v8 = vpop.eup %2602  ;;  %v1834_v24 = vmul.f32 %v2601_v21, %v1738_v19  ;;  %v1774_v29 = vadd.f32 2.0, %v1742_v56 }
 0x1ce   : > { %v2605_v6 = vpop.eup %2604  ;;  %v1835_v38 = vmul.f32 %v2603_v8, %v1739_v1  ;;  %2608 = vrcp.f32 %v1773_v2  ;;  %v1929_v45 = vsel %vm1865_vm9, %v3509_v13, %v1897_v0 }
 0x1cf   : > { %v1898_v32 = vmul.f32 %v1834_v24, %v3514_v3  ;;  %v1711_v52 = vadd.f32 2.0, %v2605_v6  ;;  %1961 = vst [vmem:[%s3280_s15 + $0xc8] sm:$0xff] %v1929_v45  ;;  %2610 = vrcp.f32 %v1774_v29 }
 0x1d0   : > { %v1899_v5 = vmul.f32 %v1835_v38, %v3527_v11 }
 0x1d1   : > { %v1930_v33 = vsel %vm1866_vm10, %v3514_v3, %v1898_v32  ;;  %v1743_v58 = vmul.f32 %v2605_v6, %v1711_v52 }
 0x1d2   : > { %1962 = vst [vmem:[%s3280_s15 + $0xd0] sm:$0xff] %v1930_v33  ;;  %v1931_v20 = vsel %vm1867_vm11, %v3527_v11, %v1899_v5 }
 0x1d3   : > { %1963 = vst [vmem:[%s3280_s15 + $0xd8] sm:$0xff] %v1931_v20  ;;  %v1775_v12 = vadd.f32 2.0, %v1743_v58 }
 0x1d4   : > { %v2607_v31 = vpop.eup %2606 }
 0x1d5   : > { %v1836_v13 = vmul.f32 %v2607_v31, %v1740_v34  ;;  %2612 = vrcp.f32 %v1775_v12 }
 0x1d7   : > { %v1900_v43 = vmul.f32 %v1836_v13, %v3543_v30 }
 0x1d8   : > { %v2609_v57 = vpop.eup %2608 }
 0x1d9   : > { %v1932_v3 = vsel %vm1868_vm12, %v3543_v30, %v1900_v43  ;;  %v1837_v26 = vmul.f32 %v2609_v57, %v1741_v60  ;;  %v2611_v41 = vpop.eup %2610 }
 0x1da   : > { %1964 = vst [vmem:[%s3280_s15 + $0xe0] sm:$0xff] %v1932_v3  ;;  %v1838_v23 = vmul.f32 %v2611_v41, %v1742_v56 }
 0x1db   : > { %v1901_v11 = vmul.f32 %v1837_v26, %v3569_v16 }
 0x1dc   : > { %v1902_v59 = vmul.f32 %v1838_v23, %v3584_v42 }
 0x1dd   : > { %v1933_v35 = vsel %vm1869_vm13, %v3569_v16, %v1901_v11 }
 0x1de   : > { %1965 = vst [vmem:[%s3280_s15 + $0xe8] sm:$0xff] %v1933_v35  ;;  %v1934_v19 = vsel %vm1870_vm14, %v3584_v42, %v1902_v59 }
 0x1df   : > { %v2613_v30 = vpop.eup %2612  ;;  %1966 = vst [vmem:[%s3280_s15 + $0xf0] sm:$0xff] %v1934_v19 }
 0x1e0   : > { %v1839_v39 = vmul.f32 %v2613_v30, %v1743_v58 }
 0x1e2   : > { %v1903_v16 = vmul.f32 %v1839_v39, %v3593_v40 }
 0x1e4   : > { %v1935_v7 = vsel %vm1871_vm15, %v3593_v40, %v1903_v16 }
 0x1e5   : > { %1967 = vst [vmem:[%s3280_s15 + $0xf8] sm:$0xff] %v1935_v7 }
 0x1e6   : > { %2627 = shalt.err (!%p2624_p8)
}
 0x1e7   : > { %s2628_s12 = scalar_lea.hbm %s3650_s19, 4096  ;;  %s2632_s14 = scalar_lea.hbm %s3713_s6, 8192 }
 0x1e8   : > { %p2629_p11 = scmp.ne.s32.totalorder %s3650_s19, %s2628_s12  ;;  %p2633_p0 = scmp.lt.u32.totalorder %s3650_s19, %s3713_s6 }
 0x1e9   : > { %p2634_p1 = scmp.lt.u32.totalorder %s2632_s14, %s2628_s12  ;;  %p2636_p3 = scmp.lt.u32.totalorder %s2628_s12, %s3650_s19 }
 0x1ea   : > { %p2630_p12 = pnand %p2629_p11, %p2776_p5 }
 0x1eb   : > { %p2635_p2 = por %p2634_p1, %p2633_p0 }
 0x1ec   : > { %p2631_p13 = pneg %p2630_p12 }
 0x1ed   : > { %p2637_p4 = por %p2636_p3, %p2635_p2 }
 0x1ef   : > { %p2638_p6 = pnand %p2637_p4, %p2631_p13 }
 0x1f1   : > { %2641 = shalt.err (!%p2638_p6)
}
 0x1f2   : > { %s2695_s17 = smov 256   ;;  %s2696_s18 = smov 512  }
 0x1f3   : > { %s2697_s20 = smov 16  }
 0x1f4   : > { %2284 = dma.vmem_to_hbm [thread:$0]  (%p2776_p5), %s3653_s16, 4096, %s3650_s19, %s3660_s24, %s2695_s17, %s2696_s18, %s2697_s20  }
 0x1f5 PF: > { %s2000_s27 = sand.u32 1, %s2672_s21   ;;  %p2287_p7 = pnand %p2135_p10, %p2787_p9 }
 0x1f6   : > { %s2001_s28 = scalar_lea.sflag [#allocation5], %s2000_s27 }
 0x1f7   : > { %2667 = dma.done.wait (!%p2287_p7), %s2001_s28, 4096  }
 0x1f8   : > { %2669 = vsyncadd (!%p2287_p7), %s2001_s28, 4294963200  ;;  %s19_s26 = sadd.s32 1, %s2692_s26   ;;  %s3717_s21 = smov %s2676_s22 }
 0x1f9   : > { %p16_p8 = scmp.ge.s32.totalorder %s19_s26, 4   ;;  %s3718_s22 = smov %s2680_s23 }
 0x1fa   : > { %s3719_s23 = smov %s2785_s10  ;;  %s3720_s24 = smov %s2688_s25 }
 0x1fb   : > { %s3721_s25 = smov %s3723_s29  ;;  %18 = sbr.rel (!%p16_p8) target bundleno = 4 (0x4), region = 180 }
 0x202   :  { %2006 = vsyncpa [#allocation5], 1 }
 0x203   :  { %2008 = vsyncpa [#allocation5 + $0x1], 1 }

// kernel: downsample4_forward.16
= control target key start
LH: loop header
LB: loop body
LE: loop exit
PB: predicated region body
PF: predicated region fallthrough
CT: control target
= control target key end

     0   :  { %s6156_s24 = smov 0   ;;  %s7851_s0 = inlined_call_operand.vmem [shape: bf16[2,8,8,256], index: 0, kind: input, shape index: {}]   ;;  %s7852_s1 = inlined_call_operand.vmem [shape: bf16[256,256], index: 1, kind: input, shape index: {}]   ;;  %s7853_s2 = inlined_call_operand.vmem [shape: f32[1,256], index: 2, kind: input, shape index: {}]   ;;  %s7854_s3 = inlined_call_operand.vmem [shape: f32[1,256], index: 3, kind: input, shape index: {}]   ;;  %s7855_s4 = inlined_call_operand.vmem [shape: bf16[9,256,256], index: 4, kind: input, shape index: {}]   ;;  %s7856_s5 = inlined_call_operand.vmem [shape: f32[1,256], index: 5, kind: input, shape index: {}]   ;;  %s7857_s6 = inlined_call_operand.vmem [shape: f32[1,256], index: 6, kind: input, shape index: {}]   ;;  %s7858_s7 = inlined_call_operand.vmem [shape: bf16[2,8,8,256], index: 7, kind: output, shape index: {}]  }
   0x1 LB: > { %s4732_s25 = sadd.s32 4294967295, %s6113_s24   ;;  %p4736_p0 = scmp.ge.s32.totalorder %s6113_s24, 1  ;;  %s6113_s24 = sphi %s6156_s24, %s17_s24  }
   0x2   : > { %p237_p1 = scmp.lt.s32.totalorder %s6113_s24, 3 }
   0x4   : > { %p238_p2 = pnand %p4736_p0, %p237_p1 }
   0x5   : > { %v5482_v0 = vld [vmem:[%s7852_s1 + $0x4] ss:$8 sps:$4 sm:$0xff] (!%p238_p2)   ;;  %v5484_v1 = vld [vmem:[%s7852_s1] ss:$8 sps:$4 sm:$0xff] (!%p238_p2)   ;;  %v5485_v2 = vld [vmem:[%s7852_s1 + $0x14] ss:$8 sps:$4 sm:$0xff] (!%p238_p2)  }
   0x6   : > { %241 = sbr.rel (%p238_p2) target bundleno = 921 (0x399), region = 48  ;;  %519 = vmatprep.subr.bf16.mxu0 (!%p238_p2), %v5482_v0  ;;  %v5487_v3 = vld [vmem:[%s7852_s1 + $0x10] ss:$8 sps:$4 sm:$0xff] (!%p238_p2)   ;;  %v5488_v4 = vld [vmem:[%s7852_s1 + $0x24] ss:$8 sps:$4 sm:$0xff] (!%p238_p2)   ;;  %p269_p3 = scmp.lt.s32.totalorder (!%p238_p2), %s4732_s25, 1 }
   0x7   : > { %520 = vmatpush1.bf16.msra.mxu0 (!%p238_p2), %v5484_v1  ;;  %v5490_v5 = vld [vmem:[%s7852_s1 + $0x20] ss:$8 sps:$4 sm:$0xff] (!%p238_p2)   ;;  %v5491_v6 = vld [vmem:[%s7852_s1 + $0x34] ss:$8 sps:$4 sm:$0xff] (!%p238_p2)   ;;  %v5493_v7 = vld [vmem:[%s7852_s1 + $0x30] ss:$8 sps:$4 sm:$0xff] (!%p238_p2)  }
   0x8   : > { %521 = vmatprep.subr.bf16.mxu0 (!%p238_p2), %v5485_v2  ;;  %v5494_v8 = vld [vmem:[%s7852_s1 + $0x44] ss:$8 sps:$4 sm:$0xff] (!%p238_p2)   ;;  %v5496_v9 = vld [vmem:[%s7852_s1 + $0x40] ss:$8 sps:$4 sm:$0xff] (!%p238_p2)   ;;  %v5497_v10 = vld [vmem:[%s7852_s1 + $0x54] ss:$8 sps:$4 sm:$0xff] (!%p238_p2)  }
   0x9   : > { %v5499_v11 = vld [vmem:[%s7852_s1 + $0x50] ss:$8 sps:$4 sm:$0xff] (!%p238_p2)   ;;  %v5500_v12 = vld [vmem:[%s7852_s1 + $0x64] ss:$8 sps:$4 sm:$0xff] (!%p238_p2)   ;;  %v5502_v16 = vld [vmem:[%s7852_s1 + $0x60] ss:$8 sps:$4 sm:$0xff] (!%p238_p2)  }
   0xa   : > { %v5503_v17 = vld [vmem:[%s7852_s1 + $0x74] ss:$8 sps:$4 sm:$0xff] (!%p238_p2)   ;;  %v5541_v18 = vld [vmem:[%s7855_s4 + $0x404] ss:$8 sps:$4 sm:$0xff] (!%p238_p2)   ;;  %v5543_v19 = vld [vmem:[%s7855_s4 + $0x400] ss:$8 sps:$4 sm:$0xff] (!%p238_p2)  }
   0xb   : > { %522 = vmatpush1.bf16.msra.mxu0 (!%p238_p2), %v5487_v3  ;;  %v5505_v20 = vld [vmem:[%s7852_s1 + $0x70] ss:$8 sps:$4 sm:$0xff] (!%p238_p2)   ;;  %v5506_v21 = vld [vmem:[%s7852_s1 + $0x84] ss:$8 sps:$4 sm:$0xff] (!%p238_p2)   ;;  %2691 = vmatprep.subr.bf16.mxu1 (!%p238_p2), %v5541_v18  ;;  %v5508_v22 = vld [vmem:[%s7852_s1 + $0x80] ss:$8 sps:$4 sm:$0xff] (!%p238_p2)  }
   0xc   : > { %523 = vmatprep.subr.bf16.mxu0 (!%p238_p2), %v5488_v4  ;;  %2692 = vmatpush1.bf16.msra.mxu1 (!%p238_p2), %v5543_v19  ;;  %v5509_v23 = vld [vmem:[%s7852_s1 + $0x94] ss:$8 sps:$4 sm:$0xff] (!%p238_p2)   ;;  %v5511_v24 = vld [vmem:[%s7852_s1 + $0x90] ss:$8 sps:$4 sm:$0xff] (!%p238_p2)   ;;  %v5512_v25 = vld [vmem:[%s7852_s1 + $0xa4] ss:$8 sps:$4 sm:$0xff] (!%p238_p2)  }
   0xd   : > { %s7860_s25 = smov (!%p269_p3, %s4732_s25), 1  ;;  %v5514_v26 = vld [vmem:[%s7852_s1 + $0xa0] ss:$8 sps:$4 sm:$0xff]   ;;  %v5515_v27 = vld [vmem:[%s7852_s1 + $0xb4] ss:$8 sps:$4 sm:$0xff]   ;;  %vm1065_vm0 = vcmask 1046528  }
   0xe   : > { %s5335_s23 = sshll.u32 %s7860_s25, 6  ;;  %v5517_v28 = vld [vmem:[%s7852_s1 + $0xb0] ss:$8 sps:$4 sm:$0xff]   ;;  %v5518_v29 = vld [vmem:[%s7852_s1 + $0xc4] ss:$8 sps:$4 sm:$0xff]  }
   0xf   : > { %524 = vmatpush1.bf16.msra.mxu0 %v5490_v5  ;;  %s6205_s30 = scalar_lea.vmem %s7851_s0, %s5335_s23  ;;  %v5520_v30 = vld [vmem:[%s7852_s1 + $0xc0] ss:$8 sps:$4 sm:$0xff]   ;;  %v5521_v31 = vld [vmem:[%s7852_s1 + $0xd4] ss:$8 sps:$4 sm:$0xff]   ;;  %v5523_v32 = vld [vmem:[%s7852_s1 + $0xd0] ss:$8 sps:$4 sm:$0xff]   ;;  %s7764_s9 = scalar_lea.vmem %s7858_s7, %s5335_s23 }
  0x10   : > { %525 = vmatprep.subr.bf16.mxu0 %v5491_v6  ;;  %v279_v13 = vld [vmem:[%s6205_s30] sm:$0xff]  ;;  %v280_v14 = vld [vmem:[%s6205_s30 + $0x8] sm:$0xff]  ;;  %v5527_v35 = vld [vmem:[%s7852_s1 + $0xf4] ss:$8 sps:$4 sm:$0xff]  }
  0x11   : > { %v4742_v15 = vcombine.high %v279_v13, %v280_v14  ;;  %v5524_v33 = vld [vmem:[%s7852_s1 + $0xe4] ss:$8 sps:$4 sm:$0xff]   ;;  %v5526_v34 = vld [vmem:[%s7852_s1 + $0xe0] ss:$8 sps:$4 sm:$0xff]   ;;  %v5529_v36 = vld [vmem:[%s7852_s1 + $0xf0] ss:$8 sps:$4 sm:$0xff]   ;;  %v4741_v41 = vcombine.low %v279_v13, %v280_v14 }
  0x12   : > { %v281_v37 = vld [vmem:[%s6205_s30 + $0x10] sm:$0xff]  ;;  %v282_v38 = vld [vmem:[%s6205_s30 + $0x18] sm:$0xff]  ;;  %v5540_v39 = vld [vmem:[%s7855_s4 + $0x104] ss:$8 sps:$4 sm:$0xff]  }
  0x13   : > { %526 = vmatpush1.bf16.msra.mxu0 %v5493_v7  ;;  %551 = vmatprep.mubr.bf16.mxu0 %v4742_v15  ;;  %v5538_v40 = vld [vmem:[%s7855_s4 + $0x100] ss:$8 sps:$4 sm:$0xff]   ;;  %v5546_v42 = vld [vmem:[%s7855_s4 + $0x114] ss:$8 sps:$4 sm:$0xff]   ;;  %v4744_v43 = vcombine.high %v281_v37, %v282_v38  ;;  %v5544_v44 = vld [vmem:[%s7855_s4 + $0x110] ss:$8 sps:$4 sm:$0xff]   ;;  %v4743_v47 = vcombine.low %v281_v37, %v282_v38 }
  0x14   : > { %527 = vmatprep.subr.bf16.mxu0 %v5494_v8  ;;  %v283_v45 = vld [vmem:[%s6205_s30 + $0x20] sm:$0xff]  ;;  %v284_v46 = vld [vmem:[%s6205_s30 + $0x28] sm:$0xff]  ;;  %v285_v49 = vld [vmem:[%s6205_s30 + $0x30] sm:$0xff] }
  0x15   : > { %v4746_v48 = vcombine.high %v283_v45, %v284_v46  ;;  %v286_v50 = vld [vmem:[%s6205_s30 + $0x38] sm:$0xff]  ;;  %v4745_v51 = vcombine.low %v283_v45, %v284_v46  ;;  %v5552_v56 = vld [vmem:[%s7855_s4 + $0x124] ss:$8 sps:$4 sm:$0xff]   ;;  %v5550_v57 = vld [vmem:[%s7855_s4 + $0x120] ss:$8 sps:$4 sm:$0xff]  }
  0x16   : > { %v4748_v52 = vcombine.high %v285_v49, %v286_v50  ;;  %v4747_v53 = vcombine.low %v285_v49, %v286_v50  ;;  %v5547_v54 = vld [vmem:[%s7855_s4 + $0x414] ss:$8 sps:$4 sm:$0xff]   ;;  %v5549_v55 = vld [vmem:[%s7855_s4 + $0x410] ss:$8 sps:$4 sm:$0xff]   ;;  %v5553_v58 = vld [vmem:[%s7855_s4 + $0x424] ss:$8 sps:$4 sm:$0xff]  }
  0x17   : > { %528 = vmatpush1.bf16.msra.mxu0 %v5496_v9  ;;  %2693 = vmatprep.subr.bf16.mxu1 %v5547_v54  ;;  %v5555_v59 = vld [vmem:[%s7855_s4 + $0x420] ss:$8 sps:$4 sm:$0xff]   ;;  %v5558_v60 = vld [vmem:[%s7855_s4 + $0x134] ss:$8 sps:$4 sm:$0xff]   ;;  %v5556_v61 = vld [vmem:[%s7855_s4 + $0x130] ss:$8 sps:$4 sm:$0xff]  }
  0x18   : > { %529 = vmatprep.subr.bf16.mxu0 %v5497_v10  ;;  %2694 = vmatpush1.bf16.msra.mxu1 %v5549_v55  ;;  %v5559_v62 = vld [vmem:[%s7855_s4 + $0x434] ss:$8 sps:$4 sm:$0xff]   ;;  %v5561_v63 = vld [vmem:[%s7855_s4 + $0x430] ss:$8 sps:$4 sm:$0xff]   ;;  %v5564_v0 = vld [vmem:[%s7855_s4 + $0x144] ss:$8 sps:$4 sm:$0xff]  }
  0x19   : > { %2695 = vmatprep.subr.bf16.mxu1 %v5553_v58  ;;  %v5562_v1 = vld [vmem:[%s7855_s4 + $0x140] ss:$8 sps:$4 sm:$0xff]   ;;  %v5565_v2 = vld [vmem:[%s7855_s4 + $0x444] ss:$8 sps:$4 sm:$0xff]   ;;  %v5570_v4 = vld [vmem:[%s7855_s4 + $0x154] ss:$8 sps:$4 sm:$0xff]  }
  0x1a   : > { %v5567_v3 = vld [vmem:[%s7855_s4 + $0x440] ss:$8 sps:$4 sm:$0xff]   ;;  %v5568_v5 = vld [vmem:[%s7855_s4 + $0x150] ss:$8 sps:$4 sm:$0xff]   ;;  %v5571_v6 = vld [vmem:[%s7855_s4 + $0x454] ss:$8 sps:$4 sm:$0xff]  }
  0x1b   : > { %530 = vmatpush1.bf16.msra.mxu0 %v5499_v11  ;;  %v5573_v7 = vld [vmem:[%s7855_s4 + $0x450] ss:$8 sps:$4 sm:$0xff]   ;;  %v5576_v8 = vld [vmem:[%s7855_s4 + $0x164] ss:$8 sps:$4 sm:$0xff]   ;;  %v5574_v9 = vld [vmem:[%s7855_s4 + $0x160] ss:$8 sps:$4 sm:$0xff]  }
  0x1c   : > { %531 = vmatprep.subr.bf16.mxu0 %v5500_v12  ;;  %2696 = vmatpush1.bf16.msra.mxu1 %v5555_v59  ;;  %v5577_v10 = vld [vmem:[%s7855_s4 + $0x464] ss:$8 sps:$4 sm:$0xff]   ;;  %v5579_v11 = vld [vmem:[%s7855_s4 + $0x460] ss:$8 sps:$4 sm:$0xff]   ;;  %v5582_v12 = vld [vmem:[%s7855_s4 + $0x174] ss:$8 sps:$4 sm:$0xff]  }
  0x1d   : > { %2697 = vmatprep.subr.bf16.mxu1 %v5559_v62  ;;  %v5580_v13 = vld [vmem:[%s7855_s4 + $0x170] ss:$8 sps:$4 sm:$0xff]   ;;  %v5583_v14 = vld [vmem:[%s7855_s4 + $0x474] ss:$8 sps:$4 sm:$0xff]   ;;  %v5589_v18 = vld [vmem:[%s7855_s4 + $0x484] ss:$8 sps:$4 sm:$0xff]  }
  0x1e   : > { %v5585_v15 = vld [vmem:[%s7855_s4 + $0x470] ss:$8 sps:$4 sm:$0xff]   ;;  %v5591_v19 = vld [vmem:[%s7855_s4 + $0x480] ss:$8 sps:$4 sm:$0xff]   ;;  %v5618_v37 = vld [vmem:[%s7855_s4 + $0x1d4] ss:$8 sps:$4 sm:$0xff]  }
  0x1f   : > { %532 = vmatpush1.bf16.msra.mxu0 %v5502_v16  ;;  %v5588_v16 = vld [vmem:[%s7855_s4 + $0x184] ss:$8 sps:$4 sm:$0xff]   ;;  %v5616_v38 = vld [vmem:[%s7855_s4 + $0x1d0] ss:$8 sps:$4 sm:$0xff]   ;;  %v5630_v45 = vld [vmem:[%s7855_s4 + $0x1f4] ss:$8 sps:$4 sm:$0xff]  }
  0x20   : > { %533 = vmatprep.subr.bf16.mxu0 %v5503_v17  ;;  %2698 = vmatpush1.bf16.msra.mxu1 %v5561_v63  ;;  %v5586_v17 = vld [vmem:[%s7855_s4 + $0x180] ss:$8 sps:$4 sm:$0xff]   ;;  %v5628_v46 = vld [vmem:[%s7855_s4 + $0x1f0] ss:$8 sps:$4 sm:$0xff]   ;;  %v5636_v49 = vld [vmem:[%s7855_s4 + $0x4] ss:$8 sps:$4 sm:$0xff]  }
  0x21   : > { %2699 = vmatprep.subr.bf16.mxu1 %v5565_v2  ;;  %v5639_v50 = vld [vmem:[%s7855_s4 + $0x504] ss:$8 sps:$4 sm:$0xff]   ;;  %v592_v54 = vld [vmem:[%s7853_s2] sm:$0x3] }
  0x23   : > { %534 = vmatpush1.bf16.msra.mxu0 %v5505_v20  ;;  %v5594_v20 = vld [vmem:[%s7855_s4 + $0x194] ss:$8 sps:$4 sm:$0xff]  }
  0x24   : > { %535 = vmatprep.subr.bf16.mxu0 %v5506_v21  ;;  %2700 = vmatpush1.bf16.msra.mxu1 %v5567_v3  ;;  %v5592_v21 = vld [vmem:[%s7855_s4 + $0x190] ss:$8 sps:$4 sm:$0xff]  }
  0x25   : > { %2701 = vmatprep.subr.bf16.mxu1 %v5571_v6 }
  0x27   : > { %536 = vmatpush1.bf16.msra.mxu0 %v5508_v22  ;;  %v5595_v22 = vld [vmem:[%s7855_s4 + $0x494] ss:$8 sps:$4 sm:$0xff]  }
  0x28   : > { %537 = vmatprep.subr.bf16.mxu0 %v5509_v23  ;;  %2702 = vmatpush1.bf16.msra.mxu1 %v5573_v7  ;;  %v5597_v23 = vld [vmem:[%s7855_s4 + $0x490] ss:$8 sps:$4 sm:$0xff]  }
  0x29   : > { %2703 = vmatprep.subr.bf16.mxu1 %v5577_v10 }
  0x2b   : > { %538 = vmatpush1.bf16.msra.mxu0 %v5511_v24  ;;  %v5600_v24 = vld [vmem:[%s7855_s4 + $0x1a4] ss:$8 sps:$4 sm:$0xff]  }
  0x2c   : > { %539 = vmatprep.subr.bf16.mxu0 %v5512_v25  ;;  %2704 = vmatpush1.bf16.msra.mxu1 %v5579_v11  ;;  %v5598_v25 = vld [vmem:[%s7855_s4 + $0x1a0] ss:$8 sps:$4 sm:$0xff]  }
  0x2d   : > { %2705 = vmatprep.subr.bf16.mxu1 %v5583_v14 }
  0x2f   : > { %540 = vmatpush1.bf16.msra.mxu0 %v5514_v26  ;;  %v6115_v26 = vmov 0.0  }
  0x30   : > { %541 = vmatprep.subr.bf16.mxu0 %v5515_v27  ;;  %2706 = vmatpush1.bf16.msra.mxu1 %v5585_v15  ;;  %828 = vst [vmem:[#allocation2 + $0x20] sm:$0xff] %v6115_v26  ;;  %830 = vst [vmem:[#allocation2 + $0x30] sm:$0x3] %v6115_v26  ;;  %v5601_v27 = vld [vmem:[%s7855_s4 + $0x4a4] ss:$8 sps:$4 sm:$0xff]  }
  0x31   : > { %2707 = vmatprep.subr.bf16.mxu1 %v5589_v18  ;;  %824 = vst [vmem:[#allocation2] sm:$0xff] %v6115_v26  ;;  %825 = vst [vmem:[#allocation2 + $0x8] sm:$0xff] %v6115_v26 }
  0x32   : > { %826 = vst [vmem:[#allocation2 + $0x10] sm:$0x3] %v6115_v26  ;;  %827 = vst [vmem:[#allocation2 + $0x18] sm:$0x3] %v6115_v26 }
  0x33   : > { %542 = vmatpush1.bf16.msra.mxu0 %v5517_v28  ;;  %829 = vst [vmem:[#allocation2 + $0x28] sm:$0xff] %v6115_v26  ;;  %831 = vst [vmem:[#allocation2 + $0x38] sm:$0x3] %v6115_v26  ;;  %v5603_v28 = vld [vmem:[%s7855_s4 + $0x4a0] ss:$8 sps:$4 sm:$0xff]  }
  0x34   : > { %543 = vmatprep.subr.bf16.mxu0 %v5518_v29  ;;  %2708 = vmatpush1.bf16.msra.mxu1 %v5591_v19  ;;  %832 = vst [vmem:[#allocation2 + $0x40] sm:$0xff] %v6115_v26  ;;  %833 = vst [vmem:[#allocation2 + $0x48] sm:$0xff] %v6115_v26  ;;  %v5606_v29 = vld [vmem:[%s7855_s4 + $0x1b4] ss:$8 sps:$4 sm:$0xff]  }
  0x35   : > { %2709 = vmatprep.subr.bf16.mxu1 %v5595_v22  ;;  %834 = vst [vmem:[#allocation2 + $0x50] sm:$0x3] %v6115_v26  ;;  %835 = vst [vmem:[#allocation2 + $0x58] sm:$0x3] %v6115_v26 }
  0x36   : > { %836 = vst [vmem:[#allocation2 + $0x60] sm:$0xff] %v6115_v26  ;;  %837 = vst [vmem:[#allocation2 + $0x68] sm:$0xff] %v6115_v26 }
  0x37   : > { %544 = vmatpush1.bf16.msra.mxu0 %v5520_v30  ;;  %838 = vst [vmem:[#allocation2 + $0x70] sm:$0x3] %v6115_v26  ;;  %839 = vst [vmem:[#allocation2 + $0x78] sm:$0x3] %v6115_v26  ;;  %v5604_v30 = vld [vmem:[%s7855_s4 + $0x1b0] ss:$8 sps:$4 sm:$0xff]  }
  0x38   : > { %545 = vmatprep.subr.bf16.mxu0 %v5521_v31  ;;  %2710 = vmatpush1.bf16.msra.mxu1 %v5597_v23  ;;  %840 = vst [vmem:[#allocation2 + $0x80] sm:$0xff] %v6115_v26  ;;  %841 = vst [vmem:[#allocation2 + $0x88] sm:$0xff] %v6115_v26  ;;  %v5607_v31 = vld [vmem:[%s7855_s4 + $0x4b4] ss:$8 sps:$4 sm:$0xff]  }
  0x39   : > { %842 = vst [vmem:[#allocation2 + $0x90] sm:$0x3] %v6115_v26  ;;  %843 = vst [vmem:[#allocation2 + $0x98] sm:$0x3] %v6115_v26  ;;  %2711 = vmatprep.subr.bf16.mxu1 %v5601_v27 }
  0x3a   : > { %844 = vst [vmem:[#allocation2 + $0xa0] sm:$0xff] %v6115_v26  ;;  %845 = vst [vmem:[#allocation2 + $0xa8] sm:$0xff] %v6115_v26 }
  0x3b   : > { %546 = vmatpush1.bf16.msra.mxu0 %v5523_v32  ;;  %846 = vst [vmem:[#allocation2 + $0xb0] sm:$0x3] %v6115_v26  ;;  %847 = vst [vmem:[#allocation2 + $0xb8] sm:$0x3] %v6115_v26  ;;  %v5609_v32 = vld [vmem:[%s7855_s4 + $0x4b0] ss:$8 sps:$4 sm:$0xff]  }
  0x3c   : > { %547 = vmatprep.subr.bf16.mxu0 %v5524_v33  ;;  %848 = vst [vmem:[#allocation2 + $0xc0] sm:$0xff] %v6115_v26  ;;  %849 = vst [vmem:[#allocation2 + $0xc8] sm:$0xff] %v6115_v26  ;;  %2712 = vmatpush1.bf16.msra.mxu1 %v5603_v28  ;;  %v5612_v33 = vld [vmem:[%s7855_s4 + $0x1c4] ss:$8 sps:$4 sm:$0xff]  }
  0x3d   : > { %850 = vst [vmem:[#allocation2 + $0xd0] sm:$0x3] %v6115_v26  ;;  %851 = vst [vmem:[#allocation2 + $0xd8] sm:$0x3] %v6115_v26  ;;  %2713 = vmatprep.subr.bf16.mxu1 %v5607_v31 }
  0x3e   : > { %852 = vst [vmem:[#allocation2 + $0xe0] sm:$0xff] %v6115_v26  ;;  %853 = vst [vmem:[#allocation2 + $0xe8] sm:$0xff] %v6115_v26 }
  0x3f   : > { %548 = vmatpush1.bf16.msra.mxu0 %v5526_v34  ;;  %854 = vst [vmem:[#allocation2 + $0xf0] sm:$0x3] %v6115_v26  ;;  %855 = vst [vmem:[#allocation2 + $0xf8] sm:$0x3] %v6115_v26  ;;  %v5610_v34 = vld [vmem:[%s7855_s4 + $0x1c0] ss:$8 sps:$4 sm:$0xff]  }
  0x40   : > { %549 = vmatprep.subr.bf16.mxu0 %v5527_v35  ;;  %856 = vst [vmem:[#allocation2 + $0x100] sm:$0xff] %v6115_v26  ;;  %857 = vst [vmem:[#allocation2 + $0x108] sm:$0xff] %v6115_v26  ;;  %2714 = vmatpush1.bf16.msra.mxu1 %v5609_v32  ;;  %v5613_v35 = vld [vmem:[%s7855_s4 + $0x4c4] ss:$8 sps:$4 sm:$0xff]  }
  0x41   : > { %858 = vst [vmem:[#allocation2 + $0x110] sm:$0x3] %v6115_v26  ;;  %859 = vst [vmem:[#allocation2 + $0x118] sm:$0x3] %v6115_v26  ;;  %2715 = vmatprep.subr.bf16.mxu1 %v5613_v35 }
  0x42   : > { %860 = vst [vmem:[#allocation2 + $0x120] sm:$0xff] %v6115_v26  ;;  %861 = vst [vmem:[#allocation2 + $0x128] sm:$0xff] %v6115_v26 }
  0x43   : > { %550 = vmatpush1.bf16.msra.mxu0 %v5529_v36  ;;  %862 = vst [vmem:[#allocation2 + $0x130] sm:$0x3] %v6115_v26  ;;  %863 = vst [vmem:[#allocation2 + $0x138] sm:$0x3] %v6115_v26  ;;  %v5615_v36 = vld [vmem:[%s7855_s4 + $0x4c0] ss:$8 sps:$4 sm:$0xff]  }
  0x44   : > { %1331 = vmatprep.subr.bf16.mxu0 %v5540_v39  ;;  %2716 = vmatpush1.bf16.msra.mxu1 %v5615_v36  ;;  %v5619_v39 = vld [vmem:[%s7855_s4 + $0x4d4] ss:$8 sps:$4 sm:$0xff]   ;;  %v1002_v36 = vld [vmem:[#allocation2 + $0x8] sm:$0xfe] }
  0x45   : > { %2717 = vmatprep.subr.bf16.mxu1 %v5619_v39 }
  0x46   : > { %552 = vmatmul.mubr.bf16.vlgmr.msra.gmra.mrb[0].mxu0 %v4741_v41  ;;  %v5624_v41 = vld [vmem:[%s7855_s4 + $0x1e4] ss:$8 sps:$4 sm:$0xff]  }
  0x47   : > { %561 = vmatprep.mubr.bf16.mxu0 %v4744_v43  ;;  %1332 = vmatpush1.bf16.msra.mxu0 %v5538_v40  ;;  %v5621_v40 = vld [vmem:[%s7855_s4 + $0x4d0] ss:$8 sps:$4 sm:$0xff]   ;;  %v5625_v43 = vld [vmem:[%s7855_s4 + $0x4e4] ss:$8 sps:$4 sm:$0xff]  }
  0x48   : > { %1333 = vmatprep.subr.bf16.mxu0 %v5546_v42  ;;  %2718 = vmatpush1.bf16.msra.mxu1 %v5621_v40  ;;  %v5622_v42 = vld [vmem:[%s7855_s4 + $0x1e0] ss:$8 sps:$4 sm:$0xff]   ;;  %v1004_v40 = vld [vmem:[#allocation2 + $0x18] sm:$0x1] }
  0x49   : > { %2719 = vmatprep.subr.bf16.mxu1 %v5625_v43 }
  0x4b   : > { %1334 = vmatpush1.bf16.msra.mxu0 %v5544_v44  ;;  %v5627_v44 = vld [vmem:[%s7855_s4 + $0x4e0] ss:$8 sps:$4 sm:$0xff]  }
  0x4c   : > { %1335 = vmatprep.subr.bf16.mxu0 %v5552_v56  ;;  %2720 = vmatpush1.bf16.msra.mxu1 %v5627_v44  ;;  %v620_v56 = vld [vmem:[%s7854_s3] sm:$0x3] }
  0x4d   : > { %v6540_v44 = vld [vmem:[#allocation2] sm:$0xfe] }
  0x4e   : > { %562 = vmatmul.mubr.bf16.gmra.mrb[4].mxu0 %v4743_v47  ;;  %v5631_v47 = vld [vmem:[%s7855_s4 + $0x4f4] ss:$8 sps:$4 sm:$0xff]  }
  0x4f   : > { %571 = vmatprep.mubr.bf16.mxu0 %v4746_v48  ;;  %1336 = vmatpush1.bf16.msra.mxu0 %v5550_v57  ;;  %v5633_v48 = vld [vmem:[%s7855_s4 + $0x4f0] ss:$8 sps:$4 sm:$0xff]  }
  0x50   : > { %1337 = vmatprep.subr.bf16.mxu0 %v5558_v60  ;;  %2721 = vmatprep.subr.bf16.mxu1 %v5631_v47 }
  0x51   : > { %2722 = vmatpush1.bf16.msra.mxu1 %v5633_v48 }
  0x52   : > { %3109 = vmatprep.subr.bf16.mxu1 %v5639_v50 }
  0x53   : > { %1338 = vmatpush1.bf16.msra.mxu0 %v5556_v61 }
  0x54   : > { %1339 = vmatprep.subr.bf16.mxu0 %v5564_v0 }
  0x56   : > { %572 = vmatmul.mubr.bf16.gmra.mrb[8].mxu0 %v4745_v51  ;;  %v594_v51 = vlaneseq }
  0x57   : > { %581 = vmatprep.mubr.bf16.mxu0 %v4748_v52  ;;  %1340 = vmatpush1.bf16.msra.mxu0 %v5562_v1 }
  0x58   : > { %1341 = vmatprep.subr.bf16.mxu0 %v5570_v4  ;;  %v595_v52 = vshrl.u32 %v594_v51, 7 }
  0x5a   : > { %v6481_v55 = vsub.s32 1, %v595_v52 }
  0x5b   : > { %1342 = vmatpush1.bf16.msra.mxu0 %v5568_v5 }
  0x5c   : > { %1343 = vmatprep.subr.bf16.mxu0 %v5576_v8  ;;  %v6490_v58 = vrot.slane %v592_v54, %v6481_v55  ;;  %v6496_v61 = vrot.slane %v620_v56, %v6481_v55 }
  0x5e   : > { %582 = vmatmul.mubr.bf16.gmra.mrb[12].mxu0 %v4747_v53  ;;  %v6476_v53 = vsub.s32 0, %v595_v52 }
  0x5f   : > { %1344 = vmatpush1.bf16.msra.mxu0 %v5574_v9 }
  0x60   : > { %1345 = vmatprep.subr.bf16.mxu0 %v5582_v12  ;;  %v6487_v57 = vrot.slane %v592_v54, %v6476_v53  ;;  %v6493_v59 = vrot.slane %v620_v56, %v6476_v53  ;;  %v1070_v54 = vrot.slane %v1004_v40, 1 }
  0x63   : > { %1346 = vmatpush1.bf16.msra.mxu0 %v5580_v13 }
  0x64   : > { %1347 = vmatprep.subr.bf16.mxu0 %v5588_v16 }
  0x67   : > { %1348 = vmatpush1.bf16.msra.mxu0 %v5586_v17 }
  0x68   : > { %1349 = vmatprep.subr.bf16.mxu0 %v5594_v20 }
  0x6b   : > { %1350 = vmatpush1.bf16.msra.mxu0 %v5592_v21 }
  0x6c   : > { %1351 = vmatprep.subr.bf16.mxu0 %v5600_v24 }
  0x6f   : > { %1352 = vmatpush1.bf16.msra.mxu0 %v5598_v25 }
  0x70   : > { %1353 = vmatprep.subr.bf16.mxu0 %v5606_v29 }
  0x73   : > { %1354 = vmatpush1.bf16.msra.mxu0 %v5604_v30 }
  0x74   : > { %1355 = vmatprep.subr.bf16.mxu0 %v5612_v33 }
  0x77   : > { %1356 = vmatpush1.bf16.msra.mxu0 %v5610_v34 }
  0x78   : > { %1357 = vmatprep.subr.bf16.mxu0 %v5618_v37 }
  0x7b   : > { %1358 = vmatpush1.bf16.msra.mxu0 %v5616_v38 }
  0x7c   : > { %1359 = vmatprep.subr.bf16.mxu0 %v5624_v41 }
  0x7f   : > { %1360 = vmatpush1.bf16.msra.mxu0 %v5622_v42 }
  0x80   : > { %1361 = vmatprep.subr.bf16.mxu0 %v5630_v45 }
  0x83   : > { %1362 = vmatpush1.bf16.msra.mxu0 %v5628_v46 }
  0x84   : > { %1564 = vmatprep.subr.bf16.mxu0 %v5636_v49  ;;  %v1069_v49 = vrot.slane %v1002_v36, 1 }
 0x119   : > { %v553_v60 = vpop.f32.mrb[0].mxu0 }
 0x11a   : > { %v604_v62 = vmul.f32 %v6487_v57, %v553_v60  ;;  %v555_v63 = vpop.f32.mrb[1].mxu0 }
 0x11b   : > { %v605_v0 = vmul.f32 %v6490_v58, %v555_v63  ;;  %v557_v1 = vpop.f32.mrb[2].mxu0 }
 0x11c   : > { %v6501_v2 = vadd.f32 %v6493_v59, %v604_v62  ;;  %v606_v3 = vmul.f32 %v6487_v57, %v557_v1  ;;  %v559_v4 = vpop.f32.mrb[3].mxu0  ;;  %v1066_v1 = vrot.slane %v6540_v44, 1 }
 0x11d   : > { %v6505_v5 = vadd.f32 %v6496_v61, %v605_v0  ;;  %v607_v6 = vmul.f32 %v6490_v58, %v559_v4  ;;  %v6553_v0 = vld [vmem:[#allocation2 + $0x10] sm:$0x1] }
 0x11e   : > { %v648_v7 = vmin.f32 %v6501_v2, 20.0  ;;  %v6510_v8 = vadd.f32 %v6493_v59, %v606_v3  ;;  %vm776_vm1 = vcmp.gt.f32.partialorder %v6501_v2, 20.0 }
 0x11f   : > { %v649_v9 = vmin.f32 %v6505_v5, 20.0  ;;  %v6514_v10 = vadd.f32 %v6496_v61, %v607_v6  ;;  %vm777_vm2 = vcmp.gt.f32.partialorder %v6505_v5, 20.0 }
 0x120   : > { %v664_v11 = vmul.f32 1.442695, %v648_v7  ;;  %v650_v12 = vmin.f32 %v6510_v8, 20.0  ;;  %vm778_vm3 = vcmp.gt.f32.partialorder %v6510_v8, 20.0 }
 0x121   : > { %v666_v13 = vmul.f32 1.442695, %v649_v9  ;;  %v651_v14 = vmin.f32 %v6514_v10, 20.0  ;;  %v563_v15 = vpop.f32.mrb[4].mxu0  ;;  %vm779_vm4 = vcmp.gt.f32.partialorder %v6514_v10, 20.0 }
 0x122   : > { %5970 = vpow2.f32 %v664_v11  ;;  %v668_v16 = vmul.f32 1.442695, %v650_v12  ;;  %v608_v17 = vmul.f32 %v6487_v57, %v563_v15  ;;  %v565_v18 = vpop.f32.mrb[5].mxu0 }
 0x123   : > { %5972 = vpow2.f32 %v666_v13  ;;  %v670_v19 = vmul.f32 1.442695, %v651_v14  ;;  %v609_v20 = vmul.f32 %v6490_v58, %v565_v18  ;;  %v567_v21 = vpop.f32.mrb[6].mxu0  ;;  %v6567_v18 = vsel %vm1065_vm0, %v1069_v49, %v1070_v54 }
 0x124   : > { %5974 = vpow2.f32 %v668_v16  ;;  %v6521_v22 = vadd.f32 %v6493_v59, %v608_v17  ;;  %v610_v23 = vmul.f32 %v6487_v57, %v567_v21  ;;  %v569_v24 = vpop.f32.mrb[7].mxu0 }
 0x125   : > { %5976 = vpow2.f32 %v670_v19  ;;  %v6525_v25 = vadd.f32 %v6496_v61, %v609_v20  ;;  %v611_v26 = vmul.f32 %v6490_v58, %v569_v24  ;;  %v1067_v19 = vrot.slane %v6553_v0, 1 }
 0x126   : > { %v652_v27 = vmin.f32 %v6521_v22, 20.0  ;;  %v6530_v28 = vadd.f32 %v6493_v59, %v610_v23  ;;  %vm780_vm5 = vcmp.gt.f32.partialorder %v6521_v22, 20.0 }
 0x127   : > { %v653_v29 = vmin.f32 %v6525_v25, 20.0  ;;  %v6534_v30 = vadd.f32 %v6496_v61, %v611_v26  ;;  %vm781_vm6 = vcmp.gt.f32.partialorder %v6525_v25, 20.0 }
 0x128   : > { %v672_v31 = vmul.f32 1.442695, %v652_v27  ;;  %v654_v32 = vmin.f32 %v6530_v28, 20.0  ;;  %vm782_vm7 = vcmp.gt.f32.partialorder %v6530_v28, 20.0 }
 0x129   : > { %v674_v33 = vmul.f32 1.442695, %v653_v29  ;;  %v655_v34 = vmin.f32 %v6534_v30, 20.0  ;;  %v573_v35 = vpop.f32.mrb[8].mxu0  ;;  %vm783_vm8 = vcmp.gt.f32.partialorder %v6534_v30, 20.0 }
 0x12a   : > { %5978 = vpow2.f32 %v672_v31  ;;  %v676_v37 = vmul.f32 1.442695, %v654_v32  ;;  %v612_v38 = vmul.f32 %v6487_v57, %v573_v35  ;;  %v575_v39 = vpop.f32.mrb[9].mxu0 }
 0x12b   : > { %5980 = vpow2.f32 %v674_v33  ;;  %v678_v41 = vmul.f32 1.442695, %v655_v34  ;;  %v613_v42 = vmul.f32 %v6490_v58, %v575_v39  ;;  %v577_v43 = vpop.f32.mrb[10].mxu0 }
 0x12c   : > { %v5971_v45 = vpop.eup %5970  ;;  %5982 = vpow2.f32 %v676_v37  ;;  %v6543_v46 = vadd.f32 %v6493_v59, %v612_v38  ;;  %v614_v47 = vmul.f32 %v6487_v57, %v577_v43  ;;  %v579_v48 = vpop.f32.mrb[11].mxu0 }
 0x12d   : > { %v5973_v50 = vpop.eup %5972  ;;  %v696_v51 = vadd.f32 2.0, %v5971_v45  ;;  %5984 = vpow2.f32 %v678_v41  ;;  %v6547_v52 = vadd.f32 %v6496_v61, %v613_v42  ;;  %v615_v9 = vmul.f32 %v6490_v58, %v579_v48 }
 0x12e   : > { %v5975_v56 = vpop.eup %5974  ;;  %v697_v60 = vadd.f32 2.0, %v5973_v50  ;;  %v656_v62 = vmin.f32 %v6543_v46, 20.0  ;;  %v6551_v63 = vadd.f32 %v6493_v59, %v614_v47  ;;  %vm784_vm9 = vcmp.gt.f32.partialorder %v6543_v46, 20.0 }
 0x12f   : > { %v5977_v3 = vpop.eup %5976  ;;  %v6556_v4 = vmul.f32 %v5971_v45, %v696_v51  ;;  %v698_v6 = vadd.f32 2.0, %v5975_v56  ;;  %v657_v7 = vmin.f32 %v6547_v52, 20.0  ;;  %v6575_v27 = vadd.f32 %v6496_v61, %v615_v9 }
 0x130   : > { %v6560_v11 = vmul.f32 %v5973_v50, %v697_v60  ;;  %v699_v12 = vadd.f32 2.0, %v5977_v3  ;;  %v680_v13 = vmul.f32 1.442695, %v656_v62  ;;  %v658_v14 = vmin.f32 %v6551_v63, 20.0 }
 0x131   : > { %v728_v15 = vadd.f32 2.0, %v6556_v4  ;;  %v6564_v16 = vmul.f32 %v5975_v56, %v698_v6  ;;  %v583_v17 = vpop.f32.mrb[12].mxu0  ;;  %v682_v23 = vmul.f32 1.442695, %v657_v7  ;;  %v659_v39 = vmin.f32 %v6575_v27, 20.0 }
 0x132   : > { %v729_v20 = vadd.f32 2.0, %v6560_v11  ;;  %v6571_v21 = vmul.f32 %v5977_v3, %v699_v12  ;;  %5986 = vpow2.f32 %v680_v13  ;;  %v585_v24 = vpop.f32.mrb[13].mxu0  ;;  %v616_v29 = vmul.f32 %v6487_v57, %v583_v17 }
 0x133   : > { %5988 = vrcp.f32 %v728_v15  ;;  %v730_v26 = vadd.f32 2.0, %v6564_v16  ;;  %v587_v31 = vpop.f32.mrb[14].mxu0  ;;  %v684_v34 = vmul.f32 1.442695, %v658_v14  ;;  %v617_v35 = vmul.f32 %v6490_v58, %v585_v24 }
 0x134   : > { %v5979_v32 = vpop.eup %5978  ;;  %5990 = vrcp.f32 %v729_v20  ;;  %v731_v33 = vadd.f32 2.0, %v6571_v21  ;;  %v589_v36 = vpop.f32.mrb[15].mxu0  ;;  %v618_v40 = vmul.f32 %v6487_v57, %v587_v31  ;;  %v6583_v43 = vadd.f32 %v6493_v59, %v616_v29 }
 0x135   : > { %v5981_v37 = vpop.eup %5980  ;;  %5992 = vrcp.f32 %v730_v26  ;;  %v700_v38 = vadd.f32 2.0, %v5979_v32  ;;  %v6586_v45 = vadd.f32 %v6496_v61, %v617_v35  ;;  %v686_v50 = vmul.f32 1.442695, %v659_v39 }
 0x136   : > { %v5983_v41 = vpop.eup %5982  ;;  %5994 = vrcp.f32 %v731_v33  ;;  %v701_v42 = vadd.f32 2.0, %v5981_v37  ;;  %v660_v57 = vmin.f32 %v6583_v43, 20.0  ;;  %v6604_v12 = vadd.f32 %v6493_v59, %v618_v40 }
 0x137   : > { %v5985_v47 = vpop.eup %5984  ;;  %v6588_v48 = vmul.f32 %v5979_v32, %v700_v38  ;;  %v702_v49 = vadd.f32 2.0, %v5983_v41  ;;  %5996 = vpow2.f32 %v682_v23  ;;  %v661_v6 = vmin.f32 %v6586_v45, 20.0 }
 0x138   : > { %v6590_v51 = vmul.f32 %v5981_v37, %v701_v42  ;;  %v703_v54 = vadd.f32 2.0, %v5985_v47  ;;  %5998 = vpow2.f32 %v684_v34  ;;  %v688_v9 = vmul.f32 1.442695, %v660_v57 }
 0x139   : > { %v732_v56 = vadd.f32 2.0, %v6588_v48  ;;  %v6595_v60 = vmul.f32 %v5983_v41, %v702_v49  ;;  %6000 = vpow2.f32 %v686_v50  ;;  %v690_v15 = vmul.f32 1.442695, %v661_v6 }
 0x13a   : > { %v733_v62 = vadd.f32 2.0, %v6590_v51  ;;  %v6599_v3 = vmul.f32 %v5985_v47, %v703_v54  ;;  %v619_v17 = vmul.f32 %v6490_v58, %v589_v36  ;;  %v662_v24 = vmin.f32 %v6604_v12, 20.0 }
 0x13b   : > { %6002 = vrcp.f32 %v732_v56  ;;  %v734_v7 = vadd.f32 2.0, %v6595_v60  ;;  %vm785_vm10 = vcmp.gt.f32.partialorder %v6547_v52, 20.0  ;;  %vm786_vm11 = vcmp.gt.f32.partialorder %v6551_v63, 20.0 }
 0x13c   : > { %v5987_v13 = vpop.eup %5986  ;;  %6004 = vrcp.f32 %v733_v62  ;;  %v735_v14 = vadd.f32 2.0, %v6599_v3  ;;  %v6613_v59 = vadd.f32 %v6496_v61, %v619_v17  ;;  %v692_v33 = vmul.f32 1.442695, %v662_v24 }
 0x13d   : > { %v5989_v20 = vpop.eup %5988  ;;  %6006 = vrcp.f32 %v734_v7  ;;  %v704_v23 = vadd.f32 2.0, %v5987_v13  ;;  %vm787_vm12 = vcmp.gt.f32.partialorder %v6575_v27, 20.0  ;;  %vm788_vm13 = vcmp.gt.f32.partialorder %v6583_v43, 20.0 }
 0x13e   : > { %v5991_v26 = vpop.eup %5990  ;;  %v760_v29 = vmul.f32 %v5989_v20, %v6556_v4  ;;  %6008 = vrcp.f32 %v735_v14  ;;  %v663_v4 = vmin.f32 %v6613_v59, 20.0  ;;  %vm789_vm14 = vcmp.gt.f32.partialorder %v6586_v45, 20.0 }
 0x13f   : > { %v5993_v31 = vpop.eup %5992  ;;  %v761_v32 = vmul.f32 %v5991_v26, %v6560_v11  ;;  %v6616_v58 = vmul.f32 %v5987_v13, %v704_v23  ;;  %6010 = vpow2.f32 %v688_v9  ;;  %vm790_vm15 = vcmp.gt.f32.partialorder %v6604_v12, 20.0 }
 0x140   : > { %v5995_v34 = vpop.eup %5994  ;;  %v792_v35 = vmul.f32 %v760_v29, %v6501_v2  ;;  %v762_v36 = vmul.f32 %v5993_v31, %v6564_v16  ;;  %6012 = vpow2.f32 %v690_v15  ;;  %v694_v42 = vmul.f32 1.442695, %v663_v4 }
 0x141   : > { %v5997_v37 = vpop.eup %5996  ;;  %v793_v38 = vmul.f32 %v761_v32, %v6505_v5  ;;  %v763_v61 = vmul.f32 %v5995_v34, %v6571_v21  ;;  %v736_v11 = vadd.f32 2.0, %v6616_v58  ;;  %6014 = vpow2.f32 %v692_v33 }
 0x142   : > { %v5999_v39 = vpop.eup %5998  ;;  %v808_v40 = vsel %vm776_vm1, %v6501_v2, %v792_v35  ;;  %v794_v16 = vmul.f32 %v762_v36, %v6510_v8  ;;  %v705_v41 = vadd.f32 2.0, %v5997_v37  ;;  %vm791_vm1 = vcmp.gt.f32.partialorder %v6613_v59, 20.0 }
 0x143   : > { %v6001_v47 = vpop.eup %6000  ;;  %v880_v49 = vrot.slane %v808_v40, 7  ;;  %v809_v21 = vsel %vm777_vm2, %v6505_v5, %v793_v38  ;;  %v795_v50 = vmul.f32 %v763_v61, %v6514_v10  ;;  %6016 = vrcp.f32 %v736_v11 }
 0x144   : > { %v881_v54 = vrot.slane %v809_v21, 7  ;;  %v810_v2 = vsel %vm778_vm3, %v6510_v8, %v794_v16  ;;  %v6637_v57 = vmul.f32 %v5997_v37, %v705_v41  ;;  %v706_v56 = vadd.f32 2.0, %v5999_v39 }
 0x145   : > { %v6003_v62 = vpop.eup %6002  ;;  %913 = vst [vmem:[#allocation2 + $0x20] sm:$0xfe] %v880_v49  ;;  %915 = vst [vmem:[#allocation2 + $0x30] sm:$0x1] %v880_v49  ;;  %v882_v6 = vrot.slane %v810_v2, 7  ;;  %v811_v7 = vsel %vm779_vm4, %v6514_v10, %v795_v50  ;;  %v707_v5 = vadd.f32 2.0, %v6001_v47  ;;  %6018 = vpow2.f32 %v694_v42 }
 0x146   : > { %v6005_v9 = vpop.eup %6004  ;;  %914 = vst [vmem:[#allocation2 + $0x28] sm:$0xfe] %v881_v54  ;;  %916 = vst [vmem:[#allocation2 + $0x38] sm:$0x1] %v881_v54  ;;  %v883_v13 = vrot.slane %v811_v7, 7  ;;  %v764_v14 = vmul.f32 %v6003_v62, %v6588_v48  ;;  %v737_v8 = vadd.f32 2.0, %v6637_v57  ;;  %v6644_v15 = vmul.f32 %v5999_v39, %v706_v56 }
 0x147   : > { %v6007_v17 = vpop.eup %6006  ;;  %917 = vst [vmem:[#allocation2 + $0x40] sm:$0xfe] %v882_v6  ;;  %919 = vst [vmem:[#allocation2 + $0x50] sm:$0x1] %v882_v6  ;;  %v765_v20 = vmul.f32 %v6005_v9, %v6590_v51  ;;  %v6649_v10 = vmul.f32 %v6001_v47, %v707_v5  ;;  %vm1701_vm2 = vcmask 1045504  }
 0x148   : > { %v6009_v23 = vpop.eup %6008  ;;  %918 = vst [vmem:[#allocation2 + $0x48] sm:$0xfe] %v883_v13  ;;  %920 = vst [vmem:[#allocation2 + $0x58] sm:$0x1] %v883_v13  ;;  %v796_v48 = vmul.f32 %v764_v14, %v6521_v22  ;;  %v766_v24 = vmul.f32 %v6007_v17, %v6595_v60  ;;  %6020 = vrcp.f32 %v737_v8  ;;  %v738_v26 = vadd.f32 2.0, %v6644_v15 }
 0x149   : > { %v6011_v29 = vpop.eup %6010  ;;  %v797_v31 = vmul.f32 %v765_v20, %v6525_v25  ;;  %v767_v51 = vmul.f32 %v6009_v23, %v6599_v3  ;;  %v739_v32 = vadd.f32 2.0, %v6649_v10 }
 0x14a   : > { %v6013_v33 = vpop.eup %6012  ;;  %v812_v34 = vsel %vm780_vm5, %v6521_v22, %v796_v48  ;;  %v798_v35 = vmul.f32 %v766_v24, %v6530_v28  ;;  %6022 = vrcp.f32 %v738_v26  ;;  %v708_v60 = vadd.f32 2.0, %v6011_v29  ;;  %v5634_v24 = vld [vmem:[%s7855_s4] ss:$8 sps:$4 sm:$0xff]  }
 0x14b   : > { %v6015_v36 = vpop.eup %6014  ;;  %v884_v4 = vrot.slane %v812_v34, 7  ;;  %v813_v37 = vsel %vm781_vm6, %v6525_v25, %v797_v31  ;;  %v799_v3 = vmul.f32 %v767_v51, %v6534_v30  ;;  %6024 = vrcp.f32 %v739_v32 }
 0x14c   : > { %v885_v38 = vrot.slane %v813_v37, 7  ;;  %v814_v61 = vsel %vm782_vm7, %v6530_v28, %v798_v35  ;;  %v6669_v11 = vmul.f32 %v6011_v29, %v708_v60  ;;  %v709_v22 = vadd.f32 2.0, %v6013_v33  ;;  %v1005_v39 = vld [vmem:[#allocation2 + $0x20] sm:$0xfe]  ;;  %v1007_v54 = vld [vmem:[#allocation2 + $0x30] sm:$0x1] }
 0x14d   : > { %v6017_v40 = vpop.eup %6016  ;;  %921 = vst [vmem:[#allocation2 + $0x60] sm:$0xfe] %v884_v4  ;;  %923 = vst [vmem:[#allocation2 + $0x70] sm:$0x1] %v884_v4  ;;  %v886_v16 = vrot.slane %v814_v61, 7  ;;  %v815_v25 = vsel %vm783_vm8, %v6534_v30, %v799_v3  ;;  %v710_v41 = vadd.f32 2.0, %v6015_v36  ;;  %v6679_v28 = vsel %vm1065_vm0, %v1066_v1, %v1067_v19 }
 0x14e   : > { %v1006_v42 = vld [vmem:[#allocation2 + $0x28] sm:$0xfe]  ;;  %v1008_v47 = vld [vmem:[#allocation2 + $0x38] sm:$0x1]  ;;  %922 = vst [vmem:[#allocation2 + $0x68] sm:$0xfe] %v885_v38  ;;  %v768_v21 = vmul.f32 %v6017_v40, %v6616_v58  ;;  %v6684_v30 = vmul.f32 %v6013_v33, %v709_v22 }
 0x14f   : > { %924 = vst [vmem:[#allocation2 + $0x78] sm:$0x1] %v885_v38  ;;  %v887_v49 = vrot.slane %v815_v25, 7  ;;  %v740_v50 = vadd.f32 2.0, %v6669_v11  ;;  %v2363_v2 = vld [vmem:[#allocation2 + $0x28] sm:$0xfe]  ;;  %v6019_v56 = vpop.eup %6018  ;;  %v6686_v44 = vmul.f32 %v6015_v36, %v710_v41 }
 0x150   : > { %925 = vst [vmem:[#allocation2 + $0x80] sm:$0xfe] %v886_v16  ;;  %927 = vst [vmem:[#allocation2 + $0x90] sm:$0x1] %v886_v16  ;;  %v1075_v0 = vrot.slane %v1006_v42, 1  ;;  %v1076_v1 = vrot.slane %v1008_v47, 1  ;;  %v800_v58 = vmul.f32 %v768_v21, %v6543_v46 }
 0x151   : > { %v1072_v19 = vrot.slane %v1005_v39, 1  ;;  %926 = vst [vmem:[#allocation2 + $0x88] sm:$0xfe] %v887_v49  ;;  %928 = vst [vmem:[#allocation2 + $0x98] sm:$0x1] %v887_v49  ;;  %6026 = vrcp.f32 %v740_v50  ;;  %v741_v62 = vadd.f32 2.0, %v6684_v30 }
 0x152   : > { %v711_v6 = vadd.f32 2.0, %v6019_v56  ;;  %v2365_v7 = vld [vmem:[#allocation2 + $0x38] sm:$0x1]  ;;  %v742_v5 = vadd.f32 2.0, %v6686_v44  ;;  %v1077_v9 = vsel %vm1065_vm0, %v1075_v0, %v1076_v1  ;;  %v1073_v13 = vrot.slane %v1007_v54, 1  ;;  %v6021_v17 = vpop.eup %6020 }
 0x153   : > { %v2367_v14 = vld [vmem:[#allocation2 + $0x48] sm:$0xfe]  ;;  %v2429_v8 = vrot.slane %v2363_v2, 1  ;;  %v816_v20 = vsel %vm784_vm9, %v6543_v46, %v800_v58  ;;  %6028 = vrcp.f32 %v741_v62  ;;  %v1131_v48 = vpack.c.bf16 %v1077_v9, %v6567_v18  ;;  %v2369_v26 = vld [vmem:[#allocation2 + $0x58] sm:$0x1] }
 0x154   : > { %v6697_v23 = vmul.f32 %v6019_v56, %v711_v6  ;;  %v2362_v29 = vld [vmem:[#allocation2 + $0x20] sm:$0xfe]  ;;  %v888_v31 = vrot.slane %v816_v20, 7  ;;  %v769_v51 = vmul.f32 %v6021_v17, %v6637_v57  ;;  %6030 = vrcp.f32 %v742_v5  ;;  %v2364_v33 = vld [vmem:[#allocation2 + $0x30] sm:$0x1]  ;;  %v6023_v34 = vpop.eup %6022 }
 0x155   : > { %v1074_v32 = vsel %vm1065_vm0, %v1072_v19, %v1073_v13  ;;  %v5642_v46 = vld [vmem:[%s7855_s4 + $0x14] ss:$8 sps:$4 sm:$0xff]   ;;  %1363 = vmatprep.mubr.bf16.mxu0 %v1131_v48  ;;  %v2430_v60 = vrot.slane %v2365_v7, 1  ;;  %v2435_v36 = vrot.slane %v2367_v14, 1  ;;  %v2366_v4 = vld [vmem:[#allocation2 + $0x40] sm:$0xfe]  ;;  %v6025_v37 = vpop.eup %6024  ;;  %v770_v3 = vmul.f32 %v6023_v34, %v6644_v15 }
 0x156   : > { %v743_v18 = vadd.f32 2.0, %v6697_v23  ;;  %v1130_v35 = vpack.c.bf16 %v1074_v32, %v6679_v28  ;;  %929 = vst [vmem:[#allocation2 + $0xa0] sm:$0xfe] %v888_v31  ;;  %931 = vst [vmem:[#allocation2 + $0xb0] sm:$0x1] %v888_v31  ;;  %v801_v57 = vmul.f32 %v769_v51, %v6547_v52  ;;  %v2436_v38 = vrot.slane %v2369_v26, 1 }
 0x157   : > { %v2368_v61 = vld [vmem:[#allocation2 + $0x50] sm:$0x1]  ;;  %v2426_v22 = vrot.slane %v2362_v29, 1  ;;  %v771_v40 = vmul.f32 %v6025_v37, %v6649_v10  ;;  %v2431_v16 = vsel %vm1065_vm0, %v2429_v8, %v2430_v60  ;;  %v2427_v25 = vrot.slane %v2364_v33, 1  ;;  %v1010_v41 = vld [vmem:[#allocation2 + $0x48] sm:$0xfe] }
 0x158   : > { %v5640_v39 = vld [vmem:[%s7855_s4 + $0x10] ss:$8 sps:$4 sm:$0xff]   ;;  %6032 = vrcp.f32 %v743_v18  ;;  %1364 = vmatmul.mubr.bf16.vlgmr.msra.gmra.mrb[16].mxu0 %v1130_v35  ;;  %v817_v15 = vsel %vm785_vm10, %v6547_v52, %v801_v57  ;;  %v802_v47 = vmul.f32 %v770_v3, %v6551_v63  ;;  %v2437_v28 = vsel %vm1065_vm0, %v2435_v36, %v2436_v38  ;;  %v1014_v10 = vld [vmem:[#allocation2 + $0x68] sm:$0xfe]  ;;  %v1009_v0 = vld [vmem:[#allocation2 + $0x40] sm:$0xfe] }
 0x159   : > { %v1012_v42 = vld [vmem:[#allocation2 + $0x58] sm:$0x1]  ;;  %1565 = vmatpush1.bf16.msra.mxu0 %v5634_v24  ;;  %v2432_v49 = vrot.slane %v2366_v4, 1  ;;  %v889_v50 = vrot.slane %v817_v15, 7  ;;  %v803_v54 = vmul.f32 %v771_v40, %v6575_v27  ;;  %v2491_v2 = vpack.c.bf16 %v2437_v28, %v2431_v16  ;;  %v5648_v52 = vld [vmem:[%s7855_s4 + $0x24] ss:$8 sps:$4 sm:$0xff]  }
 0x15a   : > { %v1016_v21 = vld [vmem:[#allocation2 + $0x78] sm:$0x1]  ;;  %v2428_v56 = vsel %vm1065_vm0, %v2426_v22, %v2427_v25  ;;  %1566 = vmatprep.subr.bf16.mxu0 %v5642_v46  ;;  %v818_v1 = vsel %vm786_vm11, %v6551_v63, %v802_v47  ;;  %v5637_v19 = vld [vmem:[%s7855_s4 + $0x500] ss:$8 sps:$4 sm:$0xff]   ;;  %v2433_v58 = vrot.slane %v2368_v61, 1  ;;  %v1081_v62 = vrot.slane %v1010_v41, 1 }
 0x15b   : > { %v1082_v6 = vrot.slane %v1012_v42, 1  ;;  %v1011_v7 = vld [vmem:[#allocation2 + $0x50] sm:$0x1]  ;;  %v6027_v5 = vpop.eup %6026  ;;  %930 = vst [vmem:[#allocation2 + $0xa8] sm:$0xfe] %v889_v50  ;;  %v890_v9 = vrot.slane %v818_v1, 7  ;;  %v819_v13 = vsel %vm787_vm12, %v6575_v27, %v803_v54  ;;  %2723 = vmatprep.mubr.bf16.mxu1 %v2491_v2 }
 0x15c   : > { %932 = vst [vmem:[#allocation2 + $0xb8] sm:$0x1] %v889_v50  ;;  %v5645_v63 = vld [vmem:[%s7855_s4 + $0x514] ss:$8 sps:$4 sm:$0xff]   ;;  %v1087_v14 = vrot.slane %v1014_v10, 1  ;;  %v1088_v8 = vrot.slane %v1016_v21, 1  ;;  %v772_v24 = vmul.f32 %v6027_v5, %v6669_v11  ;;  %v2434_v26 = vsel %vm1065_vm0, %v2432_v49, %v2433_v58 }
 0x15d   : > { %v5646_v17 = vld [vmem:[%s7855_s4 + $0x20] ss:$8 sps:$4 sm:$0xff]   ;;  %v891_v48 = vrot.slane %v819_v13, 7  ;;  %1567 = vmatpush1.bf16.msra.mxu0 %v5640_v39  ;;  %v1083_v27 = vsel %vm1065_vm0, %v1081_v62, %v1082_v6  ;;  %v1015_v29 = vld [vmem:[#allocation2 + $0x70] sm:$0x1]  ;;  %v6029_v51 = vpop.eup %6028  ;;  %v2490_v32 = vpack.c.bf16 %v2434_v26, %v2428_v56  ;;  %v1078_v46 = vrot.slane %v1009_v0, 1 }
 0x15e   : > { %v1013_v20 = vld [vmem:[#allocation2 + $0x60] sm:$0xfe]  ;;  %v2371_v31 = vld [vmem:[#allocation2 + $0x68] sm:$0xfe]  ;;  %933 = vst [vmem:[#allocation2 + $0xc0] sm:$0xfe] %v890_v9  ;;  %v1089_v33 = vsel %vm1065_vm0, %v1087_v14, %v1088_v8  ;;  %1568 = vmatprep.subr.bf16.mxu0 %v5648_v52  ;;  %v6031_v35 = vpop.eup %6030  ;;  %v804_v60 = vmul.f32 %v772_v24, %v6583_v43  ;;  %v773_v36 = vmul.f32 %v6029_v51, %v6684_v30 }
 0x15f   : > { %935 = vst [vmem:[#allocation2 + $0xd0] sm:$0x1] %v890_v9  ;;  %v1079_v34 = vrot.slane %v1011_v7, 1  ;;  %v2373_v18 = vld [vmem:[#allocation2 + $0x78] sm:$0x1]  ;;  %v1133_v37 = vpack.c.bf16 %v1089_v33, %v1083_v27  ;;  %v1084_v57 = vrot.slane %v1013_v20, 1  ;;  %v774_v61 = vmul.f32 %v6031_v35, %v6686_v44  ;;  %2724 = vmatmul.mubr.bf16.vlgmr.msra.gmra.mrb[0].mxu1 %v2490_v32 }
 0x160   : > { %v2375_v11 = vld [vmem:[#allocation2 + $0x88] sm:$0xfe]  ;;  %934 = vst [vmem:[#allocation2 + $0xc8] sm:$0xfe] %v891_v48  ;;  %936 = vst [vmem:[#allocation2 + $0xd8] sm:$0x1] %v891_v48  ;;  %v820_v25 = vsel %vm788_vm13, %v6583_v43, %v804_v60  ;;  %v805_v41 = vmul.f32 %v773_v36, %v6586_v45  ;;  %3110 = vmatpush1.bf16.msra.mxu1 %v5637_v19 }
 0x161   : > { %v5643_v4 = vld [vmem:[%s7855_s4 + $0x510] ss:$8 sps:$4 sm:$0xff]   ;;  %v5654_v38 = vld [vmem:[%s7855_s4 + $0x34] ss:$8 sps:$4 sm:$0xff]   ;;  %v1080_v22 = vsel %vm1065_vm0, %v1078_v46, %v1079_v34  ;;  %v1085_v39 = vrot.slane %v1015_v29, 1  ;;  %v2441_v40 = vrot.slane %v2371_v31, 1  ;;  %1373 = vmatprep.mubr.bf16.mxu0 %v1133_v37  ;;  %v806_v21 = vmul.f32 %v774_v61, %v6604_v12  ;;  %3111 = vmatprep.subr.bf16.mxu1 %v5645_v63 }
 0x162   : > { %v2377_v3 = vld [vmem:[#allocation2 + $0x98] sm:$0x1]  ;;  %v5651_v30 = vld [vmem:[%s7855_s4 + $0x524] ss:$8 sps:$4 sm:$0xff]   ;;  %v2442_v44 = vrot.slane %v2373_v18, 1  ;;  %v2447_v42 = vrot.slane %v2375_v11, 1  ;;  %v6033_v49 = vpop.eup %6032  ;;  %1569 = vmatpush1.bf16.msra.mxu0 %v5646_v17  ;;  %v821_v56 = vsel %vm789_vm14, %v6586_v45, %v805_v41 }
 0x163   : > { %v5652_v16 = vld [vmem:[%s7855_s4 + $0x30] ss:$8 sps:$4 sm:$0xff]   ;;  %v2370_v15 = vld [vmem:[#allocation2 + $0x60] sm:$0xfe]  ;;  %v892_v10 = vrot.slane %v820_v25, 7  ;;  %v1086_v50 = vsel %vm1065_vm0, %v1084_v57, %v1085_v39  ;;  %v2448_v43 = vrot.slane %v2377_v3, 1  ;;  %v775_v52 = vmul.f32 %v6033_v49, %v6697_v23  ;;  %1570 = vmatprep.subr.bf16.mxu0 %v5654_v38 }
 0x164   : > { %v2372_v47 = vld [vmem:[#allocation2 + $0x70] sm:$0x1]  ;;  %v5660_v28 = vld [vmem:[%s7855_s4 + $0x44] ss:$8 sps:$4 sm:$0xff]   ;;  %v1132_v0 = vpack.c.bf16 %v1086_v50, %v1080_v22  ;;  %v2443_v1 = vsel %vm1065_vm0, %v2441_v40, %v2442_v44  ;;  %v5649_v19 = vld [vmem:[%s7855_s4 + $0x520] ss:$8 sps:$4 sm:$0xff]   ;;  %v822_v45 = vsel %vm790_vm15, %v6604_v12, %v806_v21  ;;  %3112 = vmatpush1.bf16.msra.mxu1 %v5643_v4 }
 0x165   : > { %v2374_v54 = vld [vmem:[#allocation2 + $0x80] sm:$0xfe]  ;;  %v2376_v2 = vld [vmem:[#allocation2 + $0x90] sm:$0x1]  ;;  %v1018_v58 = vld [vmem:[#allocation2 + $0x88] sm:$0xfe]  ;;  %v2449_v23 = vsel %vm1065_vm0, %v2447_v42, %v2448_v43  ;;  %v807_v20 = vmul.f32 %v775_v52, %v6613_v59  ;;  %3113 = vmatprep.subr.bf16.mxu1 %v5651_v30 }
 0x166   : > { %v1020_v62 = vld [vmem:[#allocation2 + $0x98] sm:$0x1]  ;;  %v6783_v6 = vld [vmem:[#allocation2 + $0x80] sm:$0xfe]  ;;  %937 = vst [vmem:[#allocation2 + $0xe0] sm:$0xfe] %v892_v10  ;;  %1374 = vmatmul.mubr.bf16.gmra.mrb[20].mxu0 %v1132_v0  ;;  %v2493_v12 = vpack.c.bf16 %v2449_v23, %v2443_v1 }
 0x167   : > { %939 = vst [vmem:[#allocation2 + $0xf0] sm:$0x1] %v892_v10  ;;  %v893_v7 = vrot.slane %v821_v56, 7  ;;  %v2438_v5 = vrot.slane %v2370_v15, 1  ;;  %v5657_v9 = vld [vmem:[%s7855_s4 + $0x534] ss:$8 sps:$4 sm:$0xff]   ;;  %1571 = vmatpush1.bf16.msra.mxu0 %v5652_v16  ;;  %v823_v34 = vsel %vm791_vm1, %v6613_v59, %v807_v20 }
 0x168   : > { %v1022_v13 = vld [vmem:[#allocation2 + $0xa8] sm:$0xfe]  ;;  %v1024_v63 = vld [vmem:[#allocation2 + $0xb8] sm:$0x1]  ;;  %v1019_v8 = vld [vmem:[#allocation2 + $0x90] sm:$0x1]  ;;  %2733 = vmatprep.mubr.bf16.mxu1 %v2493_v12  ;;  %1572 = vmatprep.subr.bf16.mxu0 %v5660_v28 }
 0x169   : > { %v5658_v14 = vld [vmem:[%s7855_s4 + $0x40] ss:$8 sps:$4 sm:$0xff]   ;;  %v894_v17 = vrot.slane %v822_v45, 7  ;;  %v2439_v48 = vrot.slane %v2372_v47, 1  ;;  %v1023_v26 = vld [vmem:[#allocation2 + $0xb0] sm:$0x1]  ;;  %3114 = vmatpush1.bf16.msra.mxu1 %v5649_v19 }
 0x16a   : > { %v1021_v24 = vld [vmem:[#allocation2 + $0xa0] sm:$0xfe]  ;;  %v5666_v27 = vld [vmem:[%s7855_s4 + $0x54] ss:$8 sps:$4 sm:$0xff]   ;;  %938 = vst [vmem:[#allocation2 + $0xe8] sm:$0xfe] %v893_v7  ;;  %3115 = vmatprep.subr.bf16.mxu1 %v5657_v9 }
 0x16b   : > { %940 = vst [vmem:[#allocation2 + $0xf8] sm:$0x1] %v893_v7  ;;  %v2444_v29 = vrot.slane %v2374_v54, 1  ;;  %v2445_v31 = vrot.slane %v2376_v2, 1  ;;  %v1093_v51 = vrot.slane %v1018_v58, 1  ;;  %v1094_v32 = vrot.slane %v1020_v62, 1  ;;  %1573 = vmatpush1.bf16.msra.mxu0 %v5658_v14 }
 0x16c   : > { %v2379_v33 = vld [vmem:[#allocation2 + $0xa8] sm:$0xfe]  ;;  %v6799_v46 = vld [vmem:[#allocation2 + $0xa0] sm:$0xfe]  ;;  %941 = vst [vmem:[#allocation2 + $0x100] sm:$0xfe] %v894_v17  ;;  %v2440_v18 = vsel %vm1065_vm0, %v2438_v5, %v2439_v48  ;;  %1574 = vmatprep.subr.bf16.mxu0 %v5666_v27 }
 0x16d   : > { %943 = vst [vmem:[#allocation2 + $0x110] sm:$0x1] %v894_v17  ;;  %v5655_v11 = vld [vmem:[%s7855_s4 + $0x530] ss:$8 sps:$4 sm:$0xff]   ;;  %v1099_v35 = vrot.slane %v1022_v13, 1  ;;  %v1100_v60 = vrot.slane %v1024_v63, 1  ;;  %v2446_v3 = vsel %vm1065_vm0, %v2444_v29, %v2445_v31  ;;  %v1095_v38 = vsel %vm1065_vm0, %v1093_v51, %v1094_v32 }
 0x16e   : > { %v2381_v36 = vld [vmem:[#allocation2 + $0xb8] sm:$0x1]  ;;  %v2380_v4 = vld [vmem:[#allocation2 + $0xb0] sm:$0x1]  ;;  %v6808_v37 = vld [vmem:[#allocation2 + $0xc0] sm:$0xfe]  ;;  %v2492_v16 = vpack.c.bf16 %v2446_v3, %v2440_v18  ;;  %3116 = vmatpush1.bf16.msra.mxu1 %v5655_v11 }
 0x16f   : > { %v895_v57 = vrot.slane %v823_v34, 7  ;;  %v1090_v59 = vrot.slane %v6783_v6, 1  ;;  %v2383_v61 = vld [vmem:[#allocation2 + $0xc8] sm:$0xfe]  ;;  %v2385_v22 = vld [vmem:[#allocation2 + $0xd8] sm:$0x1]  ;;  %v1101_v25 = vsel %vm1065_vm0, %v1099_v35, %v1100_v60 }
 0x170   : > { %v5663_v39 = vld [vmem:[%s7855_s4 + $0x544] ss:$8 sps:$4 sm:$0xff]   ;;  %v2384_v40 = vld [vmem:[#allocation2 + $0xd0] sm:$0x1]  ;;  %v1091_v41 = vrot.slane %v1019_v8, 1  ;;  %v1096_v44 = vrot.slane %v1021_v24, 1  ;;  %v1135_v28 = vpack.c.bf16 %v1101_v25, %v1095_v38  ;;  %2734 = vmatmul.mubr.bf16.gmra.mrb[4].mxu1 %v2492_v16 }
 0x171   : > { %v5664_v30 = vld [vmem:[%s7855_s4 + $0x50] ss:$8 sps:$4 sm:$0xff]   ;;  %v6820_v42 = vld [vmem:[#allocation2 + $0xc8] sm:$0xfe]  ;;  %942 = vst [vmem:[#allocation2 + $0x108] sm:$0xfe] %v895_v57  ;;  %3117 = vmatprep.subr.bf16.mxu1 %v5663_v39 }
 0x172   : > { %v6822_v15 = vld [vmem:[#allocation2 + $0xd8] sm:$0x1]  ;;  %v5672_v47 = vld [vmem:[%s7855_s4 + $0x64] ss:$8 sps:$4 sm:$0xff]   ;;  %944 = vst [vmem:[#allocation2 + $0x118] sm:$0x1] %v895_v57  ;;  %v1092_v43 = vsel %vm1065_vm0, %v1090_v59, %v1091_v41  ;;  %1383 = vmatprep.mubr.bf16.mxu0 %v1135_v28  ;;  %1575 = vmatpush1.bf16.msra.mxu0 %v5664_v30 }
 0x173   : > { %v1097_v49 = vrot.slane %v1023_v26, 1  ;;  %v2453_v10 = vrot.slane %v2379_v33, 1  ;;  %v2454_v21 = vrot.slane %v2381_v36, 1  ;;  %v1025_v50 = vld [vmem:[#allocation2 + $0xc0] sm:$0xfe]  ;;  %v2459_v54 = vrot.slane %v2383_v61, 1  ;;  %1576 = vmatprep.subr.bf16.mxu0 %v5672_v47 }
 0x174   : > { %v2460_v2 = vrot.slane %v2385_v22, 1  ;;  %v5661_v56 = vld [vmem:[%s7855_s4 + $0x540] ss:$8 sps:$4 sm:$0xff]   ;;  %v2450_v52 = vrot.slane %v6799_v46, 1  ;;  %v1027_v0 = vld [vmem:[#allocation2 + $0xd0] sm:$0x1] }
 0x175   : > { %v1098_v1 = vsel %vm1065_vm0, %v1096_v44, %v1097_v49  ;;  %v2455_v19 = vsel %vm1065_vm0, %v2453_v10, %v2454_v21  ;;  %v2451_v58 = vrot.slane %v2380_v4, 1  ;;  %v2456_v62 = vrot.slane %v6808_v37, 1  ;;  %v5669_v6 = vld [vmem:[%s7855_s4 + $0x554] ss:$8 sps:$4 sm:$0xff]   ;;  %v5670_v7 = vld [vmem:[%s7855_s4 + $0x60] ss:$8 sps:$4 sm:$0xff]   ;;  %3118 = vmatpush1.bf16.msra.mxu1 %v5661_v56 }
 0x176   : > { %v1029_v45 = vld [vmem:[#allocation2 + $0xe0] sm:$0xfe]  ;;  %v1031_v23 = vld [vmem:[#allocation2 + $0xf0] sm:$0x1]  ;;  %v1134_v5 = vpack.c.bf16 %v1098_v1, %v1092_v43  ;;  %v2461_v9 = vsel %vm1065_vm0, %v2459_v54, %v2460_v2  ;;  %v2457_v13 = vrot.slane %v2384_v40, 1  ;;  %v1105_v8 = vrot.slane %v6820_v42, 1  ;;  %3119 = vmatprep.subr.bf16.mxu1 %v5669_v6  ;;  %1577 = vmatpush1.bf16.msra.mxu0 %v5670_v7 }
 0x177   : > { %v1030_v63 = vld [vmem:[#allocation2 + $0xe8] sm:$0xfe]  ;;  %v1032_v14 = vld [vmem:[#allocation2 + $0xf8] sm:$0x1]  ;;  %v5678_v17 = vld [vmem:[%s7855_s4 + $0x74] ss:$8 sps:$4 sm:$0xff]   ;;  %v2495_v20 = vpack.c.bf16 %v2461_v9, %v2455_v19  ;;  %v2452_v12 = vsel %vm1065_vm0, %v2450_v52, %v2451_v58 }
 0x178   : > { %v1106_v48 = vrot.slane %v6822_v15, 1  ;;  %v1111_v24 = vrot.slane %v1030_v63, 1  ;;  %v2387_v26 = vld [vmem:[#allocation2 + $0xe8] sm:$0xfe]  ;;  %v2389_v27 = vld [vmem:[#allocation2 + $0xf8] sm:$0x1]  ;;  %1384 = vmatmul.mubr.bf16.gmra.mrb[24].mxu0 %v1134_v5  ;;  %v2458_v31 = vsel %vm1065_vm0, %v2456_v62, %v2457_v13  ;;  %1578 = vmatprep.subr.bf16.mxu0 %v5678_v17 }
 0x179   : > { %v6848_v29 = vld [vmem:[#allocation2 + $0xe0] sm:$0xfe]  ;;  %v5667_v51 = vld [vmem:[%s7855_s4 + $0x550] ss:$8 sps:$4 sm:$0xff]   ;;  %v1112_v32 = vrot.slane %v1032_v14, 1  ;;  %v1102_v33 = vrot.slane %v1025_v50, 1  ;;  %2743 = vmatprep.mubr.bf16.mxu1 %v2495_v20  ;;  %v2494_v18 = vpack.c.bf16 %v2458_v31, %v2452_v12 }
 0x17a   : > { %v1103_v46 = vrot.slane %v1027_v0, 1  ;;  %v2388_v34 = vld [vmem:[#allocation2 + $0xf0] sm:$0x1]  ;;  %v1108_v11 = vrot.slane %v1029_v45, 1  ;;  %v1109_v35 = vrot.slane %v1031_v23, 1  ;;  %v1107_v3 = vsel %vm1065_vm0, %v1105_v8, %v1106_v48  ;;  %v948_v47 = vld [vmem:[#allocation2 + $0x28] sm:$0xff]  ;;  %3120 = vmatpush1.bf16.msra.mxu1 %v5667_v51 }
 0x17b   : > { %v5675_v60 = vld [vmem:[%s7855_s4 + $0x564] ss:$8 sps:$4 sm:$0xff]   ;;  %v2392_v4 = vld [vmem:[#allocation2 + $0x110] sm:$0x1]  ;;  %v1113_v38 = vsel %vm1065_vm0, %v1111_v24, %v1112_v32  ;;  %v2393_v22 = vld [vmem:[#allocation2 + $0x118] sm:$0x1]  ;;  %2744 = vmatmul.mubr.bf16.gmra.mrb[8].mxu1 %v2494_v18 }
 0x17c   : > { %v2390_v36 = vld [vmem:[#allocation2 + $0x100] sm:$0xfe]  ;;  %v5676_v37 = vld [vmem:[%s7855_s4 + $0x70] ss:$8 sps:$4 sm:$0xff]   ;;  %v2781_v57 = vld [vmem:[#allocation2 + $0x28] sm:$0xfc]  ;;  %v1104_v59 = vsel %vm1065_vm0, %v1102_v33, %v1103_v46  ;;  %v1137_v30 = vpack.c.bf16 %v1113_v38, %v1107_v3  ;;  %v1110_v16 = vsel %vm1065_vm0, %v1108_v11, %v1109_v35  ;;  %3121 = vmatprep.subr.bf16.mxu1 %v5675_v60 }
 0x17d   : > { %v2391_v61 = vld [vmem:[#allocation2 + $0x108] sm:$0xfe]  ;;  %v2465_v39 = vrot.slane %v2387_v26, 1  ;;  %v2466_v25 = vrot.slane %v2389_v27, 1  ;;  %v2783_v44 = vld [vmem:[#allocation2 + $0x38] sm:$0x3]  ;;  %v1136_v15 = vpack.c.bf16 %v1110_v16, %v1104_v59  ;;  %1579 = vmatpush1.bf16.msra.mxu0 %v5676_v37 }
 0x17e   : > { %v5684_v40 = vld [vmem:[%s7855_s4 + $0x84] ss:$8 sps:$4 sm:$0xff]   ;;  %v2471_v41 = vrot.slane %v2391_v61, 1  ;;  %v2472_v28 = vrot.slane %v2393_v22, 1  ;;  %v2462_v49 = vrot.slane %v6848_v29, 1  ;;  %1393 = vmatprep.mubr.bf16.mxu0 %v1137_v30  ;;  %v2463_v50 = vrot.slane %v2388_v34, 1 }
 0x17f   : > { %v2785_v42 = vld [vmem:[#allocation2 + $0x48] sm:$0xfc]  ;;  %v2787_v10 = vld [vmem:[#allocation2 + $0x58] sm:$0x3]  ;;  %v2467_v21 = vsel %vm1065_vm0, %v2465_v39, %v2466_v25  ;;  %v2468_v43 = vrot.slane %v2390_v36, 1  ;;  %v2469_v54 = vrot.slane %v2392_v4, 1  ;;  %1580 = vmatprep.subr.bf16.mxu0 %v5684_v40 }
 0x180   : > { %v2473_v2 = vsel %vm1065_vm0, %v2471_v41, %v2472_v28  ;;  %v5673_v56 = vld [vmem:[%s7855_s4 + $0x560] ss:$8 sps:$4 sm:$0xff]   ;;  %v2847_v52 = vrot.slane %v2781_v57, 2  ;;  %v2848_v0 = vrot.slane %v2783_v44, 2  ;;  %v2853_v1 = vrot.slane %v2785_v42, 2  ;;  %1394 = vmatmul.mubr.bf16.gmra.mrb[28].mxu0 %v1136_v15 }
 0x181   : > { %v6873_v19 = vld [vmem:[#allocation2] sm:$0xff]  ;;  %v2497_v62 = vpack.c.bf16 %v2473_v2, %v2467_v21  ;;  %v2470_v6 = vsel %vm1065_vm0, %v2468_v43, %v2469_v54  ;;  %v2854_v7 = vrot.slane %v2787_v10, 2  ;;  %v5681_v45 = vld [vmem:[%s7855_s4 + $0x574] ss:$8 sps:$4 sm:$0xff]   ;;  %v2464_v9 = vsel %vm1065_vm0, %v2462_v49, %v2463_v50  ;;  %3122 = vmatpush1.bf16.msra.mxu1 %v5673_v56  ;;  %v5679_v8 = vld [vmem:[%s7855_s4 + $0x570] ss:$8 sps:$4 sm:$0xff]  }
 0x182   : > { %v962_v58 = vpack.c.bf16 %v948_v47, %v6873_v19  ;;  %v5682_v23 = vld [vmem:[%s7855_s4 + $0x80] ss:$8 sps:$4 sm:$0xff]   ;;  %v5690_v5 = vld [vmem:[%s7855_s4 + $0x94] ss:$8 sps:$4 sm:$0xff]   ;;  %v2496_v63 = vpack.c.bf16 %v2470_v6, %v2464_v9  ;;  %v2849_v14 = vsel %vm1701_vm2, %v2847_v52, %v2848_v0  ;;  %3123 = vmatprep.subr.bf16.mxu1 %v5681_v45  ;;  %v5687_v20 = vld [vmem:[%s7855_s4 + $0x584] ss:$8 sps:$4 sm:$0xff]  }
 0x183   : > { %2753 = vmatprep.mubr.bf16.mxu1 %v2497_v62  ;;  %v2855_v13 = vsel %vm1701_vm2, %v2853_v1, %v2854_v7  ;;  %1581 = vmatpush1.bf16.msra.mxu0 %v5682_v23  ;;  %v5688_v12 = vld [vmem:[%s7855_s4 + $0x90] ss:$8 sps:$4 sm:$0xff]   ;;  %v5696_v48 = vld [vmem:[%s7855_s4 + $0xa4] ss:$8 sps:$4 sm:$0xff]   ;;  %v5685_v24 = vld [vmem:[%s7855_s4 + $0x580] ss:$8 sps:$4 sm:$0xff]  }
 0x184   : > { %1596 = vmatprep.mubr.bf16.mxu0 %v962_v58  ;;  %v2909_v17 = vpack.c.bf16 %v2855_v13, %v2849_v14  ;;  %2754 = vmatmul.mubr.bf16.gmra.mrb[12].mxu1 %v2496_v63  ;;  %v5693_v26 = vld [vmem:[%s7855_s4 + $0x594] ss:$8 sps:$4 sm:$0xff]   ;;  %v5694_v27 = vld [vmem:[%s7855_s4 + $0xa0] ss:$8 sps:$4 sm:$0xff]   ;;  %v5691_v31 = vld [vmem:[%s7855_s4 + $0x590] ss:$8 sps:$4 sm:$0xff]  }
 0x185   : > { %1582 = vmatprep.subr.bf16.mxu0 %v5690_v5  ;;  %3124 = vmatpush1.bf16.msra.mxu1 %v5679_v8  ;;  %v5702_v29 = vld [vmem:[%s7855_s4 + $0xb4] ss:$8 sps:$4 sm:$0xff]   ;;  %v5699_v51 = vld [vmem:[%s7855_s4 + $0x5a4] ss:$8 sps:$4 sm:$0xff]   ;;  %v5700_v32 = vld [vmem:[%s7855_s4 + $0xb0] ss:$8 sps:$4 sm:$0xff]  }
 0x186   : > { %3141 = vmatprep.mubr.bf16.mxu1 %v2909_v17  ;;  %3125 = vmatprep.subr.bf16.mxu1 %v5687_v20  ;;  %v5708_v33 = vld [vmem:[%s7855_s4 + $0xc4] ss:$8 sps:$4 sm:$0xff]   ;;  %v5697_v46 = vld [vmem:[%s7855_s4 + $0x5a0] ss:$8 sps:$4 sm:$0xff]   ;;  %v5705_v34 = vld [vmem:[%s7855_s4 + $0x5b4] ss:$8 sps:$4 sm:$0xff]  }
 0x187   : > { %1583 = vmatpush1.bf16.msra.mxu0 %v5688_v12  ;;  %v5706_v18 = vld [vmem:[%s7855_s4 + $0xc0] ss:$8 sps:$4 sm:$0xff]   ;;  %v5714_v11 = vld [vmem:[%s7855_s4 + $0xd4] ss:$8 sps:$4 sm:$0xff]   ;;  %v5703_v35 = vld [vmem:[%s7855_s4 + $0x5b0] ss:$8 sps:$4 sm:$0xff]  }
 0x188   : > { %1584 = vmatprep.subr.bf16.mxu0 %v5696_v48  ;;  %v5711_v60 = vld [vmem:[%s7855_s4 + $0x5c4] ss:$8 sps:$4 sm:$0xff]   ;;  %v5712_v36 = vld [vmem:[%s7855_s4 + $0xd0] ss:$8 sps:$4 sm:$0xff]   ;;  %v5709_v37 = vld [vmem:[%s7855_s4 + $0x5c0] ss:$8 sps:$4 sm:$0xff]  }
 0x189   : > { %3126 = vmatpush1.bf16.msra.mxu1 %v5685_v24  ;;  %v5720_v4 = vld [vmem:[%s7855_s4 + $0xe4] ss:$8 sps:$4 sm:$0xff]   ;;  %v5717_v57 = vld [vmem:[%s7855_s4 + $0x5d4] ss:$8 sps:$4 sm:$0xff]   ;;  %v5718_v3 = vld [vmem:[%s7855_s4 + $0xe0] ss:$8 sps:$4 sm:$0xff]  }
 0x18a   : > { %3127 = vmatprep.subr.bf16.mxu1 %v5693_v26  ;;  %v5726_v38 = vld [vmem:[%s7855_s4 + $0xf4] ss:$8 sps:$4 sm:$0xff]   ;;  %v5715_v59 = vld [vmem:[%s7855_s4 + $0x5d0] ss:$8 sps:$4 sm:$0xff]   ;;  %v5723_v61 = vld [vmem:[%s7855_s4 + $0x5e4] ss:$8 sps:$4 sm:$0xff]  }
 0x18b   : > { %1585 = vmatpush1.bf16.msra.mxu0 %v5694_v27  ;;  %v5724_v22 = vld [vmem:[%s7855_s4 + $0xf0] ss:$8 sps:$4 sm:$0xff]   ;;  %v5721_v39 = vld [vmem:[%s7855_s4 + $0x5e0] ss:$8 sps:$4 sm:$0xff]   ;;  %v5732_v40 = vld [vmem:[%s7855_s4 + $0x204] ss:$8 sps:$4 sm:$0xff]  }
 0x18c   : > { %1586 = vmatprep.subr.bf16.mxu0 %v5702_v29  ;;  %v5729_v30 = vld [vmem:[%s7855_s4 + $0x5f4] ss:$8 sps:$4 sm:$0xff]   ;;  %v947_v16 = vld [vmem:[#allocation2 + $0x20] sm:$0xff]  ;;  %v2786_v41 = vld [vmem:[#allocation2 + $0x50] sm:$0x3] }
 0x18d   : > { %3128 = vmatpush1.bf16.msra.mxu1 %v5691_v31  ;;  %v2784_v25 = vld [vmem:[#allocation2 + $0x40] sm:$0xfc]  ;;  %v952_v42 = vld [vmem:[#allocation2 + $0x68] sm:$0xff]  ;;  %v2795_v47 = vld [vmem:[#allocation2 + $0x98] sm:$0x3]  ;;  %v961_v21 = vpack.c.bf16 %v947_v16, %v6873_v19  ;;  %v2851_v43 = vrot.slane %v2786_v41, 2 }
 0x18e   : > { %3129 = vmatprep.subr.bf16.mxu1 %v5699_v51  ;;  %v5730_v44 = vld [vmem:[%s7855_s4 + $0x200] ss:$8 sps:$4 sm:$0xff]   ;;  %v2782_v10 = vld [vmem:[#allocation2 + $0x30] sm:$0x3]  ;;  %v2850_v50 = vrot.slane %v2784_v25, 2  ;;  %v2866_v0 = vrot.slane %v2795_v47, 2 }
 0x18f   : > { %1587 = vmatpush1.bf16.msra.mxu0 %v5700_v32  ;;  %v2793_v15 = vld [vmem:[#allocation2 + $0x88] sm:$0xfc]  ;;  %v2780_v49 = vld [vmem:[#allocation2 + $0x20] sm:$0xfc]  ;;  %v2791_v2 = vld [vmem:[#allocation2 + $0x78] sm:$0x3] }
 0x190   : > { %1588 = vmatprep.subr.bf16.mxu0 %v5708_v33  ;;  %v6982_v28 = vld [vmem:[#allocation2 + $0x48] sm:$0xff]  ;;  %v2865_v52 = vrot.slane %v2793_v15, 2  ;;  %v5738_v1 = vld [vmem:[%s7855_s4 + $0x214] ss:$8 sps:$4 sm:$0xff]   ;;  %v5727_v58 = vld [vmem:[%s7855_s4 + $0x5f0] ss:$8 sps:$4 sm:$0xff]   ;;  %v2852_v5 = vsel %vm1701_vm2, %v2850_v50, %v2851_v43 }
 0x191   : > { %3130 = vmatpush1.bf16.msra.mxu1 %v5697_v46  ;;  %v2789_v54 = vld [vmem:[#allocation2 + $0x68] sm:$0xfc]  ;;  %v6986_v56 = vpack.c.bf16 %v952_v42, %v6982_v28  ;;  %v2844_v62 = vrot.slane %v2780_v49, 2  ;;  %v2845_v6 = vrot.slane %v2782_v10, 2  ;;  %v2860_v23 = vrot.slane %v2791_v2, 2  ;;  %v949_v48 = vld [vmem:[#allocation2 + $0x40] sm:$0xff] }
 0x192   : > { %3131 = vmatprep.subr.bf16.mxu1 %v5705_v34  ;;  %v5735_v7 = vld [vmem:[%s7855_s4 + $0x604] ss:$8 sps:$4 sm:$0xff]   ;;  %v2859_v45 = vrot.slane %v2789_v54, 2  ;;  %v5733_v9 = vld [vmem:[%s7855_s4 + $0x600] ss:$8 sps:$4 sm:$0xff]   ;;  %v2867_v63 = vsel %vm1701_vm2, %v2865_v52, %v2866_v0 }
 0x193   : > { %1589 = vmatpush1.bf16.msra.mxu0 %v5706_v18  ;;  %v5736_v13 = vld [vmem:[%s7855_s4 + $0x210] ss:$8 sps:$4 sm:$0xff]   ;;  %v5741_v14 = vld [vmem:[%s7855_s4 + $0x614] ss:$8 sps:$4 sm:$0xff]   ;;  %v5744_v8 = vld [vmem:[%s7855_s4 + $0x224] ss:$8 sps:$4 sm:$0xff]   ;;  %v2846_v12 = vsel %vm1701_vm2, %v2844_v62, %v2845_v6 }
 0x194   : > { %1590 = vmatprep.subr.bf16.mxu0 %v5714_v11  ;;  %v2792_v17 = vld [vmem:[#allocation2 + $0x80] sm:$0xfc]  ;;  %v2794_v20 = vld [vmem:[#allocation2 + $0x90] sm:$0x3]  ;;  %v2801_v27 = vld [vmem:[#allocation2 + $0xc8] sm:$0xfc]  ;;  %v2908_v31 = vpack.c.bf16 %v2852_v5, %v2846_v12  ;;  %v2861_v51 = vsel %vm1701_vm2, %v2859_v45, %v2860_v23 }
 0x195   : > { %3132 = vmatpush1.bf16.msra.mxu1 %v5703_v35  ;;  %v951_v24 = vld [vmem:[#allocation2 + $0x60] sm:$0xff]  ;;  %v2803_v29 = vld [vmem:[#allocation2 + $0xd8] sm:$0x3]  ;;  %v956_v32 = vld [vmem:[#allocation2 + $0xa8] sm:$0xff]  ;;  %v2911_v34 = vpack.c.bf16 %v2867_v63, %v2861_v51  ;;  %v2862_v18 = vrot.slane %v2792_v17, 2  ;;  %v2863_v11 = vrot.slane %v2794_v20, 2 }
 0x196   : > { %3133 = vmatprep.subr.bf16.mxu1 %v5711_v60  ;;  %v5742_v26 = vld [vmem:[%s7855_s4 + $0x220] ss:$8 sps:$4 sm:$0xff]   ;;  %v2790_v46 = vld [vmem:[#allocation2 + $0x70] sm:$0x3]  ;;  %v2799_v60 = vld [vmem:[#allocation2 + $0xb8] sm:$0x3] }
 0x197   : > { %1591 = vmatpush1.bf16.msra.mxu0 %v5712_v36  ;;  %v2788_v33 = vld [vmem:[#allocation2 + $0x60] sm:$0xfc]  ;;  %v2797_v35 = vld [vmem:[#allocation2 + $0xa8] sm:$0xfc]  ;;  %v7017_v36 = vpack.c.bf16 %v951_v24, %v949_v48  ;;  %v2864_v16 = vsel %vm1701_vm2, %v2862_v18, %v2863_v11  ;;  %v5748_v41 = vld [vmem:[%s7855_s4 + $0x230] ss:$8 sps:$4 sm:$0xff]  }
 0x198   : > { %1592 = vmatprep.subr.bf16.mxu0 %v5720_v4  ;;  %v954_v4 = vld [vmem:[#allocation2 + $0x88] sm:$0xff]  ;;  %v5753_v49 = vld [vmem:[%s7855_s4 + $0x634] ss:$8 sps:$4 sm:$0xff]   ;;  %v2802_v50 = vld [vmem:[#allocation2 + $0xd0] sm:$0x3] }
 0x199   : > { %3134 = vmatpush1.bf16.msra.mxu1 %v5709_v37  ;;  %v2877_v37 = vrot.slane %v2801_v27, 2  ;;  %v5745_v25 = vld [vmem:[%s7855_s4 + $0x620] ss:$8 sps:$4 sm:$0xff]   ;;  %v5756_v42 = vld [vmem:[%s7855_s4 + $0x244] ss:$8 sps:$4 sm:$0xff]  }
 0x19a   : > { %3135 = vmatprep.subr.bf16.mxu1 %v5717_v57  ;;  %v2878_v57 = vrot.slane %v2803_v29, 2  ;;  %v7042_v15 = vld [vmem:[#allocation2 + $0x8] sm:$0xfc]  ;;  %v1640_v43 = vld [vmem:[#allocation2 + $0x18] sm:$0x3]  ;;  %v953_v2 = vld [vmem:[#allocation2 + $0x80] sm:$0xff] }
 0x19b   : > { %1593 = vmatpush1.bf16.msra.mxu0 %v5718_v3  ;;  %v5750_v3 = vld [vmem:[%s7855_s4 + $0x234] ss:$8 sps:$4 sm:$0xff]   ;;  %v960_v10 = vld [vmem:[#allocation2 + $0xe8] sm:$0xff]  ;;  %v2796_v0 = vld [vmem:[#allocation2 + $0xa0] sm:$0xfc]  ;;  %v1705_v24 = vrot.slane %v7042_v15, 2 }
 0x19c   : > { %1594 = vmatprep.subr.bf16.mxu0 %v5726_v38  ;;  %v5739_v38 = vld [vmem:[%s7855_s4 + $0x610] ss:$8 sps:$4 sm:$0xff]   ;;  %v2879_v47 = vsel %vm1701_vm2, %v2877_v37, %v2878_v57  ;;  %v5754_v52 = vld [vmem:[%s7855_s4 + $0x240] ss:$8 sps:$4 sm:$0xff]   ;;  %v5762_v48 = vld [vmem:[%s7855_s4 + $0x254] ss:$8 sps:$4 sm:$0xff]  }
 0x19d   : > { %3136 = vmatpush1.bf16.msra.mxu1 %v5715_v59  ;;  %v7025_v59 = vpack.c.bf16 %v956_v32, %v954_v4  ;;  %v2805_v45 = vld [vmem:[#allocation2 + $0xe8] sm:$0xfc]  ;;  %v2807_v23 = vld [vmem:[#allocation2 + $0xf8] sm:$0x3]  ;;  %v2868_v29 = vrot.slane %v2796_v0, 2  ;;  %v1706_v51 = vrot.slane %v1640_v43, 2 }
 0x19e   : > { %3137 = vmatprep.subr.bf16.mxu1 %v5723_v61  ;;  %v2856_v61 = vrot.slane %v2788_v33, 2  ;;  %v1642_v63 = vld [vmem:[#allocation2 + $0x28] sm:$0xfc]  ;;  %v2883_v33 = vrot.slane %v2805_v45, 2  ;;  %v2808_v37 = vld [vmem:[#allocation2 + $0x100] sm:$0xfc] }
 0x19f   : > { %1595 = vmatpush1.bf16.msra.mxu0 %v5724_v22  ;;  %v2857_v22 = vrot.slane %v2790_v46, 2  ;;  %v958_v17 = vld [vmem:[#allocation2 + $0xc8] sm:$0xff]  ;;  %v2884_v46 = vrot.slane %v2807_v23, 2  ;;  %v2810_v57 = vld [vmem:[#allocation2 + $0x110] sm:$0x3] }
 0x1a0   : > { %1967 = vmatprep.subr.bf16.mxu0 %v5732_v40  ;;  %v2871_v40 = vrot.slane %v2797_v35, 2  ;;  %v7062_v27 = vpack.c.bf16 %v960_v10, %v958_v17  ;;  %v5759_v32 = vld [vmem:[%s7855_s4 + $0x644] ss:$8 sps:$4 sm:$0xff]   ;;  %v5760_v35 = vld [vmem:[%s7855_s4 + $0x250] ss:$8 sps:$4 sm:$0xff]  }
 0x1a1   : > { %3138 = vmatpush1.bf16.msra.mxu1 %v5721_v39  ;;  %v5747_v39 = vld [vmem:[%s7855_s4 + $0x624] ss:$8 sps:$4 sm:$0xff]   ;;  %v2858_v54 = vsel %vm1701_vm2, %v2856_v61, %v2857_v22  ;;  %v5766_v15 = vld [vmem:[%s7855_s4 + $0x260] ss:$8 sps:$4 sm:$0xff]   ;;  %v5777_v45 = vld [vmem:[%s7855_s4 + $0x674] ss:$8 sps:$4 sm:$0xff]  }
 0x1a2   : > { %1597 = vmatmul.mubr.bf16.vlgmr.msra.gmra.mrb[16].mxu0 %v961_v21  ;;  %3139 = vmatprep.subr.bf16.mxu1 %v5729_v30  ;;  %v2872_v30 = vrot.slane %v2799_v60, 2  ;;  %v2800_v21 = vld [vmem:[#allocation2 + $0xc0] sm:$0xfc]  ;;  %v2910_v62 = vpack.c.bf16 %v2864_v16, %v2858_v54  ;;  %v5789_v17 = vld [vmem:[%s7855_s4 + $0x694] ss:$8 sps:$4 sm:$0xff]  }
 0x1a3   : > { %1606 = vmatprep.mubr.bf16.mxu0 %v6986_v56  ;;  %1968 = vmatpush1.bf16.msra.mxu0 %v5730_v44  ;;  %v955_v44 = vld [vmem:[#allocation2 + $0xa0] sm:$0xff] }
 0x1a4   : > { %1969 = vmatprep.subr.bf16.mxu0 %v5738_v1  ;;  %v2809_v1 = vld [vmem:[#allocation2 + $0x108] sm:$0xfc]  ;;  %v2873_v6 = vsel %vm1701_vm2, %v2871_v40, %v2872_v30  ;;  %v959_v61 = vld [vmem:[#allocation2 + $0xe0] sm:$0xff]  ;;  %v5765_v40 = vld [vmem:[%s7855_s4 + $0x654] ss:$8 sps:$4 sm:$0xff]   ;;  %v1707_v30 = vsel %vm1701_vm2, %v1705_v24, %v1706_v51 }
 0x1a5   : > { %3140 = vmatpush1.bf16.msra.mxu1 %v5727_v58  ;;  %v2811_v58 = vld [vmem:[#allocation2 + $0x118] sm:$0x3]  ;;  %v2913_v5 = vpack.c.bf16 %v2879_v47, %v2873_v6  ;;  %v2889_v20 = vrot.slane %v2809_v1, 2  ;;  %v5768_v4 = vld [vmem:[%s7855_s4 + $0x264] ss:$8 sps:$4 sm:$0xff]   ;;  %v2886_v47 = vrot.slane %v2808_v37, 2 }
 0x1a6   : > { %3416 = vmatprep.subr.bf16.mxu1 %v5735_v7  ;;  %v2798_v7 = vld [vmem:[#allocation2 + $0xb0] sm:$0x3]  ;;  %v2890_v12 = vrot.slane %v2811_v58, 2  ;;  %v5780_v58 = vld [vmem:[%s7855_s4 + $0x284] ss:$8 sps:$4 sm:$0xff]  }
 0x1a7   : > { %1970 = vmatpush1.bf16.msra.mxu0 %v5736_v13  ;;  %v2875_v13 = vrot.slane %v2802_v50, 2  ;;  %v5763_v50 = vld [vmem:[%s7855_s4 + $0x650] ss:$8 sps:$4 sm:$0xff]   ;;  %v5769_v6 = vld [vmem:[%s7855_s4 + $0x660] ss:$8 sps:$4 sm:$0xff]  }
 0x1a8   : > { %3142 = vmatmul.mubr.bf16.vlgmr.msra.gmra.mrb[0].mxu1 %v2908_v31  ;;  %1971 = vmatprep.subr.bf16.mxu0 %v5744_v8  ;;  %v7053_v8 = vpack.c.bf16 %v955_v44, %v953_v2  ;;  %v2869_v31 = vrot.slane %v2798_v7, 2  ;;  %v2891_v60 = vsel %vm1701_vm2, %v2889_v20, %v2890_v12  ;;  %v5772_v1 = vld [vmem:[%s7855_s4 + $0x270] ss:$8 sps:$4 sm:$0xff]   ;;  %v5778_v23 = vld [vmem:[%s7855_s4 + $0x280] ss:$8 sps:$4 sm:$0xff]  }
 0x1a9   : > { %3151 = vmatprep.mubr.bf16.mxu1 %v2911_v34  ;;  %3417 = vmatpush1.bf16.msra.mxu1 %v5733_v9  ;;  %v2874_v9 = vrot.slane %v2800_v21, 2  ;;  %v1711_v34 = vrot.slane %v1642_v63, 2  ;;  %v5774_v21 = vld [vmem:[%s7855_s4 + $0x274] ss:$8 sps:$4 sm:$0xff]   ;;  %v5784_v63 = vld [vmem:[%s7855_s4 + $0x290] ss:$8 sps:$4 sm:$0xff]  }
 0x1aa   : > { %3418 = vmatprep.subr.bf16.mxu1 %v5741_v14  ;;  %1607 = vmatmul.mubr.bf16.gmra.mrb[20].mxu0 %v7017_v36  ;;  %v1644_v14 = vld [vmem:[#allocation2 + $0x38] sm:$0x3]  ;;  %v5790_v20 = vld [vmem:[%s7855_s4 + $0x2a0] ss:$8 sps:$4 sm:$0xff]   ;;  %v5798_v12 = vld [vmem:[%s7855_s4 + $0x2b4] ss:$8 sps:$4 sm:$0xff]  }
 0x1ab   : > { %1616 = vmatprep.mubr.bf16.mxu0 %v7025_v59  ;;  %1972 = vmatpush1.bf16.msra.mxu0 %v5742_v26  ;;  %v5751_v26 = vld [vmem:[%s7855_s4 + $0x630] ss:$8 sps:$4 sm:$0xff]   ;;  %v1712_v18 = vrot.slane %v1644_v14, 2  ;;  %v2876_v11 = vsel %vm1701_vm2, %v2874_v9, %v2875_v13  ;;  %v5783_v13 = vld [vmem:[%s7855_s4 + $0x684] ss:$8 sps:$4 sm:$0xff]  }
 0x1ac   : > { %1973 = vmatprep.subr.bf16.mxu0 %v5750_v3  ;;  %v2870_v3 = vsel %vm1701_vm2, %v2868_v29, %v2869_v31  ;;  %v5775_v9 = vld [vmem:[%s7855_s4 + $0x670] ss:$8 sps:$4 sm:$0xff]   ;;  %v5792_v14 = vld [vmem:[%s7855_s4 + $0x2a4] ss:$8 sps:$4 sm:$0xff]   ;;  %v5793_v31 = vld [vmem:[%s7855_s4 + $0x6a0] ss:$8 sps:$4 sm:$0xff]  }
 0x1ad   : > { %3419 = vmatpush1.bf16.msra.mxu1 %v5739_v38  ;;  %v5757_v38 = vld [vmem:[%s7855_s4 + $0x640] ss:$8 sps:$4 sm:$0xff]   ;;  %v2912_v22 = vpack.c.bf16 %v2876_v11, %v2870_v3  ;;  %v1713_v16 = vsel %vm1701_vm2, %v1711_v34, %v1712_v18  ;;  %v5795_v24 = vld [vmem:[%s7855_s4 + $0x6a4] ss:$8 sps:$4 sm:$0xff]   ;;  %v5801_v51 = vld [vmem:[%s7855_s4 + $0x6b4] ss:$8 sps:$4 sm:$0xff]  }
 0x1ae   : > { %3420 = vmatprep.subr.bf16.mxu1 %v5747_v39  ;;  %v2885_v39 = vsel %vm1701_vm2, %v2883_v33, %v2884_v46  ;;  %v1767_v43 = vpack.c.bf16 %v1713_v16, %v1707_v30  ;;  %v5804_v29 = vld [vmem:[%s7855_s4 + $0x2c4] ss:$8 sps:$4 sm:$0xff]   ;;  %v5810_v33 = vld [vmem:[%s7855_s4 + $0x2d4] ss:$8 sps:$4 sm:$0xff]   ;;  %v5799_v46 = vld [vmem:[%s7855_s4 + $0x6b0] ss:$8 sps:$4 sm:$0xff]  }
 0x1af   : > { %1974 = vmatpush1.bf16.msra.mxu0 %v5748_v41  ;;  %v2806_v41 = vld [vmem:[#allocation2 + $0xf0] sm:$0x3]  ;;  %v2915_v44 = vpack.c.bf16 %v2891_v60, %v2885_v39  ;;  %v5807_v34 = vld [vmem:[%s7855_s4 + $0x6c4] ss:$8 sps:$4 sm:$0xff]   ;;  %v5813_v37 = vld [vmem:[%s7855_s4 + $0x6d4] ss:$8 sps:$4 sm:$0xff]  }
 0x1b0   : > { %3152 = vmatmul.mubr.bf16.gmra.mrb[4].mxu1 %v2910_v62  ;;  %1975 = vmatprep.subr.bf16.mxu0 %v5756_v42  ;;  %v957_v42 = vld [vmem:[#allocation2 + $0xc0] sm:$0xff]  ;;  %v2881_v2 = vrot.slane %v2806_v41, 2  ;;  %v5808_v18 = vld [vmem:[%s7855_s4 + $0x2d0] ss:$8 sps:$4 sm:$0xff]  }
 0x1b1   : > { %3161 = vmatprep.mubr.bf16.mxu1 %v2913_v5  ;;  %3421 = vmatpush1.bf16.msra.mxu1 %v5745_v25  ;;  %v2804_v25 = vld [vmem:[#allocation2 + $0xe0] sm:$0xfc]  ;;  %v7090_v10 = vpack.c.bf16 %v959_v61, %v957_v42  ;;  %v5786_v5 = vld [vmem:[%s7855_s4 + $0x294] ss:$8 sps:$4 sm:$0xff]   ;;  %v1643_v3 = vld [vmem:[#allocation2 + $0x30] sm:$0x3] }
 0x1b2   : > { %3422 = vmatprep.subr.bf16.mxu1 %v5753_v49  ;;  %1617 = vmatmul.mubr.bf16.gmra.mrb[24].mxu0 %v7053_v8  ;;  %v2887_v49 = vrot.slane %v2810_v57, 2  ;;  %v2880_v54 = vrot.slane %v2804_v25, 2  ;;  %v5816_v11 = vld [vmem:[%s7855_s4 + $0x2e4] ss:$8 sps:$4 sm:$0xff]   ;;  %v5811_v39 = vld [vmem:[%s7855_s4 + $0x6d0] ss:$8 sps:$4 sm:$0xff]  }
 0x1b3   : > { %1626 = vmatprep.mubr.bf16.mxu0 %v7062_v27  ;;  %1976 = vmatpush1.bf16.msra.mxu0 %v5754_v52  ;;  %v5771_v52 = vld [vmem:[%s7855_s4 + $0x664] ss:$8 sps:$4 sm:$0xff]   ;;  %v1709_v41 = vrot.slane %v1643_v3, 2  ;;  %v1648_v42 = vld [vmem:[#allocation2 + $0x58] sm:$0x3] }
 0x1b4   : > { %1977 = vmatprep.subr.bf16.mxu0 %v5762_v48  ;;  %v2888_v0 = vsel %vm1701_vm2, %v2886_v47, %v2887_v49  ;;  %v2882_v62 = vsel %vm1701_vm2, %v2880_v54, %v2881_v2  ;;  %v5787_v48 = vld [vmem:[%s7855_s4 + $0x690] ss:$8 sps:$4 sm:$0xff]   ;;  %v1637_v60 = vld [vmem:[#allocation2] sm:$0xfc]  ;;  %v1650_v61 = vld [vmem:[#allocation2 + $0x68] sm:$0xfc] }
 0x1b5   : > { %3423 = vmatpush1.bf16.msra.mxu1 %v5751_v26  ;;  %v2914_v7 = vpack.c.bf16 %v2888_v0, %v2882_v62  ;;  %v5796_v26 = vld [vmem:[%s7855_s4 + $0x2b0] ss:$8 sps:$4 sm:$0xff]   ;;  %v1641_v57 = vld [vmem:[#allocation2 + $0x20] sm:$0xfc]  ;;  %v1702_v30 = vrot.slane %v1637_v60, 2  ;;  %v1723_v47 = vrot.slane %v1650_v61, 2 }
 0x1b6   : > { %3424 = vmatprep.subr.bf16.mxu1 %v5759_v32  ;;  %v5802_v32 = vld [vmem:[%s7855_s4 + $0x2c0] ss:$8 sps:$4 sm:$0xff]   ;;  %v1708_v25 = vrot.slane %v1641_v57, 2  ;;  %v1718_v54 = vrot.slane %v1648_v42, 2  ;;  %v5837_v60 = vld [vmem:[%s7855_s4 + $0x714] ss:$8 sps:$4 sm:$0xff]  }
 0x1b7   : > { %1978 = vmatpush1.bf16.msra.mxu0 %v5760_v35  ;;  %v5805_v35 = vld [vmem:[%s7855_s4 + $0x6c0] ss:$8 sps:$4 sm:$0xff]   ;;  %v1659_v57 = vld [vmem:[#allocation2 + $0xb0] sm:$0x3] }
 0x1b8   : > { %3162 = vmatmul.mubr.bf16.gmra.mrb[8].mxu1 %v2912_v22  ;;  %1979 = vmatprep.subr.bf16.mxu0 %v5768_v4  ;;  %v1639_v4 = vld [vmem:[#allocation2 + $0x10] sm:$0x3]  ;;  %v1652_v22 = vld [vmem:[#allocation2 + $0x78] sm:$0x3]  ;;  %v5817_v2 = vld [vmem:[%s7855_s4 + $0x6e0] ss:$8 sps:$4 sm:$0xff]   ;;  %v1710_v0 = vsel %vm1701_vm2, %v1708_v25, %v1709_v41 }
 0x1b9   : > { %3171 = vmatprep.mubr.bf16.mxu1 %v2915_v44  ;;  %3425 = vmatpush1.bf16.msra.mxu1 %v5757_v38  ;;  %v5814_v38 = vld [vmem:[%s7855_s4 + $0x2e0] ss:$8 sps:$4 sm:$0xff]   ;;  %v1703_v16 = vrot.slane %v1639_v4, 2  ;;  %v1724_v49 = vrot.slane %v1652_v22, 2  ;;  %v5835_v3 = vld [vmem:[%s7855_s4 + $0x710] ss:$8 sps:$4 sm:$0xff]  }
 0x1ba   : > { %3426 = vmatprep.subr.bf16.mxu1 %v5765_v40  ;;  %1627 = vmatmul.mubr.bf16.gmra.mrb[28].mxu0 %v7090_v10  ;;  %v5822_v40 = vld [vmem:[%s7855_s4 + $0x2f4] ss:$8 sps:$4 sm:$0xff]   ;;  %v1646_v44 = vld [vmem:[#allocation2 + $0x48] sm:$0xfc]  ;;  %v1649_v62 = vld [vmem:[#allocation2 + $0x60] sm:$0xfc] }
 0x1bb   : > { %1980 = vmatpush1.bf16.msra.mxu0 %v5766_v15  ;;  %1999 = vmatprep.mubr.bf16.mxu0 %v1767_v43  ;;  %v5819_v15 = vld [vmem:[%s7855_s4 + $0x6e4] ss:$8 sps:$4 sm:$0xff]   ;;  %v1717_v43 = vrot.slane %v1646_v44, 2  ;;  %v5838_v61 = vld [vmem:[%s7855_s4 + $0x320] ss:$8 sps:$4 sm:$0xff]  }
 0x1bc   : > { %1981 = vmatprep.subr.bf16.mxu0 %v5774_v21  ;;  %v5820_v21 = vld [vmem:[%s7855_s4 + $0x2f0] ss:$8 sps:$4 sm:$0xff]   ;;  %v1666_v22 = vld [vmem:[#allocation2 + $0xe8] sm:$0xfc]  ;;  %v1653_v25 = vld [vmem:[#allocation2 + $0x80] sm:$0xfc] }
 0x1bd   : > { %3427 = vmatpush1.bf16.msra.mxu1 %v5763_v50  ;;  %v5828_v50 = vld [vmem:[%s7855_s4 + $0x304] ss:$8 sps:$4 sm:$0xff]   ;;  %v1655_v41 = vld [vmem:[#allocation2 + $0x90] sm:$0x3] }
 0x1be   : > { %3428 = vmatprep.subr.bf16.mxu1 %v5771_v52  ;;  %v1704_v52 = vsel %vm1701_vm2, %v1702_v30, %v1703_v16  ;;  %v5846_v16 = vld [vmem:[%s7855_s4 + $0x334] ss:$8 sps:$4 sm:$0xff]  }
 0x1bf   : > { %1982 = vmatpush1.bf16.msra.mxu0 %v5772_v1  ;;  %v5825_v1 = vld [vmem:[%s7855_s4 + $0x6f4] ss:$8 sps:$4 sm:$0xff]  }
 0x1c0   : > { %3172 = vmatmul.mubr.bf16.gmra.mrb[12].mxu1 %v2914_v7  ;;  %1983 = vmatprep.subr.bf16.mxu0 %v5780_v58  ;;  %v1725_v58 = vsel %vm1701_vm2, %v1723_v47, %v1724_v49  ;;  %v5823_v7 = vld [vmem:[%s7855_s4 + $0x6f0] ss:$8 sps:$4 sm:$0xff]   ;;  %v1662_v47 = vld [vmem:[#allocation2 + $0xc8] sm:$0xfc] }
 0x1c1   : > { %3429 = vmatpush1.bf16.msra.mxu1 %v5769_v6  ;;  %3448 = vmatprep.mubr.bf16.mxu1 %v6986_v56  ;;  %v5781_v56 = vld [vmem:[%s7855_s4 + $0x680] ss:$8 sps:$4 sm:$0xff]   ;;  %v1651_v6 = vld [vmem:[#allocation2 + $0x70] sm:$0x3]  ;;  %v1664_v49 = vld [vmem:[#allocation2 + $0xd8] sm:$0x3] }
 0x1c2   : > { %3430 = vmatprep.subr.bf16.mxu1 %v5777_v45  ;;  %v5826_v45 = vld [vmem:[%s7855_s4 + $0x300] ss:$8 sps:$4 sm:$0xff]  }
 0x1c3   : > { %1984 = vmatpush1.bf16.msra.mxu0 %v5778_v23  ;;  %v1658_v23 = vld [vmem:[#allocation2 + $0xa8] sm:$0xfc] }
 0x1c4   : > { %1985 = vmatprep.subr.bf16.mxu0 %v5786_v5  ;;  %v1660_v5 = vld [vmem:[#allocation2 + $0xb8] sm:$0x3] }
 0x1c5   : > { %3431 = vmatpush1.bf16.msra.mxu1 %v5775_v9  ;;  %v1766_v9 = vpack.c.bf16 %v1710_v0, %v1704_v52  ;;  %v1741_v52 = vrot.slane %v1662_v47, 2  ;;  %v1742_v0 = vrot.slane %v1664_v49, 2  ;;  %v5873_v47 = vld [vmem:[%s7855_s4 + $0x774] ss:$8 sps:$4 sm:$0xff]  }
 0x1c6   : > { %3432 = vmatprep.subr.bf16.mxu1 %v5783_v13  ;;  %v1719_v13 = vsel %vm1701_vm2, %v1717_v43, %v1718_v54  ;;  %v1726_v43 = vrot.slane %v1653_v25, 2  ;;  %v1727_v54 = vrot.slane %v1655_v41, 2  ;;  %v5868_v25 = vld [vmem:[%s7855_s4 + $0x370] ss:$8 sps:$4 sm:$0xff]  }
 0x1c7   : > { %1986 = vmatpush1.bf16.msra.mxu0 %v5784_v63  ;;  %v5834_v63 = vld [vmem:[%s7855_s4 + $0x314] ss:$8 sps:$4 sm:$0xff]  }
 0x1c8   : > { %1987 = vmatprep.subr.bf16.mxu0 %v5792_v14  ;;  %v1645_v14 = vld [vmem:[#allocation2 + $0x40] sm:$0xfc] }
 0x1c9   : > { %3433 = vmatpush1.bf16.msra.mxu1 %v5781_v56  ;;  %v1647_v56 = vld [vmem:[#allocation2 + $0x50] sm:$0x3] }
 0x1ca   : > { %3434 = vmatprep.subr.bf16.mxu1 %v5789_v17  ;;  %v1769_v17 = vpack.c.bf16 %v1725_v58, %v1719_v13  ;;  %v1743_v13 = vsel %vm1701_vm2, %v1741_v52, %v1742_v0  ;;  %v5886_v52 = vld [vmem:[%s7855_s4 + $0x3a0] ss:$8 sps:$4 sm:$0xff]   ;;  %v5894_v0 = vld [vmem:[%s7855_s4 + $0x3b4] ss:$8 sps:$4 sm:$0xff]  }
 0x1cb   : > { %1988 = vmatpush1.bf16.msra.mxu0 %v5790_v20  ;;  %v1720_v20 = vrot.slane %v1649_v62, 2  ;;  %v5849_v62 = vld [vmem:[%s7855_s4 + $0x734] ss:$8 sps:$4 sm:$0xff]  }
 0x1cc   : > { %1989 = vmatprep.subr.bf16.mxu0 %v5798_v12  ;;  %v1721_v12 = vrot.slane %v1651_v6, 2 }
 0x1cd   : > { %3435 = vmatpush1.bf16.msra.mxu1 %v5787_v48  ;;  %v1654_v48 = vld [vmem:[#allocation2 + $0x88] sm:$0xfc] }
 0x1ce   : > { %3436 = vmatprep.subr.bf16.mxu1 %v5795_v24  ;;  %v1656_v24 = vld [vmem:[#allocation2 + $0x98] sm:$0x3] }
 0x1cf   : > { %1990 = vmatpush1.bf16.msra.mxu0 %v5796_v26  ;;  %v5831_v26 = vld [vmem:[%s7855_s4 + $0x704] ss:$8 sps:$4 sm:$0xff]  }
 0x1d0   : > { %1991 = vmatprep.subr.bf16.mxu0 %v5804_v29  ;;  %v1735_v29 = vrot.slane %v1658_v23, 2  ;;  %v1728_v23 = vsel %vm1701_vm2, %v1726_v43, %v1727_v54  ;;  %v5888_v43 = vld [vmem:[%s7855_s4 + $0x3a4] ss:$8 sps:$4 sm:$0xff]   ;;  %v5877_v54 = vld [vmem:[%s7855_s4 + $0x780] ss:$8 sps:$4 sm:$0xff]  }
 0x1d1   : > { %3437 = vmatpush1.bf16.msra.mxu1 %v5793_v31  ;;  %v1736_v31 = vrot.slane %v1660_v5, 2  ;;  %v5850_v5 = vld [vmem:[%s7855_s4 + $0x340] ss:$8 sps:$4 sm:$0xff]  }
 0x1d2   : > { %3438 = vmatprep.subr.bf16.mxu1 %v5801_v51  ;;  %v5832_v51 = vld [vmem:[%s7855_s4 + $0x310] ss:$8 sps:$4 sm:$0xff]  }
 0x1d3   : > { %1992 = vmatpush1.bf16.msra.mxu0 %v5802_v32  ;;  %v1714_v32 = vrot.slane %v1645_v14, 2  ;;  %v1737_v4 = vsel %vm1701_vm2, %v1735_v29, %v1736_v31  ;;  %v1661_v14 = vld [vmem:[#allocation2 + $0xc0] sm:$0xfc]  ;;  %v7292_v29 = vld [vmem:[#allocation2 + $0x108] sm:$0xff] }
 0x1d4   : > { %1993 = vmatprep.subr.bf16.mxu0 %v5810_v33  ;;  %v1715_v33 = vrot.slane %v1647_v56, 2  ;;  %v1663_v56 = vld [vmem:[#allocation2 + $0xd0] sm:$0x3]  ;;  %v5864_v31 = vld [vmem:[%s7855_s4 + $0x364] ss:$8 sps:$4 sm:$0xff]  }
 0x1d5   : > { %3439 = vmatpush1.bf16.msra.mxu1 %v5799_v46  ;;  %v5840_v46 = vld [vmem:[%s7855_s4 + $0x324] ss:$8 sps:$4 sm:$0xff]  }
 0x1d6   : > { %3440 = vmatprep.subr.bf16.mxu1 %v5807_v34  ;;  %v1729_v34 = vrot.slane %v1654_v48, 2  ;;  %v5855_v48 = vld [vmem:[%s7855_s4 + $0x744] ss:$8 sps:$4 sm:$0xff]  }
 0x1d7   : > { %1994 = vmatpush1.bf16.msra.mxu0 %v5808_v18  ;;  %v1730_v18 = vrot.slane %v1656_v24, 2  ;;  %v1738_v24 = vrot.slane %v1661_v14, 2  ;;  %v5912_v14 = vld [vmem:[%s7855_s4 + $0x3e4] ss:$8 sps:$4 sm:$0xff]  }
 0x1d8   : > { %1995 = vmatprep.subr.bf16.mxu0 %v5816_v11  ;;  %v5829_v11 = vld [vmem:[%s7855_s4 + $0x700] ss:$8 sps:$4 sm:$0xff]  }
 0x1d9   : > { %3441 = vmatpush1.bf16.msra.mxu1 %v5805_v35  ;;  %v1722_v35 = vsel %vm1701_vm2, %v1720_v20, %v1721_v12  ;;  %v1731_v30 = vsel %vm1701_vm2, %v1729_v34, %v1730_v18  ;;  %v5861_v34 = vld [vmem:[%s7855_s4 + $0x754] ss:$8 sps:$4 sm:$0xff]   ;;  %v3222_v18 = vpack.c.bf16 %v6873_v19, %v7292_v29 }
 0x1da   : > { %3442 = vmatprep.subr.bf16.mxu1 %v5813_v37  ;;  %v1657_v37 = vld [vmem:[#allocation2 + $0xa0] sm:$0xfc]  ;;  %v1771_v44 = vpack.c.bf16 %v1737_v4, %v1731_v30  ;;  %v3508_v4 = vld [vmem:[#allocation2 + $0x58] sm:$0x1] }
 0x1db   : > { %1996 = vmatpush1.bf16.msra.mxu0 %v5814_v38  ;;  %v1716_v38 = vsel %vm1701_vm2, %v1714_v32, %v1715_v33  ;;  %v1732_v42 = vrot.slane %v1657_v37, 2  ;;  %v3510_v33 = vld [vmem:[#allocation2 + $0x68] sm:$0xfe]  ;;  %v3573_v30 = vrot.slane %v3508_v4, 1 }
 0x1dc   : > { %1997 = vmatprep.subr.bf16.mxu0 %v5822_v40  ;;  %v1768_v40 = vpack.c.bf16 %v1722_v35, %v1716_v38  ;;  %v5862_v35 = vld [vmem:[%s7855_s4 + $0x360] ss:$8 sps:$4 sm:$0xff]  }
 0x1dd   : > { %3443 = vmatpush1.bf16.msra.mxu1 %v5811_v39  ;;  %v1668_v39 = vld [vmem:[#allocation2 + $0xf8] sm:$0x3] }
 0x1de   : > { %3444 = vmatprep.subr.bf16.mxu1 %v5819_v15  ;;  %v1733_v15 = vrot.slane %v1659_v57, 2  ;;  %v2057_v57 = vld [vmem:[#allocation2 + $0x28] sm:$0xff] }
 0x1df   : > { %1998 = vmatpush1.bf16.msra.mxu0 %v5820_v21  ;;  %v1747_v21 = vrot.slane %v1666_v22, 2  ;;  %v5859_v22 = vld [vmem:[%s7855_s4 + $0x750] ss:$8 sps:$4 sm:$0xff]  }
 0x1e0   : > { %2273 = vmatprep.subr.bf16.mxu0 %v5828_v50  ;;  %v1748_v50 = vrot.slane %v1668_v39, 2  ;;  %v1734_v58 = vsel %vm1701_vm2, %v1732_v42, %v1733_v15  ;;  %v2073_v39 = vpack.c.bf16 %v6982_v28, %v2057_v57  ;;  %v5876_v28 = vld [vmem:[%s7855_s4 + $0x384] ss:$8 sps:$4 sm:$0xff]   ;;  %v3516_v57 = vld [vmem:[#allocation2 + $0x98] sm:$0x1] }
 0x1e1   : > { %3445 = vmatpush1.bf16.msra.mxu1 %v5817_v2  ;;  %v5852_v2 = vld [vmem:[%s7855_s4 + $0x344] ss:$8 sps:$4 sm:$0xff]  }
 0x1e2   : > { %3446 = vmatprep.subr.bf16.mxu1 %v5825_v1  ;;  %2000 = vmatmul.mubr.bf16.vlgmr.msra.gmra.mrb[16].mxu0 %v1766_v9  ;;  %v5841_v1 = vld [vmem:[%s7855_s4 + $0x720] ss:$8 sps:$4 sm:$0xff]   ;;  %v1749_v6 = vsel %vm1701_vm2, %v1747_v21, %v1748_v50  ;;  %v1770_v9 = vpack.c.bf16 %v1734_v58, %v1728_v23  ;;  %v5882_v21 = vld [vmem:[%s7855_s4 + $0x394] ss:$8 sps:$4 sm:$0xff]   ;;  %v5879_v50 = vld [vmem:[%s7855_s4 + $0x784] ss:$8 sps:$4 sm:$0xff]  }
 0x1e3   : > { %2009 = vmatprep.mubr.bf16.mxu0 %v1769_v17  ;;  %2274 = vmatpush1.bf16.msra.mxu0 %v5826_v45  ;;  %v1667_v45 = vld [vmem:[#allocation2 + $0xf0] sm:$0x3]  ;;  %v1773_v20 = vpack.c.bf16 %v1749_v6, %v1743_v13  ;;  %v5891_v58 = vld [vmem:[%s7855_s4 + $0x7a4] ss:$8 sps:$4 sm:$0xff]   ;;  %v5898_v23 = vld [vmem:[%s7855_s4 + $0x3c0] ss:$8 sps:$4 sm:$0xff]  }
 0x1e4   : > { %2275 = vmatprep.subr.bf16.mxu0 %v5834_v63  ;;  %v5858_v63 = vld [vmem:[%s7855_s4 + $0x354] ss:$8 sps:$4 sm:$0xff]   ;;  %v5847_v17 = vld [vmem:[%s7855_s4 + $0x730] ss:$8 sps:$4 sm:$0xff]   ;;  %v5900_v6 = vld [vmem:[%s7855_s4 + $0x3c4] ss:$8 sps:$4 sm:$0xff]  }
 0x1e5   : > { %3447 = vmatpush1.bf16.msra.mxu1 %v5823_v7  ;;  %v1665_v7 = vld [vmem:[#allocation2 + $0xe0] sm:$0xfc] }
 0x1e6   : > { %3834 = vmatprep.subr.bf16.mxu1 %v5831_v26  ;;  %v1744_v12 = vrot.slane %v1665_v7, 2  ;;  %v1739_v26 = vrot.slane %v1663_v56, 2  ;;  %v5889_v7 = vld [vmem:[%s7855_s4 + $0x7a0] ss:$8 sps:$4 sm:$0xff]   ;;  %v5903_v13 = vld [vmem:[%s7855_s4 + $0x7c4] ss:$8 sps:$4 sm:$0xff]  }
 0x1e7   : > { %2276 = vmatpush1.bf16.msra.mxu0 %v5832_v51  ;;  %v5853_v51 = vld [vmem:[%s7855_s4 + $0x740] ss:$8 sps:$4 sm:$0xff]  }
 0x1e8   : > { %3449 = vmatmul.mubr.bf16.vlgmr.msra.gmra.mrb[0].mxu1 %v7017_v36  ;;  %2277 = vmatprep.subr.bf16.mxu0 %v5840_v46  ;;  %v5843_v36 = vld [vmem:[%s7855_s4 + $0x724] ss:$8 sps:$4 sm:$0xff]   ;;  %v3512_v46 = vld [vmem:[#allocation2 + $0x78] sm:$0x1]  ;;  %v5901_v56 = vld [vmem:[%s7855_s4 + $0x7c0] ss:$8 sps:$4 sm:$0xff]  }
 0x1e9   : > { %3458 = vmatprep.mubr.bf16.mxu1 %v7025_v59  ;;  %3835 = vmatpush1.bf16.msra.mxu1 %v5829_v11  ;;  %v5844_v59 = vld [vmem:[%s7855_s4 + $0x330] ss:$8 sps:$4 sm:$0xff]   ;;  %v1740_v11 = vsel %vm1701_vm2, %v1738_v24, %v1739_v26  ;;  %v3579_v38 = vrot.slane %v3512_v46, 1  ;;  %v2058_v24 = vld [vmem:[#allocation2 + $0x40] sm:$0xff]  ;;  %v2063_v26 = vld [vmem:[#allocation2 + $0x88] sm:$0xff] }
 0x1ea   : > { %3836 = vmatprep.subr.bf16.mxu1 %v5837_v60  ;;  %2010 = vmatmul.mubr.bf16.gmra.mrb[20].mxu0 %v1768_v40  ;;  %v3506_v60 = vld [vmem:[#allocation2 + $0x48] sm:$0xfe] }
 0x1eb   : > { %2019 = vmatprep.mubr.bf16.mxu0 %v1771_v44  ;;  %2278 = vmatpush1.bf16.msra.mxu0 %v5838_v61  ;;  %v5870_v61 = vld [vmem:[%s7855_s4 + $0x374] ss:$8 sps:$4 sm:$0xff]   ;;  %v3572_v40 = vrot.slane %v3506_v60, 1  ;;  %v5865_v44 = vld [vmem:[%s7855_s4 + $0x760] ss:$8 sps:$4 sm:$0xff]  }
 0x1ec   : > { %2279 = vmatprep.subr.bf16.mxu0 %v5846_v16  ;;  %v7321_v16 = vld [vmem:[#allocation2 + $0x100] sm:$0xff]  ;;  %v3518_v46 = vld [vmem:[#allocation2 + $0xa8] sm:$0xfe] }
 0x1ed   : > { %3837 = vmatpush1.bf16.msra.mxu1 %v5835_v3  ;;  %v3578_v3 = vrot.slane %v3510_v33, 1  ;;  %v3221_v42 = vpack.c.bf16 %v6873_v19, %v7321_v16  ;;  %v3574_v15 = vsel %vm1065_vm0, %v3572_v40, %v3573_v30  ;;  %v5871_v19 = vld [vmem:[%s7855_s4 + $0x770] ss:$8 sps:$4 sm:$0xff]   ;;  %v2056_v33 = vld [vmem:[#allocation2 + $0x20] sm:$0xff] }
 0x1ee   : > { %3838 = vmatprep.subr.bf16.mxu1 %v5843_v36  ;;  %v5874_v36 = vld [vmem:[%s7855_s4 + $0x380] ss:$8 sps:$4 sm:$0xff]  }
 0x1ef   : > { %2280 = vmatpush1.bf16.msra.mxu0 %v5844_v59  ;;  %v3580_v41 = vsel %vm1065_vm0, %v3578_v3, %v3579_v38  ;;  %v5880_v59 = vld [vmem:[%s7855_s4 + $0x390] ss:$8 sps:$4 sm:$0xff]   ;;  %v2072_v3 = vpack.c.bf16 %v2058_v24, %v2056_v33  ;;  %v2061_v38 = vld [vmem:[#allocation2 + $0x68] sm:$0xff] }
 0x1f0   : > { %3459 = vmatmul.mubr.bf16.gmra.mrb[4].mxu1 %v7053_v8  ;;  %2281 = vmatprep.subr.bf16.mxu0 %v5852_v2  ;;  %v1745_v8 = vrot.slane %v1667_v45, 2  ;;  %v3634_v49 = vpack.c.bf16 %v3580_v41, %v3574_v15  ;;  %v5885_v2 = vld [vmem:[%s7855_s4 + $0x794] ss:$8 sps:$4 sm:$0xff]   ;;  %v3536_v24 = vld [vmem:[#allocation2 + $0x138] sm:$0x1] }
 0x1f1   : > { %3468 = vmatprep.mubr.bf16.mxu1 %v7062_v27  ;;  %3839 = vmatpush1.bf16.msra.mxu1 %v5841_v1  ;;  %v5856_v27 = vld [vmem:[%s7855_s4 + $0x350] ss:$8 sps:$4 sm:$0xff]   ;;  %v5897_v45 = vld [vmem:[%s7855_s4 + $0x7b4] ss:$8 sps:$4 sm:$0xff]  }
 0x1f2   : > { %3840 = vmatprep.subr.bf16.mxu1 %v5849_v62  ;;  %2020 = vmatmul.mubr.bf16.gmra.mrb[24].mxu0 %v1770_v9  ;;  %v1746_v32 = vsel %vm1701_vm2, %v1744_v12, %v1745_v8  ;;  %v5883_v1 = vld [vmem:[%s7855_s4 + $0x790] ss:$8 sps:$4 sm:$0xff]   ;;  %v5918_v12 = vld [vmem:[%s7855_s4 + $0x3f4] ss:$8 sps:$4 sm:$0xff]  }
 0x1f3   : > { %2029 = vmatprep.mubr.bf16.mxu0 %v1773_v20  ;;  %2282 = vmatpush1.bf16.msra.mxu0 %v5850_v5  ;;  %v1772_v37 = vpack.c.bf16 %v1746_v32, %v1740_v11  ;;  %v5892_v62 = vld [vmem:[%s7855_s4 + $0x3b0] ss:$8 sps:$4 sm:$0xff]   ;;  %v5906_v5 = vld [vmem:[%s7855_s4 + $0x3d4] ss:$8 sps:$4 sm:$0xff]   ;;  %v5910_v20 = vld [vmem:[%s7855_s4 + $0x3e0] ss:$8 sps:$4 sm:$0xff]  }
 0x1f4   : > { %2283 = vmatprep.subr.bf16.mxu0 %v5858_v63  ;;  %v5895_v9 = vld [vmem:[%s7855_s4 + $0x7b0] ss:$8 sps:$4 sm:$0xff]   ;;  %v5913_v32 = vld [vmem:[%s7855_s4 + $0x7e0] ss:$8 sps:$4 sm:$0xff]  }
 0x1f5   : > { %3841 = vmatpush1.bf16.msra.mxu1 %v5847_v17  ;;  %v5904_v63 = vld [vmem:[%s7855_s4 + $0x3d0] ss:$8 sps:$4 sm:$0xff]   ;;  %v5909_v17 = vld [vmem:[%s7855_s4 + $0x7d4] ss:$8 sps:$4 sm:$0xff]   ;;  %v3505_v11 = vld [vmem:[#allocation2 + $0x40] sm:$0xfe] }
 0x1f6   : > { %3842 = vmatprep.subr.bf16.mxu1 %v5855_v48  ;;  %v5907_v8 = vld [vmem:[%s7855_s4 + $0x7d0] ss:$8 sps:$4 sm:$0xff]   ;;  %v5915_v48 = vld [vmem:[%s7855_s4 + $0x7e4] ss:$8 sps:$4 sm:$0xff]   ;;  %v3569_v40 = vrot.slane %v3505_v11, 1 }
 0x1f7   : > { %2284 = vmatpush1.bf16.msra.mxu0 %v5856_v27  ;;  %v5916_v27 = vld [vmem:[%s7855_s4 + $0x3f0] ss:$8 sps:$4 sm:$0xff]  }
 0x1f8   : > { %3469 = vmatmul.mubr.bf16.gmra.mrb[8].mxu1 %v7090_v10  ;;  %2285 = vmatprep.subr.bf16.mxu0 %v5864_v31  ;;  %v5867_v10 = vld [vmem:[%s7855_s4 + $0x764] ss:$8 sps:$4 sm:$0xff]   ;;  %v3527_v33 = vld [vmem:[#allocation2 + $0xf0] sm:$0x1]  ;;  %v3532_v11 = vld [vmem:[#allocation2 + $0x118] sm:$0x1] }
 0x1f9   : > { %3478 = vmatprep.mubr.bf16.mxu1 %v3222_v18  ;;  %3843 = vmatpush1.bf16.msra.mxu1 %v5853_v51  ;;  %v3509_v31 = vld [vmem:[#allocation2 + $0x60] sm:$0xfe]  ;;  %v3511_v51 = vld [vmem:[#allocation2 + $0x70] sm:$0x1]  ;;  %v5921_v18 = vld [vmem:[%s7855_s4 + $0x7f4] ss:$8 sps:$4 sm:$0xff]  }
 0x1fa   : > { %3844 = vmatprep.subr.bf16.mxu1 %v5861_v34  ;;  %2030 = vmatmul.mubr.bf16.gmra.mrb[28].mxu0 %v1772_v37  ;;  %v3520_v34 = vld [vmem:[#allocation2 + $0xb8] sm:$0x1]  ;;  %v3575_v60 = vrot.slane %v3509_v31, 1  ;;  %v3576_v4 = vrot.slane %v3511_v51, 1  ;;  %v3514_v37 = vld [vmem:[#allocation2 + $0x88] sm:$0xfe] }
 0x1fb   : > { %2286 = vmatpush1.bf16.msra.mxu0 %v5862_v35  ;;  %2305 = vmatprep.mubr.bf16.mxu0 %v2073_v39  ;;  %v3507_v35 = vld [vmem:[#allocation2 + $0x50] sm:$0x1]  ;;  %v3584_v41 = vrot.slane %v3514_v37, 1  ;;  %v2064_v31 = vld [vmem:[#allocation2 + $0xa0] sm:$0xff] }
 0x1fc   : > { %2287 = vmatprep.subr.bf16.mxu0 %v5870_v61  ;;  %v3590_v61 = vrot.slane %v3518_v46, 1  ;;  %v5919_v39 = vld [vmem:[%s7855_s4 + $0x7f0] ss:$8 sps:$4 sm:$0xff]   ;;  %v3570_v30 = vrot.slane %v3507_v35, 1  ;;  %v2066_v51 = vld [vmem:[#allocation2 + $0xc0] sm:$0xff] }
 0x1fd   : > { %3845 = vmatpush1.bf16.msra.mxu1 %v5859_v22  ;;  %v3591_v22 = vrot.slane %v3520_v34, 1  ;;  %v5928_v34 = vld [vmem:[%s7855_s4 + $0x820] ss:$8 sps:$4 sm:$0xff]  }
 0x1fe   : > { %3846 = vmatprep.subr.bf16.mxu1 %v5867_v10  ;;  %v2075_v10 = vpack.c.bf16 %v2063_v26, %v2061_v38  ;;  %v3521_v37 = vld [vmem:[#allocation2 + $0xc0] sm:$0xfe]  ;;  %v2076_v38 = vpack.c.bf16 %v2066_v51, %v2064_v31  ;;  %v5943_v51 = vld [vmem:[%s7855_s4 + $0x870] ss:$8 sps:$4 sm:$0xff]  }
 0x1ff   : > { %2288 = vmatpush1.bf16.msra.mxu0 %v5868_v25  ;;  %v5924_v25 = vld [vmem:[%s7855_s4 + $0x804] ss:$8 sps:$4 sm:$0xff]   ;;  %v3592_v15 = vsel %vm1065_vm0, %v3590_v61, %v3591_v22  ;;  %v3600_v22 = vrot.slane %v3527_v33, 1  ;;  %v5946_v33 = vld [vmem:[%s7855_s4 + $0x880] ss:$8 sps:$4 sm:$0xff]  }
 0x200   : > { %3479 = vmatmul.mubr.bf16.gmra.mrb[12].mxu1 %v3221_v42  ;;  %2289 = vmatprep.subr.bf16.mxu0 %v5876_v28  ;;  %v3585_v28 = vrot.slane %v3516_v57, 1  ;;  %v2062_v42 = vld [vmem:[#allocation2 + $0x80] sm:$0xff]  ;;  %v3523_v57 = vld [vmem:[#allocation2 + $0xd0] sm:$0x1] }
 0x201   : > { %3847 = vmatpush1.bf16.msra.mxu1 %v5865_v44  ;;  %3866 = vmatprep.mubr.bf16.mxu1 %v3634_v49  ;;  %v3577_v44 = vsel %vm1065_vm0, %v3575_v60, %v3576_v4  ;;  %v3517_v49 = vld [vmem:[#allocation2 + $0xa0] sm:$0xfe]  ;;  %v5933_v4 = vld [vmem:[%s7855_s4 + $0x834] ss:$8 sps:$4 sm:$0xff]  }
 0x202   : > { %3848 = vmatprep.subr.bf16.mxu1 %v5873_v47  ;;  %v2067_v47 = vld [vmem:[#allocation2 + $0xc8] sm:$0xff] }
 0x203   : > { %2290 = vmatpush1.bf16.msra.mxu0 %v5874_v36  ;;  %v3519_v36 = vld [vmem:[#allocation2 + $0xb0] sm:$0x1] }
 0x204   : > { %2291 = vmatprep.subr.bf16.mxu0 %v5882_v21  ;;  %v3571_v21 = vsel %vm1065_vm0, %v3569_v40, %v3570_v30  ;;  %v3609_v40 = vrot.slane %v3532_v11, 1  ;;  %v5952_v11 = vld [vmem:[%s7855_s4 + $0x8a0] ss:$8 sps:$4 sm:$0xff]  }
 0x205   : > { %3849 = vmatpush1.bf16.msra.mxu1 %v5871_v19  ;;  %v5922_v19 = vld [vmem:[%s7855_s4 + $0x800] ss:$8 sps:$4 sm:$0xff]  }
 0x206   : > { %3850 = vmatprep.subr.bf16.mxu1 %v5879_v50  ;;  %v2060_v50 = vld [vmem:[#allocation2 + $0x60] sm:$0xff] }
 0x207   : > { %2292 = vmatpush1.bf16.msra.mxu0 %v5880_v59  ;;  %v3526_v59 = vld [vmem:[#allocation2 + $0xe8] sm:$0xfe] }
 0x208   : > { %2293 = vmatprep.subr.bf16.mxu0 %v5888_v43  ;;  %v3528_v43 = vld [vmem:[#allocation2 + $0xf8] sm:$0x1] }
 0x209   : > { %3851 = vmatpush1.bf16.msra.mxu1 %v5877_v54  ;;  %v3633_v54 = vpack.c.bf16 %v3577_v44, %v3571_v21  ;;  %v3593_v44 = vrot.slane %v3521_v37, 1  ;;  %v5958_v37 = vld [vmem:[%s7855_s4 + $0x8c0] ss:$8 sps:$4 sm:$0xff]  }
 0x20a   : > { %3852 = vmatprep.subr.bf16.mxu1 %v5885_v2  ;;  %v3586_v2 = vsel %vm1065_vm0, %v3584_v41, %v3585_v28  ;;  %v5931_v41 = vld [vmem:[%s7855_s4 + $0x830] ss:$8 sps:$4 sm:$0xff]  }
 0x20b   : > { %2294 = vmatpush1.bf16.msra.mxu0 %v5886_v52  ;;  %v5927_v52 = vld [vmem:[%s7855_s4 + $0x814] ss:$8 sps:$4 sm:$0xff]  }
 0x20c   : > { %2295 = vmatprep.subr.bf16.mxu0 %v5894_v0  ;;  %v3513_v0 = vld [vmem:[#allocation2 + $0x80] sm:$0xfe] }
 0x20d   : > { %3853 = vmatpush1.bf16.msra.mxu1 %v5883_v1  ;;  %v3515_v1 = vld [vmem:[#allocation2 + $0x90] sm:$0x1] }
 0x20e   : > { %3854 = vmatprep.subr.bf16.mxu1 %v5891_v58  ;;  %v3636_v58 = vpack.c.bf16 %v3592_v15, %v3586_v2  ;;  %v5936_v15 = vld [vmem:[%s7855_s4 + $0x844] ss:$8 sps:$4 sm:$0xff]   ;;  %v3930_v2 = vld [vmem:[#allocation2 + $0x78] sm:$0x3] }
 0x20f   : > { %2296 = vmatpush1.bf16.msra.mxu0 %v5892_v62  ;;  %v3587_v62 = vrot.slane %v3517_v49, 1  ;;  %v3533_v49 = vld [vmem:[#allocation2 + $0x120] sm:$0xfe] }
 0x210   : > { %2297 = vmatprep.subr.bf16.mxu0 %v5900_v6  ;;  %v3588_v6 = vrot.slane %v3519_v36, 1  ;;  %v3535_v36 = vld [vmem:[#allocation2 + $0x130] sm:$0x1] }
 0x211   : > { %3855 = vmatpush1.bf16.msra.mxu1 %v5889_v7  ;;  %v3522_v7 = vld [vmem:[#allocation2 + $0xc8] sm:$0xfe] }
 0x212   : > { %3856 = vmatprep.subr.bf16.mxu1 %v5897_v45  ;;  %v3524_v45 = vld [vmem:[#allocation2 + $0xd8] sm:$0x1] }
 0x213   : > { %2298 = vmatpush1.bf16.msra.mxu0 %v5898_v23  ;;  %v2074_v23 = vpack.c.bf16 %v2062_v42, %v2060_v50  ;;  %v3594_v42 = vrot.slane %v3523_v57, 1  ;;  %v3529_v50 = vld [vmem:[#allocation2 + $0x100] sm:$0xfe]  ;;  %v5963_v57 = vld [vmem:[%s7855_s4 + $0x8d4] ss:$8 sps:$4 sm:$0xff]  }
 0x214   : > { %2299 = vmatprep.subr.bf16.mxu0 %v5906_v5  ;;  %v2065_v5 = vld [vmem:[#allocation2 + $0xa8] sm:$0xff] }
 0x215   : > { %3857 = vmatpush1.bf16.msra.mxu1 %v5895_v9  ;;  %v3602_v9 = vrot.slane %v3526_v59, 1  ;;  %v3531_v59 = vld [vmem:[#allocation2 + $0x110] sm:$0x1] }
 0x216   : > { %3858 = vmatprep.subr.bf16.mxu1 %v5903_v13  ;;  %v3603_v13 = vrot.slane %v3528_v43, 1  ;;  %v5934_v43 = vld [vmem:[%s7855_s4 + $0x840] ss:$8 sps:$4 sm:$0xff]  }
 0x217   : > { %2300 = vmatpush1.bf16.msra.mxu0 %v5904_v63  ;;  %v5925_v63 = vld [vmem:[%s7855_s4 + $0x810] ss:$8 sps:$4 sm:$0xff]  }
 0x218   : > { %2301 = vmatprep.subr.bf16.mxu0 %v5912_v14  ;;  %v2077_v14 = vpack.c.bf16 %v2067_v47, %v2065_v5  ;;  %v3604_v26 = vsel %vm1065_vm0, %v3602_v9, %v3603_v13  ;;  %v3926_v5 = vld [vmem:[#allocation2 + $0x58] sm:$0x3] }
 0x219   : > { %3859 = vmatpush1.bf16.msra.mxu1 %v5901_v56  ;;  %v3581_v56 = vrot.slane %v3513_v0, 1  ;;  %v5939_v0 = vld [vmem:[%s7855_s4 + $0x854] ss:$8 sps:$4 sm:$0xff]  }
 0x21a   : > { %3860 = vmatprep.subr.bf16.mxu1 %v5909_v17  ;;  %v3582_v17 = vrot.slane %v3515_v1, 1  ;;  %v2068_v1 = vld [vmem:[#allocation2 + $0xe0] sm:$0xff] }
 0x21b   : > { %2302 = vmatpush1.bf16.msra.mxu0 %v5910_v20  ;;  %v5930_v20 = vld [vmem:[%s7855_s4 + $0x824] ss:$8 sps:$4 sm:$0xff]   ;;  %v2078_v9 = vpack.c.bf16 %v7321_v16, %v2068_v1  ;;  %v3946_v1 = vld [vmem:[#allocation2 + $0xf8] sm:$0x3] }
 0x21c   : > { %2303 = vmatprep.subr.bf16.mxu0 %v5918_v12  ;;  %v3596_v12 = vrot.slane %v3522_v7, 1  ;;  %v3583_v46 = vsel %vm1065_vm0, %v3581_v56, %v3582_v17  ;;  %v3605_v7 = vrot.slane %v3529_v50, 1  ;;  %v5942_v56 = vld [vmem:[%s7855_s4 + $0x864] ss:$8 sps:$4 sm:$0xff]  }
 0x21d   : > { %3861 = vmatpush1.bf16.msra.mxu1 %v5907_v8  ;;  %v3597_v8 = vrot.slane %v3524_v45, 1  ;;  %v3606_v45 = vrot.slane %v3531_v59, 1 }
 0x21e   : > { %3862 = vmatprep.subr.bf16.mxu1 %v5915_v48  ;;  %v3589_v48 = vsel %vm1065_vm0, %v3587_v62, %v3588_v6  ;;  %v3612_v62 = vrot.slane %v3535_v36, 1  ;;  %v5967_v36 = vld [vmem:[%s7855_s4 + $0x8f0] ss:$8 sps:$4 sm:$0xff]  }
 0x21f   : > { %2304 = vmatpush1.bf16.msra.mxu0 %v5916_v27  ;;  %v3534_v27 = vld [vmem:[#allocation2 + $0x128] sm:$0xfe]  ;;  %v3635_v35 = vpack.c.bf16 %v3589_v48, %v3583_v46  ;;  %v3598_v60 = vsel %vm1065_vm0, %v3596_v12, %v3597_v8  ;;  %v3607_v12 = vsel %vm1065_vm0, %v3605_v7, %v3606_v45  ;;  %v5951_v46 = vld [vmem:[%s7855_s4 + $0x894] ss:$8 sps:$4 sm:$0xff]   ;;  %v3933_v7 = vld [vmem:[#allocation2 + $0x90] sm:$0x3] }
 0x220   : > { %v3614_v30 = vrot.slane %v3534_v27, 1  ;;  %v5940_v48 = vld [vmem:[%s7855_s4 + $0x860] ss:$8 sps:$4 sm:$0xff]  }
 0x221   : > { %3863 = vmatpush1.bf16.msra.mxu1 %v5913_v32  ;;  %v3525_v32 = vld [vmem:[#allocation2 + $0xe0] sm:$0xfe] }
 0x222   : > { %3864 = vmatprep.subr.bf16.mxu1 %v5921_v18  ;;  %2306 = vmatmul.mubr.bf16.vlgmr.msra.gmra.mrb[16].mxu0 %v2072_v3  ;;  %v3530_v18 = vld [vmem:[#allocation2 + $0x108] sm:$0xfe]  ;;  %v3638_v3 = vpack.c.bf16 %v3604_v26, %v3598_v60  ;;  %v3599_v61 = vrot.slane %v3525_v32, 1  ;;  %v5945_v26 = vld [vmem:[%s7855_s4 + $0x874] ss:$8 sps:$4 sm:$0xff]  }
 0x223   : > { %2315 = vmatprep.mubr.bf16.mxu0 %v2075_v10  ;;  %v3608_v10 = vrot.slane %v3530_v18, 1  ;;  %v5948_v32 = vld [vmem:[%s7855_s4 + $0x884] ss:$8 sps:$4 sm:$0xff]   ;;  %v5955_v60 = vld [vmem:[%s7855_s4 + $0x8b0] ss:$8 sps:$4 sm:$0xff]  }
 0x224   : > { %v3601_v47 = vsel %vm1065_vm0, %v3599_v61, %v3600_v22  ;;  %v5954_v18 = vld [vmem:[%s7855_s4 + $0x8a4] ss:$8 sps:$4 sm:$0xff]   ;;  %v3929_v22 = vld [vmem:[#allocation2 + $0x70] sm:$0x3] }
 0x225   : > { %3865 = vmatpush1.bf16.msra.mxu1 %v5919_v39  ;;  %v2069_v39 = vld [vmem:[#allocation2 + $0xe8] sm:$0xff]  ;;  %v3610_v21 = vsel %vm1065_vm0, %v3608_v10, %v3609_v40  ;;  %v3927_v61 = vld [vmem:[#allocation2 + $0x60] sm:$0xfc]  ;;  %v3938_v40 = vld [vmem:[#allocation2 + $0xb8] sm:$0x3] }
 0x226   : > { %4252 = vmatprep.subr.bf16.mxu1 %v5924_v25  ;;  %v3615_v25 = vrot.slane %v3536_v24, 1  ;;  %v2079_v28 = vpack.c.bf16 %v7292_v29, %v2069_v39  ;;  %v3595_v29 = vsel %vm1065_vm0, %v3593_v44, %v3594_v42  ;;  %v5964_v39 = vld [vmem:[%s7855_s4 + $0x8e0] ss:$8 sps:$4 sm:$0xff]   ;;  %v3994_v44 = vrot.slane %v3929_v22, 2 }
 0x227   : > { %v3936_v10 = vld [vmem:[#allocation2 + $0xa8] sm:$0xfc] }
 0x228   : > { %3867 = vmatmul.mubr.bf16.vlgmr.msra.gmra.mrb[0].mxu1 %v3633_v54  ;;  %v3928_v54 = vld [vmem:[#allocation2 + $0x68] sm:$0xfc] }
 0x229   : > { %3876 = vmatprep.mubr.bf16.mxu1 %v3636_v58  ;;  %4253 = vmatpush1.bf16.msra.mxu1 %v5922_v19  ;;  %v3616_v19 = vsel %vm1065_vm0, %v3614_v30, %v3615_v25  ;;  %v3611_v58 = vrot.slane %v3533_v49, 1  ;;  %v3996_v13 = vrot.slane %v3928_v54, 2  ;;  %v5969_v30 = vld [vmem:[%s7855_s4 + $0x8f4] ss:$8 sps:$4 sm:$0xff]   ;;  %v3923_v25 = vld [vmem:[#allocation2 + $0x40] sm:$0xfc] }
 0x22a   : > { %4254 = vmatprep.subr.bf16.mxu1 %v5927_v52  ;;  %2316 = vmatmul.mubr.bf16.gmra.mrb[20].mxu0 %v2074_v23  ;;  %v3637_v52 = vpack.c.bf16 %v3601_v47, %v3595_v29  ;;  %v3640_v6 = vpack.c.bf16 %v3616_v19, %v3610_v21  ;;  %v3924_v23 = vld [vmem:[#allocation2 + $0x48] sm:$0xfc]  ;;  %v4008_v47 = vrot.slane %v3936_v10, 2  ;;  %v4009_v49 = vrot.slane %v3938_v40, 2  ;;  %v3935_v54 = vld [vmem:[#allocation2 + $0xa0] sm:$0xfc] }
 0x22b   : > { %2325 = vmatprep.mubr.bf16.mxu0 %v2077_v14  ;;  %v5937_v14 = vld [vmem:[%s7855_s4 + $0x850] ss:$8 sps:$4 sm:$0xff]   ;;  %v3990_v17 = vrot.slane %v3924_v23, 2  ;;  %v3613_v16 = vsel %vm1065_vm0, %v3611_v58, %v3612_v62  ;;  %v3932_v42 = vld [vmem:[#allocation2 + $0x88] sm:$0xfc]  ;;  %v3987_v21 = vrot.slane %v3923_v25, 2 }
 0x22c   : > { %v3639_v27 = vpack.c.bf16 %v3613_v16, %v3607_v12  ;;  %v4002_v50 = vrot.slane %v3932_v42, 2  ;;  %v4005_v23 = vrot.slane %v3935_v54, 2  ;;  %v3951_v25 = vld [vmem:[#allocation2 + $0x120] sm:$0xfc] }
 0x22d   : > { %4255 = vmatpush1.bf16.msra.mxu1 %v5925_v63  ;;  %v3997_v63 = vrot.slane %v3930_v2, 2  ;;  %v3937_v2 = vld [vmem:[#allocation2 + $0xb0] sm:$0x3] }
 0x22e   : > { %4256 = vmatprep.subr.bf16.mxu1 %v5930_v20  ;;  %v3991_v20 = vrot.slane %v3926_v5, 2  ;;  %v4006_v5 = vrot.slane %v3937_v2, 2 }
 0x22f   : > { %v3998_v8 = vsel %vm1701_vm2, %v3996_v13, %v3997_v63  ;;  %v3942_v13 = vld [vmem:[#allocation2 + $0xd8] sm:$0x3] }
 0x230   : > { %3877 = vmatmul.mubr.bf16.gmra.mrb[4].mxu1 %v3635_v35  ;;  %v3992_v24 = vsel %vm1701_vm2, %v3990_v17, %v3991_v20  ;;  %v5957_v35 = vld [vmem:[%s7855_s4 + $0x8b4] ss:$8 sps:$4 sm:$0xff]   ;;  %v4000_v17 = vrot.slane %v3933_v7, 2  ;;  %v4015_v12 = vrot.slane %v3942_v13, 2  ;;  %v4007_v16 = vsel %vm1701_vm2, %v4005_v23, %v4006_v5  ;;  %v4341_v13 = vld [vmem:[%s7856_s5] sm:$0x3] }
 0x231   : > { %3886 = vmatprep.mubr.bf16.mxu1 %v3638_v3  ;;  %4257 = vmatpush1.bf16.msra.mxu1 %v5928_v34  ;;  %v4052_v31 = vpack.c.bf16 %v3998_v8, %v3992_v24  ;;  %v5949_v34 = vld [vmem:[%s7855_s4 + $0x890] ss:$8 sps:$4 sm:$0xff]   ;;  %v3948_v24 = vld [vmem:[#allocation2 + $0x108] sm:$0xfc] }
 0x232   : > { %4258 = vmatprep.subr.bf16.mxu1 %v5933_v4  ;;  %2326 = vmatmul.mubr.bf16.gmra.mrb[24].mxu0 %v2076_v38  ;;  %v5960_v4 = vld [vmem:[%s7855_s4 + $0x8c4] ss:$8 sps:$4 sm:$0xff]   ;;  %v5961_v3 = vld [vmem:[%s7855_s4 + $0x8d0] ss:$8 sps:$4 sm:$0xff]  }
 0x233   : > { %2335 = vmatprep.mubr.bf16.mxu0 %v2079_v28  ;;  %v5966_v38 = vld [vmem:[%s7855_s4 + $0x8e4] ss:$8 sps:$4 sm:$0xff]   ;;  %v3993_v28 = vrot.slane %v3927_v61, 2 }
 0x235   : > { %4259 = vmatpush1.bf16.msra.mxu1 %v5931_v41  ;;  %v3925_v41 = vld [vmem:[#allocation2 + $0x50] sm:$0x3]  ;;  %v3995_v29 = vsel %vm1701_vm2, %v3993_v28, %v3994_v44 }
 0x236   : > { %4260 = vmatprep.subr.bf16.mxu1 %v5936_v15  ;;  %v3934_v15 = vld [vmem:[#allocation2 + $0x98] sm:$0x3]  ;;  %v3988_v19 = vrot.slane %v3925_v41, 2  ;;  %v3953_v41 = vld [vmem:[#allocation2 + $0x130] sm:$0x3] }
 0x237   : > { %v4003_v59 = vrot.slane %v3934_v15, 2 }
 0x238   : > { %3887 = vmatmul.mubr.bf16.gmra.mrb[8].mxu1 %v3637_v52  ;;  %v3989_v52 = vsel %vm1701_vm2, %v3987_v21, %v3988_v19 }
 0x239   : > { %3896 = vmatprep.mubr.bf16.mxu1 %v3640_v6  ;;  %4261 = vmatpush1.bf16.msra.mxu1 %v5934_v43  ;;  %v4010_v43 = vsel %vm1701_vm2, %v4008_v47, %v4009_v49  ;;  %v4051_v58 = vpack.c.bf16 %v3995_v29, %v3989_v52  ;;  %v4004_v62 = vsel %vm1701_vm2, %v4002_v50, %v4003_v59  ;;  %v3931_v6 = vld [vmem:[#allocation2 + $0x80] sm:$0xfc]  ;;  %v4029_v49 = vrot.slane %v3951_v25, 2 }
 0x23a   : > { %4262 = vmatprep.subr.bf16.mxu1 %v5939_v0  ;;  %2336 = vmatmul.mubr.bf16.gmra.mrb[28].mxu0 %v2078_v9  ;;  %v3944_v0 = vld [vmem:[#allocation2 + $0xe8] sm:$0xfc]  ;;  %v4054_v45 = vpack.c.bf16 %v4010_v43, %v4004_v62 }
 0x23b   : > { %v3940_v9 = vld [vmem:[#allocation2 + $0xc8] sm:$0xfc]  ;;  %v4020_v63 = vrot.slane %v3944_v0, 2 }
 0x23c   : > { %v4014_v20 = vrot.slane %v3940_v9, 2 }
 0x23d   : > { %4263 = vmatpush1.bf16.msra.mxu1 %v5937_v14  ;;  %v4021_v14 = vrot.slane %v3946_v1, 2 }
 0x23e   : > { %4264 = vmatprep.subr.bf16.mxu1 %v5942_v56  ;;  %v3999_v56 = vrot.slane %v3931_v6, 2 }
 0x23f   : > { %v4022_v8 = vsel %vm1701_vm2, %v4020_v63, %v4021_v14  ;;  %v4369_v63 = vld [vmem:[%s7857_s6] sm:$0x3]  ;;  %v7586_v14 = vrot.slane %v4341_v13, %v6476_v53 }
 0x240   : > { %3897 = vmatmul.mubr.bf16.gmra.mrb[12].mxu1 %v3639_v27  ;;  %v3945_v27 = vld [vmem:[#allocation2 + $0xf0] sm:$0x3] }
 0x241   : > { %4265 = vmatpush1.bf16.msra.mxu1 %v5940_v48  ;;  %4284 = vmatprep.mubr.bf16.mxu1 %v4052_v31  ;;  %v3943_v48 = vld [vmem:[#allocation2 + $0xe0] sm:$0xfc]  ;;  %v3950_v31 = vld [vmem:[#allocation2 + $0x118] sm:$0x3] }
 0x242   : > { %4266 = vmatprep.subr.bf16.mxu1 %v5945_v26  ;;  %v4001_v26 = vsel %vm1701_vm2, %v3999_v56, %v4000_v17  ;;  %v7589_v17 = vrot.slane %v4341_v13, %v6481_v55  ;;  %v7643_v13 = vld [vmem:[%s6205_s30 + $0x8] sm:$0xff] }
 0x245   : > { %4267 = vmatpush1.bf16.msra.mxu1 %v5943_v51  ;;  %v3952_v51 = vld [vmem:[#allocation2 + $0x128] sm:$0xfc] }
 0x246   : > { %4268 = vmatprep.subr.bf16.mxu1 %v5948_v32  ;;  %v3954_v32 = vld [vmem:[#allocation2 + $0x138] sm:$0x3] }
 0x249   : > { %4269 = vmatpush1.bf16.msra.mxu1 %v5946_v33  ;;  %v4053_v33 = vpack.c.bf16 %v4007_v16, %v4001_v26 }
 0x24a   : > { %4270 = vmatprep.subr.bf16.mxu1 %v5951_v46  ;;  %v4016_v46 = vsel %vm1701_vm2, %v4014_v20, %v4015_v12  ;;  %v7592_v12 = vrot.slane %v4369_v63, %v6476_v53 }
 0x24d   : > { %4271 = vmatpush1.bf16.msra.mxu1 %v5949_v34  ;;  %v3939_v34 = vld [vmem:[#allocation2 + $0xc0] sm:$0xfc] }
 0x24e   : > { %4272 = vmatprep.subr.bf16.mxu1 %v5954_v18  ;;  %v3941_v18 = vld [vmem:[#allocation2 + $0xd0] sm:$0x3] }
 0x24f   : > { %v4012_v61 = vrot.slane %v3941_v18, 2 }
 0x251   : > { %4273 = vmatpush1.bf16.msra.mxu1 %v5952_v11  ;;  %v4056_v11 = vpack.c.bf16 %v4022_v8, %v4016_v46 }
 0x252   : > { %4274 = vmatprep.subr.bf16.mxu1 %v5957_v35  ;;  %v4017_v35 = vrot.slane %v3943_v48, 2  ;;  %v7595_v48 = vrot.slane %v4369_v63, %v6481_v55  ;;  %v4575_v63 = vunpack.c.l.bf16 %v7643_v13 }
 0x255   : > { %4275 = vmatpush1.bf16.msra.mxu1 %v5955_v60  ;;  %v4018_v60 = vrot.slane %v3945_v27, 2 }
 0x256   : > { %4276 = vmatprep.subr.bf16.mxu1 %v5960_v4  ;;  %v4026_v4 = vrot.slane %v3948_v24, 2 }
 0x257   : > { %v4019_v22 = vsel %vm1701_vm2, %v4017_v35, %v4018_v60 }
 0x259   : > { %4277 = vmatpush1.bf16.msra.mxu1 %v5958_v37  ;;  %v4027_v37 = vrot.slane %v3950_v31, 2 }
 0x25a   : > { %4278 = vmatprep.subr.bf16.mxu1 %v5963_v57  ;;  %v4032_v57 = vrot.slane %v3952_v51, 2 }
 0x25b   : > { %v4028_v10 = vsel %vm1701_vm2, %v4026_v4, %v4027_v37 }
 0x25d   : > { %4279 = vmatpush1.bf16.msra.mxu1 %v5961_v3  ;;  %v4033_v3 = vrot.slane %v3954_v32, 2 }
 0x25e   : > { %4280 = vmatprep.subr.bf16.mxu1 %v5966_v38  ;;  %v4011_v38 = vrot.slane %v3939_v34, 2 }
 0x25f   : > { %v4034_v40 = vsel %vm1701_vm2, %v4032_v57, %v4033_v3 }
 0x260   : > { %v4013_v28 = vsel %vm1701_vm2, %v4011_v38, %v4012_v61  ;;  %v4058_v15 = vpack.c.bf16 %v4034_v40, %v4028_v10 }
 0x261   : > { %4281 = vmatpush1.bf16.msra.mxu1 %v5964_v39  ;;  %v3947_v39 = vld [vmem:[#allocation2 + $0x100] sm:$0xfc]  ;;  %v4055_v44 = vpack.c.bf16 %v4019_v22, %v4013_v28 }
 0x262   : > { %4282 = vmatprep.subr.bf16.mxu1 %v5969_v30  ;;  %v3949_v30 = vld [vmem:[#allocation2 + $0x110] sm:$0x3]  ;;  %v4023_v42 = vrot.slane %v3947_v39, 2 }
 0x263   : > { %v4024_v47 = vrot.slane %v3949_v30, 2 }
 0x265   : > { %4283 = vmatpush1.bf16.msra.mxu1 %v5967_v36  ;;  %v4030_v36 = vrot.slane %v3953_v41, 2  ;;  %v4025_v21 = vsel %vm1701_vm2, %v4023_v42, %v4024_v47 }
 0x267   : > { %v4031_v19 = vsel %vm1701_vm2, %v4029_v49, %v4030_v36 }
 0x268   : > { %4285 = vmatmul.mubr.bf16.vlgmr.msra.gmra.mrb[0].mxu1 %v4051_v58  ;;  %v4057_v50 = vpack.c.bf16 %v4031_v19, %v4025_v21  ;;  %v7632_v19 = vld [vmem:[%s6205_s30] sm:$0xff] }
 0x269   : > { %4294 = vmatprep.mubr.bf16.mxu1 %v4054_v45 }
 0x270   : > { %4295 = vmatmul.mubr.bf16.gmra.mrb[4].mxu1 %v4053_v33 }
 0x271   : > { %4304 = vmatprep.mubr.bf16.mxu1 %v4056_v11 }
 0x278   : > { %4305 = vmatmul.mubr.bf16.gmra.mrb[8].mxu1 %v4055_v44 }
 0x279   : > { %4314 = vmatprep.mubr.bf16.mxu1 %v4058_v15 }
 0x280   : > { %4315 = vmatmul.mubr.bf16.gmra.mrb[12].mxu1 %v4057_v50  ;;  %v4573_v50 = vunpack.c.l.bf16 %v7632_v19 }
 0x2f5   : > { %v2307_v59 = vpop.f32.mrb[16].mxu0 }
 0x2f6   : > { %v2309_v29 = vpop.f32.mrb[17].mxu0 }
 0x2f7   : > { %v2311_v43 = vpop.f32.mrb[18].mxu0 }
 0x2f8   : > { %v2313_v54 = vpop.f32.mrb[19].mxu0 }
 0x2fd   : > { %v2317_v2 = vpop.f32.mrb[20].mxu0 }
 0x2fe   : > { %v2319_v52 = vpop.f32.mrb[21].mxu0 }
 0x2ff   : > { %v2321_v0 = vpop.f32.mrb[22].mxu0 }
 0x300   : > { %v2323_v1 = vpop.f32.mrb[23].mxu0 }
 0x305   : > { %v7563_v58 = vpop.f32.mrb[24].mxu0 }
 0x306   : > { %v7565_v62 = vpop.f32.mrb[25].mxu0 }
 0x307   : > { %v7567_v6 = vpop.f32.mrb[26].mxu0 }
 0x308   : > { %v7569_v7 = vpop.f32.mrb[27].mxu0 }
 0x30d   : > { %v7571_v45 = vpop.f32.mrb[28].mxu0 }
 0x30e   : > { %v7573_v23 = vpop.f32.mrb[29].mxu0 }
 0x30f   : > { %v7575_v5 = vpop.f32.mrb[30].mxu0 }
 0x310   : > { %v7577_v9 = vpop.f32.mrb[31].mxu0 }
 0x33b   : > { %v4286_v56 = vpop.f32.mrb[0].mxu1 }
 0x33c   : > { %v5345_v20 = vadd.f32 %v4286_v56, %v2307_v59  ;;  %v4288_v16 = vpop.f32.mrb[1].mxu1 }
 0x33d   : > { %v5346_v8 = vadd.f32 %v4288_v16, %v2309_v29  ;;  %v4290_v27 = vpop.f32.mrb[2].mxu1 }
 0x33e   : > { %v4353_v24 = vmul.f32 %v5345_v20, %v7586_v14  ;;  %v5347_v26 = vadd.f32 %v4290_v27, %v2311_v43  ;;  %v4292_v31 = vpop.f32.mrb[3].mxu1 }
 0x33f   : > { %v4354_v51 = vmul.f32 %v5346_v8, %v7589_v17  ;;  %v5348_v32 = vadd.f32 %v4292_v31, %v2313_v54  ;;  %v4574_v54 = vunpack.c.h.bf16 %v7632_v19 }
 0x340   : > { %v7600_v33 = vadd.f32 %v7592_v12, %v4353_v24  ;;  %v4355_v46 = vmul.f32 %v5347_v26, %v7586_v14 }
 0x341   : > { %v7604_v53 = vadd.f32 %v7595_v48, %v4354_v51  ;;  %v4356_v34 = vmul.f32 %v5348_v32, %v7589_v17 }
 0x342   : > { %v4397_v55 = vmin.f32 %v7600_v33, 20.0  ;;  %v7609_v18 = vadd.f32 %v7592_v12, %v4355_v46  ;;  %vm4525_vm0 = vcmp.gt.f32.partialorder %v7600_v33, 20.0 }
 0x343   : > { %v4398_v11 = vmin.f32 %v7604_v53, 20.0  ;;  %v7613_v35 = vadd.f32 %v7595_v48, %v4356_v34  ;;  %v4296_v60 = vpop.f32.mrb[4].mxu1  ;;  %v4576_v34 = vunpack.c.h.bf16 %v7643_v13  ;;  %vm4526_vm3 = vcmp.gt.f32.partialorder %v7604_v53, 20.0 }
 0x344   : > { %v4413_v4 = vmul.f32 1.442695, %v4397_v55  ;;  %v4399_v37 = vmin.f32 %v7609_v18, 20.0  ;;  %v5349_v57 = vadd.f32 %v4296_v60, %v2317_v2  ;;  %v4298_v3 = vpop.f32.mrb[5].mxu1  ;;  %v7658_v60 = vld [vmem:[%s6205_s30 + $0x10] sm:$0xff]  ;;  %vm4527_vm4 = vcmp.gt.f32.partialorder %v7609_v18, 20.0 }
 0x345   : > { %v4415_v38 = vmul.f32 1.442695, %v4398_v11  ;;  %v4400_v61 = vmin.f32 %v7613_v35, 20.0  ;;  %v5350_v22 = vadd.f32 %v4298_v3, %v2319_v52  ;;  %v4300_v39 = vpop.f32.mrb[6].mxu1  ;;  %vm4528_vm5 = vcmp.gt.f32.partialorder %v7613_v35, 20.0 }
 0x346   : > { %6034 = vpow2.f32 %v4413_v4  ;;  %v4417_v10 = vmul.f32 1.442695, %v4399_v37  ;;  %v4357_v40 = vmul.f32 %v5349_v57, %v7586_v14  ;;  %v5351_v30 = vadd.f32 %v4300_v39, %v2321_v0  ;;  %v4302_v25 = vpop.f32.mrb[7].mxu1 }
 0x347   : > { %6036 = vpow2.f32 %v4415_v38  ;;  %v4419_v41 = vmul.f32 1.442695, %v4400_v61  ;;  %v4358_v28 = vmul.f32 %v5350_v22, %v7589_v17  ;;  %v5352_v44 = vadd.f32 %v4302_v25, %v2323_v1 }
 0x348   : > { %6038 = vpow2.f32 %v4417_v10  ;;  %v7620_v42 = vadd.f32 %v7592_v12, %v4357_v40  ;;  %v4359_v15 = vmul.f32 %v5351_v30, %v7586_v14  ;;  %v4578_v57 = vunpack.c.h.bf16 %v7658_v60 }
 0x349   : > { %6040 = vpow2.f32 %v4419_v41  ;;  %v7624_v47 = vadd.f32 %v7595_v48, %v4358_v28  ;;  %v4360_v49 = vmul.f32 %v5352_v44, %v7589_v17 }
 0x34a   : > { %v4401_v36 = vmin.f32 %v7620_v42, 20.0  ;;  %v7629_v21 = vadd.f32 %v7592_v12, %v4359_v15  ;;  %vm4529_vm6 = vcmp.gt.f32.partialorder %v7620_v42, 20.0 }
 0x34b   : > { %v4402_v59 = vmin.f32 %v7624_v47, 20.0  ;;  %v7637_v29 = vadd.f32 %v7595_v48, %v4360_v49  ;;  %v4306_v43 = vpop.f32.mrb[8].mxu1  ;;  %vm4530_vm7 = vcmp.gt.f32.partialorder %v7624_v47, 20.0 }
 0x34c   : > { %v4421_v2 = vmul.f32 1.442695, %v4401_v36  ;;  %v4403_v52 = vmin.f32 %v7629_v21, 20.0  ;;  %v5353_v0 = vadd.f32 %v4306_v43, %v7563_v58  ;;  %v4308_v1 = vpop.f32.mrb[9].mxu1  ;;  %v7677_v36 = vld [vmem:[%s6205_s30 + $0x18] sm:$0xff]  ;;  %vm4531_vm8 = vcmp.gt.f32.partialorder %v7629_v21, 20.0 }
 0x34d   : > { %v4423_v56 = vmul.f32 1.442695, %v4402_v59  ;;  %v4404_v20 = vmin.f32 %v7637_v29, 20.0  ;;  %v5354_v16 = vadd.f32 %v4308_v1, %v7565_v62  ;;  %v4310_v8 = vpop.f32.mrb[10].mxu1  ;;  %v4579_v59 = vunpack.c.l.bf16 %v7677_v36 }
 0x34e   : > { %6042 = vpow2.f32 %v4421_v2  ;;  %v4425_v27 = vmul.f32 1.442695, %v4403_v52  ;;  %v4361_v24 = vmul.f32 %v5353_v0, %v7586_v14  ;;  %v5355_v26 = vadd.f32 %v4310_v8, %v7567_v6  ;;  %v4312_v31 = vpop.f32.mrb[11].mxu1 }
 0x34f   : > { %6044 = vpow2.f32 %v4423_v56  ;;  %v4427_v58 = vmul.f32 1.442695, %v4404_v20  ;;  %v4362_v51 = vmul.f32 %v5354_v16, %v7589_v17  ;;  %v5356_v32 = vadd.f32 %v4312_v31, %v7569_v7 }
 0x350   : > { %v6035_v46 = vpop.eup %6034  ;;  %6046 = vpow2.f32 %v4425_v27  ;;  %v7654_v62 = vadd.f32 %v7592_v12, %v4361_v24  ;;  %v4363_v55 = vmul.f32 %v5355_v26, %v7586_v14  ;;  %v4577_v6 = vunpack.c.l.bf16 %v7658_v60 }
 0x351   : > { %v6037_v11 = vpop.eup %6036  ;;  %v4445_v4 = vadd.f32 2.0, %v6035_v46  ;;  %6048 = vpow2.f32 %v4427_v58  ;;  %v7662_v37 = vadd.f32 %v7595_v48, %v4362_v51  ;;  %v4364_v30 = vmul.f32 %v5356_v32, %v7589_v17 }
 0x352   : > { %v6039_v7 = vpop.eup %6038  ;;  %v4446_v3 = vadd.f32 2.0, %v6037_v11  ;;  %v4405_v38 = vmin.f32 %v7654_v62, 20.0  ;;  %v7667_v61 = vadd.f32 %v7592_v12, %v4363_v55  ;;  %vm4532_vm9 = vcmp.gt.f32.partialorder %v7637_v29, 20.0 }
 0x353   : > { %v6041_v22 = vpop.eup %6040  ;;  %v7669_v39 = vmul.f32 %v6035_v46, %v4445_v4  ;;  %v4447_v10 = vadd.f32 2.0, %v6039_v7  ;;  %v4406_v40 = vmin.f32 %v7662_v37, 20.0  ;;  %v4316_v25 = vpop.f32.mrb[12].mxu1  ;;  %v7688_v27 = vadd.f32 %v7595_v48, %v4364_v30 }
 0x354   : > { %v7673_v41 = vmul.f32 %v6037_v11, %v4446_v3  ;;  %v4448_v28 = vadd.f32 2.0, %v6041_v22  ;;  %v4429_v44 = vmul.f32 1.442695, %v4405_v38  ;;  %v4407_v15 = vmin.f32 %v7667_v61, 20.0  ;;  %v4318_v49 = vpop.f32.mrb[13].mxu1 }
 0x355   : > { %v4477_v43 = vadd.f32 2.0, %v7669_v39  ;;  %v7681_v2 = vmul.f32 %v6039_v7, %v4447_v10  ;;  %v4431_v52 = vmul.f32 1.442695, %v4406_v40  ;;  %v4320_v0 = vpop.f32.mrb[14].mxu1  ;;  %v5357_v24 = vadd.f32 %v4316_v25, %v7571_v45 }
 0x356   : > { %v4478_v1 = vadd.f32 2.0, %v7673_v41  ;;  %v7684_v56 = vmul.f32 %v6041_v22, %v4448_v28  ;;  %6050 = vpow2.f32 %v4429_v44  ;;  %v4433_v20 = vmul.f32 1.442695, %v4407_v15  ;;  %v4322_v16 = vpop.f32.mrb[15].mxu1 }
 0x357   : > { %6052 = vrcp.f32 %v4477_v43  ;;  %v4479_v8 = vadd.f32 2.0, %v7681_v2  ;;  %v5358_v58 = vadd.f32 %v4318_v49, %v7573_v23  ;;  %v5359_v51 = vadd.f32 %v4320_v0, %v7575_v5 }
 0x358   : > { %v6043_v26 = vpop.eup %6042  ;;  %6054 = vrcp.f32 %v4478_v1  ;;  %v4480_v31 = vadd.f32 2.0, %v7684_v56  ;;  %v4580_v46 = vunpack.c.h.bf16 %v7677_v36  ;;  %v4408_v11 = vmin.f32 %v7688_v27, 20.0 }
 0x359   : > { %v6045_v32 = vpop.eup %6044  ;;  %6056 = vrcp.f32 %v4479_v8  ;;  %v4449_v55 = vadd.f32 2.0, %v6043_v26  ;;  %v4365_v45 = vmul.f32 %v5357_v24, %v7586_v14  ;;  %v4366_v3 = vmul.f32 %v5358_v58, %v7589_v17 }
 0x35a   : > { %v6047_v4 = vpop.eup %6046  ;;  %6058 = vrcp.f32 %v4480_v31  ;;  %v4450_v7 = vadd.f32 2.0, %v6045_v32  ;;  %v4435_v5 = vmul.f32 1.442695, %v4408_v11  ;;  %v4367_v24 = vmul.f32 %v5359_v51, %v7586_v14 }
 0x35b   : > { %v6049_v38 = vpop.eup %6048  ;;  %v7698_v22 = vmul.f32 %v6043_v26, %v4449_v55  ;;  %v4451_v23 = vadd.f32 2.0, %v6047_v4  ;;  %6060 = vpow2.f32 %v4431_v52  ;;  %v7703_v30 = vadd.f32 %v7592_v12, %v4365_v45 }
 0x35c   : > { %v7700_v10 = vmul.f32 %v6045_v32, %v4450_v7  ;;  %v4452_v40 = vadd.f32 2.0, %v6049_v38  ;;  %6062 = vpow2.f32 %v4433_v20  ;;  %v7709_v44 = vadd.f32 %v7595_v48, %v4366_v3 }
 0x35d   : > { %v4481_v25 = vadd.f32 2.0, %v7698_v22  ;;  %v7706_v28 = vmul.f32 %v6047_v4, %v4451_v23  ;;  %6064 = vpow2.f32 %v4435_v5  ;;  %v4409_v43 = vmin.f32 %v7703_v30, 20.0 }
 0x35e   : > { %v4482_v15 = vadd.f32 2.0, %v7700_v10  ;;  %v7713_v49 = vmul.f32 %v6049_v38, %v4452_v40  ;;  %v4410_v0 = vmin.f32 %v7709_v44, 20.0  ;;  %v5360_v32 = vadd.f32 %v4322_v16, %v7577_v9 }
 0x35f   : > { %6066 = vrcp.f32 %v4481_v25  ;;  %v4483_v52 = vadd.f32 2.0, %v7706_v28  ;;  %v4437_v8 = vmul.f32 1.442695, %v4409_v43  ;;  %v7725_v4 = vadd.f32 %v7592_v12, %v4367_v24 }
 0x360   : > { %v6051_v1 = vpop.eup %6050  ;;  %6068 = vrcp.f32 %v4482_v15  ;;  %v4484_v20 = vadd.f32 2.0, %v7713_v49  ;;  %v4439_v58 = vmul.f32 1.442695, %v4410_v0  ;;  %v4368_v23 = vmul.f32 %v5360_v32, %v7589_v17 }
 0x361   : > { %v6053_v26 = vpop.eup %6052  ;;  %6070 = vrcp.f32 %v4483_v52  ;;  %v4453_v31 = vadd.f32 2.0, %v6051_v1  ;;  %vm4533_vm10 = vcmp.gt.f32.partialorder %v7654_v62, 20.0  ;;  %vm4534_vm11 = vcmp.gt.f32.partialorder %v7662_v37, 20.0 }
 0x362   : > { %v6055_v55 = vpop.eup %6054  ;;  %v4509_v11 = vmul.f32 %v6053_v26, %v7669_v39  ;;  %6072 = vrcp.f32 %v4484_v20  ;;  %v4411_v39 = vmin.f32 %v7725_v4, 20.0  ;;  %vm4535_vm12 = vcmp.gt.f32.partialorder %v7667_v61, 20.0 }
 0x363   : > { %v6057_v7 = vpop.eup %6056  ;;  %v4510_v45 = vmul.f32 %v6055_v55, %v7673_v41  ;;  %v7729_v14 = vmul.f32 %v6051_v1, %v4453_v31  ;;  %6074 = vpow2.f32 %v4437_v8  ;;  %vm4536_vm13 = vcmp.gt.f32.partialorder %v7688_v27, 20.0 }
 0x364   : > { %v6059_v51 = vpop.eup %6058  ;;  %v4541_v9 = vmul.f32 %v4509_v11, %v7600_v33  ;;  %v4511_v16 = vmul.f32 %v6057_v7, %v7681_v2  ;;  %6076 = vpow2.f32 %v4439_v58  ;;  %v4441_v15 = vmul.f32 1.442695, %v4411_v39 }
 0x365   : > { %v6061_v3 = vpop.eup %6060  ;;  %v4542_v12 = vmul.f32 %v4510_v45, %v7604_v53  ;;  %v4512_v38 = vmul.f32 %v6059_v51, %v7684_v56  ;;  %v4485_v41 = vadd.f32 2.0, %v7729_v14  ;;  %vm4537_vm14 = vcmp.gt.f32.partialorder %v7703_v30, 20.0 }
 0x366   : > { %v6063_v5 = vpop.eup %6062  ;;  %v4557_v40 = vsel %vm4525_vm0, %v7600_v33, %v4541_v9  ;;  %v4543_v2 = vmul.f32 %v4511_v16, %v7609_v18  ;;  %v4454_v25 = vadd.f32 2.0, %v6061_v3  ;;  %vm4538_vm15 = vcmp.gt.f32.partialorder %v7709_v44, 20.0 }
 0x367   : > { %v6065_v43 = vpop.eup %6064  ;;  %v4589_v56 = vadd.f32 %v4573_v50, %v4557_v40  ;;  %v4558_v17 = vsel %vm4526_vm3, %v7604_v53, %v4542_v12  ;;  %v4544_v52 = vmul.f32 %v4512_v38, %v7613_v35  ;;  %6078 = vrcp.f32 %v4485_v41 }
 0x368   : > { %v4590_v33 = vadd.f32 %v4574_v54, %v4558_v17  ;;  %v4559_v0 = vsel %vm4527_vm4, %v7609_v18, %v4543_v2  ;;  %v7757_v1 = vmul.f32 %v6061_v3, %v4454_v25  ;;  %v4455_v50 = vadd.f32 2.0, %v6063_v5 }
 0x369   : > { %v6067_v20 = vpop.eup %6066  ;;  %v4591_v53 = vadd.f32 %v4575_v63, %v4559_v0  ;;  %v4560_v18 = vsel %vm4528_vm5, %v7613_v35, %v4544_v52  ;;  %v4456_v19 = vadd.f32 2.0, %v6065_v43  ;;  %6080 = vpow2.f32 %v4441_v15 }
 0x36a   : > { %v6069_v54 = vpop.eup %6068  ;;  %v5337_v8 = vpack.c.bf16 %v4590_v33, %v4589_v56  ;;  %v4592_v24 = vadd.f32 %v4576_v34, %v4560_v18  ;;  %v4513_v26 = vmul.f32 %v6067_v20, %v7698_v22  ;;  %v4486_v31 = vadd.f32 2.0, %v7757_v1 }
 0x36b   : > { %v6071_v58 = vpop.eup %6070  ;;  %v4514_v32 = vmul.f32 %v6069_v54, %v7700_v10  ;;  %v4471_v63 = vmul.f32 %v6063_v5, %v4455_v50  ;;  %v7776_v55 = vmul.f32 %v6065_v43, %v4456_v19  ;;  %v7779_v35 = vadd.f32 %v7595_v48, %v4368_v23  ;;  %v6103_v43 = vld [vmem:[%s6205_s30 + $0x20] sm:$0xff] }
 0x36c   : > { %v6073_v11 = vpop.eup %6072  ;;  %4669 = vst [vmem:[%s7764_s9] sm:$0xff] %v5337_v8  ;;  %v5338_v7 = vpack.c.bf16 %v4592_v24, %v4591_v53  ;;  %v4545_v13 = vmul.f32 %v4513_v26, %v7620_v42  ;;  %v4515_v34 = vmul.f32 %v6071_v58, %v7706_v28  ;;  %6082 = vrcp.f32 %v4486_v31  ;;  %v6104_v24 = vld [vmem:[%s6205_s30 + $0x28] sm:$0xff] }
 0x36d   : > { %v6075_v22 = vpop.eup %6074  ;;  %v4546_v45 = vmul.f32 %v4514_v32, %v7624_v47  ;;  %v4516_v10 = vmul.f32 %v6073_v11, %v7713_v49  ;;  %v4487_v51 = vadd.f32 2.0, %v4471_v63  ;;  %v4488_v9 = vadd.f32 2.0, %v7776_v55 }
 0x36e   : > { %v6077_v16 = vpop.eup %6076  ;;  %4670 = vst [vmem:[%s7764_s9 + $0x8] sm:$0xff] %v5338_v7  ;;  %v4561_v48 = vsel %vm4529_vm6, %v7620_v42, %v4545_v13  ;;  %v4547_v39 = vmul.f32 %v4515_v34, %v7629_v21  ;;  %v4457_v3 = vadd.f32 2.0, %v6075_v22  ;;  %v4412_v28 = vmin.f32 %v7779_v35, 20.0 }
 0x36f   : > { %v4593_v12 = vadd.f32 %v4577_v6, %v4561_v48  ;;  %v4562_v49 = vsel %vm4530_vm7, %v7624_v47, %v4546_v45  ;;  %v4548_v38 = vmul.f32 %v4516_v10, %v7637_v29  ;;  %6084 = vrcp.f32 %v4487_v51  ;;  %v6105_v10 = vld [vmem:[%s6205_s30 + $0x30] sm:$0xff] }
 0x370   : > { %v4594_v41 = vadd.f32 %v4578_v57, %v4562_v49  ;;  %v4563_v42 = vsel %vm4531_vm8, %v7629_v21, %v4547_v39  ;;  %6086 = vrcp.f32 %v4488_v9  ;;  %v4473_v23 = vmul.f32 %v6075_v22, %v4457_v3 }
 0x371   : > { %v6079_v5 = vpop.eup %6078  ;;  %v4595_v6 = vadd.f32 %v4579_v59, %v4563_v42  ;;  %v4564_v47 = vsel %vm4532_vm9, %v7637_v29, %v4548_v38  ;;  %v4458_v40 = vadd.f32 2.0, %v6077_v16  ;;  %v4443_v2 = vmul.f32 1.442695, %v4412_v28 }
 0x372   : > { %v5339_v25 = vpack.c.bf16 %v4594_v41, %v4593_v12  ;;  %v4596_v60 = vadd.f32 %v4580_v46, %v4564_v47  ;;  %v4517_v21 = vmul.f32 %v6079_v5, %v7729_v14  ;;  %v4489_v57 = vadd.f32 2.0, %v4473_v23 }
 0x373   : > { %v6081_v15 = vpop.eup %6080  ;;  %v4581_v56 = vunpack.c.l.bf16 %v6103_v43  ;;  %v4474_v17 = vmul.f32 %v6077_v16, %v4458_v40  ;;  %6088 = vpow2.f32 %v4443_v2  ;;  %v4582_v20 = vunpack.c.h.bf16 %v6103_v43 }
 0x374   : > { %4671 = vst [vmem:[%s7764_s9 + $0x10] sm:$0xff] %v5339_v25  ;;  %v5340_v59 = vpack.c.bf16 %v4596_v60, %v4595_v6  ;;  %v4549_v52 = vmul.f32 %v4517_v21, %v7654_v62  ;;  %6090 = vrcp.f32 %v4489_v57  ;;  %v4459_v29 = vadd.f32 2.0, %v6081_v15 }
 0x375   : > { %v4490_v33 = vadd.f32 2.0, %v4474_v17  ;;  %v4583_v26 = vunpack.c.l.bf16 %v6104_v24  ;;  %v4584_v58 = vunpack.c.h.bf16 %v6104_v24  ;;  %v4585_v51 = vunpack.c.l.bf16 %v6105_v10 }
 0x376   : > { %v6083_v36 = vpop.eup %6082  ;;  %4672 = vst [vmem:[%s7764_s9 + $0x18] sm:$0xff] %v5340_v59  ;;  %v4565_v46 = vsel %vm4533_vm10, %v7654_v62, %v4549_v52  ;;  %v4475_v14 = vmul.f32 %v6081_v15, %v4459_v29  ;;  %v4586_v12 = vunpack.c.h.bf16 %v6105_v10  ;;  %vm4539_vm1 = vcmp.gt.f32.partialorder %v7725_v4, 20.0 }
 0x377   : > { %v4597_v0 = vadd.f32 %v4581_v56, %v4565_v46  ;;  %v4518_v50 = vmul.f32 %v6083_v36, %v7757_v1  ;;  %6092 = vrcp.f32 %v4490_v33  ;;  %vm4540_vm2 = vcmp.gt.f32.partialorder %v7779_v35, 20.0 }
 0x378   : > { %v4491_v53 = vadd.f32 2.0, %v4475_v14 }
 0x379   : > { %v6085_v18 = vpop.eup %6084  ;;  %v4550_v19 = vmul.f32 %v4518_v50, %v7662_v37 }
 0x37a   : > { %v6087_v54 = vpop.eup %6086  ;;  %v4519_v8 = vmul.f32 %v6085_v18, %v4471_v63  ;;  %6094 = vrcp.f32 %v4491_v53 }
 0x37b   : > { %v4566_v31 = vsel %vm4534_vm11, %v7662_v37, %v4550_v19  ;;  %v4520_v62 = vmul.f32 %v6087_v54, %v7776_v55 }
 0x37c   : > { %v4598_v1 = vadd.f32 %v4582_v20, %v4566_v31  ;;  %v4551_v32 = vmul.f32 %v4519_v8, %v7667_v61 }
 0x37d   : > { %v6089_v11 = vpop.eup %6088  ;;  %v4552_v7 = vmul.f32 %v4520_v62, %v7688_v27 }
 0x37e   : > { %v6091_v13 = vpop.eup %6090  ;;  %v5341_v63 = vpack.c.bf16 %v4598_v1, %v4597_v0  ;;  %v4567_v34 = vsel %vm4535_vm12, %v7667_v61, %v4551_v32  ;;  %v4460_v37 = vadd.f32 2.0, %v6089_v11 }
 0x37f   : > { %v4599_v22 = vadd.f32 %v4583_v26, %v4567_v34  ;;  %v4568_v55 = vsel %vm4536_vm13, %v7688_v27, %v4552_v7  ;;  %v4521_v45 = vmul.f32 %v6091_v13, %v4473_v23  ;;  %v6106_v23 = vld [vmem:[%s6205_s30 + $0x38] sm:$0xff] }
 0x380   : > { %4673 = vst [vmem:[%s7764_s9 + $0x20] sm:$0xff] %v5341_v63  ;;  %v4600_v9 = vadd.f32 %v4584_v58, %v4568_v55  ;;  %v4476_v16 = vmul.f32 %v6089_v11, %v4460_v37  ;;  %v4587_v5 = vunpack.c.l.bf16 %v6106_v23  ;;  %v4588_v57 = vunpack.c.h.bf16 %v6106_v23 }
 0x381   : > { %v6093_v48 = vpop.eup %6092  ;;  %v4553_v39 = vmul.f32 %v4521_v45, %v7703_v30 }
 0x382   : > { %v5342_v3 = vpack.c.bf16 %v4600_v9, %v4599_v22  ;;  %v4522_v61 = vmul.f32 %v6093_v48, %v4474_v17  ;;  %v4492_v28 = vadd.f32 2.0, %v4476_v16 }
 0x383   : > { %v4569_v49 = vsel %vm4537_vm14, %v7703_v30, %v4553_v39 }
 0x384   : > { %v6095_v27 = vpop.eup %6094  ;;  %4674 = vst [vmem:[%s7764_s9 + $0x28] sm:$0xff] %v5342_v3  ;;  %v4601_v38 = vadd.f32 %v4585_v51, %v4569_v49  ;;  %v4554_v41 = vmul.f32 %v4522_v61, %v7709_v44  ;;  %6096 = vrcp.f32 %v4492_v28 }
 0x385   : > { %v4523_v42 = vmul.f32 %v6095_v27, %v4475_v14 }
 0x386   : > { %v4570_v6 = vsel %vm4538_vm15, %v7709_v44, %v4554_v41 }
 0x387   : > { %v4602_v47 = vadd.f32 %v4586_v12, %v4570_v6  ;;  %v4555_v40 = vmul.f32 %v4523_v42, %v7725_v4 }
 0x389   : > { %v5343_v30 = vpack.c.bf16 %v4602_v47, %v4601_v38  ;;  %v4571_v2 = vsel %vm4539_vm1, %v7725_v4, %v4555_v40 }
 0x38a   : > { %v4603_v25 = vadd.f32 %v4587_v5, %v4571_v2 }
 0x38b   : > { %4675 = vst [vmem:[%s7764_s9 + $0x30] sm:$0xff] %v5343_v30 }
 0x38e   : > { %v6097_v60 = vpop.eup %6096 }
 0x38f   : > { %v4524_v21 = vmul.f32 %v6097_v60, %v4476_v16 }
 0x391   : > { %v4556_v15 = vmul.f32 %v4524_v21, %v7779_v35 }
 0x393   : > { %v4572_v44 = vsel %vm4540_vm2, %v7779_v35, %v4556_v15 }
 0x394   : > { %v4604_v43 = vadd.f32 %v4588_v57, %v4572_v44 }
 0x396   : > { %v5344_v56 = vpack.c.bf16 %v4604_v43, %v4603_v25 }
 0x398   : > { %4676 = vst [vmem:[%s7764_s9 + $0x38] sm:$0xff] %v5344_v56 }
 0x399 PF: > { %s17_s24 = sadd.s32 1, %s6113_s24  }
 0x39a   : > { %p14_p4 = scmp.ge.s32.totalorder %s17_s24, 4  }
 0x39c   :  { %16 = sbr.rel (!%p14_p4) target bundleno = 1 (0x1), region = 88 }

</bundles_post_ra>
